<compile_context>
chip_gen: v7x
topology: tpu7x:2x2x1
jax: 0.10.0
libtpu: 0.0.40
codegen_flags: <defaults>
</compile_context>

<pallas_src>
import math
from functools import partial

import numpy as np
import jax
import jax.numpy as jnp
from jax import lax
from jax.experimental import pallas as pl
from jax.experimental.pallas import tpu as pltpu


EPS = 1e-12        # eigenvalue floor for log / sqrt / rsqrt / pow
REEIG_EPS = 1e-4   # ReEig eigenvalue clamp threshold
BN_EPS = 1e-5      # batch-norm variance epsilon


# ----------------------------------------------------------------- plumbing

def _vmem_call(kernel, out_shape, *args):
    """Single-step (no grid) pallas_call: whole arrays resident in VMEM."""
    in_specs = [pl.BlockSpec(memory_space=pltpu.MemorySpace.VMEM) for _ in args]
    out_specs = jax.tree.map(
        lambda _: pl.BlockSpec(memory_space=pltpu.MemorySpace.VMEM), out_shape)
    return pl.pallas_call(kernel, out_shape=out_shape,
                          in_specs=in_specs, out_specs=out_specs)(*args)


def _recon(U, f):
    """U diag(f) U^T for a batch (traced inside kernel bodies)."""
    return jnp.einsum('bij,bkj->bik', U * f[:, None, :], U,
                      preferred_element_type=jnp.float32)


# ------------------------------------------------------------------ kernels

def _congr_shared_kernel(wt_ref, x_ref, o_ref):
    """o[n] = W^T X[n] W with one shared W; wt_ref holds W^T (q, p)."""
    Wt = wt_ref[...]                                    # (q, p)
    X = x_ref[...]                                      # (B, p, p)
    B, p, _ = X.shape
    q = Wt.shape[0]
    # Fold the batch into the MXU M dimension: (B*p, p) x (p, q).
    Y = lax.dot_general(X.reshape(B * p, p), Wt, (((1,), (1,)), ((), ())),
                        preferred_element_type=jnp.float32)         # X W
    Y = Y.reshape(B, p, q)
    Wtb = jnp.broadcast_to(Wt[None], (B, q, p))                      # VMEM-resident, tiny
    o_ref[...] = jnp.einsum('bij,bjk->bik', Wtb, Y,
                            preferred_element_type=jnp.float32)      # W^T (X W)


def congr_shared(Wt, X):
    """out_n = W^T X_n W (Wt = W^T).  Wt: (q, p), X: (B, p, p) -> (B, q, q)."""
    B, p, _ = X.shape
    q = Wt.shape[0]
    return _vmem_call(_congr_shared_kernel,
                      jax.ShapeDtypeStruct((B, q, q), jnp.float32),
                      Wt.astype(jnp.float32), X.astype(jnp.float32))


def _congr_batched_kernel(a_ref, x_ref, o_ref):
    """o[n] = A[n] X[n] A[n]^T  (A[n] symmetric whiteners here)."""
    A = a_ref[...]
    X = x_ref[...]
    Z = jnp.einsum('bij,bjk->bik', A, X, preferred_element_type=jnp.float32)
    o_ref[...] = jnp.einsum('bij,bkj->bik', Z, A, preferred_element_type=jnp.float32)


def congr_batched(A, X):
    B, d, _ = X.shape
    return _vmem_call(_congr_batched_kernel,
                      jax.ShapeDtypeStruct((B, d, d), jnp.float32),
                      A.astype(jnp.float32), X.astype(jnp.float32))


def _sqrt_invsqrt_kernel(u_ref, w_ref, sq_ref, isq_ref):
    """Fused matrix sqrt and inverse-sqrt from one eigendecomposition."""
    U = u_ref[...]
    w = jnp.maximum(w_ref[...], EPS)
    sq_ref[...] = _recon(U, jnp.sqrt(w))
    isq_ref[...] = _recon(U, lax.rsqrt(w))


def sqrt_invsqrt(U, w):
    B, d, _ = U.shape
    out = (jax.ShapeDtypeStruct((B, d, d), jnp.float32),
           jax.ShapeDtypeStruct((B, d, d), jnp.float32))
    return _vmem_call(_sqrt_invsqrt_kernel, out,
                      U.astype(jnp.float32), w.astype(jnp.float32))


def _log_recon_wmean_kernel(u_ref, w_ref, wtt_ref, o_ref):
    """o[d] = sum_n Wt[d, n] * U[n] diag(log w[n]) U[n]^T  (wtt_ref = Wt^T, (B, D))."""
    U = u_ref[...]
    L = _recon(U, jnp.log(jnp.maximum(w_ref[...], EPS)))   # (B, d, d)
    Wtt = wtt_ref[...]                                     # (B, D)
    D = o_ref.shape[0]
    for dom in range(D):                                   # D is tiny & static
        wcol = Wtt[:, dom:dom + 1][:, :, None]             # (B, 1, 1)
        o_ref[dom] = jnp.sum(wcol * L, axis=0)


def log_recon_wmean(U, w, WtT):
    B, d, _ = U.shape
    D = WtT.shape[1]
    return _vmem_call(_log_recon_wmean_kernel,
                      jax.ShapeDtypeStruct((D, d, d), jnp.float32),
                      U.astype(jnp.float32), w.astype(jnp.float32),
                      WtT.astype(jnp.float32))


def _exp_recon_congr_kernel(u_ref, w_ref, gsq_ref, o_ref):
    """o[d] = Gsq[d] expm(GT[d]) Gsq[d] from (w, U) = eigh(GT)."""
    E = _recon(u_ref[...], jnp.exp(w_ref[...]))
    G = gsq_ref[...]
    Z = jnp.einsum('bij,bjk->bik', G, E, preferred_element_type=jnp.float32)
    o_ref[...] = jnp.einsum('bij,bkj->bik', Z, G, preferred_element_type=jnp.float32)


def exp_recon_congr(U, w, Gsq):
    D, d, _ = U.shape
    return _vmem_call(_exp_recon_congr_kernel,
                      jax.ShapeDtypeStruct((D, d, d), jnp.float32),
                      U.astype(jnp.float32), w.astype(jnp.float32),
                      Gsq.astype(jnp.float32))


def _dombn_powm_kernel(u_ref, w_ref, wt_ref, oh_ref, std_ref, o_ref):
    """Fused scalar-dispersion rescale of the whitened batch:
    var_d = sum_n Wt[d,n] ||log w[n]||^2 ;  s_n = std[dom_n] / sqrt(var[dom_n]+eps);
    o[n] = U[n] diag(w[n]^{s_n}) U[n]^T."""
    U = u_ref[...]                                         # (N, d, d)
    lw = jnp.log(jnp.maximum(w_ref[...], EPS))             # (N, d)
    per_n = jnp.sum(lw * lw, axis=-1, keepdims=True)       # (N, 1) squared AI distance
    var = jnp.dot(wt_ref[...], per_n,
                  preferred_element_type=jnp.float32)      # (D, 1)
    sd = std_ref[...] * lax.rsqrt(var + BN_EPS)            # (D, 1)
    s = jnp.dot(oh_ref[...], sd,
                preferred_element_type=jnp.float32)        # (N, 1) gather via one-hot
    o_ref[...] = _recon(U, jnp.exp(s * lw))                # w^s = exp(s log w)


def dombn_powm(U, w, Wt, onehot, std):
    B, d, _ = U.shape
    return _vmem_call(_dombn_powm_kernel,
                      jax.ShapeDtypeStruct((B, d, d), jnp.float32),
                      U.astype(jnp.float32), w.astype(jnp.float32),
                      Wt.astype(jnp.float32), onehot.astype(jnp.float32),
                      std.astype(jnp.float32))


def _clamp_recon_kernel(u_ref, w_ref, o_ref, *, threshold):
    o_ref[...] = _recon(u_ref[...], jnp.maximum(w_ref[...], threshold))


def clamp_recon(U, w, threshold):
    """ReEig: U diag(max(w, threshold)) U^T."""
    B, d, _ = U.shape
    return _vmem_call(partial(_clamp_recon_kernel, threshold=threshold),
                      jax.ShapeDtypeStruct((B, d, d), jnp.float32),
                      U.astype(jnp.float32), w.astype(jnp.float32))


def _logeig_head_kernel(u_ref, w_ref, w3_ref, o_ref, *, clamp):
    """(ReEig +) LogEig + tril vectorisation + bias-free Linear, fused:
    o[n, c] = sum_{i,j} W3[i, j, c] * logm_clamped(X[n])[i, j]."""
    U = u_ref[...]                                         # (N, d, d)
    L = _recon(U, jnp.log(jnp.maximum(w_ref[...], clamp))) # (N, d, d)
    W3 = w3_ref[...]                                       # (d, d, C)
    N, C = o_ref.shape
    d = W3.shape[0]
    acc = jnp.zeros((N, C), jnp.float32)
    for i in range(d):                                     # d is small & static
        acc = acc + jnp.dot(L[:, i, :], W3[i],
                            preferred_element_type=jnp.float32)
    o_ref[...] = acc


def logeig_head(U, w, W3, clamp):
    B, d, _ = U.shape
    C = W3.shape[-1]
    return _vmem_call(partial(_logeig_head_kernel, clamp=clamp),
                      jax.ShapeDtypeStruct((B, C), jnp.float32),
                      U.astype(jnp.float32), w.astype(jnp.float32),
                      W3.astype(jnp.float32))


# --------------------------------------------------------------- spd helpers

def karcher_mean_multi(X, Wt, domain_idx, iters):
    """Weighted Karcher (Frechet) means on the SPD manifold, all weight rows at once.
    X: (N, d, d); Wt: (D, N) rows sum to 1 with Wt[d, n] == 0 whenever
    domain_idx[n] != d (domain_idx may be None when D == 1).  Returns (D, d, d)."""
    D = Wt.shape[0]
    WtT = Wt.T                                            # (N, D)
    G0 = jnp.einsum('dn,nij->dij', Wt, X)                 # arithmetic-mean init

    def body(_, G):
        wG, UG = jnp.linalg.eigh(G)
        Gsq, Ginvsq = sqrt_invsqrt(UG, wG)
        if D == 1:
            Xw = congr_shared(Ginvsq[0], X)               # shared whitener (no HBM broadcast)
        else:
            Xw = congr_batched(jnp.take(Ginvsq, domain_idx, axis=0), X)
        wX, UX = jnp.linalg.eigh(Xw)
        GT = log_recon_wmean(UX, wX, WtT)                 # weighted log-map means (D, d, d)
        wT, UT = jnp.linalg.eigh(GT)
        return exp_recon_congr(UT, wT, Gsq)               # G <- G^1/2 expm(GT) G^1/2

    # TODO(synk): reference spd_mean_kracher_flow uses an adaptive step size and a
    # convergence criterion; fixed-step, fixed-iteration flow used here.
    return lax.fori_loop(0, iters, body, G0)


# ------------------------------------------------------------------ model

def init_params(key, bimap_dims, nclasses, n_domains):
    layers = []
    din = bimap_dims[0]
    for dout in bimap_dims[1:]:
        key, k1 = jax.random.split(key)
        A = jax.random.normal(k1, (din, din), dtype=jnp.float32)
        Q, _ = jnp.linalg.qr(A)
        W = Q[:, :dout]                                   # semi-orthogonal BiMap init
        layers.append(dict(bimap_t=W.T))                  # store W^T for the kernels
        din = dout

    d = bimap_dims[-1]
    tsdim = d * (d + 1) // 2
    a = math.sqrt(6.0 / (tsdim + nclasses))
    key, k2 = jax.random.split(key)
    lin_w = jax.random.uniform(k2, (nclasses, tsdim), jnp.float32, -a, a)

    # Fold the LogEig tril-vectorisation (diag first, then sqrt(2) * lower off-diag)
    # into the classifier weight:  out_c = sum_{i,j} W3[i, j, c] * L[i, j], L symmetric.
    # TODO(synk): the vectorisation ordering is a permutation of the reference's; it is
    # absorbed by the learned linear weights.
    diag_idx = np.arange(d)
    ti, tj = np.tril_indices(d, k=-1)
    M = jnp.zeros((nclasses, d, d), jnp.float32)
    M = M.at[:, diag_idx, diag_idx].set(lin_w[:, :d])
    off = lin_w[:, d:] / np.sqrt(2.0)
    M = M.at[:, ti, tj].set(off)
    M = M.at[:, tj, ti].set(off)
    head_w3 = jnp.transpose(M, (1, 2, 0))                 # (d, d, C)

    dombn_std = jnp.ones((n_domains, 1), jnp.float32)     # learned dispersion, init 1.0
    return dict(layers=layers, dombn_std=dombn_std, head_w3=head_w3, lin_w=lin_w)


def dsbn_spdbn_forward(params, inputs, domains, *, n_domains, karcher_iters=15):
    """inputs: (N, d0, d0) SPD matrices, domains: (N,) int32 -> (N, nclasses).
    The reference's singleton channel axis is squeezed."""
    X = inputs.astype(jnp.float32)
    N = X.shape[0]
    onehot = jax.nn.one_hot(domains, n_domains, dtype=jnp.float32)      # (N, D)
    counts = jnp.sum(onehot, axis=0)                                    # (D,)
    Wt_dom = (onehot / jnp.maximum(counts, 1.0)[None, :]).T             # (D, N), rows sum to 1
    # TODO(synk): a domain absent from the batch yields an all-zero weight row; the
    # reference skips absent domains.

    # ---- 1. AdaMomDomainSPDBatchNorm (training, eta=1.0, learn_mean=False, SCALAR) ----
    G = karcher_mean_multi(X, Wt_dom, domains, iters=karcher_iters)     # (D, d0, d0)
    wG, UG = jnp.linalg.eigh(G)
    _, Ginvsq = sqrt_invsqrt(UG, wG)
    if n_domains == 1:
        Xw = congr_shared(Ginvsq[0], X)
    else:
        Xw = congr_batched(jnp.take(Ginvsq, domains, axis=0), X)        # whiten to identity
    wXw, UXw = jnp.linalg.eigh(Xw)
    X = dombn_powm(UXw, wXw, Wt_dom, onehot, params['dombn_std'])
    # learn_mean=False -> bias mean is the identity; no trailing congruence.

    # ---- 2. BiMap -> BatchNormSPD -> ReEig layers ----
    nlayers = len(params['layers'])
    for li, layer in enumerate(params['layers']):
        X = congr_shared(layer['bimap_t'], X)                           # BiMap: W^T X W
        Wt_all = jnp.full((1, N), 1.0 / N, jnp.float32)
        Gb = karcher_mean_multi(X, Wt_all, None, iters=karcher_iters)   # batch Karcher mean
        wb, Ub = jnp.linalg.eigh(Gb)
        _, Gbinv = sqrt_invsqrt(Ub, wb)
        X = congr_shared(Gbinv[0], X)                                   # whiten by batch mean
        # TODO(synk): BatchNormSPD's learned SPD bias (identity at init) and its
        # running-mean momentum update are omitted; forward output is identical at init.
        if li < nlayers - 1:
            w, U = jnp.linalg.eigh(X)
            X = clamp_recon(U, w, REEIG_EPS)                            # ReEig
        # last layer: ReEig shares its eigenbasis with LogEig -> fused into the head.

    # ---- 3. (ReEig +) LogEig + tril vectorisation + Linear, one fused kernel ----
    w, U = jnp.linalg.eigh(X)
    clamp = REEIG_EPS if nlayers > 0 else EPS
    return logeig_head(U, w, params['head_w3'], clamp)                  # (N, nclasses)


# ------------------------------------------------------------------ driver

if __name__ == "__main__":
    key = jax.random.PRNGKey(0)
    N = 8
    bimap_dims = [16, 8]
    nclasses = 4
    n_domains = 2

    params = init_params(key, bimap_dims, nclasses, n_domains)

    key, kx = jax.random.split(key)
    A = jax.random.normal(kx, (N, bimap_dims[0], bimap_dims[0]), jnp.float32)
    inputs = jnp.einsum('nij,nkj->nik', A, A) / bimap_dims[0] \
        + 0.1 * jnp.eye(bimap_dims[0], dtype=jnp.float32)               # SPD inputs (N, d0, d0)
    domains = jnp.array([0, 1, 0, 1, 0, 1, 0, 1], dtype=jnp.int32)

    fwd = jax.jit(partial(dsbn_spdbn_forward, n_domains=n_domains, karcher_iters=15))
    out = fwd(params, inputs, domains)
    out = jax.block_until_ready(out)

    assert out.shape == (N, nclasses)
    assert bool(jnp.all(jnp.isfinite(out)))
    print("KERNEL_OK")
</pallas_src>

<mosaic_0001>
module attributes {stable_mosaic.version = 11 : i64} {
  func.func @_sqrt_invsqrt_kernel(%arg0: memref<2x16x16xf32, #tpu.memory_space<vmem>>, %arg1: memref<2x16xf32, #tpu.memory_space<vmem>>, %arg2: memref<2x16x16xf32, #tpu.memory_space<vmem>>, %arg3: memref<2x16x16xf32, #tpu.memory_space<vmem>>) attributes {dimension_semantics = [], scalar_prefetch = 0 : i64, scratch_operands = 0 : i64, tpu.core_type = #tpu.core_type<tc>} {
    %c0 = arith.constant 0 : index
    %c0_0 = arith.constant 0 : index
    %c0_1 = arith.constant 0 : index
    %0 = vector.load %arg0[%c0, %c0_0, %c0_1] : memref<2x16x16xf32, #tpu.memory_space<vmem>>, vector<2x16x16xf32>
    %c0_2 = arith.constant 0 : index
    %c0_3 = arith.constant 0 : index
    %1 = vector.load %arg1[%c0_2, %c0_3] : memref<2x16xf32, #tpu.memory_space<vmem>>, vector<2x16xf32>
    %cst = arith.constant 9.99999996E-13 : f32
    %2 = vector.broadcast %cst : f32 to vector<2x16xf32>
    %3 = arith.maximumf %1, %2 : vector<2x16xf32>
    %4 = math.sqrt %3 : vector<2x16xf32>
    %5 = vector.shape_cast %4 : vector<2x16xf32> to vector<2x1x16xf32>
    %6 = vector.broadcast %5 : vector<2x1x16xf32> to vector<2x16x16xf32>
    %7 = arith.mulf %0, %6 : vector<2x16x16xf32>
    "tpu.trace_start"() <{level = 10 : i32, message = "bij,bkj->bik"}> : () -> ()
    %cst_4 = arith.constant dense<0.000000e+00> : vector<2x16x16xf32>
    %8 = tpu.matmul %7, %0, %cst_4 {dimension_numbers = #tpu.dot_dimension_numbers<[2], [2], [1], [1], [0, 0, 0, 1, 1, 1], [0], [0]>} : vector<2x16x16xf32>, vector<2x16x16xf32>, vector<2x16x16xf32> -> vector<2x16x16xf32>
    "tpu.trace_stop"() : () -> ()
    %c0_5 = arith.constant 0 : index
    %c0_6 = arith.constant 0 : index
    %c0_7 = arith.constant 0 : index
    %9 = vector.load %arg2[%c0_5, %c0_6, %c0_7] : memref<2x16x16xf32, #tpu.memory_space<vmem>>, vector<2x16x16xf32>
    tpu.vector_store %arg2[%c0_5, %c0_6, %c0_7], %8 {strides = array<i32>} : memref<2x16x16xf32, #tpu.memory_space<vmem>>, vector<2x16x16xf32>,
    %10 = math.rsqrt %3 : vector<2x16xf32>
    %11 = vector.shape_cast %10 : vector<2x16xf32> to vector<2x1x16xf32>
    %12 = vector.broadcast %11 : vector<2x1x16xf32> to vector<2x16x16xf32>
    %13 = arith.mulf %0, %12 : vector<2x16x16xf32>
    "tpu.trace_start"() <{level = 10 : i32, message = "bij,bkj->bik"}> : () -> ()
    %cst_8 = arith.constant dense<0.000000e+00> : vector<2x16x16xf32>
    %14 = tpu.matmul %13, %0, %cst_8 {dimension_numbers = #tpu.dot_dimension_numbers<[2], [2], [1], [1], [0, 0, 0, 1, 1, 1], [0], [0]>} : vector<2x16x16xf32>, vector<2x16x16xf32>, vector<2x16x16xf32> -> vector<2x16x16xf32>
    "tpu.trace_stop"() : () -> ()
    %c0_9 = arith.constant 0 : index
    %c0_10 = arith.constant 0 : index
    %c0_11 = arith.constant 0 : index
    %15 = vector.load %arg3[%c0_9, %c0_10, %c0_11] : memref<2x16x16xf32, #tpu.memory_space<vmem>>, vector<2x16x16xf32>
    tpu.vector_store %arg3[%c0_9, %c0_10, %c0_11], %14 {strides = array<i32>} : memref<2x16x16xf32, #tpu.memory_space<vmem>>, vector<2x16x16xf32>,
    return
  }
}

module attributes {stable_mosaic.version = 11 : i64} {
  func.func @_congr_batched_kernel(%arg0: memref<8x16x16xf32, #tpu.memory_space<vmem>>, %arg1: memref<8x16x16xf32, #tpu.memory_space<vmem>>, %arg2: memref<8x16x16xf32, #tpu.memory_space<vmem>>) attributes {dimension_semantics = [], scalar_prefetch = 0 : i64, scratch_operands = 0 : i64, tpu.core_type = #tpu.core_type<tc>} {
    %c0 = arith.constant 0 : index
    %c0_0 = arith.constant 0 : index
    %c0_1 = arith.constant 0 : index
    %0 = vector.load %arg0[%c0, %c0_0, %c0_1] : memref<8x16x16xf32, #tpu.memory_space<vmem>>, vector<8x16x16xf32>
    %c0_2 = arith.constant 0 : index
    %c0_3 = arith.constant 0 : index
    %c0_4 = arith.constant 0 : index
    %1 = vector.load %arg1[%c0_2, %c0_3, %c0_4] : memref<8x16x16xf32, #tpu.memory_space<vmem>>, vector<8x16x16xf32>
    "tpu.trace_start"() <{level = 10 : i32, message = "bij,bjk->bik"}> : () -> ()
    %cst = arith.constant dense<0.000000e+00> : vector<8x16x16xf32>
    %2 = tpu.matmul %0, %1, %cst {dimension_numbers = #tpu.dot_dimension_numbers<[2], [1], [1], [2], [0, 0, 0, 1, 1, 2], [0], [0]>} : vector<8x16x16xf32>, vector<8x16x16xf32>, vector<8x16x16xf32> -> vector<8x16x16xf32>
    "tpu.trace_stop"() : () -> ()
    "tpu.trace_start"() <{level = 10 : i32, message = "bij,bkj->bik"}> : () -> ()
    %cst_5 = arith.constant dense<0.000000e+00> : vector<8x16x16xf32>
    %3 = tpu.matmul %2, %0, %cst_5 {dimension_numbers = #tpu.dot_dimension_numbers<[2], [2], [1], [1], [0, 0, 0, 1, 1, 1], [0], [0]>} : vector<8x16x16xf32>, vector<8x16x16xf32>, vector<8x16x16xf32> -> vector<8x16x16xf32>
    "tpu.trace_stop"() : () -> ()
    %c0_6 = arith.constant 0 : index
    %c0_7 = arith.constant 0 : index
    %c0_8 = arith.constant 0 : index
    %4 = vector.load %arg2[%c0_6, %c0_7, %c0_8] : memref<8x16x16xf32, #tpu.memory_space<vmem>>, vector<8x16x16xf32>
    tpu.vector_store %arg2[%c0_6, %c0_7, %c0_8], %3 {strides = array<i32>} : memref<8x16x16xf32, #tpu.memory_space<vmem>>, vector<8x16x16xf32>,
    return
  }
}

module attributes {stable_mosaic.version = 11 : i64} {
  func.func @_log_recon_wmean_kernel(%arg0: memref<8x16x16xf32, #tpu.memory_space<vmem>>, %arg1: memref<8x16xf32, #tpu.memory_space<vmem>>, %arg2: memref<8x2xf32, #tpu.memory_space<vmem>>, %arg3: memref<2x16x16xf32, #tpu.memory_space<vmem>>) attributes {dimension_semantics = [], scalar_prefetch = 0 : i64, scratch_operands = 0 : i64, tpu.core_type = #tpu.core_type<tc>} {
    %c0 = arith.constant 0 : index
    %c0_0 = arith.constant 0 : index
    %c0_1 = arith.constant 0 : index
    %0 = vector.load %arg0[%c0, %c0_0, %c0_1] : memref<8x16x16xf32, #tpu.memory_space<vmem>>, vector<8x16x16xf32>
    %c0_2 = arith.constant 0 : index
    %c0_3 = arith.constant 0 : index
    %1 = vector.load %arg1[%c0_2, %c0_3] : memref<8x16xf32, #tpu.memory_space<vmem>>, vector<8x16xf32>
    %cst = arith.constant 9.99999996E-13 : f32
    %2 = vector.broadcast %cst : f32 to vector<8x16xf32>
    %3 = arith.maximumf %1, %2 : vector<8x16xf32>
    %4 = math.log %3 : vector<8x16xf32>
    %5 = vector.shape_cast %4 : vector<8x16xf32> to vector<8x1x16xf32>
    %6 = vector.broadcast %5 : vector<8x1x16xf32> to vector<8x16x16xf32>
    %7 = arith.mulf %0, %6 : vector<8x16x16xf32>
    "tpu.trace_start"() <{level = 10 : i32, message = "bij,bkj->bik"}> : () -> ()
    %cst_4 = arith.constant dense<0.000000e+00> : vector<8x16x16xf32>
    %8 = tpu.matmul %7, %0, %cst_4 {dimension_numbers = #tpu.dot_dimension_numbers<[2], [2], [1], [1], [0, 0, 0, 1, 1, 1], [0], [0]>} : vector<8x16x16xf32>, vector<8x16x16xf32>, vector<8x16x16xf32> -> vector<8x16x16xf32>
    "tpu.trace_stop"() : () -> ()
    %c0_5 = arith.constant 0 : index
    %c0_6 = arith.constant 0 : index
    %9 = vector.load %arg2[%c0_5, %c0_6] : memref<8x2xf32, #tpu.memory_space<vmem>>, vector<8x2xf32>
    %10 = vector.extract_strided_slice %9 {offsets = [0, 0], sizes = [8, 1], strides = [1, 1]} : vector<8x2xf32> to vector<8x1xf32>
    %11 = vector.shape_cast %10 : vector<8x1xf32> to vector<8x1x1xf32>
    %12 = vector.broadcast %11 : vector<8x1x1xf32> to vector<8x16x16xf32>
    %13 = arith.mulf %12, %8 : vector<8x16x16xf32>
    %cst_7 = arith.constant dense<0.000000e+00> : vector<16x16xf32>
    %14 = vector.multi_reduction <add>, %13, %cst_7 [0] : vector<8x16x16xf32> to vector<16x16xf32>
    %c0_8 = arith.constant 0 : index
    %c0_9 = arith.constant 0 : index
    %c0_10 = arith.constant 0 : index
    %15 = vector.load %arg3[%c0_8, %c0_9, %c0_10] : memref<2x16x16xf32, #tpu.memory_space<vmem>>, vector<1x16x16xf32>
    %16 = vector.shape_cast %15 : vector<1x16x16xf32> to vector<16x16xf32>
    %17 = vector.shape_cast %14 : vector<16x16xf32> to vector<1x16x16xf32>
    tpu.vector_store %arg3[%c0_8, %c0_9, %c0_10], %17 {strides = array<i32>} : memref<2x16x16xf32, #tpu.memory_space<vmem>>, vector<1x16x16xf32>,
    %18 = vector.extract_strided_slice %9 {offsets = [0, 1], sizes = [8, 1], strides = [1, 1]} : vector<8x2xf32> to vector<8x1xf32>
    %19 = vector.shape_cast %18 : vector<8x1xf32> to vector<8x1x1xf32>
    %20 = vector.broadcast %19 : vector<8x1x1xf32> to vector<8x16x16xf32>
    %21 = arith.mulf %20, %8 : vector<8x16x16xf32>
    %cst_11 = arith.constant dense<0.000000e+00> : vector<16x16xf32>
    %22 = vector.multi_reduction <add>, %21, %cst_11 [0] : vector<8x16x16xf32> to vector<16x16xf32>
    %c1 = arith.constant 1 : index
    %c0_12 = arith.constant 0 : index
    %c0_13 = arith.constant 0 : index
    %23 = vector.load %arg3[%c1, %c0_12, %c0_13] : memref<2x16x16xf32, #tpu.memory_space<vmem>>, vector<1x16x16xf32>
    %24 = vector.shape_cast %23 : vector<1x16x16xf32> to vector<16x16xf32>
    %25 = vector.shape_cast %22 : vector<16x16xf32> to vector<1x16x16xf32>
    tpu.vector_store %arg3[%c1, %c0_12, %c0_13], %25 {strides = array<i32>} : memref<2x16x16xf32, #tpu.memory_space<vmem>>, vector<1x16x16xf32>,
    return
  }
}

module attributes {stable_mosaic.version = 11 : i64} {
  func.func @_exp_recon_congr_kernel(%arg0: memref<2x16x16xf32, #tpu.memory_space<vmem>>, %arg1: memref<2x16xf32, #tpu.memory_space<vmem>>, %arg2: memref<2x16x16xf32, #tpu.memory_space<vmem>>, %arg3: memref<2x16x16xf32, #tpu.memory_space<vmem>>) attributes {dimension_semantics = [], scalar_prefetch = 0 : i64, scratch_operands = 0 : i64, tpu.core_type = #tpu.core_type<tc>} {
    %c0 = arith.constant 0 : index
    %c0_0 = arith.constant 0 : index
    %c0_1 = arith.constant 0 : index
    %0 = vector.load %arg0[%c0, %c0_0, %c0_1] : memref<2x16x16xf32, #tpu.memory_space<vmem>>, vector<2x16x16xf32>
    %c0_2 = arith.constant 0 : index
    %c0_3 = arith.constant 0 : index
    %1 = vector.load %arg1[%c0_2, %c0_3] : memref<2x16xf32, #tpu.memory_space<vmem>>, vector<2x16xf32>
    %2 = math.exp %1 : vector<2x16xf32>
    %3 = vector.shape_cast %2 : vector<2x16xf32> to vector<2x1x16xf32>
    %4 = vector.broadcast %3 : vector<2x1x16xf32> to vector<2x16x16xf32>
    %5 = arith.mulf %0, %4 : vector<2x16x16xf32>
    "tpu.trace_start"() <{level = 10 : i32, message = "bij,bkj->bik"}> : () -> ()
    %cst = arith.constant dense<0.000000e+00> : vector<2x16x16xf32>
    %6 = tpu.matmul %5, %0, %cst {dimension_numbers = #tpu.dot_dimension_numbers<[2], [2], [1], [1], [0, 0, 0, 1, 1, 1], [0], [0]>} : vector<2x16x16xf32>, vector<2x16x16xf32>, vector<2x16x16xf32> -> vector<2x16x16xf32>
    "tpu.trace_stop"() : () -> ()
    %c0_4 = arith.constant 0 : index
    %c0_5 = arith.constant 0 : index
    %c0_6 = arith.constant 0 : index
    %7 = vector.load %arg2[%c0_4, %c0_5, %c0_6] : memref<2x16x16xf32, #tpu.memory_space<vmem>>, vector<2x16x16xf32>
    "tpu.trace_start"() <{level = 10 : i32, message = "bij,bjk->bik"}> : () -> ()
    %cst_7 = arith.constant dense<0.000000e+00> : vector<2x16x16xf32>
    %8 = tpu.matmul %7, %6, %cst_7 {dimension_numbers = #tpu.dot_dimension_numbers<[2], [1], [1], [2], [0, 0, 0, 1, 1, 2], [0], [0]>} : vector<2x16x16xf32>, vector<2x16x16xf32>, vector<2x16x16xf32> -> vector<2x16x16xf32>
    "tpu.trace_stop"() : () -> ()
    "tpu.trace_start"() <{level = 10 : i32, message = "bij,bkj->bik"}> : () -> ()
    %cst_8 = arith.constant dense<0.000000e+00> : vector<2x16x16xf32>
    %9 = tpu.matmul %8, %7, %cst_8 {dimension_numbers = #tpu.dot_dimension_numbers<[2], [2], [1], [1], [0, 0, 0, 1, 1, 1], [0], [0]>} : vector<2x16x16xf32>, vector<2x16x16xf32>, vector<2x16x16xf32> -> vector<2x16x16xf32>
    "tpu.trace_stop"() : () -> ()
    %c0_9 = arith.constant 0 : index
    %c0_10 = arith.constant 0 : index
    %c0_11 = arith.constant 0 : index
    %10 = vector.load %arg3[%c0_9, %c0_10, %c0_11] : memref<2x16x16xf32, #tpu.memory_space<vmem>>, vector<2x16x16xf32>
    tpu.vector_store %arg3[%c0_9, %c0_10, %c0_11], %9 {strides = array<i32>} : memref<2x16x16xf32, #tpu.memory_space<vmem>>, vector<2x16x16xf32>,
    return
  }
}

module attributes {stable_mosaic.version = 11 : i64} {
  func.func @_sqrt_invsqrt_kernel(%arg0: memref<2x16x16xf32, #tpu.memory_space<vmem>>, %arg1: memref<2x16xf32, #tpu.memory_space<vmem>>, %arg2: memref<2x16x16xf32, #tpu.memory_space<vmem>>, %arg3: memref<2x16x16xf32, #tpu.memory_space<vmem>>) attributes {dimension_semantics = [], scalar_prefetch = 0 : i64, scratch_operands = 0 : i64, tpu.core_type = #tpu.core_type<tc>} {
    %c0 = arith.constant 0 : index
    %c0_0 = arith.constant 0 : index
    %c0_1 = arith.constant 0 : index
    %0 = vector.load %arg0[%c0, %c0_0, %c0_1] : memref<2x16x16xf32, #tpu.memory_space<vmem>>, vector<2x16x16xf32>
    %c0_2 = arith.constant 0 : index
    %c0_3 = arith.constant 0 : index
    %1 = vector.load %arg1[%c0_2, %c0_3] : memref<2x16xf32, #tpu.memory_space<vmem>>, vector<2x16xf32>
    %cst = arith.constant 9.99999996E-13 : f32
    %2 = vector.broadcast %cst : f32 to vector<2x16xf32>
    %3 = arith.maximumf %1, %2 : vector<2x16xf32>
    %4 = math.sqrt %3 : vector<2x16xf32>
    %5 = vector.shape_cast %4 : vector<2x16xf32> to vector<2x1x16xf32>
    %6 = vector.broadcast %5 : vector<2x1x16xf32> to vector<2x16x16xf32>
    %7 = arith.mulf %0, %6 : vector<2x16x16xf32>
    "tpu.trace_start"() <{level = 10 : i32, message = "bij,bkj->bik"}> : () -> ()
    %cst_4 = arith.constant dense<0.000000e+00> : vector<2x16x16xf32>
    %8 = tpu.matmul %7, %0, %cst_4 {dimension_numbers = #tpu.dot_dimension_numbers<[2], [2], [1], [1], [0, 0, 0, 1, 1, 1], [0], [0]>} : vector<2x16x16xf32>, vector<2x16x16xf32>, vector<2x16x16xf32> -> vector<2x16x16xf32>
    "tpu.trace_stop"() : () -> ()
    %c0_5 = arith.constant 0 : index
    %c0_6 = arith.constant 0 : index
    %c0_7 = arith.constant 0 : index
    %9 = vector.load %arg2[%c0_5, %c0_6, %c0_7] : memref<2x16x16xf32, #tpu.memory_space<vmem>>, vector<2x16x16xf32>
    tpu.vector_store %arg2[%c0_5, %c0_6, %c0_7], %8 {strides = array<i32>} : memref<2x16x16xf32, #tpu.memory_space<vmem>>, vector<2x16x16xf32>,
    %10 = math.rsqrt %3 : vector<2x16xf32>
    %11 = vector.shape_cast %10 : vector<2x16xf32> to vector<2x1x16xf32>
    %12 = vector.broadcast %11 : vector<2x1x16xf32> to vector<2x16x16xf32>
    %13 = arith.mulf %0, %12 : vector<2x16x16xf32>
    "tpu.trace_start"() <{level = 10 : i32, message = "bij,bkj->bik"}> : () -> ()
    %cst_8 = arith.constant dense<0.000000e+00> : vector<2x16x16xf32>
    %14 = tpu.matmul %13, %0, %cst_8 {dimension_numbers = #tpu.dot_dimension_numbers<[2], [2], [1], [1], [0, 0, 0, 1, 1, 1], [0], [0]>} : vector<2x16x16xf32>, vector<2x16x16xf32>, vector<2x16x16xf32> -> vector<2x16x16xf32>
    "tpu.trace_stop"() : () -> ()
    %c0_9 = arith.constant 0 : index
    %c0_10 = arith.constant 0 : index
    %c0_11 = arith.constant 0 : index
    %15 = vector.load %arg3[%c0_9, %c0_10, %c0_11] : memref<2x16x16xf32, #tpu.memory_space<vmem>>, vector<2x16x16xf32>
    tpu.vector_store %arg3[%c0_9, %c0_10, %c0_11], %14 {strides = array<i32>} : memref<2x16x16xf32, #tpu.memory_space<vmem>>, vector<2x16x16xf32>,
    return
  }
}

module attributes {stable_mosaic.version = 11 : i64} {
  func.func @_congr_shared_kernel(%arg0: memref<8x16xf32, #tpu.memory_space<vmem>>, %arg1: memref<8x16x16xf32, #tpu.memory_space<vmem>>, %arg2: memref<8x8x8xf32, #tpu.memory_space<vmem>>) attributes {dimension_semantics = [], scalar_prefetch = 0 : i64, scratch_operands = 0 : i64, tpu.core_type = #tpu.core_type<tc>} {
    %c0 = arith.constant 0 : index
    %c0_0 = arith.constant 0 : index
    %0 = vector.load %arg0[%c0, %c0_0] : memref<8x16xf32, #tpu.memory_space<vmem>>, vector<8x16xf32>
    %c0_1 = arith.constant 0 : index
    %c0_2 = arith.constant 0 : index
    %c0_3 = arith.constant 0 : index
    %1 = vector.load %arg1[%c0_1, %c0_2, %c0_3] : memref<8x16x16xf32, #tpu.memory_space<vmem>>, vector<8x16x16xf32>
    %2 = vector.shape_cast %1 : vector<8x16x16xf32> to vector<128x16xf32>
    %cst = arith.constant dense<0.000000e+00> : vector<128x8xf32>
    %3 = tpu.matmul %2, %0, %cst {dimension_numbers = #tpu.dot_dimension_numbers<[1], [1], [0], [0], [0, 0, 1, 0], [], []>} : vector<128x16xf32>, vector<8x16xf32>, vector<128x8xf32> -> vector<128x8xf32>
    %4 = vector.shape_cast %3 : vector<128x8xf32> to vector<8x16x8xf32>
    %5 = vector.shape_cast %0 : vector<8x16xf32> to vector<1x8x16xf32>
    %6 = vector.shape_cast %5 : vector<1x8x16xf32> to vector<1x8x16xf32>
    %7 = vector.broadcast %6 : vector<1x8x16xf32> to vector<8x8x16xf32>
    "tpu.trace_start"() <{level = 10 : i32, message = "bij,bjk->bik"}> : () -> ()
    %cst_4 = arith.constant dense<0.000000e+00> : vector<8x8x8xf32>
    %8 = tpu.matmul %7, %4, %cst_4 {dimension_numbers = #tpu.dot_dimension_numbers<[2], [1], [1], [2], [0, 0, 0, 1, 1, 2], [0], [0]>} : vector<8x8x16xf32>, vector<8x16x8xf32>, vector<8x8x8xf32> -> vector<8x8x8xf32>
    "tpu.trace_stop"() : () -> ()
    %c0_5 = arith.constant 0 : index
    %c0_6 = arith.constant 0 : index
    %c0_7 = arith.constant 0 : index
    %9 = vector.load %arg2[%c0_5, %c0_6, %c0_7] : memref<8x8x8xf32, #tpu.memory_space<vmem>>, vector<8x8x8xf32>
    tpu.vector_store %arg2[%c0_5, %c0_6, %c0_7], %8 {strides = array<i32>} : memref<8x8x8xf32, #tpu.memory_space<vmem>>, vector<8x8x8xf32>,
    return
  }
}

module attributes {stable_mosaic.version = 11 : i64} {
  func.func @_dombn_powm_kernel(%arg0: memref<8x16x16xf32, #tpu.memory_space<vmem>>, %arg1: memref<8x16xf32, #tpu.memory_space<vmem>>, %arg2: memref<2x8xf32, #tpu.memory_space<vmem>>, %arg3: memref<8x2xf32, #tpu.memory_space<vmem>>, %arg4: memref<2x1xf32, #tpu.memory_space<vmem>>, %arg5: memref<8x16x16xf32, #tpu.memory_space<vmem>>) attributes {dimension_semantics = [], scalar_prefetch = 0 : i64, scratch_operands = 0 : i64, tpu.core_type = #tpu.core_type<tc>} {
    %c0 = arith.constant 0 : index
    %c0_0 = arith.constant 0 : index
    %c0_1 = arith.constant 0 : index
    %0 = vector.load %arg0[%c0, %c0_0, %c0_1] : memref<8x16x16xf32, #tpu.memory_space<vmem>>, vector<8x16x16xf32>
    %c0_2 = arith.constant 0 : index
    %c0_3 = arith.constant 0 : index
    %1 = vector.load %arg1[%c0_2, %c0_3] : memref<8x16xf32, #tpu.memory_space<vmem>>, vector<8x16xf32>
    %cst = arith.constant 9.99999996E-13 : f32
    %2 = vector.broadcast %cst : f32 to vector<8x16xf32>
    %3 = arith.maximumf %1, %2 : vector<8x16xf32>
    %4 = math.log %3 : vector<8x16xf32>
    %5 = arith.mulf %4, %4 : vector<8x16xf32>
    %cst_4 = arith.constant dense<0.000000e+00> : vector<8xf32>
    %6 = vector.multi_reduction <add>, %5, %cst_4 [1] : vector<8x16xf32> to vector<8xf32>
    %7 = vector.shape_cast %6 : vector<8xf32> to vector<8x1xf32>
    %c0_5 = arith.constant 0 : index
    %c0_6 = arith.constant 0 : index
    %8 = vector.load %arg2[%c0_5, %c0_6] : memref<2x8xf32, #tpu.memory_space<vmem>>, vector<2x8xf32>
    %cst_7 = arith.constant dense<0.000000e+00> : vector<2x1xf32>
    %9 = tpu.matmul %8, %7, %cst_7 {dimension_numbers = #tpu.dot_dimension_numbers<[1], [0], [0], [1], [0, 0, 1, 1], [], []>} : vector<2x8xf32>, vector<8x1xf32>, vector<2x1xf32> -> vector<2x1xf32>
    %c0_8 = arith.constant 0 : index
    %c0_9 = arith.constant 0 : index
    %10 = vector.load %arg4[%c0_8, %c0_9] : memref<2x1xf32, #tpu.memory_space<vmem>>, vector<2x1xf32>
    %cst_10 = arith.constant 9.99999974E-6 : f32
    %11 = vector.broadcast %cst_10 : f32 to vector<2x1xf32>
    %12 = arith.addf %9, %11 : vector<2x1xf32>
    %13 = math.rsqrt %12 : vector<2x1xf32>
    %14 = arith.mulf %10, %13 : vector<2x1xf32>
    %c0_11 = arith.constant 0 : index
    %c0_12 = arith.constant 0 : index
    %15 = vector.load %arg3[%c0_11, %c0_12] : memref<8x2xf32, #tpu.memory_space<vmem>>, vector<8x2xf32>
    %cst_13 = arith.constant dense<0.000000e+00> : vector<8x1xf32>
    %16 = tpu.matmul %15, %14, %cst_13 {dimension_numbers = #tpu.dot_dimension_numbers<[1], [0], [0], [1], [0, 0, 1, 1], [], []>} : vector<8x2xf32>, vector<2x1xf32>, vector<8x1xf32> -> vector<8x1xf32>
    %17 = vector.broadcast %16 : vector<8x1xf32> to vector<8x16xf32>
    %18 = arith.mulf %17, %4 : vector<8x16xf32>
    %19 = math.exp %18 : vector<8x16xf32>
    %20 = vector.shape_cast %19 : vector<8x16xf32> to vector<8x1x16xf32>
    %21 = vector.broadcast %20 : vector<8x1x16xf32> to vector<8x16x16xf32>
    %22 = arith.mulf %0, %21 : vector<8x16x16xf32>
    "tpu.trace_start"() <{level = 10 : i32, message = "bij,bkj->bik"}> : () -> ()
    %cst_14 = arith.constant dense<0.000000e+00> : vector<8x16x16xf32>
    %23 = tpu.matmul %22, %0, %cst_14 {dimension_numbers = #tpu.dot_dimension_numbers<[2], [2], [1], [1], [0, 0, 0, 1, 1, 1], [0], [0]>} : vector<8x16x16xf32>, vector<8x16x16xf32>, vector<8x16x16xf32> -> vector<8x16x16xf32>
    "tpu.trace_stop"() : () -> ()
    %c0_15 = arith.constant 0 : index
    %c0_16 = arith.constant 0 : index
    %c0_17 = arith.constant 0 : index
    %24 = vector.load %arg5[%c0_15, %c0_16, %c0_17] : memref<8x16x16xf32, #tpu.memory_space<vmem>>, vector<8x16x16xf32>
    tpu.vector_store %arg5[%c0_15, %c0_16, %c0_17], %23 {strides = array<i32>} : memref<8x16x16xf32, #tpu.memory_space<vmem>>, vector<8x16x16xf32>,
    return
  }
}

module attributes {stable_mosaic.version = 11 : i64} {
  func.func @_sqrt_invsqrt_kernel(%arg0: memref<1x8x8xf32, #tpu.memory_space<vmem>>, %arg1: memref<1x8xf32, #tpu.memory_space<vmem>>, %arg2: memref<1x8x8xf32, #tpu.memory_space<vmem>>, %arg3: memref<1x8x8xf32, #tpu.memory_space<vmem>>) attributes {dimension_semantics = [], scalar_prefetch = 0 : i64, scratch_operands = 0 : i64, tpu.core_type = #tpu.core_type<tc>} {
    %c0 = arith.constant 0 : index
    %c0_0 = arith.constant 0 : index
    %c0_1 = arith.constant 0 : index
    %0 = vector.load %arg0[%c0, %c0_0, %c0_1] : memref<1x8x8xf32, #tpu.memory_space<vmem>>, vector<1x8x8xf32>
    %c0_2 = arith.constant 0 : index
    %c0_3 = arith.constant 0 : index
    %1 = vector.load %arg1[%c0_2, %c0_3] : memref<1x8xf32, #tpu.memory_space<vmem>>, vector<1x8xf32>
    %cst = arith.constant 9.99999996E-13 : f32
    %2 = vector.broadcast %cst : f32 to vector<1x8xf32>
    %3 = arith.maximumf %1, %2 : vector<1x8xf32>
    %4 = math.sqrt %3 : vector<1x8xf32>
    %5 = vector.shape_cast %4 : vector<1x8xf32> to vector<1x1x8xf32>
    %6 = vector.broadcast %5 : vector<1x1x8xf32> to vector<1x8x8xf32>
    %7 = arith.mulf %0, %6 : vector<1x8x8xf32>
    "tpu.trace_start"() <{level = 10 : i32, message = "bij,bkj->bik"}> : () -> ()
    %cst_4 = arith.constant dense<0.000000e+00> : vector<1x8x8xf32>
    %8 = tpu.matmul %7, %0, %cst_4 {dimension_numbers = #tpu.dot_dimension_numbers<[2], [2], [1], [1], [0, 0, 0, 1, 1, 1], [0], [0]>} : vector<1x8x8xf32>, vector<1x8x8xf32>, vector<1x8x8xf32> -> vector<1x8x8xf32>
    "tpu.trace_stop"() : () -> ()
    %c0_5 = arith.constant 0 : index
    %c0_6 = arith.constant 0 : index
    %c0_7 = arith.constant 0 : index
    %9 = vector.load %arg2[%c0_5, %c0_6, %c0_7] : memref<1x8x8xf32, #tpu.memory_space<vmem>>, vector<1x8x8xf32>
    tpu.vector_store %arg2[%c0_5, %c0_6, %c0_7], %8 {strides = array<i32>} : memref<1x8x8xf32, #tpu.memory_space<vmem>>, vector<1x8x8xf32>,
    %10 = math.rsqrt %3 : vector<1x8xf32>
    %11 = vector.shape_cast %10 : vector<1x8xf32> to vector<1x1x8xf32>
    %12 = vector.broadcast %11 : vector<1x1x8xf32> to vector<1x8x8xf32>
    %13 = arith.mulf %0, %12 : vector<1x8x8xf32>
    "tpu.trace_start"() <{level = 10 : i32, message = "bij,bkj->bik"}> : () -> ()
    %cst_8 = arith.constant dense<0.000000e+00> : vector<1x8x8xf32>
    %14 = tpu.matmul %13, %0, %cst_8 {dimension_numbers = #tpu.dot_dimension_numbers<[2], [2], [1], [1], [0, 0, 0, 1, 1, 1], [0], [0]>} : vector<1x8x8xf32>, vector<1x8x8xf32>, vector<1x8x8xf32> -> vector<1x8x8xf32>
    "tpu.trace_stop"() : () -> ()
    %c0_9 = arith.constant 0 : index
    %c0_10 = arith.constant 0 : index
    %c0_11 = arith.constant 0 : index
    %15 = vector.load %arg3[%c0_9, %c0_10, %c0_11] : memref<1x8x8xf32, #tpu.memory_space<vmem>>, vector<1x8x8xf32>
    tpu.vector_store %arg3[%c0_9, %c0_10, %c0_11], %14 {strides = array<i32>} : memref<1x8x8xf32, #tpu.memory_space<vmem>>, vector<1x8x8xf32>,
    return
  }
}

module attributes {stable_mosaic.version = 11 : i64} {
  func.func @_congr_shared_kernel(%arg0: memref<8x8xf32, #tpu.memory_space<vmem>>, %arg1: memref<8x8x8xf32, #tpu.memory_space<vmem>>, %arg2: memref<8x8x8xf32, #tpu.memory_space<vmem>>) attributes {dimension_semantics = [], scalar_prefetch = 0 : i64, scratch_operands = 0 : i64, tpu.core_type = #tpu.core_type<tc>} {
    %c0 = arith.constant 0 : index
    %c0_0 = arith.constant 0 : index
    %0 = vector.load %arg0[%c0, %c0_0] : memref<8x8xf32, #tpu.memory_space<vmem>>, vector<8x8xf32>
    %c0_1 = arith.constant 0 : index
    %c0_2 = arith.constant 0 : index
    %c0_3 = arith.constant 0 : index
    %1 = vector.load %arg1[%c0_1, %c0_2, %c0_3] : memref<8x8x8xf32, #tpu.memory_space<vmem>>, vector<8x8x8xf32>
    %2 = vector.shape_cast %1 : vector<8x8x8xf32> to vector<64x8xf32>
    %cst = arith.constant dense<0.000000e+00> : vector<64x8xf32>
    %3 = tpu.matmul %2, %0, %cst {dimension_numbers = #tpu.dot_dimension_numbers<[1], [1], [0], [0], [0, 0, 1, 0], [], []>} : vector<64x8xf32>, vector<8x8xf32>, vector<64x8xf32> -> vector<64x8xf32>
    %4 = vector.shape_cast %3 : vector<64x8xf32> to vector<8x8x8xf32>
    %5 = vector.shape_cast %0 : vector<8x8xf32> to vector<1x8x8xf32>
    %6 = vector.shape_cast %5 : vector<1x8x8xf32> to vector<1x8x8xf32>
    %7 = vector.broadcast %6 : vector<1x8x8xf32> to vector<8x8x8xf32>
    "tpu.trace_start"() <{level = 10 : i32, message = "bij,bjk->bik"}> : () -> ()
    %cst_4 = arith.constant dense<0.000000e+00> : vector<8x8x8xf32>
    %8 = tpu.matmul %7, %4, %cst_4 {dimension_numbers = #tpu.dot_dimension_numbers<[2], [1], [1], [2], [0, 0, 0, 1, 1, 2], [0], [0]>} : vector<8x8x8xf32>, vector<8x8x8xf32>, vector<8x8x8xf32> -> vector<8x8x8xf32>
    "tpu.trace_stop"() : () -> ()
    %c0_5 = arith.constant 0 : index
    %c0_6 = arith.constant 0 : index
    %c0_7 = arith.constant 0 : index
    %9 = vector.load %arg2[%c0_5, %c0_6, %c0_7] : memref<8x8x8xf32, #tpu.memory_space<vmem>>, vector<8x8x8xf32>
    tpu.vector_store %arg2[%c0_5, %c0_6, %c0_7], %8 {strides = array<i32>} : memref<8x8x8xf32, #tpu.memory_space<vmem>>, vector<8x8x8xf32>,
    return
  }
}

module attributes {stable_mosaic.version = 11 : i64} {
  func.func @_log_recon_wmean_kernel(%arg0: memref<8x8x8xf32, #tpu.memory_space<vmem>>, %arg1: memref<8x8xf32, #tpu.memory_space<vmem>>, %arg2: memref<8x1xf32, #tpu.memory_space<vmem>>, %arg3: memref<1x8x8xf32, #tpu.memory_space<vmem>>) attributes {dimension_semantics = [], scalar_prefetch = 0 : i64, scratch_operands = 0 : i64, tpu.core_type = #tpu.core_type<tc>} {
    %c0 = arith.constant 0 : index
    %c0_0 = arith.constant 0 : index
    %c0_1 = arith.constant 0 : index
    %0 = vector.load %arg0[%c0, %c0_0, %c0_1] : memref<8x8x8xf32, #tpu.memory_space<vmem>>, vector<8x8x8xf32>
    %c0_2 = arith.constant 0 : index
    %c0_3 = arith.constant 0 : index
    %1 = vector.load %arg1[%c0_2, %c0_3] : memref<8x8xf32, #tpu.memory_space<vmem>>, vector<8x8xf32>
    %cst = arith.constant 9.99999996E-13 : f32
    %2 = vector.broadcast %cst : f32 to vector<8x8xf32>
    %3 = arith.maximumf %1, %2 : vector<8x8xf32>
    %4 = math.log %3 : vector<8x8xf32>
    %5 = vector.shape_cast %4 : vector<8x8xf32> to vector<8x1x8xf32>
    %6 = vector.broadcast %5 : vector<8x1x8xf32> to vector<8x8x8xf32>
    %7 = arith.mulf %0, %6 : vector<8x8x8xf32>
    "tpu.trace_start"() <{level = 10 : i32, message = "bij,bkj->bik"}> : () -> ()
    %cst_4 = arith.constant dense<0.000000e+00> : vector<8x8x8xf32>
    %8 = tpu.matmul %7, %0, %cst_4 {dimension_numbers = #tpu.dot_dimension_numbers<[2], [2], [1], [1], [0, 0, 0, 1, 1, 1], [0], [0]>} : vector<8x8x8xf32>, vector<8x8x8xf32>, vector<8x8x8xf32> -> vector<8x8x8xf32>
    "tpu.trace_stop"() : () -> ()
    %c0_5 = arith.constant 0 : index
    %c0_6 = arith.constant 0 : index
    %9 = vector.load %arg2[%c0_5, %c0_6] : memref<8x1xf32, #tpu.memory_space<vmem>>, vector<8x1xf32>
    %10 = vector.shape_cast %9 : vector<8x1xf32> to vector<8x1x1xf32>
    %11 = vector.broadcast %10 : vector<8x1x1xf32> to vector<8x8x8xf32>
    %12 = arith.mulf %11, %8 : vector<8x8x8xf32>
    %cst_7 = arith.constant dense<0.000000e+00> : vector<8x8xf32>
    %13 = vector.multi_reduction <add>, %12, %cst_7 [0] : vector<8x8x8xf32> to vector<8x8xf32>
    %c0_8 = arith.constant 0 : index
    %c0_9 = arith.constant 0 : index
    %c0_10 = arith.constant 0 : index
    %14 = vector.load %arg3[%c0_8, %c0_9, %c0_10] : memref<1x8x8xf32, #tpu.memory_space<vmem>>, vector<1x8x8xf32>
    %15 = vector.shape_cast %14 : vector<1x8x8xf32> to vector<8x8xf32>
    %16 = vector.shape_cast %13 : vector<8x8xf32> to vector<1x8x8xf32>
    tpu.vector_store %arg3[%c0_8, %c0_9, %c0_10], %16 {strides = array<i32>} : memref<1x8x8xf32, #tpu.memory_space<vmem>>, vector<1x8x8xf32>,
    return
  }
}

module attributes {stable_mosaic.version = 11 : i64} {
  func.func @_exp_recon_congr_kernel(%arg0: memref<1x8x8xf32, #tpu.memory_space<vmem>>, %arg1: memref<1x8xf32, #tpu.memory_space<vmem>>, %arg2: memref<1x8x8xf32, #tpu.memory_space<vmem>>, %arg3: memref<1x8x8xf32, #tpu.memory_space<vmem>>) attributes {dimension_semantics = [], scalar_prefetch = 0 : i64, scratch_operands = 0 : i64, tpu.core_type = #tpu.core_type<tc>} {
    %c0 = arith.constant 0 : index
    %c0_0 = arith.constant 0 : index
    %c0_1 = arith.constant 0 : index
    %0 = vector.load %arg0[%c0, %c0_0, %c0_1] : memref<1x8x8xf32, #tpu.memory_space<vmem>>, vector<1x8x8xf32>
    %c0_2 = arith.constant 0 : index
    %c0_3 = arith.constant 0 : index
    %1 = vector.load %arg1[%c0_2, %c0_3] : memref<1x8xf32, #tpu.memory_space<vmem>>, vector<1x8xf32>
    %2 = math.exp %1 : vector<1x8xf32>
    %3 = vector.shape_cast %2 : vector<1x8xf32> to vector<1x1x8xf32>
    %4 = vector.broadcast %3 : vector<1x1x8xf32> to vector<1x8x8xf32>
    %5 = arith.mulf %0, %4 : vector<1x8x8xf32>
    "tpu.trace_start"() <{level = 10 : i32, message = "bij,bkj->bik"}> : () -> ()
    %cst = arith.constant dense<0.000000e+00> : vector<1x8x8xf32>
    %6 = tpu.matmul %5, %0, %cst {dimension_numbers = #tpu.dot_dimension_numbers<[2], [2], [1], [1], [0, 0, 0, 1, 1, 1], [0], [0]>} : vector<1x8x8xf32>, vector<1x8x8xf32>, vector<1x8x8xf32> -> vector<1x8x8xf32>
    "tpu.trace_stop"() : () -> ()
    %c0_4 = arith.constant 0 : index
    %c0_5 = arith.constant 0 : index
    %c0_6 = arith.constant 0 : index
    %7 = vector.load %arg2[%c0_4, %c0_5, %c0_6] : memref<1x8x8xf32, #tpu.memory_space<vmem>>, vector<1x8x8xf32>
    "tpu.trace_start"() <{level = 10 : i32, message = "bij,bjk->bik"}> : () -> ()
    %cst_7 = arith.constant dense<0.000000e+00> : vector<1x8x8xf32>
    %8 = tpu.matmul %7, %6, %cst_7 {dimension_numbers = #tpu.dot_dimension_numbers<[2], [1], [1], [2], [0, 0, 0, 1, 1, 2], [0], [0]>} : vector<1x8x8xf32>, vector<1x8x8xf32>, vector<1x8x8xf32> -> vector<1x8x8xf32>
    "tpu.trace_stop"() : () -> ()
    "tpu.trace_start"() <{level = 10 : i32, message = "bij,bkj->bik"}> : () -> ()
    %cst_8 = arith.constant dense<0.000000e+00> : vector<1x8x8xf32>
    %9 = tpu.matmul %8, %7, %cst_8 {dimension_numbers = #tpu.dot_dimension_numbers<[2], [2], [1], [1], [0, 0, 0, 1, 1, 1], [0], [0]>} : vector<1x8x8xf32>, vector<1x8x8xf32>, vector<1x8x8xf32> -> vector<1x8x8xf32>
    "tpu.trace_stop"() : () -> ()
    %c0_9 = arith.constant 0 : index
    %c0_10 = arith.constant 0 : index
    %c0_11 = arith.constant 0 : index
    %10 = vector.load %arg3[%c0_9, %c0_10, %c0_11] : memref<1x8x8xf32, #tpu.memory_space<vmem>>, vector<1x8x8xf32>
    tpu.vector_store %arg3[%c0_9, %c0_10, %c0_11], %9 {strides = array<i32>} : memref<1x8x8xf32, #tpu.memory_space<vmem>>, vector<1x8x8xf32>,
    return
  }
}

module attributes {stable_mosaic.version = 11 : i64} {
  func.func @_sqrt_invsqrt_kernel(%arg0: memref<1x8x8xf32, #tpu.memory_space<vmem>>, %arg1: memref<1x8xf32, #tpu.memory_space<vmem>>, %arg2: memref<1x8x8xf32, #tpu.memory_space<vmem>>, %arg3: memref<1x8x8xf32, #tpu.memory_space<vmem>>) attributes {dimension_semantics = [], scalar_prefetch = 0 : i64, scratch_operands = 0 : i64, tpu.core_type = #tpu.core_type<tc>} {
    %c0 = arith.constant 0 : index
    %c0_0 = arith.constant 0 : index
    %c0_1 = arith.constant 0 : index
    %0 = vector.load %arg0[%c0, %c0_0, %c0_1] : memref<1x8x8xf32, #tpu.memory_space<vmem>>, vector<1x8x8xf32>
    %c0_2 = arith.constant 0 : index
    %c0_3 = arith.constant 0 : index
    %1 = vector.load %arg1[%c0_2, %c0_3] : memref<1x8xf32, #tpu.memory_space<vmem>>, vector<1x8xf32>
    %cst = arith.constant 9.99999996E-13 : f32
    %2 = vector.broadcast %cst : f32 to vector<1x8xf32>
    %3 = arith.maximumf %1, %2 : vector<1x8xf32>
    %4 = math.sqrt %3 : vector<1x8xf32>
    %5 = vector.shape_cast %4 : vector<1x8xf32> to vector<1x1x8xf32>
    %6 = vector.broadcast %5 : vector<1x1x8xf32> to vector<1x8x8xf32>
    %7 = arith.mulf %0, %6 : vector<1x8x8xf32>
    "tpu.trace_start"() <{level = 10 : i32, message = "bij,bkj->bik"}> : () -> ()
    %cst_4 = arith.constant dense<0.000000e+00> : vector<1x8x8xf32>
    %8 = tpu.matmul %7, %0, %cst_4 {dimension_numbers = #tpu.dot_dimension_numbers<[2], [2], [1], [1], [0, 0, 0, 1, 1, 1], [0], [0]>} : vector<1x8x8xf32>, vector<1x8x8xf32>, vector<1x8x8xf32> -> vector<1x8x8xf32>
    "tpu.trace_stop"() : () -> ()
    %c0_5 = arith.constant 0 : index
    %c0_6 = arith.constant 0 : index
    %c0_7 = arith.constant 0 : index
    %9 = vector.load %arg2[%c0_5, %c0_6, %c0_7] : memref<1x8x8xf32, #tpu.memory_space<vmem>>, vector<1x8x8xf32>
    tpu.vector_store %arg2[%c0_5, %c0_6, %c0_7], %8 {strides = array<i32>} : memref<1x8x8xf32, #tpu.memory_space<vmem>>, vector<1x8x8xf32>,
    %10 = math.rsqrt %3 : vector<1x8xf32>
    %11 = vector.shape_cast %10 : vector<1x8xf32> to vector<1x1x8xf32>
    %12 = vector.broadcast %11 : vector<1x1x8xf32> to vector<1x8x8xf32>
    %13 = arith.mulf %0, %12 : vector<1x8x8xf32>
    "tpu.trace_start"() <{level = 10 : i32, message = "bij,bkj->bik"}> : () -> ()
    %cst_8 = arith.constant dense<0.000000e+00> : vector<1x8x8xf32>
    %14 = tpu.matmul %13, %0, %cst_8 {dimension_numbers = #tpu.dot_dimension_numbers<[2], [2], [1], [1], [0, 0, 0, 1, 1, 1], [0], [0]>} : vector<1x8x8xf32>, vector<1x8x8xf32>, vector<1x8x8xf32> -> vector<1x8x8xf32>
    "tpu.trace_stop"() : () -> ()
    %c0_9 = arith.constant 0 : index
    %c0_10 = arith.constant 0 : index
    %c0_11 = arith.constant 0 : index
    %15 = vector.load %arg3[%c0_9, %c0_10, %c0_11] : memref<1x8x8xf32, #tpu.memory_space<vmem>>, vector<1x8x8xf32>
    tpu.vector_store %arg3[%c0_9, %c0_10, %c0_11], %14 {strides = array<i32>} : memref<1x8x8xf32, #tpu.memory_space<vmem>>, vector<1x8x8xf32>,
    return
  }
}

module attributes {stable_mosaic.version = 11 : i64} {
  func.func @_logeig_head_kernel(%arg0: memref<8x8x8xf32, #tpu.memory_space<vmem>>, %arg1: memref<8x8xf32, #tpu.memory_space<vmem>>, %arg2: memref<8x8x4xf32, #tpu.memory_space<vmem>>, %arg3: memref<8x4xf32, #tpu.memory_space<vmem>>) attributes {dimension_semantics = [], scalar_prefetch = 0 : i64, scratch_operands = 0 : i64, tpu.core_type = #tpu.core_type<tc>} {
    %c0 = arith.constant 0 : index
    %c0_0 = arith.constant 0 : index
    %c0_1 = arith.constant 0 : index
    %0 = vector.load %arg0[%c0, %c0_0, %c0_1] : memref<8x8x8xf32, #tpu.memory_space<vmem>>, vector<8x8x8xf32>
    %c0_2 = arith.constant 0 : index
    %c0_3 = arith.constant 0 : index
    %1 = vector.load %arg1[%c0_2, %c0_3] : memref<8x8xf32, #tpu.memory_space<vmem>>, vector<8x8xf32>
    %cst = arith.constant 9.99999974E-5 : f32
    %2 = vector.broadcast %cst : f32 to vector<8x8xf32>
    %3 = arith.maximumf %1, %2 : vector<8x8xf32>
    %4 = math.log %3 : vector<8x8xf32>
    %5 = vector.shape_cast %4 : vector<8x8xf32> to vector<8x1x8xf32>
    %6 = vector.broadcast %5 : vector<8x1x8xf32> to vector<8x8x8xf32>
    %7 = arith.mulf %0, %6 : vector<8x8x8xf32>
    "tpu.trace_start"() <{level = 10 : i32, message = "bij,bkj->bik"}> : () -> ()
    %cst_4 = arith.constant dense<0.000000e+00> : vector<8x8x8xf32>
    %8 = tpu.matmul %7, %0, %cst_4 {dimension_numbers = #tpu.dot_dimension_numbers<[2], [2], [1], [1], [0, 0, 0, 1, 1, 1], [0], [0]>} : vector<8x8x8xf32>, vector<8x8x8xf32>, vector<8x8x8xf32> -> vector<8x8x8xf32>
    "tpu.trace_stop"() : () -> ()
    %c0_5 = arith.constant 0 : index
    %c0_6 = arith.constant 0 : index
    %c0_7 = arith.constant 0 : index
    %9 = vector.load %arg2[%c0_5, %c0_6, %c0_7] : memref<8x8x4xf32, #tpu.memory_space<vmem>>, vector<8x8x4xf32>
    %cst_8 = arith.constant 0.000000e+00 : f32
    %10 = vector.broadcast %cst_8 : f32 to vector<8x4xf32>
    %11 = vector.extract_strided_slice %8 {offsets = [0, 0, 0], sizes = [8, 1, 8], strides = [1, 1, 1]} : vector<8x8x8xf32> to vector<8x1x8xf32>
    %12 = vector.shape_cast %11 : vector<8x1x8xf32> to vector<8x8xf32>
    %13 = vector.extract_strided_slice %9 {offsets = [0, 0, 0], sizes = [1, 8, 4], strides = [1, 1, 1]} : vector<8x8x4xf32> to vector<1x8x4xf32>
    %14 = vector.shape_cast %13 : vector<1x8x4xf32> to vector<8x4xf32>
    %cst_9 = arith.constant dense<0.000000e+00> : vector<8x4xf32>
    %15 = tpu.matmul %12, %14, %cst_9 {dimension_numbers = #tpu.dot_dimension_numbers<[1], [0], [0], [1], [0, 0, 1, 1], [], []>} : vector<8x8xf32>, vector<8x4xf32>, vector<8x4xf32> -> vector<8x4xf32>
    %16 = arith.addf %10, %15 : vector<8x4xf32>
    %17 = vector.extract_strided_slice %8 {offsets = [0, 1, 0], sizes = [8, 1, 8], strides = [1, 1, 1]} : vector<8x8x8xf32> to vector<8x1x8xf32>
    %18 = vector.shape_cast %17 : vector<8x1x8xf32> to vector<8x8xf32>
    %19 = vector.extract_strided_slice %9 {offsets = [1, 0, 0], sizes = [1, 8, 4], strides = [1, 1, 1]} : vector<8x8x4xf32> to vector<1x8x4xf32>
    %20 = vector.shape_cast %19 : vector<1x8x4xf32> to vector<8x4xf32>
    %cst_10 = arith.constant dense<0.000000e+00> : vector<8x4xf32>
    %21 = tpu.matmul %18, %20, %cst_10 {dimension_numbers = #tpu.dot_dimension_numbers<[1], [0], [0], [1], [0, 0, 1, 1], [], []>} : vector<8x8xf32>, vector<8x4xf32>, vector<8x4xf32> -> vector<8x4xf32>
    %22 = arith.addf %16, %21 : vector<8x4xf32>
    %23 = vector.extract_strided_slice %8 {offsets = [0, 2, 0], sizes = [8, 1, 8], strides = [1, 1, 1]} : vector<8x8x8xf32> to vector<8x1x8xf32>
    %24 = vector.shape_cast %23 : vector<8x1x8xf32> to vector<8x8xf32>
    %25 = vector.extract_strided_slice %9 {offsets = [2, 0, 0], sizes = [1, 8, 4], strides = [1, 1, 1]} : vector<8x8x4xf32> to vector<1x8x4xf32>
    %26 = vector.shape_cast %25 : vector<1x8x4xf32> to vector<8x4xf32>
    %cst_11 = arith.constant dense<0.000000e+00> : vector<8x4xf32>
    %27 = tpu.matmul %24, %26, %cst_11 {dimension_numbers = #tpu.dot_dimension_numbers<[1], [0], [0], [1], [0, 0, 1, 1], [], []>} : vector<8x8xf32>, vector<8x4xf32>, vector<8x4xf32> -> vector<8x4xf32>
    %28 = arith.addf %22, %27 : vector<8x4xf32>
    %29 = vector.extract_strided_slice %8 {offsets = [0, 3, 0], sizes = [8, 1, 8], strides = [1, 1, 1]} : vector<8x8x8xf32> to vector<8x1x8xf32>
    %30 = vector.shape_cast %29 : vector<8x1x8xf32> to vector<8x8xf32>
    %31 = vector.extract_strided_slice %9 {offsets = [3, 0, 0], sizes = [1, 8, 4], strides = [1, 1, 1]} : vector<8x8x4xf32> to vector<1x8x4xf32>
    %32 = vector.shape_cast %31 : vector<1x8x4xf32> to vector<8x4xf32>
    %cst_12 = arith.constant dense<0.000000e+00> : vector<8x4xf32>
    %33 = tpu.matmul %30, %32, %cst_12 {dimension_numbers = #tpu.dot_dimension_numbers<[1], [0], [0], [1], [0, 0, 1, 1], [], []>} : vector<8x8xf32>, vector<8x4xf32>, vector<8x4xf32> -> vector<8x4xf32>
    %34 = arith.addf %28, %33 : vector<8x4xf32>
    %35 = vector.extract_strided_slice %8 {offsets = [0, 4, 0], sizes = [8, 1, 8], strides = [1, 1, 1]} : vector<8x8x8xf32> to vector<8x1x8xf32>
    %36 = vector.shape_cast %35 : vector<8x1x8xf32> to vector<8x8xf32>
    %37 = vector.extract_strided_slice %9 {offsets = [4, 0, 0], sizes = [1, 8, 4], strides = [1, 1, 1]} : vector<8x8x4xf32> to vector<1x8x4xf32>
    %38 = vector.shape_cast %37 : vector<1x8x4xf32> to vector<8x4xf32>
    %cst_13 = arith.constant dense<0.000000e+00> : vector<8x4xf32>
    %39 = tpu.matmul %36, %38, %cst_13 {dimension_numbers = #tpu.dot_dimension_numbers<[1], [0], [0], [1], [0, 0, 1, 1], [], []>} : vector<8x8xf32>, vector<8x4xf32>, vector<8x4xf32> -> vector<8x4xf32>
    %40 = arith.addf %34, %39 : vector<8x4xf32>
    %41 = vector.extract_strided_slice %8 {offsets = [0, 5, 0], sizes = [8, 1, 8], strides = [1, 1, 1]} : vector<8x8x8xf32> to vector<8x1x8xf32>
    %42 = vector.shape_cast %41 : vector<8x1x8xf32> to vector<8x8xf32>
    %43 = vector.extract_strided_slice %9 {offsets = [5, 0, 0], sizes = [1, 8, 4], strides = [1, 1, 1]} : vector<8x8x4xf32> to vector<1x8x4xf32>
    %44 = vector.shape_cast %43 : vector<1x8x4xf32> to vector<8x4xf32>
    %cst_14 = arith.constant dense<0.000000e+00> : vector<8x4xf32>
    %45 = tpu.matmul %42, %44, %cst_14 {dimension_numbers = #tpu.dot_dimension_numbers<[1], [0], [0], [1], [0, 0, 1, 1], [], []>} : vector<8x8xf32>, vector<8x4xf32>, vector<8x4xf32> -> vector<8x4xf32>
    %46 = arith.addf %40, %45 : vector<8x4xf32>
    %47 = vector.extract_strided_slice %8 {offsets = [0, 6, 0], sizes = [8, 1, 8], strides = [1, 1, 1]} : vector<8x8x8xf32> to vector<8x1x8xf32>
    %48 = vector.shape_cast %47 : vector<8x1x8xf32> to vector<8x8xf32>
    %49 = vector.extract_strided_slice %9 {offsets = [6, 0, 0], sizes = [1, 8, 4], strides = [1, 1, 1]} : vector<8x8x4xf32> to vector<1x8x4xf32>
    %50 = vector.shape_cast %49 : vector<1x8x4xf32> to vector<8x4xf32>
    %cst_15 = arith.constant dense<0.000000e+00> : vector<8x4xf32>
    %51 = tpu.matmul %48, %50, %cst_15 {dimension_numbers = #tpu.dot_dimension_numbers<[1], [0], [0], [1], [0, 0, 1, 1], [], []>} : vector<8x8xf32>, vector<8x4xf32>, vector<8x4xf32> -> vector<8x4xf32>
    %52 = arith.addf %46, %51 : vector<8x4xf32>
    %53 = vector.extract_strided_slice %8 {offsets = [0, 7, 0], sizes = [8, 1, 8], strides = [1, 1, 1]} : vector<8x8x8xf32> to vector<8x1x8xf32>
    %54 = vector.shape_cast %53 : vector<8x1x8xf32> to vector<8x8xf32>
    %55 = vector.extract_strided_slice %9 {offsets = [7, 0, 0], sizes = [1, 8, 4], strides = [1, 1, 1]} : vector<8x8x4xf32> to vector<1x8x4xf32>
    %56 = vector.shape_cast %55 : vector<1x8x4xf32> to vector<8x4xf32>
    %cst_16 = arith.constant dense<0.000000e+00> : vector<8x4xf32>
    %57 = tpu.matmul %54, %56, %cst_16 {dimension_numbers = #tpu.dot_dimension_numbers<[1], [0], [0], [1], [0, 0, 1, 1], [], []>} : vector<8x8xf32>, vector<8x4xf32>, vector<8x4xf32> -> vector<8x4xf32>
    %58 = arith.addf %52, %57 : vector<8x4xf32>
    %c0_17 = arith.constant 0 : index
    %c0_18 = arith.constant 0 : index
    %59 = vector.load %arg3[%c0_17, %c0_18] : memref<8x4xf32, #tpu.memory_space<vmem>>, vector<8x4xf32>
    tpu.vector_store %arg3[%c0_17, %c0_18], %58 {strides = array<i32>} : memref<8x4xf32, #tpu.memory_space<vmem>>, vector<8x4xf32>,
    return
  }
}

</mosaic_0001>

<bundles_post_ra>
// kernel: custom-call.39
= control target key start
LH: loop header
LB: loop body
LE: loop exit
PB: predicated region body
PF: predicated region fallthrough
CT: control target
= control target key end

     0   :  { %s1672_s30 = smov 0   ;;  %s1674_s10 = smov 0   ;;  %s1981_s0 = inlined_call_operand.vmem [shape: f32[2,8,8], index: 0, kind: input, shape index: {}]   ;;  %s1982_s1 = inlined_call_operand.vmem [shape: f32[2,8,8], index: 1, kind: input, shape index: {}]   ;;  %s1983_s2 = inlined_call_operand.vmem [shape: f32[2,8,8], index: 2, kind: input, shape index: {}]   ;;  %s1984_s3 = inlined_call_operand.vmem [shape: f32[2,8,8], index: 3, kind: input, shape index: {}]   ;;  %s1985_s4 = inlined_call_operand.vmem [shape: f32[2,8], index: 4, kind: output, shape index: {0}]   ;;  %s1986_s5 = inlined_call_operand.vmem [shape: f32[2,8], index: 5, kind: output, shape index: {1}]   ;;  %s1987_s6 = inlined_call_operand.vmem [shape: f32[2,8,8], index: 6, kind: output, shape index: {2}]   ;;  %s1988_s7 = inlined_call_operand.vmem [shape: f32[2,8,8], index: 7, kind: output, shape index: {3}]   ;;  %s1989_s8 = inlined_call_operand.vmem [shape: f32[2,8,8], index: 8, kind: output, shape index: {4}]   ;;  %s1990_s9 = inlined_call_operand.vmem [shape: f32[2,8,8], index: 9, kind: output, shape index: {5}]  }
   0x1   :  { %s1676_s11 = smov 0  }
   0x2 LB: > { %s1688_s12 = sadd.s32 4294967295, %s1609_s11   ;;  %s1691_s13 = sadd.s32 1, %s1609_s11   ;;  %s1609_s11 = sphi %s1676_s11, %s1999_s11   ;;  %s1605_s10 = sphi %s1674_s10, %s1998_s10   ;;  %s1601_s30 = sphi %s1672_s30, %s1997_s30  }
   0x3   : > { %s20_s14 = sshrl.u32 %s1609_s11, 3  ;;  %s21_s15 = sshrl.u32 %s1691_s13, 3 }
   0x4   : > { %s22_s16 = ssub.s32 %s20_s14, %s21_s15  ;;  %s25_s17 = sadd.s32 1, %s1605_s10 }
   0x5   : > { %p23_p0 = scmp.eq.s32.totalorder %s22_s16, 0  ;;  %p35_p1 = scmp.ne.s32.totalorder %s1605_s10, %s1601_s30 }
   0x6   : > { %p36_p2 = scmp.eq.s32.totalorder %s1688_s12, 1  ;;  %p1470_p4 = scmp.ge.s32.totalorder %s1609_s11, 2 }
   0x7   : > { %s1700_s18 = scalar_select %p23_p0, %s1605_s10, %s25_s17  }
   0x8   : > { %p1702_p3 = por %p36_p2, %p35_p1  ;;  %86 = sbr.rel (%p1470_p4) target bundleno = 17 (0x11), region = 16 }
   0x9   : > { %1991 = sst [smem:[#allocation25_spill]] %s1700_s18  ;;  %s88_s20 = sand.u32 (!%p1470_p4), 1, %s1609_s11  }
   0xa   : > { %s1472_s21 = sshll.u32 (!%p1470_p4), %s1609_s11, 3  ;;  %s1471_s22 = sshll.u32 (!%p1470_p4), %s88_s20, 3 }
   0xb   : > { %s92_s25 = scalar_lea.vmem (!%p1470_p4), %s1981_s0, %s1472_s21  ;;  %s90_s26 = scalar_lea.vmem (!%p1470_p4), [#allocation0], %s1471_s22 }
   0xc   : > { %v120_v0 = vld [vmem:[%s92_s25] sm:$0xff] (!%p1470_p4)  ;;  %s130_s29 = scalar_lea.vmem (!%p1470_p4), %s1982_s1, %s1472_s21  ;;  %s168_s16 = scalar_lea.vmem (!%p1470_p4), %s1983_s2, %s1472_s21 }
   0xd   : > { %121 = vst [vmem:[%s90_s26] sm:$0xff] (!%p1470_p4), %v120_v0  ;;  %v158_v1 = vld [vmem:[%s130_s29] sm:$0xff] (!%p1470_p4)  ;;  %s128_s17 = scalar_lea.vmem (!%p1470_p4), [#allocation1], %s1471_s22  ;;  %s206_s23 = scalar_lea.vmem (!%p1470_p4), %s1984_s3, %s1472_s21 }
   0xe   : > { %159 = vst [vmem:[%s128_s17] sm:$0xff] (!%p1470_p4), %v158_v1  ;;  %v196_v2 = vld [vmem:[%s168_s16] sm:$0xff] (!%p1470_p4)  ;;  %s166_s24 = scalar_lea.vmem (!%p1470_p4), [#allocation2], %s1471_s22  ;;  %s204_s25 = scalar_lea.vmem (!%p1470_p4), [#allocation3], %s1471_s22 }
   0xf   : > { %197 = vst [vmem:[%s166_s24] sm:$0xff] %v196_v2  ;;  %v234_v3 = vld [vmem:[%s206_s23] sm:$0xff] }
  0x10   : > { %235 = vst [vmem:[%s204_s25] sm:$0xff] %v234_v3 }
  0x11 PF: > { %p1479_p5 = scmp.ge.s32.totalorder %s1609_s11, 1  ;;  %p240_p6 = scmp.lt.s32.totalorder %s1609_s11, 3 }
  0x13   : > { %p241_p7 = pnand %p1479_p5, %p240_p6 }
  0x15   : > { %244 = sbr.rel (%p241_p7) target bundleno = 992 (0x3e0), region = 156 }
  0x1c   : > { %s247_s26 = sand.u32 1, %s1688_s12   ;;  %s281_s27 = sand.u32 1, %s1601_s30   ;;  %v325_v4 = vlaneseq  ;;  %v1619_v11 = vmov 0.0  }
  0x1d   : > { %s1480_s28 = sshll.u32 %s247_s26, 3  ;;  %s1725_s18 = sshll.u32 %s281_s27, 1 }
  0x1e   : > { %v1727_v5 = vand.u32 127, %v325_v4  ;;  %v1729_v6 = vshrl.u32 %v325_v4, 7  ;;  %s249_s21 = scalar_lea.vmem [#allocation0], %s1480_s28  ;;  %s253_s22 = scalar_lea.vmem [#allocation1], %s1480_s28 }
  0x1f   : > { %v309_v7 = vld [vmem:[%s249_s21] sm:$0xff]  ;;  %v312_v8 = vld [vmem:[%s253_s22] sm:$0xff]  ;;  %s257_s29 = scalar_lea.vmem [#allocation2], %s1480_s28  ;;  %s261_s11 = scalar_lea.vmem [#allocation3], %s1480_s28 }
  0x20   : > { %v315_v9 = vld [vmem:[%s257_s29] sm:$0xff]  ;;  %v318_v10 = vld [vmem:[%s261_s11] sm:$0xff]  ;;  %s1731_s14 = scalar_lea.vmem [#allocation8], %s1480_s28  ;;  %s1734_s30 = scalar_lea.vmem [#allocation9], %s1480_s28  ;;  %v327_v5 = vmov %v1727_v5  ;;  %v330_v6 = vmov %v1729_v6  ;;  %vm1359_vm2 = vcmp.lt.s32.totalorder %v1727_v5, 8 }
  0x21   : > { %320 = vst [vmem:[%s1731_s14] sm:$0xff] %v1619_v11  ;;  %321 = vst [vmem:[%s1734_s30] sm:$0xff] %v1619_v11  ;;  %s308_s15 = smov [#allocation12]  ;;  %s311_s16 = smov [#allocation13]  ;;  %v340_v5 = vmov %v1727_v5  ;;  %v343_v6 = vmov %v1729_v6  ;;  %vm334_vm0 = vcmp.eq.s32.totalorder %v330_v6, %v327_v5 }
  0x22   : > { %s1737_s17 = scalar_lea.vmem [#allocation10], %s1480_s28  ;;  %s1740_s20 = scalar_lea.vmem [#allocation11], %s1480_s28  ;;  %310 = vst [vmem:[%s308_s15] sm:$0xff] %v309_v7  ;;  %313 = vst [vmem:[%s311_s16] sm:$0xff] %v312_v8  ;;  %vm347_vm1 = vcmp.eq.s32.totalorder %v343_v6, %v340_v5  ;;  %v1351_v5 = vmov %v1727_v5  ;;  %v1354_v6 = vmov %v1729_v6 }
  0x23   : > { %322 = vst [vmem:[%s1737_s17] sm:$0xff] %v1619_v11  ;;  %323 = vst [vmem:[%s1740_s20] sm:$0xff] %v1619_v11  ;;  %s314_s23 = smov [#allocation14]  ;;  %s317_s24 = smov [#allocation15]  ;;  %vm1364_vm3 = vcmp.eq.s32.totalorder %v1354_v6, %v1351_v5  ;;  %v1402_v5 = vmov %v1727_v5  ;;  %v1371_v6 = vmov %v1729_v6 }
  0x24   : > { %316 = vst [vmem:[%s314_s23] sm:$0xff] %v315_v9  ;;  %319 = vst [vmem:[%s317_s24] sm:$0xff] %v318_v10  ;;  %s324_s14 = smov %s1731_s14  ;;  %s337_s20 = smov %s1740_s20  ;;  %v1368_v5 = vmov %v1727_v5  ;;  %v1405_v6 = vmov %v1729_v6 }
  0x25   : > { %s283_s25 = scalar_lea.vmem [#allocation5], %s1725_s18  ;;  %s1355_s27 = smov [#allocation12]  ;;  %v1385_v5 = vmov %v1727_v5  ;;  %v1388_v6 = vmov %v1729_v6  ;;  %vm1415_vm4 = vcmp.eq.s32.totalorder %v1405_v6, %v1402_v5 }
  0x26   : > { %s1372_s28 = smov [#allocation13]  ;;  %s1389_s21 = smov [#allocation14] }
  0x27   : > { %s1406_s22 = smov [#allocation15] }
  0x28   : > { %v331_v12 = vld [vmem:[%s324_s14] sm:$0xff] }
  0x29   : > { %v335_v13 = vsel %vm334_vm0, 1.0, %v331_v12  ;;  %v1361_v16 = vld [vmem:[%s1355_s27] sm:$0xff] }
  0x2a   : > { %v344_v14 = vld [vmem:[%s337_s20] sm:$0xff]  ;;  %336 = vst [vmem:[%s324_s14] sm:$0xff] %v335_v13  ;;  %v1362_v18 = vsel %vm1359_vm2, %v1361_v16, 0.0 }
  0x2b   : > { %v348_v15 = vsel %vm347_vm1, 1.0, %v344_v14  ;;  %v1378_v17 = vld [vmem:[%s1372_s28] sm:$0xff]  ;;  %v1363_v22 = vmul.f32 %v1362_v18, %v1362_v18 }
  0x2c   : > { %349 = vst [vmem:[%s337_s20] sm:$0xff] %v348_v15  ;;  %v1379_v19 = vsel %vm1359_vm2, %v1378_v17, 0.0  ;;  %v1395_v20 = vld [vmem:[%s1389_s21] sm:$0xff] }
  0x2d   : > { %v1412_v21 = vld [vmem:[%s1406_s22] sm:$0xff]  ;;  %v1380_v23 = vmul.f32 %v1379_v19, %v1379_v19  ;;  %v1396_v24 = vsel %vm1359_vm2, %v1395_v20, 0.0  ;;  %v1365_v29 = vsel %vm1364_vm3, 0.0, %v1363_v22 }
  0x2e   : > { %v1413_v25 = vsel %vm1359_vm2, %v1412_v21, 0.0  ;;  %v1397_v26 = vmul.f32 %v1396_v24, %v1396_v24 }
  0x2f   : > { %v1382_v27 = vadd.f32 %v1380_v23, %v1363_v22  ;;  %v1414_v28 = vmul.f32 %v1413_v25, %v1413_v25  ;;  %v1381_v30 = vadd.f32 %v1380_v23, %v1365_v29 }
  0x31   : > { %v1399_v31 = vadd.f32 %v1397_v26, %v1382_v27  ;;  %v1398_v32 = vadd.f32 %v1397_v26, %v1381_v30  ;;  %v1416_v33 = vsel %vm1415_vm4, 0.0, %v1414_v28 }
  0x33   : > { %v1418_v34 = vadd.f32 %v1414_v28, %v1399_v31  ;;  %v1417_v35 = vadd.f32 %v1416_v33, %v1398_v32 }
  0x35   : > { %1419 = vadd.xlane.f32.xlu0 %v1418_v34 }
  0x39   : > { %1427 = vadd.xlane.f32.xlu0 %v1417_v35 }
  0xc2   : > { %v1420_v36 = vpop.xlane.xlu0 %1419 }
  0xc3   : > { %v1421_v37 = vrot.slane %v1420_v36, 4 }
  0xc5   : > { %v1422_v38 = vadd.f32 %v1421_v37, %v1420_v36 }
  0xc6   : > { %v1428_v39 = vpop.xlane.xlu0 %1427 }
  0xc7   : > { %v1423_v40 = vrot.slane %v1422_v38, 2  ;;  %v1429_v41 = vrot.slane %v1428_v39, 4 }
  0xc9   : > { %v1430_v42 = vadd.f32 %v1429_v41, %v1428_v39  ;;  %v1424_v43 = vadd.f32 %v1423_v40, %v1422_v38 }
  0xcb   : > { %v1431_v44 = vrot.slane %v1430_v42, 2  ;;  %v1425_v46 = vrot.slane %v1424_v43, 1 }
  0xcd   : > { %v1432_v45 = vadd.f32 %v1431_v44, %v1430_v42  ;;  %v1426_v49 = vadd.f32 %v1425_v46, %v1424_v43 }
  0xcf   : > { %v1433_v47 = vrot.slane %v1432_v45, 1 }
  0xd1   : > { %v1434_v48 = vadd.f32 %v1433_v47, %v1432_v45 }
  0xd3   : > { %1520 = vpush %v1434_v48 }
  0xd4   : > { %1522 = vpush %v1426_v49 }
 0x104   : > { %s1521_s29 = spop %1520 }
 0x105   : > { %s1523_s11 = spop %1522 }
 0x106   : > { %s1437_s15 = smul.f32 1e-10, %s1523_s11 }
 0x108   : > { %p1438_p8 = scmp.le.f32.partialorder %s1521_s29, %s1437_s15 }
 0x109   : > { %s1769_s16 = smov (!%p1438_p8), 0  }
 0x10a   : > { %1441 = sbr.rel (%p1438_p8) target bundleno = 948 (0x3b4), region = 499 }
 0x111 LB: >> { %s1774_s23 = smov 0   ;;  %s1613_s16 = sphi %s1769_s16, %s1993_s16  }
 0x112 LB: >>> { %s454_s24 = smov [#allocation12]  ;;  %v458_v5 = vmov %v1727_v5  ;;  %v461_v6 = vmov %v1729_v6  ;;  %s474_s27 = smov [#allocation13]  ;;  %vm777_vm14 = vcmp.eq.s32.totalorder %v1729_v6, 0  ;;  %vm789_vm15 = vcmp.eq.s32.totalorder %v1729_v6, 7  ;;  %s1617_s23 = sphi %s1774_s23, %s453_s23  }
 0x113   : >>> { %v478_v5 = vmov %v1727_v5  ;;  %v481_v6 = vmov %v1729_v6  ;;  %v462_v50 = vld [vmem:[%s454_s24] sm:$0xff]  ;;  %vm465_vm5 = vcmp.eq.s32.totalorder %v461_v6, %v458_v5  ;;  %s494_s28 = smov [#allocation15]  ;;  %s455_s21 = smov [#allocation16] }
 0x114   : >>> { %vm485_vm6 = vcmp.eq.s32.totalorder %v481_v6, %v478_v5  ;;  %v498_v5 = vmov %v1727_v5  ;;  %v501_v6 = vmov %v1729_v6  ;;  %v466_v51 = vsel %vm465_vm5, %v462_v50, 0.0  ;;  %v482_v52 = vld [vmem:[%s474_s27] sm:$0xff]  ;;  %s475_s22 = smov [#allocation17]  ;;  %s495_s29 = smov [#allocation18] }
 0x115   : >>> { %vm505_vm7 = vcmp.eq.s32.totalorder %v501_v6, %v498_v5  ;;  %v467_v53 = vrot.slane %v466_v51, 4  ;;  %v486_v54 = vsel %vm485_vm6, %v482_v52, 0.0  ;;  %v502_v55 = vld [vmem:[%s494_s28] sm:$0xff]  ;;  %s518_s11 = smov [#allocation17]  ;;  %s516_s15 = smov [#allocation16]  ;;  %v567_v5 = vmov %v1727_v5 }
 0x116   : >>> { %v487_v56 = vrot.slane %v486_v54, 4  ;;  %v506_v57 = vsel %vm505_vm7, %v502_v55, 0.0  ;;  %s520_s24 = smov [#allocation18]  ;;  %s555_s27 = smov [#allocation19]  ;;  %v570_v6 = vmov %v1729_v6  ;;  %v582_v5 = vmov %v1727_v5 }
 0x117   : >>> { %v468_v58 = vadd.f32 %v467_v53, %v466_v51  ;;  %v507_v59 = vrot.slane %v506_v57, 4  ;;  %s557_s28 = smov [#allocation20]  ;;  %v585_v6 = vmov %v1729_v6  ;;  %vm572_vm12 = vcmp.eq.s32.totalorder %v570_v6, %v567_v5  ;;  %s1796_s14 = smov %s1731_s14 }
 0x118   : >>> { %v488_v60 = vadd.f32 %v487_v56, %v486_v54  ;;  %vm587_vm13 = vcmp.eq.s32.totalorder %v585_v6, %v582_v5  ;;  %s1799_s30 = smov %s1734_s30  ;;  %s1802_s17 = smov %s1737_s17  ;;  %v825_v52 = vld [vmem:[%s1796_s14] sm:$0xff]  ;;  %v680_v5 = vmov %v1727_v5  ;;  %v683_v6 = vmov %v1729_v6 }
 0x119   : >>> { %v469_v61 = vrot.slane %v468_v58, 2  ;;  %v508_v62 = vadd.f32 %v507_v59, %v506_v57  ;;  %s1806_s20 = smov %s1740_s20  ;;  %v826_v53 = vld [vmem:[%s1799_s30] sm:$0xff]  ;;  %s819_s26 = smov [#allocation24]  ;;  %v653_v5 = vmov %v1727_v5  ;;  %v656_v6 = vmov %v1729_v6 }
 0x11a   : >>> { %v489_v63 = vrot.slane %v488_v60, 2  ;;  %v827_v56 = vld [vmem:[%s1802_s17] sm:$0xff]  ;;  %v694_v5 = vmov %v1727_v5  ;;  %v697_v6 = vmov %v1729_v6  ;;  %vm687_vm0 = vcmp.eq.s32.totalorder %v683_v6, %v680_v5  ;;  %s453_s23 = sadd.s32 1, %s1617_s23  }
 0x11b   : >>> { %v470_v0 = vadd.f32 %v469_v61, %v468_v58  ;;  %v509_v1 = vrot.slane %v508_v62, 2  ;;  %v828_v57 = vld [vmem:[%s1806_s20] sm:$0xff]  ;;  %v667_v5 = vmov %v1727_v5  ;;  %v670_v6 = vmov %v1729_v6  ;;  %p450_p9 = scmp.ge.s32.totalorder %s453_s23, 15  }
 0x11c   : >>> { %v490_v2 = vadd.f32 %v489_v63, %v488_v60  ;;  %vm661_vm1 = vcmp.eq.s32.totalorder %v656_v6, %v653_v5  ;;  %vm702_vm3 = vcmp.eq.s32.totalorder %v697_v6, %v694_v5  ;;  %vm674_vm4 = vcmp.eq.s32.totalorder %v670_v6, %v667_v5 }
 0x11d   : >>> { %v471_v3 = vrot.slane %v470_v0, 1  ;;  %v510_v4 = vadd.f32 %v509_v1, %v508_v62  ;;  %vm716_vm5 = vcmp.eq.s32.totalorder %v1727_v5, 0  ;;  %vm720_vm6 = vcmp.eq.s32.totalorder %v1727_v5, 1 }
 0x11e   : >>> { %v491_v7 = vrot.slane %v490_v2, 1  ;;  %vm733_vm7 = vcmp.eq.s32.totalorder %v1727_v5, 7  ;;  %v354_v5 = vmov (%p450_p9), %v1727_v5  ;;  %v357_v6 = vmov (%p450_p9), %v1729_v6 }
 0x11f   : >>> { %v472_v8 = vadd.f32 %v471_v3, %v470_v0  ;;  %v511_v9 = vrot.slane %v510_v4, 1  ;;  %v407_v5 = vmov (%p450_p9), %v1727_v5 }
 0x120   : >>> { %v492_v10 = vadd.f32 %v491_v7, %v490_v2 }
 0x121   : >>> { %473 = vst [vmem:[%s455_s21] sm:$0x1] %v472_v8  ;;  %v512_v11 = vadd.f32 %v511_v9, %v510_v4  ;;  %s514_s21 = smov [#allocation21] }
 0x122   : >>> { %493 = vst [vmem:[%s475_s22] sm:$0x1] %v492_v10  ;;  %s515_s22 = smov [#allocation22]  ;;  %s559_s21 = smov %s514_s21 }
 0x123   : >>> { %513 = vst [vmem:[%s495_s29] sm:$0x1] %v512_v11  ;;  %s561_s22 = smov %s515_s22  ;;  %s563_s29 = smov [#allocation21] }
 0x128   : >>> { %v517_v14 = vld [vmem:[%s516_s15] sm:$0xff]  ;;  %s576_s15 = smov [#allocation23] }
 0x129   : >>> { %v519_v12 = vld [vmem:[%s518_s11] sm:$0xff]  ;;  %v540_v27 = vand.u32 2147483647, %v517_v14  ;;  %s578_s11 = smov [#allocation22] }
 0x12a   : >>> { %v523_v13 = vmul.f32 2.0, %v519_v12  ;;  %v521_v15 = vld [vmem:[%s520_s24] sm:$0xff]  ;;  %v541_v32 = vand.u32 2147483647, %v519_v12  ;;  %s593_s24 = smov [#allocation23] }
 0x12b   : >>> { %v522_v16 = vsub.f32 %v521_v15, %v517_v14  ;;  %v542_v28 = vand.u32 2147483647, %v521_v15 }
 0x12c   : >>> { %1571 = vrcp.f32 %v523_v13 }
 0x12d   : >>> { %v543_v31 = vmin.f32 %v540_v27, %v542_v28 }
 0x12f   : >>> { %v544_v33 = vmul.f32 1.1920929e-08, %v543_v31 }
 0x131   : >>> { %vm545_vm11 = vcmp.le.f32.partialorder %v541_v32, %v544_v33 }
 0x136   : >>> { %v1572_v17 = vpop.eup %1571 }
 0x137   : >>> { %v525_v18 = vmul.f32 %v1572_v17, %v522_v16 }
 0x139   : >>> { %v527_v19 = vmul.f32 %v525_v18, %v525_v18  ;;  %vm526_vm10 = vcmp.ge.f32.partialorder %v525_v18, 0.0 }
 0x13b   : >>> { %v528_v20 = vadd.f32 1.0, %v527_v19 }
 0x13d   : >>> { %1573 = vrsqrt.f32 %v528_v20  ;;  %vm531_vm8 = vcmp.eq.f32.partialorder %v528_v20, inf  ;;  %v534_v22 = vand.u32 2147483648, %v528_v20  ;;  %vm533_vm9 = vcmp.eq.f32.partialorder %v528_v20, 0.0 }
 0x147   : >>> { %v1574_v21 = vpop.eup %1573 }
 0x148   : >>> { %v530_v23 = vmul.f32 %v1574_v21, %v528_v20 }
 0x14a   : >>> { %v532_v24 = vsel %vm531_vm8, %v528_v20, %v530_v23  ;;  %vm369_vm8 = vcmp.eq.s32.totalorder (%p450_p9), %v357_v6, %v354_v5  ;;  %v410_v6 = vmov (%p450_p9), %v1729_v6  ;;  %v373_v5 = vmov (%p450_p9), %v1727_v5 }
 0x14b   : >>> { %v535_v25 = vsel %vm533_vm9, %v534_v22, %v532_v24  ;;  %v376_v6 = vmov (%p450_p9), %v1729_v6  ;;  %v390_v5 = vmov (%p450_p9), %v1727_v5  ;;  %vm422_vm9 = vcmp.eq.s32.totalorder (%p450_p9), %v410_v6, %v407_v5 }
 0x14c   : >>> { %v536_v26 = vxor.u32 2147483648, %v535_v25  ;;  %v393_v6 = vmov (%p450_p9), %v1729_v6 }
 0x14e   : >>> { %v537_v29 = vsel %vm526_vm10, %v535_v25, %v536_v26 }
 0x14f   : >>> { %v538_v30 = vadd.f32 %v537_v29, %v525_v18 }
 0x151   : >>> { %1575 = vrcp.f32 %v538_v30 }
 0x15b   : >>> { %v1576_v34 = vpop.eup %1575 }
 0x15c   : >>> { %v546_v35 = vsel %vm545_vm11, 0.0, %v1576_v34 }
 0x15d   : >>> { %v547_v36 = vmul.f32 %v546_v35, %v546_v35  ;;  %v551_v37 = vmul.f32 %v546_v35, %v519_v12 }
 0x15f   : >>> { %v548_v38 = vadd.f32 1.0, %v547_v36  ;;  %v552_v39 = vsub.f32 %v517_v14, %v551_v37  ;;  %v554_v40 = vadd.f32 %v551_v37, %v521_v15 }
 0x161   : >>> { %1577 = vrsqrt.f32 %v548_v38  ;;  %556 = vst [vmem:[%s555_s27] sm:$0xff] %v552_v39  ;;  %558 = vst [vmem:[%s557_s28] sm:$0xff] %v554_v40  ;;  %s1789_s27 = smov [#allocation12]  ;;  %s591_s28 = smov [#allocation24] }
 0x162   : >>> { %v601_v49 = vld [vmem:[%s1789_s27] sm:$0xff] }
 0x16b   : >>> { %v1578_v41 = vpop.eup %1577 }
 0x16c   : >>> { %560 = vst [vmem:[%s559_s21] sm:$0xff] %v1578_v41  ;;  %v550_v42 = vmul.f32 %v1578_v41, %v546_v35  ;;  %s1791_s21 = smov [#allocation13] }
 0x16d   : >>> { %v602_v50 = vld [vmem:[%s1791_s21] sm:$0xff] }
 0x16e   : >>> { %562 = vst [vmem:[%s561_s22] sm:$0xff] %v550_v42  ;;  %s1793_s22 = smov [#allocation15] }
 0x16f   : >>> { %v604_v51 = vld [vmem:[%s1793_s22] sm:$0xff] }
 0x173   : >>> { %v564_v43 = vld [vmem:[%s563_s29] ss:$0 sm:$0xff]  ;;  %s817_s29 = smov [#allocation23] }
 0x174   : >>> { %v573_v44 = vsel %vm572_vm12, %v564_v43, 0.0 }
 0x175   : >>> { %574 = vadd.xlane.f32.xlu0 %v573_v44  ;;  %v579_v45 = vld [vmem:[%s578_s11] ss:$0 sm:$0xff]  ;;  %s1808_s11 = smov [#allocation14] }
 0x176   : >>> { %v588_v46 = vsel %vm587_vm13, %v579_v45, 0.0  ;;  %v603_v58 = vld [vmem:[%s1808_s11] sm:$0xff] }
 0x179   : >>> { %589 = vadd.xlane.f32.xlu0 %v588_v46 }
 0x202   : >>> { %v575_v47 = vpop.xlane.xlu0 %574 }
 0x203   : >>> { %577 = vst [vmem:[%s576_s15] sm:$0xff] %v575_v47  ;;  %s595_s15 = smov [#allocation24] }
 0x206   : >>> { %v590_v48 = vpop.xlane.xlu0 %589 }
 0x207   : >>> { %592 = vst [vmem:[%s591_s28] sm:$0xff] %v590_v48  ;;  %s1835_s28 = smov [#allocation14] }
 0x20a   : >>> { %v594_v54 = vld [vmem:[%s593_s24] sm:$0xff]  ;;  %s623_s24 = smov [#allocation22] }
 0x20b   : >>> { %v818_v55 = vld [vmem:[%s817_s29] sm:$0xff]  ;;  %v605_v59 = vmul.f32 %v601_v49, %v594_v54  ;;  %v608_v60 = vmul.f32 %v602_v50, %v594_v54  ;;  %v615_v61 = vmul.f32 %v604_v51, %v594_v54  ;;  %v612_v4 = vmul.f32 %v603_v58, %v594_v54  ;;  %s650_s29 = smov [#allocation19] }
 0x20c   : >>> { %v829_v62 = vmul.f32 %v825_v52, %v818_v55  ;;  %v832_v63 = vmul.f32 %v826_v53, %v818_v55  ;;  %v836_v0 = vmul.f32 %v827_v56, %v818_v55  ;;  %v839_v1 = vmul.f32 %v828_v57, %v818_v55  ;;  %v624_v24 = vld [vmem:[%s623_s24] ss:$0 sm:$0xff]  ;;  %s690_s24 = smov [#allocation15] }
 0x20d   : >>> { %v657_v55 = vld [vmem:[%s650_s29] ss:$0 sm:$0xff]  ;;  %s706_s29 = smov [#allocation13] }
 0x20e   : >>> { %v596_v2 = vld [vmem:[%s595_s15] sm:$0xff]  ;;  %s677_s15 = smov [#allocation14] }
 0x20f   : >>> { %v820_v3 = vld [vmem:[%s819_s26] sm:$0xff]  ;;  %v609_v7 = vmul.f32 %v604_v51, %v596_v2  ;;  %v611_v8 = vmul.f32 %v601_v49, %v596_v2  ;;  %v614_v9 = vmul.f32 %v602_v50, %v596_v2  ;;  %v606_v14 = vmul.f32 %v603_v58, %v596_v2  ;;  %s621_s26 = smov [#allocation21] }
 0x210   : >>> { %v830_v10 = vmul.f32 %v827_v56, %v820_v3  ;;  %v833_v11 = vmul.f32 %v828_v57, %v820_v3  ;;  %v835_v12 = vmul.f32 %v825_v52, %v820_v3  ;;  %v838_v13 = vmul.f32 %v826_v53, %v820_v3  ;;  %v622_v23 = vld [vmem:[%s621_s26] ss:$0 sm:$0xff]  ;;  %s649_s26 = smov [#allocation12] }
 0x211   : >>> { %v610_v15 = vsub.f32 %v608_v60, %v609_v7  ;;  %v616_v16 = vadd.f32 %v615_v61, %v614_v9  ;;  %v613_v18 = vadd.f32 %v612_v4, %v611_v8  ;;  %v607_v22 = vsub.f32 %v605_v59, %v606_v14 }
 0x212   : >>> { %v831_v17 = vsub.f32 %v829_v62, %v830_v10  ;;  %v834_v19 = vsub.f32 %v832_v63, %v833_v11  ;;  %v837_v20 = vadd.f32 %v836_v0, %v835_v12  ;;  %v840_v21 = vadd.f32 %v839_v1, %v838_v13 }
 0x213   : >>> { %618 = vst [vmem:[%s1791_s21] sm:$0xff] %v610_v15  ;;  %620 = vst [vmem:[%s1793_s22] sm:$0xff] %v616_v16  ;;  %s1837_s21 = smov [#allocation15]  ;;  %s1841_s22 = smov [#allocation13] }
 0x214   : >>> { %841 = vst [vmem:[%s1796_s14] sm:$0xff] %v831_v17  ;;  %619 = vst [vmem:[%s1808_s11] sm:$0xff] %v613_v18  ;;  %s845_s14 = smov %s1731_s14  ;;  %s691_s11 = smov [#allocation20] }
 0x215   : >>> { %842 = vst [vmem:[%s1799_s30] sm:$0xff] %v834_v19  ;;  %843 = vst [vmem:[%s1802_s17] sm:$0xff] %v837_v20  ;;  %s846_s17 = smov %s1737_s17  ;;  %s1828_s30 = smov %s1734_s30  ;;  %v698_v56 = vld [vmem:[%s691_s11] ss:$0 sm:$0xff] }
 0x216   : >>> { %844 = vst [vmem:[%s1806_s20] sm:$0xff] %v840_v21  ;;  %617 = vst [vmem:[%s1789_s27] sm:$0xff] %v607_v22  ;;  %s1831_s20 = smov %s1740_s20  ;;  %s1839_s27 = smov [#allocation12] }
 0x217   : >>> { %s1621_s11 = smov 127  }
 0x21a   : >>> { %v632_v39 = vld [vmem:[%s1837_s21] sm:$0xff] }
 0x21b   : >>> { %v847_v25 = vld [vmem:[%s845_s14] ss:$0 sm:$0xff]  ;;  %v1499_v27 = vld [vmem:[%s845_s14 + $0x7] ss:$0 sm:$0xff]  ;;  %v640_v42 = vmul.f32 %v632_v39, %v624_v24  ;;  %v643_v46 = vmul.f32 %v632_v39, %v622_v23 }
 0x21c   : >>> { %v1498_v26 = vld [vmem:[%s845_s14 - $0x1] sm:$0xfe]  ;;  %v1503_v34 = vld [vmem:[%s1828_s30 + $0x7] ss:$0 sm:$0xff] }
 0x21d   : >>> { %v854_v28 = vsel %vm777_vm14, %v847_v25, %v1498_v26  ;;  %v858_v29 = vld [vmem:[%s846_s17] ss:$0 sm:$0xff]  ;;  %v1501_v30 = vld [vmem:[%s846_s17 + $0x1] sm:$0x7f] }
 0x21e   : >>> { %v871_v31 = vld [vmem:[%s1828_s30] ss:$0 sm:$0xff]  ;;  %857 = vst [vmem:[%s845_s14] sm:$0xff] %v854_v28  ;;  %v866_v32 = vsel %vm789_vm15, %v1499_v27, %v1501_v30  ;;  %v1505_v37 = vld [vmem:[%s1831_s20 + $0x1] sm:$0x7f] }
 0x21f   : >>> { %v1502_v33 = vld [vmem:[%s1828_s30 - $0x1] sm:$0xfe]  ;;  %1500 = vst [vmem:[%s845_s14 + $0x1] sm:$0x1] %v858_v29  ;;  %868 = vst [vmem:[%s846_s17] sm:$0xff] %v866_v32  ;;  %v890_v40 = vsel %vm789_vm15, %v1503_v34, %v1505_v37 }
 0x220   : >>> { %v882_v35 = vld [vmem:[%s1831_s20] ss:$0 sm:$0xff]  ;;  %v878_v36 = vsel %vm777_vm14, %v871_v31, %v1502_v33 }
 0x221   : >>> { %v631_v38 = vld [vmem:[%s1835_s28] sm:$0xff]  ;;  %881 = vst [vmem:[%s1828_s30] sm:$0xff] %v878_v36  ;;  %892 = vst [vmem:[%s1831_s20] sm:$0xff] %v890_v40 }
 0x222   : >>> { %v639_v41 = vmul.f32 %v631_v38, %v622_v23  ;;  %v642_v43 = vmul.f32 %v631_v38, %v624_v24  ;;  %v629_v44 = vld [vmem:[%s1839_s27] sm:$0xff]  ;;  %1504 = vst [vmem:[%s1828_s30 + $0x1] sm:$0x1] %v882_v35 }
 0x223   : >>> { %v630_v45 = vld [vmem:[%s1841_s22] sm:$0xff]  ;;  %v633_v47 = vmul.f32 %v629_v44, %v622_v23  ;;  %v636_v49 = vmul.f32 %v629_v44, %v624_v24 }
 0x224   : >>> { %v634_v48 = vmul.f32 %v630_v45, %v624_v24  ;;  %v641_v50 = vsub.f32 %v639_v41, %v640_v42  ;;  %v637_v51 = vmul.f32 %v630_v45, %v622_v23  ;;  %v644_v52 = vadd.f32 %v643_v46, %v642_v43 }
 0x226   : >>> { %v635_v53 = vsub.f32 %v633_v47, %v634_v48  ;;  %647 = vst [vmem:[%s1835_s28] sm:$0xff] %v641_v50  ;;  %v638_v54 = vadd.f32 %v637_v51, %v636_v49  ;;  %648 = vst [vmem:[%s1837_s21] sm:$0xff] %v644_v52  ;;  %s664_s28 = smov [#allocation13]  ;;  %s1875_s21 = smov [#allocation14] }
 0x228   : >>> { %645 = vst [vmem:[%s1839_s27] sm:$0xff] %v635_v53  ;;  %646 = vst [vmem:[%s1841_s22] sm:$0xff] %v638_v54  ;;  %s705_s27 = smov [#allocation12]  ;;  %s1620_s22 = smov 1  }
 0x22d   : >>> { %v684_v57 = vld [vmem:[%s677_s15] sm:$0xff] }
 0x22e   : >>> { %v688_v58 = vsel %vm687_vm0, 0.0, %v684_v57  ;;  %v699_v60 = vld [vmem:[%s690_s24] sm:$0xff] }
 0x22f   : >>> { %v658_v59 = vld [vmem:[%s649_s26] sm:$0xff]  ;;  %689 = vst [vmem:[%s677_s15] sm:$0xff] %v688_v58  ;;  %v703_v63 = vsel %vm702_vm3, %v698_v56, %v699_v60  ;;  %s1878_s15 = smov [#allocation15] }
 0x230   : >>> { %v662_v61 = vsel %vm661_vm1, %v657_v55, %v658_v59  ;;  %v671_v62 = vld [vmem:[%s664_s28] sm:$0xff]  ;;  %704 = vst [vmem:[%s690_s24] sm:$0xff] %v703_v63  ;;  %s793_s24 = smov [#allocation13] }
 0x231   : >>> { %663 = vst [vmem:[%s649_s26] sm:$0xff] %v662_v61  ;;  %v675_v0 = vsel %vm674_vm4, 0.0, %v671_v62  ;;  %s769_s26 = smov [#allocation12] }
 0x232   : >>> { %676 = vst [vmem:[%s664_s28] sm:$0xff] %v675_v0  ;;  %s770_s28 = smov [#allocation14] }
 0x236   : >>> { %v743_v1 = vld [vmem:[%s1875_s21] sm:$0xff] }
 0x237   : >>> { %744 = vrot.lane.b32.xlu0 %v743_v1, %s1620_s22  ;;  %v739_v4 = vld [vmem:[%s1878_s15] sm:$0xff] }
 0x238   : >>> { %v711_v2 = vld [vmem:[%s705_s27] sm:$0xff] }
 0x239   : >>> { %712 = vrot.lane.b32.xlu1 %v711_v2, %s1620_s22  ;;  %v707_v3 = vld [vmem:[%s706_s29] sm:$0xff] }
 0x23d   : >>> { %708 = vrot.lane.b32.xlu1 %v707_v3, %s1620_s22 }
 0x241   : >>> { %729 = vrot.lane.b32.xlu1 %v707_v3, %s1621_s11 }
 0x245   : >>> { %740 = vrot.lane.b32.xlu1 %v739_v4, %s1620_s22  ;;  %s358_s22 = smov (%p450_p9), [#allocation12] }
 0x249   : >>> { %761 = vrot.lane.b32.xlu1 %v739_v4, %s1621_s11  ;;  %s394_s11 = smov (%p450_p9), [#allocation14] }
 0x2a9   : >>> { %v745_v13 = vpop.permute.xlu0 %744 }
 0x2aa   : >>> { %v749_v15 = vsel %vm716_vm5, %v743_v1, %v745_v13 }
 0x2ab   : >>> { %v713_v7 = vpop.permute.xlu1 %712 }
 0x2ac   : >>> { %v717_v8 = vsel %vm716_vm5, %v711_v2, %v713_v7 }
 0x2af   : >>> { %v709_v9 = vpop.permute.xlu1 %708 }
 0x2b0   : >>> { %v721_v10 = vsel %vm720_vm6, %v709_v9, %v717_v8 }
 0x2b1   : >>> { %v727_v11 = vsel %vm1359_vm2, %v721_v10, 0.0 }
 0x2b2   : >>> { %735 = vst [vmem:[%s705_s27] sm:$0xff] %v727_v11  ;;  %s794_s27 = smov [#allocation15] }
 0x2b3   : >>> { %v730_v12 = vpop.permute.xlu1 %729 }
 0x2b4   : >>> { %v734_v14 = vsel %vm733_vm7, %v711_v2, %v730_v12 }
 0x2b5   : >>> { %736 = vst [vmem:[%s706_s29] sm:$0xff] %v734_v14  ;;  %s377_s29 = smov (%p450_p9), [#allocation13] }
 0x2b7   : >>> { %v741_v16 = vpop.permute.xlu1 %740 }
 0x2b8   : >>> { %v753_v17 = vsel %vm720_vm6, %v741_v16, %v749_v15 }
 0x2b9   : >>> { %v771_v18 = vld [vmem:[%s769_s26] ss:$0 sm:$0xff]  ;;  %v1491_v20 = vld [vmem:[%s769_s26 + $0x7] ss:$0 sm:$0xff]  ;;  %v759_v22 = vsel %vm1359_vm2, %v753_v17, 0.0 }
 0x2ba   : >>> { %v1490_v19 = vld [vmem:[%s769_s26 - $0x1] sm:$0xfe]  ;;  %767 = vst [vmem:[%s1875_s21] sm:$0xff] %v759_v22  ;;  %s893_s21 = sadd.s32 (%p450_p9), 1, %s1613_s16  }
 0x2bb   : >>> { %v778_v21 = vsel %vm777_vm14, %v771_v18, %v1490_v19  ;;  %v762_v23 = vpop.permute.xlu1 %761  ;;  %p446_p10 = scmp.ge.s32.totalorder (%p450_p9), %s893_s21, 15  ;;  %s1993_s16 = smov (%p450_p9), %s893_s21 }
 0x2bc   : >>> { %781 = vst [vmem:[%s769_s26] sm:$0xff] %v778_v21  ;;  %v795_v24 = vld [vmem:[%s793_s24] ss:$0 sm:$0xff]  ;;  %v1495_v26 = vld [vmem:[%s793_s24 + $0x7] ss:$0 sm:$0xff]  ;;  %v766_v27 = vsel %vm733_vm7, %v743_v1, %v762_v23 }
 0x2bd   : >>> { %v1494_v25 = vld [vmem:[%s793_s24 - $0x1] sm:$0xfe]  ;;  %768 = vst [vmem:[%s1878_s15] sm:$0xff] %v766_v27  ;;  %s411_s15 = smov (%p450_p9), [#allocation15] }
 0x2be   : >>> { %v802_v28 = vsel %vm777_vm14, %v795_v24, %v1494_v25 }
 0x2bf   : >>> { %805 = vst [vmem:[%s793_s24] sm:$0xff] %v802_v28 }
 0x2c1   : >>> { %v782_v29 = vld [vmem:[%s770_s28] ss:$0 sm:$0xff]  ;;  %v1493_v30 = vld [vmem:[%s770_s28 + $0x1] sm:$0x7f] }
 0x2c2   : >>> { %1492 = vst [vmem:[%s769_s26 + $0x1] sm:$0x1] %v782_v29  ;;  %v790_v31 = vsel %vm789_vm15, %v1491_v20, %v1493_v30  ;;  %452 = sbr.rel (!%p450_p9) target bundleno = 274 (0x112), region = 494 }
 0x2c3   : >>> { %792 = vst [vmem:[%s770_s28] sm:$0xff] %v790_v31 }
 0x2c4   : >>> { %v806_v32 = vld [vmem:[%s794_s27] ss:$0 sm:$0xff]  ;;  %v1497_v33 = vld [vmem:[%s794_s27 + $0x1] sm:$0x7f] }
 0x2c5   : >>> { %1496 = vst [vmem:[%s793_s24 + $0x1] sm:$0x1] %v806_v32  ;;  %v814_v34 = vsel %vm789_vm15, %v1495_v26, %v1497_v33 }
 0x2c6   : >>> { %816 = vst [vmem:[%s794_s27] sm:$0xff] %v814_v34 }
 0x2c9   : >> { %v364_v35 = vld [vmem:[%s358_s22] sm:$0xff] }
 0x2ca   : >> { %v365_v37 = vsel %vm1359_vm2, %v364_v35, 0.0  ;;  %v400_v39 = vld [vmem:[%s394_s11] sm:$0xff] }
 0x2cb   : >> { %v366_v41 = vmul.f32 %v365_v37, %v365_v37  ;;  %v401_v43 = vsel %vm1359_vm2, %v400_v39, 0.0 }
 0x2cc   : >> { %v383_v36 = vld [vmem:[%s377_s29] sm:$0xff]  ;;  %v402_v45 = vmul.f32 %v401_v43, %v401_v43 }
 0x2cd   : >> { %v384_v38 = vsel %vm1359_vm2, %v383_v36, 0.0  ;;  %v417_v40 = vld [vmem:[%s411_s15] sm:$0xff]  ;;  %v370_v48 = vsel %vm369_vm8, 0.0, %v366_v41 }
 0x2ce   : >> { %v385_v42 = vmul.f32 %v384_v38, %v384_v38  ;;  %v418_v44 = vsel %vm1359_vm2, %v417_v40, 0.0 }
 0x2cf   : >> { %v419_v47 = vmul.f32 %v418_v44, %v418_v44 }
 0x2d0   : >> { %v387_v46 = vadd.f32 %v385_v42, %v366_v41  ;;  %v386_v49 = vadd.f32 %v385_v42, %v370_v48 }
 0x2d1   : >> { %v423_v52 = vsel %vm422_vm9, 0.0, %v419_v47 }
 0x2d2   : >> { %v404_v50 = vadd.f32 %v402_v45, %v387_v46  ;;  %v403_v51 = vadd.f32 %v402_v45, %v386_v49 }
 0x2d4   : >> { %v425_v53 = vadd.f32 %v419_v47, %v404_v50  ;;  %v424_v54 = vadd.f32 %v423_v52, %v403_v51 }
 0x2d6   : >> { %426 = vadd.xlane.f32.xlu0 %v425_v53 }
 0x2da   : >> { %434 = vadd.xlane.f32.xlu0 %v424_v54 }
 0x363   : >> { %v427_v55 = vpop.xlane.xlu0 %426 }
 0x364   : >> { %v428_v56 = vrot.slane %v427_v55, 4 }
 0x366   : >> { %v429_v57 = vadd.f32 %v428_v56, %v427_v55 }
 0x367   : >> { %v435_v58 = vpop.xlane.xlu0 %434 }
 0x368   : >> { %v430_v59 = vrot.slane %v429_v57, 2  ;;  %v436_v60 = vrot.slane %v435_v58, 4 }
 0x36a   : >> { %v437_v61 = vadd.f32 %v436_v60, %v435_v58  ;;  %v431_v62 = vadd.f32 %v430_v59, %v429_v57 }
 0x36c   : >> { %v438_v63 = vrot.slane %v437_v61, 2  ;;  %v432_v1 = vrot.slane %v431_v62, 1 }
 0x36e   : >> { %v439_v0 = vadd.f32 %v438_v63, %v437_v61  ;;  %v433_v4 = vadd.f32 %v432_v1, %v431_v62 }
 0x370   : >> { %v440_v2 = vrot.slane %v439_v0, 1 }
 0x372   : >> { %v441_v3 = vadd.f32 %v440_v2, %v439_v0 }
 0x374   : >> { %1524 = vpush %v441_v3 }
 0x375   : >> { %1526 = vpush %v433_v4 }
 0x3a5   : >> { %s1525_s23 = spop %1524 }
 0x3a6   : >> { %s1527_s26 = spop %1526 }
 0x3a7   : >> { %s444_s24 = smul.f32 1e-10, %s1527_s26 }
 0x3a9   : >> { %p445_p11 = scmp.le.f32.partialorder %s1525_s23, %s444_s24 }
 0x3ab   : >> { %p447_p12 = por %p446_p10, %p445_p11 }
 0x3ad   : > { %895 = sbr.rel (!%p447_p12) target bundleno = 273 (0x111), region = 505 }
 0x3b4 PF: > { %s900_s28 = smov [#allocation12]  ;;  %v904_v5 = vmov %v1727_v5  ;;  %v907_v6 = vmov %v1729_v6  ;;  %s920_s27 = smov [#allocation15] }
 0x3b5   : > { %v924_v5 = vmov %v1727_v5  ;;  %v927_v6 = vmov %v1729_v6  ;;  %v908_v7 = vld [vmem:[%s900_s28] sm:$0xff]  ;;  %vm911_vm10 = vcmp.eq.s32.totalorder %v907_v6, %v904_v5  ;;  %s896_s16 = sand.u32 7, %s1688_s12   ;;  %s1994_s29 = scalar_lea.vmem [#allocation7], %s1725_s18 }
 0x3b6   : > { %vm931_vm11 = vcmp.eq.s32.totalorder %v927_v6, %v924_v5  ;;  %v912_v8 = vsel %vm911_vm10, %v908_v7, 0.0  ;;  %v928_v10 = vld [vmem:[%s920_s27] sm:$0xff]  ;;  %s897_s21 = scalar_lea.vmem [#allocation4], %s896_s16  ;;  %s899_s22 = scalar_lea.vmem [#allocation6], %s896_s16 }
 0x3b7   : > { %v913_v9 = vrot.slane %v912_v8, 4  ;;  %v932_v11 = vsel %vm931_vm11, %v928_v10, 0.0  ;;  %s901_s21 = smov %s897_s21  ;;  %s921_s22 = smov %s899_s22 }
 0x3b8   : > { %v933_v13 = vrot.slane %v932_v11, 4  ;;  %s979_s11 = sshrl.u32 (%p1702_p3), %s1688_s12, 3 }
 0x3b9   : > { %v914_v12 = vadd.f32 %v913_v9, %v912_v8  ;;  %s1512_s15 = sshll.u32 (%p1702_p3), %s979_s11, 1 }
 0x3ba   : > { %v934_v15 = vadd.f32 %v933_v13, %v932_v11  ;;  %s981_s24 = scalar_lea.vmem (%p1702_p3), %s1985_s4, %s1512_s15 }
 0x3bb   : > { %v915_v14 = vrot.slane %v914_v12, 2 }
 0x3bc   : > { %v935_v17 = vrot.slane %v934_v15, 2 }
 0x3bd   : > { %v916_v16 = vadd.f32 %v915_v14, %v914_v12 }
 0x3be   : > { %v936_v19 = vadd.f32 %v935_v17, %v934_v15 }
 0x3bf   : > { %v917_v18 = vrot.slane %v916_v16, 1 }
 0x3c0   : > { %v937_v5 = vrot.slane %v936_v19, 1 }
 0x3c1   : > { %v918_v20 = vadd.f32 %v917_v18, %v916_v16 }
 0x3c2   : > { %v938_v6 = vadd.f32 %v937_v5, %v936_v19 }
 0x3c3   : > { %919 = vst [vmem:[%s901_s21] sm:$0x1] %v918_v20 }
 0x3c4   : > { %939 = vst [vmem:[%s921_s22] sm:$0x1] %v938_v6 }
 0x3c6   : > { %978 = sbr.rel (!%p1702_p3) target bundleno = 980 (0x3d4), region = 174 }
 0x3ca   : > { %v943_v21 = vld [vmem:[#allocation4] sm:$0x3] }
 0x3cb   : > { %945 = vst [vmem:[%s283_s25] sm:$0x3] %v943_v21  ;;  %v949_v22 = vld [vmem:[#allocation6] sm:$0x3] }
 0x3cc   : > { %951 = vst [vmem:[%s1994_s29] sm:$0x3] %v949_v22 }
 0x3d2   : > { %v997_v23 = vld [vmem:[%s283_s25] sm:$0x3] }
 0x3d3   : > { %998 = vst [vmem:[%s981_s24] sm:$0x3] %v997_v23 }
 0x3d4 PF: > { %1015 = sbr.rel (!%p1702_p3) target bundleno = 988 (0x3dc), region = 208  ;;  %s1016_s28 = sshrl.u32 (%p1702_p3), %s1688_s12, 3 }
 0x3d5   : > { %s1995_s27 = scalar_lea.vmem (%p1702_p3), [#allocation7], %s1725_s18  ;;  %s1513_s16 = sshll.u32 (%p1702_p3), %s1016_s28, 1 }
 0x3d6   : > { %s1018_s25 = scalar_lea.vmem (%p1702_p3), %s1986_s5, %s1513_s16 }
 0x3da   : > { %v1034_v24 = vld [vmem:[%s1995_s27] sm:$0x3] (%p1702_p3) }
 0x3db   : > { %1035 = vst [vmem:[%s1018_s25] sm:$0x3] %v1034_v24 }
 0x3dc PF: > { %s1514_s29 = sshll.u32 %s1688_s12, 3  ;;  %v1079_v25 = vld [vmem:[%s1731_s14] sm:$0xff]  ;;  %v1113_v26 = vld [vmem:[%s1734_s30] sm:$0xff] }
 0x3dd   : > { %v1147_v27 = vld [vmem:[%s1737_s17] sm:$0xff]  ;;  %s1051_s18 = scalar_lea.vmem %s1987_s6, %s1514_s29  ;;  %s1085_s26 = scalar_lea.vmem %s1988_s7, %s1514_s29  ;;  %v1181_v28 = vld [vmem:[%s1740_s20] sm:$0xff] }
 0x3de   : > { %1080 = vst [vmem:[%s1051_s18] sm:$0xff] %v1079_v25  ;;  %1114 = vst [vmem:[%s1085_s26] sm:$0xff] %v1113_v26  ;;  %s1119_s27 = scalar_lea.vmem %s1989_s8, %s1514_s29  ;;  %s1153_s14 = scalar_lea.vmem %s1990_s9, %s1514_s29 }
 0x3df   : > { %1148 = vst [vmem:[%s1119_s27] sm:$0xff] %v1147_v27  ;;  %1182 = vst [vmem:[%s1153_s14] sm:$0xff] %v1181_v28 }
 0x3e0 PF: > { %s1996_s17 = sld [smem:[#allocation25_spill]]  ;;  %p13_p13 = scmp.ge.s32.totalorder %s1691_s13, 4  }
 0x3e1   : > { %s1997_s30 = smov %s1605_s10  ;;  %s1999_s11 = smov %s1691_s13 }
 0x3e2   :  { %15 = sbr.rel (!%p13_p13) target bundleno = 2 (0x2), region = 516 }
 0x3e6   : > { %s1998_s10 = smov %s1996_s17 }

// kernel: custom-call.40
= control target key start
LH: loop header
LB: loop body
LE: loop exit
PB: predicated region body
PF: predicated region fallthrough
CT: control target
= control target key end

     0   :  { %s1662_s30 = smov 0   ;;  %s1664_s10 = smov 0   ;;  %s1971_s0 = inlined_call_operand.vmem [shape: f32[8,8,8], index: 0, kind: input, shape index: {}]   ;;  %s1972_s1 = inlined_call_operand.vmem [shape: f32[8,8,8], index: 1, kind: input, shape index: {}]   ;;  %s1973_s2 = inlined_call_operand.vmem [shape: f32[8,8,8], index: 2, kind: input, shape index: {}]   ;;  %s1974_s3 = inlined_call_operand.vmem [shape: f32[8,8,8], index: 3, kind: input, shape index: {}]   ;;  %s1975_s4 = inlined_call_operand.vmem [shape: f32[8,8], index: 4, kind: output, shape index: {0}]   ;;  %s1976_s5 = inlined_call_operand.vmem [shape: f32[8,8], index: 5, kind: output, shape index: {1}]   ;;  %s1977_s6 = inlined_call_operand.vmem [shape: f32[8,8,8], index: 6, kind: output, shape index: {2}]   ;;  %s1978_s7 = inlined_call_operand.vmem [shape: f32[8,8,8], index: 7, kind: output, shape index: {3}]   ;;  %s1979_s8 = inlined_call_operand.vmem [shape: f32[8,8,8], index: 8, kind: output, shape index: {4}]   ;;  %s1980_s9 = inlined_call_operand.vmem [shape: f32[8,8,8], index: 9, kind: output, shape index: {5}]  }
   0x1   :  { %s1666_s11 = smov 0  }
   0x2 LB: > { %s1678_s12 = sadd.s32 4294967295, %s1599_s11   ;;  %s1681_s13 = sadd.s32 1, %s1599_s11   ;;  %s1599_s11 = sphi %s1666_s11, %s1989_s11   ;;  %s1595_s10 = sphi %s1664_s10, %s1988_s10   ;;  %s1591_s30 = sphi %s1662_s30, %s1987_s30  }
   0x3   : > { %s20_s14 = sshrl.u32 %s1599_s11, 3  ;;  %s21_s15 = sshrl.u32 %s1681_s13, 3 }
   0x4   : > { %s22_s16 = ssub.s32 %s20_s14, %s21_s15  ;;  %s25_s17 = sadd.s32 1, %s1595_s10 }
   0x5   : > { %p23_p0 = scmp.eq.s32.totalorder %s22_s16, 0  ;;  %p35_p1 = scmp.ne.s32.totalorder %s1595_s10, %s1591_s30 }
   0x6   : > { %p36_p2 = scmp.eq.s32.totalorder %s1678_s12, 7  ;;  %p1460_p4 = scmp.ge.s32.totalorder %s1599_s11, 8 }
   0x7   : > { %s1690_s18 = scalar_select %p23_p0, %s1595_s10, %s25_s17  }
   0x8   : > { %p1692_p3 = por %p36_p2, %p35_p1  ;;  %86 = sbr.rel (%p1460_p4) target bundleno = 17 (0x11), region = 16 }
   0x9   : > { %1981 = sst [smem:[#allocation23_spill]] %s1690_s18  ;;  %s88_s20 = sand.u32 (!%p1460_p4), 1, %s1599_s11  }
   0xa   : > { %s1462_s21 = sshll.u32 (!%p1460_p4), %s1599_s11, 3  ;;  %s1461_s22 = sshll.u32 (!%p1460_p4), %s88_s20, 3 }
   0xb   : > { %s92_s25 = scalar_lea.vmem (!%p1460_p4), %s1971_s0, %s1462_s21  ;;  %s90_s26 = scalar_lea.vmem (!%p1460_p4), [#allocation0], %s1461_s22 }
   0xc   : > { %v120_v0 = vld [vmem:[%s92_s25] sm:$0xff] (!%p1460_p4)  ;;  %s130_s29 = scalar_lea.vmem (!%p1460_p4), %s1972_s1, %s1462_s21  ;;  %s168_s16 = scalar_lea.vmem (!%p1460_p4), %s1973_s2, %s1462_s21 }
   0xd   : > { %121 = vst [vmem:[%s90_s26] sm:$0xff] (!%p1460_p4), %v120_v0  ;;  %v158_v1 = vld [vmem:[%s130_s29] sm:$0xff] (!%p1460_p4)  ;;  %s128_s17 = scalar_lea.vmem (!%p1460_p4), [#allocation1], %s1461_s22  ;;  %s206_s23 = scalar_lea.vmem (!%p1460_p4), %s1974_s3, %s1462_s21 }
   0xe   : > { %159 = vst [vmem:[%s128_s17] sm:$0xff] (!%p1460_p4), %v158_v1  ;;  %v196_v2 = vld [vmem:[%s168_s16] sm:$0xff] (!%p1460_p4)  ;;  %s166_s24 = scalar_lea.vmem (!%p1460_p4), [#allocation2], %s1461_s22  ;;  %s204_s25 = scalar_lea.vmem (!%p1460_p4), [#allocation3], %s1461_s22 }
   0xf   : > { %197 = vst [vmem:[%s166_s24] sm:$0xff] %v196_v2  ;;  %v234_v3 = vld [vmem:[%s206_s23] sm:$0xff] }
  0x10   : > { %235 = vst [vmem:[%s204_s25] sm:$0xff] %v234_v3 }
  0x11 PF: > { %p1469_p5 = scmp.ge.s32.totalorder %s1599_s11, 1  ;;  %p240_p6 = scmp.lt.s32.totalorder %s1599_s11, 9 }
  0x13   : > { %p241_p7 = pnand %p1469_p5, %p240_p6 }
  0x15   : > { %244 = sbr.rel (%p241_p7) target bundleno = 984 (0x3d8), region = 156 }
  0x1c   : > { %s247_s26 = sand.u32 1, %s1678_s12   ;;  %s281_s27 = sand.u32 1, %s1591_s30   ;;  %v325_v4 = vlaneseq  ;;  %v1609_v11 = vmov 0.0  }
  0x1d   : > { %s1470_s28 = sshll.u32 %s247_s26, 3  ;;  %s1715_s18 = sshll.u32 %s281_s27, 3 }
  0x1e   : > { %v1717_v5 = vand.u32 127, %v325_v4  ;;  %v1719_v6 = vshrl.u32 %v325_v4, 7  ;;  %s249_s21 = scalar_lea.vmem [#allocation0], %s1470_s28  ;;  %s253_s22 = scalar_lea.vmem [#allocation1], %s1470_s28 }
  0x1f   : > { %v309_v7 = vld [vmem:[%s249_s21] sm:$0xff]  ;;  %v312_v8 = vld [vmem:[%s253_s22] sm:$0xff]  ;;  %s257_s29 = scalar_lea.vmem [#allocation2], %s1470_s28  ;;  %s261_s11 = scalar_lea.vmem [#allocation3], %s1470_s28 }
  0x20   : > { %v315_v9 = vld [vmem:[%s257_s29] sm:$0xff]  ;;  %v318_v10 = vld [vmem:[%s261_s11] sm:$0xff]  ;;  %s1721_s14 = scalar_lea.vmem [#allocation6], %s1470_s28  ;;  %s1724_s30 = scalar_lea.vmem [#allocation7], %s1470_s28  ;;  %v327_v5 = vmov %v1717_v5  ;;  %v330_v6 = vmov %v1719_v6  ;;  %vm1349_vm2 = vcmp.lt.s32.totalorder %v1717_v5, 8 }
  0x21   : > { %320 = vst [vmem:[%s1721_s14] sm:$0xff] %v1609_v11  ;;  %321 = vst [vmem:[%s1724_s30] sm:$0xff] %v1609_v11  ;;  %s308_s15 = smov [#allocation10]  ;;  %s311_s16 = smov [#allocation11]  ;;  %v340_v5 = vmov %v1717_v5  ;;  %v343_v6 = vmov %v1719_v6  ;;  %vm334_vm0 = vcmp.eq.s32.totalorder %v330_v6, %v327_v5 }
  0x22   : > { %s1727_s17 = scalar_lea.vmem [#allocation8], %s1470_s28  ;;  %s1730_s20 = scalar_lea.vmem [#allocation9], %s1470_s28  ;;  %310 = vst [vmem:[%s308_s15] sm:$0xff] %v309_v7  ;;  %313 = vst [vmem:[%s311_s16] sm:$0xff] %v312_v8  ;;  %vm347_vm1 = vcmp.eq.s32.totalorder %v343_v6, %v340_v5  ;;  %v1341_v5 = vmov %v1717_v5  ;;  %v1344_v6 = vmov %v1719_v6 }
  0x23   : > { %322 = vst [vmem:[%s1727_s17] sm:$0xff] %v1609_v11  ;;  %323 = vst [vmem:[%s1730_s20] sm:$0xff] %v1609_v11  ;;  %s314_s23 = smov [#allocation12]  ;;  %s317_s24 = smov [#allocation13]  ;;  %vm1354_vm3 = vcmp.eq.s32.totalorder %v1344_v6, %v1341_v5  ;;  %v1392_v5 = vmov %v1717_v5  ;;  %v1361_v6 = vmov %v1719_v6 }
  0x24   : > { %316 = vst [vmem:[%s314_s23] sm:$0xff] %v315_v9  ;;  %319 = vst [vmem:[%s317_s24] sm:$0xff] %v318_v10  ;;  %s324_s14 = smov %s1721_s14  ;;  %s337_s20 = smov %s1730_s20  ;;  %v1358_v5 = vmov %v1717_v5  ;;  %v1395_v6 = vmov %v1719_v6 }
  0x25   : > { %s283_s25 = scalar_lea.vmem [#allocation4], %s1715_s18  ;;  %s1345_s27 = smov [#allocation10]  ;;  %v1375_v5 = vmov %v1717_v5  ;;  %v1378_v6 = vmov %v1719_v6  ;;  %vm1405_vm4 = vcmp.eq.s32.totalorder %v1395_v6, %v1392_v5 }
  0x26   : > { %s1362_s28 = smov [#allocation11]  ;;  %s1379_s21 = smov [#allocation12] }
  0x27   : > { %s1396_s22 = smov [#allocation13] }
  0x28   : > { %v331_v12 = vld [vmem:[%s324_s14] sm:$0xff] }
  0x29   : > { %v335_v13 = vsel %vm334_vm0, 1.0, %v331_v12  ;;  %v1351_v16 = vld [vmem:[%s1345_s27] sm:$0xff] }
  0x2a   : > { %v344_v14 = vld [vmem:[%s337_s20] sm:$0xff]  ;;  %336 = vst [vmem:[%s324_s14] sm:$0xff] %v335_v13  ;;  %v1352_v18 = vsel %vm1349_vm2, %v1351_v16, 0.0 }
  0x2b   : > { %v348_v15 = vsel %vm347_vm1, 1.0, %v344_v14  ;;  %v1368_v17 = vld [vmem:[%s1362_s28] sm:$0xff]  ;;  %v1353_v22 = vmul.f32 %v1352_v18, %v1352_v18 }
  0x2c   : > { %349 = vst [vmem:[%s337_s20] sm:$0xff] %v348_v15  ;;  %v1369_v19 = vsel %vm1349_vm2, %v1368_v17, 0.0  ;;  %v1385_v20 = vld [vmem:[%s1379_s21] sm:$0xff] }
  0x2d   : > { %v1402_v21 = vld [vmem:[%s1396_s22] sm:$0xff]  ;;  %v1370_v23 = vmul.f32 %v1369_v19, %v1369_v19  ;;  %v1386_v24 = vsel %vm1349_vm2, %v1385_v20, 0.0  ;;  %v1355_v29 = vsel %vm1354_vm3, 0.0, %v1353_v22 }
  0x2e   : > { %v1403_v25 = vsel %vm1349_vm2, %v1402_v21, 0.0  ;;  %v1387_v26 = vmul.f32 %v1386_v24, %v1386_v24 }
  0x2f   : > { %v1372_v27 = vadd.f32 %v1370_v23, %v1353_v22  ;;  %v1404_v28 = vmul.f32 %v1403_v25, %v1403_v25  ;;  %v1371_v30 = vadd.f32 %v1370_v23, %v1355_v29 }
  0x31   : > { %v1389_v31 = vadd.f32 %v1387_v26, %v1372_v27  ;;  %v1388_v32 = vadd.f32 %v1387_v26, %v1371_v30  ;;  %v1406_v33 = vsel %vm1405_vm4, 0.0, %v1404_v28 }
  0x33   : > { %v1408_v34 = vadd.f32 %v1404_v28, %v1389_v31  ;;  %v1407_v35 = vadd.f32 %v1406_v33, %v1388_v32 }
  0x35   : > { %1409 = vadd.xlane.f32.xlu0 %v1408_v34 }
  0x39   : > { %1417 = vadd.xlane.f32.xlu0 %v1407_v35 }
  0xc2   : > { %v1410_v36 = vpop.xlane.xlu0 %1409 }
  0xc3   : > { %v1411_v37 = vrot.slane %v1410_v36, 4 }
  0xc5   : > { %v1412_v38 = vadd.f32 %v1411_v37, %v1410_v36 }
  0xc6   : > { %v1418_v39 = vpop.xlane.xlu0 %1417 }
  0xc7   : > { %v1413_v40 = vrot.slane %v1412_v38, 2  ;;  %v1419_v41 = vrot.slane %v1418_v39, 4 }
  0xc9   : > { %v1420_v42 = vadd.f32 %v1419_v41, %v1418_v39  ;;  %v1414_v43 = vadd.f32 %v1413_v40, %v1412_v38 }
  0xcb   : > { %v1421_v44 = vrot.slane %v1420_v42, 2  ;;  %v1415_v46 = vrot.slane %v1414_v43, 1 }
  0xcd   : > { %v1422_v45 = vadd.f32 %v1421_v44, %v1420_v42  ;;  %v1416_v49 = vadd.f32 %v1415_v46, %v1414_v43 }
  0xcf   : > { %v1423_v47 = vrot.slane %v1422_v45, 1 }
  0xd1   : > { %v1424_v48 = vadd.f32 %v1423_v47, %v1422_v45 }
  0xd3   : > { %1510 = vpush %v1424_v48 }
  0xd4   : > { %1512 = vpush %v1416_v49 }
 0x104   : > { %s1511_s29 = spop %1510 }
 0x105   : > { %s1513_s11 = spop %1512 }
 0x106   : > { %s1427_s15 = smul.f32 1e-10, %s1513_s11 }
 0x108   : > { %p1428_p8 = scmp.le.f32.partialorder %s1511_s29, %s1427_s15 }
 0x109   : > { %s1759_s16 = smov (!%p1428_p8), 0  }
 0x10a   : > { %1431 = sbr.rel (%p1428_p8) target bundleno = 948 (0x3b4), region = 507 }
 0x111 LB: >> { %s1764_s23 = smov 0   ;;  %s1603_s16 = sphi %s1759_s16, %s1983_s16  }
 0x112 LB: >>> { %s454_s24 = smov [#allocation10]  ;;  %v458_v5 = vmov %v1717_v5  ;;  %v461_v6 = vmov %v1719_v6  ;;  %s474_s27 = smov [#allocation11]  ;;  %vm777_vm14 = vcmp.eq.s32.totalorder %v1719_v6, 0  ;;  %vm789_vm15 = vcmp.eq.s32.totalorder %v1719_v6, 7  ;;  %s1607_s23 = sphi %s1764_s23, %s453_s23  }
 0x113   : >>> { %v478_v5 = vmov %v1717_v5  ;;  %v481_v6 = vmov %v1719_v6  ;;  %v462_v50 = vld [vmem:[%s454_s24] sm:$0xff]  ;;  %vm465_vm5 = vcmp.eq.s32.totalorder %v461_v6, %v458_v5  ;;  %s494_s28 = smov [#allocation13]  ;;  %s455_s21 = smov [#allocation14] }
 0x114   : >>> { %vm485_vm6 = vcmp.eq.s32.totalorder %v481_v6, %v478_v5  ;;  %v498_v5 = vmov %v1717_v5  ;;  %v501_v6 = vmov %v1719_v6  ;;  %v466_v51 = vsel %vm465_vm5, %v462_v50, 0.0  ;;  %v482_v52 = vld [vmem:[%s474_s27] sm:$0xff]  ;;  %s475_s22 = smov [#allocation15]  ;;  %s495_s29 = smov [#allocation16] }
 0x115   : >>> { %vm505_vm7 = vcmp.eq.s32.totalorder %v501_v6, %v498_v5  ;;  %v467_v53 = vrot.slane %v466_v51, 4  ;;  %v486_v54 = vsel %vm485_vm6, %v482_v52, 0.0  ;;  %v502_v55 = vld [vmem:[%s494_s28] sm:$0xff]  ;;  %s518_s11 = smov [#allocation15]  ;;  %s516_s15 = smov [#allocation14]  ;;  %v567_v5 = vmov %v1717_v5 }
 0x116   : >>> { %v487_v56 = vrot.slane %v486_v54, 4  ;;  %v506_v57 = vsel %vm505_vm7, %v502_v55, 0.0  ;;  %s520_s24 = smov [#allocation16]  ;;  %s555_s27 = smov [#allocation17]  ;;  %v570_v6 = vmov %v1719_v6  ;;  %v582_v5 = vmov %v1717_v5 }
 0x117   : >>> { %v468_v58 = vadd.f32 %v467_v53, %v466_v51  ;;  %v507_v59 = vrot.slane %v506_v57, 4  ;;  %s557_s28 = smov [#allocation18]  ;;  %v585_v6 = vmov %v1719_v6  ;;  %vm572_vm12 = vcmp.eq.s32.totalorder %v570_v6, %v567_v5  ;;  %s1786_s14 = smov %s1721_s14 }
 0x118   : >>> { %v488_v60 = vadd.f32 %v487_v56, %v486_v54  ;;  %vm587_vm13 = vcmp.eq.s32.totalorder %v585_v6, %v582_v5  ;;  %s1789_s30 = smov %s1724_s30  ;;  %s1792_s17 = smov %s1727_s17  ;;  %v825_v52 = vld [vmem:[%s1786_s14] sm:$0xff]  ;;  %v680_v5 = vmov %v1717_v5  ;;  %v683_v6 = vmov %v1719_v6 }
 0x119   : >>> { %v469_v61 = vrot.slane %v468_v58, 2  ;;  %v508_v62 = vadd.f32 %v507_v59, %v506_v57  ;;  %s1796_s20 = smov %s1730_s20  ;;  %v826_v53 = vld [vmem:[%s1789_s30] sm:$0xff]  ;;  %s819_s26 = smov [#allocation22]  ;;  %v653_v5 = vmov %v1717_v5  ;;  %v656_v6 = vmov %v1719_v6 }
 0x11a   : >>> { %v489_v63 = vrot.slane %v488_v60, 2  ;;  %v827_v56 = vld [vmem:[%s1792_s17] sm:$0xff]  ;;  %v694_v5 = vmov %v1717_v5  ;;  %v697_v6 = vmov %v1719_v6  ;;  %vm687_vm0 = vcmp.eq.s32.totalorder %v683_v6, %v680_v5  ;;  %s453_s23 = sadd.s32 1, %s1607_s23  }
 0x11b   : >>> { %v470_v0 = vadd.f32 %v469_v61, %v468_v58  ;;  %v509_v1 = vrot.slane %v508_v62, 2  ;;  %v828_v57 = vld [vmem:[%s1796_s20] sm:$0xff]  ;;  %v667_v5 = vmov %v1717_v5  ;;  %v670_v6 = vmov %v1719_v6  ;;  %p450_p9 = scmp.ge.s32.totalorder %s453_s23, 15  }
 0x11c   : >>> { %v490_v2 = vadd.f32 %v489_v63, %v488_v60  ;;  %vm661_vm1 = vcmp.eq.s32.totalorder %v656_v6, %v653_v5  ;;  %vm702_vm3 = vcmp.eq.s32.totalorder %v697_v6, %v694_v5  ;;  %vm674_vm4 = vcmp.eq.s32.totalorder %v670_v6, %v667_v5 }
 0x11d   : >>> { %v471_v3 = vrot.slane %v470_v0, 1  ;;  %v510_v4 = vadd.f32 %v509_v1, %v508_v62  ;;  %vm716_vm5 = vcmp.eq.s32.totalorder %v1717_v5, 0  ;;  %vm720_vm6 = vcmp.eq.s32.totalorder %v1717_v5, 1 }
 0x11e   : >>> { %v491_v7 = vrot.slane %v490_v2, 1  ;;  %vm733_vm7 = vcmp.eq.s32.totalorder %v1717_v5, 7  ;;  %v354_v5 = vmov (%p450_p9), %v1717_v5  ;;  %v357_v6 = vmov (%p450_p9), %v1719_v6 }
 0x11f   : >>> { %v472_v8 = vadd.f32 %v471_v3, %v470_v0  ;;  %v511_v9 = vrot.slane %v510_v4, 1  ;;  %v407_v5 = vmov (%p450_p9), %v1717_v5 }
 0x120   : >>> { %v492_v10 = vadd.f32 %v491_v7, %v490_v2 }
 0x121   : >>> { %473 = vst [vmem:[%s455_s21] sm:$0x1] %v472_v8  ;;  %v512_v11 = vadd.f32 %v511_v9, %v510_v4  ;;  %s514_s21 = smov [#allocation19] }
 0x122   : >>> { %493 = vst [vmem:[%s475_s22] sm:$0x1] %v492_v10  ;;  %s515_s22 = smov [#allocation20]  ;;  %s559_s21 = smov %s514_s21 }
 0x123   : >>> { %513 = vst [vmem:[%s495_s29] sm:$0x1] %v512_v11  ;;  %s561_s22 = smov %s515_s22  ;;  %s563_s29 = smov [#allocation19] }
 0x128   : >>> { %v517_v14 = vld [vmem:[%s516_s15] sm:$0xff]  ;;  %s576_s15 = smov [#allocation21] }
 0x129   : >>> { %v519_v12 = vld [vmem:[%s518_s11] sm:$0xff]  ;;  %v540_v27 = vand.u32 2147483647, %v517_v14  ;;  %s578_s11 = smov [#allocation20] }
 0x12a   : >>> { %v523_v13 = vmul.f32 2.0, %v519_v12  ;;  %v521_v15 = vld [vmem:[%s520_s24] sm:$0xff]  ;;  %v541_v32 = vand.u32 2147483647, %v519_v12  ;;  %s593_s24 = smov [#allocation21] }
 0x12b   : >>> { %v522_v16 = vsub.f32 %v521_v15, %v517_v14  ;;  %v542_v28 = vand.u32 2147483647, %v521_v15 }
 0x12c   : >>> { %1561 = vrcp.f32 %v523_v13 }
 0x12d   : >>> { %v543_v31 = vmin.f32 %v540_v27, %v542_v28 }
 0x12f   : >>> { %v544_v33 = vmul.f32 1.1920929e-08, %v543_v31 }
 0x131   : >>> { %vm545_vm11 = vcmp.le.f32.partialorder %v541_v32, %v544_v33 }
 0x136   : >>> { %v1562_v17 = vpop.eup %1561 }
 0x137   : >>> { %v525_v18 = vmul.f32 %v1562_v17, %v522_v16 }
 0x139   : >>> { %v527_v19 = vmul.f32 %v525_v18, %v525_v18  ;;  %vm526_vm10 = vcmp.ge.f32.partialorder %v525_v18, 0.0 }
 0x13b   : >>> { %v528_v20 = vadd.f32 1.0, %v527_v19 }
 0x13d   : >>> { %1563 = vrsqrt.f32 %v528_v20  ;;  %vm531_vm8 = vcmp.eq.f32.partialorder %v528_v20, inf  ;;  %v534_v22 = vand.u32 2147483648, %v528_v20  ;;  %vm533_vm9 = vcmp.eq.f32.partialorder %v528_v20, 0.0 }
 0x147   : >>> { %v1564_v21 = vpop.eup %1563 }
 0x148   : >>> { %v530_v23 = vmul.f32 %v1564_v21, %v528_v20 }
 0x14a   : >>> { %v532_v24 = vsel %vm531_vm8, %v528_v20, %v530_v23  ;;  %vm369_vm8 = vcmp.eq.s32.totalorder (%p450_p9), %v357_v6, %v354_v5  ;;  %v410_v6 = vmov (%p450_p9), %v1719_v6  ;;  %v373_v5 = vmov (%p450_p9), %v1717_v5 }
 0x14b   : >>> { %v535_v25 = vsel %vm533_vm9, %v534_v22, %v532_v24  ;;  %v376_v6 = vmov (%p450_p9), %v1719_v6  ;;  %v390_v5 = vmov (%p450_p9), %v1717_v5  ;;  %vm422_vm9 = vcmp.eq.s32.totalorder (%p450_p9), %v410_v6, %v407_v5 }
 0x14c   : >>> { %v536_v26 = vxor.u32 2147483648, %v535_v25  ;;  %v393_v6 = vmov (%p450_p9), %v1719_v6 }
 0x14e   : >>> { %v537_v29 = vsel %vm526_vm10, %v535_v25, %v536_v26 }
 0x14f   : >>> { %v538_v30 = vadd.f32 %v537_v29, %v525_v18 }
 0x151   : >>> { %1565 = vrcp.f32 %v538_v30 }
 0x15b   : >>> { %v1566_v34 = vpop.eup %1565 }
 0x15c   : >>> { %v546_v35 = vsel %vm545_vm11, 0.0, %v1566_v34 }
 0x15d   : >>> { %v547_v36 = vmul.f32 %v546_v35, %v546_v35  ;;  %v551_v37 = vmul.f32 %v546_v35, %v519_v12 }
 0x15f   : >>> { %v548_v38 = vadd.f32 1.0, %v547_v36  ;;  %v552_v39 = vsub.f32 %v517_v14, %v551_v37  ;;  %v554_v40 = vadd.f32 %v551_v37, %v521_v15 }
 0x161   : >>> { %1567 = vrsqrt.f32 %v548_v38  ;;  %556 = vst [vmem:[%s555_s27] sm:$0xff] %v552_v39  ;;  %558 = vst [vmem:[%s557_s28] sm:$0xff] %v554_v40  ;;  %s1779_s27 = smov [#allocation10]  ;;  %s591_s28 = smov [#allocation22] }
 0x162   : >>> { %v601_v49 = vld [vmem:[%s1779_s27] sm:$0xff] }
 0x16b   : >>> { %v1568_v41 = vpop.eup %1567 }
 0x16c   : >>> { %560 = vst [vmem:[%s559_s21] sm:$0xff] %v1568_v41  ;;  %v550_v42 = vmul.f32 %v1568_v41, %v546_v35  ;;  %s1781_s21 = smov [#allocation11] }
 0x16d   : >>> { %v602_v50 = vld [vmem:[%s1781_s21] sm:$0xff] }
 0x16e   : >>> { %562 = vst [vmem:[%s561_s22] sm:$0xff] %v550_v42  ;;  %s1783_s22 = smov [#allocation13] }
 0x16f   : >>> { %v604_v51 = vld [vmem:[%s1783_s22] sm:$0xff] }
 0x173   : >>> { %v564_v43 = vld [vmem:[%s563_s29] ss:$0 sm:$0xff]  ;;  %s817_s29 = smov [#allocation21] }
 0x174   : >>> { %v573_v44 = vsel %vm572_vm12, %v564_v43, 0.0 }
 0x175   : >>> { %574 = vadd.xlane.f32.xlu0 %v573_v44  ;;  %v579_v45 = vld [vmem:[%s578_s11] ss:$0 sm:$0xff]  ;;  %s1798_s11 = smov [#allocation12] }
 0x176   : >>> { %v588_v46 = vsel %vm587_vm13, %v579_v45, 0.0  ;;  %v603_v58 = vld [vmem:[%s1798_s11] sm:$0xff] }
 0x179   : >>> { %589 = vadd.xlane.f32.xlu0 %v588_v46 }
 0x202   : >>> { %v575_v47 = vpop.xlane.xlu0 %574 }
 0x203   : >>> { %577 = vst [vmem:[%s576_s15] sm:$0xff] %v575_v47  ;;  %s595_s15 = smov [#allocation22] }
 0x206   : >>> { %v590_v48 = vpop.xlane.xlu0 %589 }
 0x207   : >>> { %592 = vst [vmem:[%s591_s28] sm:$0xff] %v590_v48  ;;  %s1825_s28 = smov [#allocation12] }
 0x20a   : >>> { %v594_v54 = vld [vmem:[%s593_s24] sm:$0xff]  ;;  %s623_s24 = smov [#allocation20] }
 0x20b   : >>> { %v818_v55 = vld [vmem:[%s817_s29] sm:$0xff]  ;;  %v605_v59 = vmul.f32 %v601_v49, %v594_v54  ;;  %v608_v60 = vmul.f32 %v602_v50, %v594_v54  ;;  %v615_v61 = vmul.f32 %v604_v51, %v594_v54  ;;  %v612_v4 = vmul.f32 %v603_v58, %v594_v54  ;;  %s650_s29 = smov [#allocation17] }
 0x20c   : >>> { %v829_v62 = vmul.f32 %v825_v52, %v818_v55  ;;  %v832_v63 = vmul.f32 %v826_v53, %v818_v55  ;;  %v836_v0 = vmul.f32 %v827_v56, %v818_v55  ;;  %v839_v1 = vmul.f32 %v828_v57, %v818_v55  ;;  %v624_v24 = vld [vmem:[%s623_s24] ss:$0 sm:$0xff]  ;;  %s690_s24 = smov [#allocation13] }
 0x20d   : >>> { %v657_v55 = vld [vmem:[%s650_s29] ss:$0 sm:$0xff]  ;;  %s706_s29 = smov [#allocation11] }
 0x20e   : >>> { %v596_v2 = vld [vmem:[%s595_s15] sm:$0xff]  ;;  %s677_s15 = smov [#allocation12] }
 0x20f   : >>> { %v820_v3 = vld [vmem:[%s819_s26] sm:$0xff]  ;;  %v609_v7 = vmul.f32 %v604_v51, %v596_v2  ;;  %v611_v8 = vmul.f32 %v601_v49, %v596_v2  ;;  %v614_v9 = vmul.f32 %v602_v50, %v596_v2  ;;  %v606_v14 = vmul.f32 %v603_v58, %v596_v2  ;;  %s621_s26 = smov [#allocation19] }
 0x210   : >>> { %v830_v10 = vmul.f32 %v827_v56, %v820_v3  ;;  %v833_v11 = vmul.f32 %v828_v57, %v820_v3  ;;  %v835_v12 = vmul.f32 %v825_v52, %v820_v3  ;;  %v838_v13 = vmul.f32 %v826_v53, %v820_v3  ;;  %v622_v23 = vld [vmem:[%s621_s26] ss:$0 sm:$0xff]  ;;  %s649_s26 = smov [#allocation10] }
 0x211   : >>> { %v610_v15 = vsub.f32 %v608_v60, %v609_v7  ;;  %v616_v16 = vadd.f32 %v615_v61, %v614_v9  ;;  %v613_v18 = vadd.f32 %v612_v4, %v611_v8  ;;  %v607_v22 = vsub.f32 %v605_v59, %v606_v14 }
 0x212   : >>> { %v831_v17 = vsub.f32 %v829_v62, %v830_v10  ;;  %v834_v19 = vsub.f32 %v832_v63, %v833_v11  ;;  %v837_v20 = vadd.f32 %v836_v0, %v835_v12  ;;  %v840_v21 = vadd.f32 %v839_v1, %v838_v13 }
 0x213   : >>> { %618 = vst [vmem:[%s1781_s21] sm:$0xff] %v610_v15  ;;  %620 = vst [vmem:[%s1783_s22] sm:$0xff] %v616_v16  ;;  %s1827_s21 = smov [#allocation13]  ;;  %s1831_s22 = smov [#allocation11] }
 0x214   : >>> { %841 = vst [vmem:[%s1786_s14] sm:$0xff] %v831_v17  ;;  %619 = vst [vmem:[%s1798_s11] sm:$0xff] %v613_v18  ;;  %s845_s14 = smov %s1721_s14  ;;  %s691_s11 = smov [#allocation18] }
 0x215   : >>> { %842 = vst [vmem:[%s1789_s30] sm:$0xff] %v834_v19  ;;  %843 = vst [vmem:[%s1792_s17] sm:$0xff] %v837_v20  ;;  %s846_s17 = smov %s1727_s17  ;;  %s1818_s30 = smov %s1724_s30  ;;  %v698_v56 = vld [vmem:[%s691_s11] ss:$0 sm:$0xff] }
 0x216   : >>> { %844 = vst [vmem:[%s1796_s20] sm:$0xff] %v840_v21  ;;  %617 = vst [vmem:[%s1779_s27] sm:$0xff] %v607_v22  ;;  %s1821_s20 = smov %s1730_s20  ;;  %s1829_s27 = smov [#allocation10] }
 0x217   : >>> { %s1611_s11 = smov 127  }
 0x21a   : >>> { %v632_v39 = vld [vmem:[%s1827_s21] sm:$0xff] }
 0x21b   : >>> { %v847_v25 = vld [vmem:[%s845_s14] ss:$0 sm:$0xff]  ;;  %v1489_v27 = vld [vmem:[%s845_s14 + $0x7] ss:$0 sm:$0xff]  ;;  %v640_v42 = vmul.f32 %v632_v39, %v624_v24  ;;  %v643_v46 = vmul.f32 %v632_v39, %v622_v23 }
 0x21c   : >>> { %v1488_v26 = vld [vmem:[%s845_s14 - $0x1] sm:$0xfe]  ;;  %v1493_v34 = vld [vmem:[%s1818_s30 + $0x7] ss:$0 sm:$0xff] }
 0x21d   : >>> { %v854_v28 = vsel %vm777_vm14, %v847_v25, %v1488_v26  ;;  %v858_v29 = vld [vmem:[%s846_s17] ss:$0 sm:$0xff]  ;;  %v1491_v30 = vld [vmem:[%s846_s17 + $0x1] sm:$0x7f] }
 0x21e   : >>> { %v871_v31 = vld [vmem:[%s1818_s30] ss:$0 sm:$0xff]  ;;  %857 = vst [vmem:[%s845_s14] sm:$0xff] %v854_v28  ;;  %v866_v32 = vsel %vm789_vm15, %v1489_v27, %v1491_v30  ;;  %v1495_v37 = vld [vmem:[%s1821_s20 + $0x1] sm:$0x7f] }
 0x21f   : >>> { %v1492_v33 = vld [vmem:[%s1818_s30 - $0x1] sm:$0xfe]  ;;  %1490 = vst [vmem:[%s845_s14 + $0x1] sm:$0x1] %v858_v29  ;;  %868 = vst [vmem:[%s846_s17] sm:$0xff] %v866_v32  ;;  %v890_v40 = vsel %vm789_vm15, %v1493_v34, %v1495_v37 }
 0x220   : >>> { %v882_v35 = vld [vmem:[%s1821_s20] ss:$0 sm:$0xff]  ;;  %v878_v36 = vsel %vm777_vm14, %v871_v31, %v1492_v33 }
 0x221   : >>> { %v631_v38 = vld [vmem:[%s1825_s28] sm:$0xff]  ;;  %881 = vst [vmem:[%s1818_s30] sm:$0xff] %v878_v36  ;;  %892 = vst [vmem:[%s1821_s20] sm:$0xff] %v890_v40 }
 0x222   : >>> { %v639_v41 = vmul.f32 %v631_v38, %v622_v23  ;;  %v642_v43 = vmul.f32 %v631_v38, %v624_v24  ;;  %v629_v44 = vld [vmem:[%s1829_s27] sm:$0xff]  ;;  %1494 = vst [vmem:[%s1818_s30 + $0x1] sm:$0x1] %v882_v35 }
 0x223   : >>> { %v630_v45 = vld [vmem:[%s1831_s22] sm:$0xff]  ;;  %v633_v47 = vmul.f32 %v629_v44, %v622_v23  ;;  %v636_v49 = vmul.f32 %v629_v44, %v624_v24 }
 0x224   : >>> { %v634_v48 = vmul.f32 %v630_v45, %v624_v24  ;;  %v641_v50 = vsub.f32 %v639_v41, %v640_v42  ;;  %v637_v51 = vmul.f32 %v630_v45, %v622_v23  ;;  %v644_v52 = vadd.f32 %v643_v46, %v642_v43 }
 0x226   : >>> { %v635_v53 = vsub.f32 %v633_v47, %v634_v48  ;;  %647 = vst [vmem:[%s1825_s28] sm:$0xff] %v641_v50  ;;  %v638_v54 = vadd.f32 %v637_v51, %v636_v49  ;;  %648 = vst [vmem:[%s1827_s21] sm:$0xff] %v644_v52  ;;  %s664_s28 = smov [#allocation11]  ;;  %s1865_s21 = smov [#allocation12] }
 0x228   : >>> { %645 = vst [vmem:[%s1829_s27] sm:$0xff] %v635_v53  ;;  %646 = vst [vmem:[%s1831_s22] sm:$0xff] %v638_v54  ;;  %s705_s27 = smov [#allocation10]  ;;  %s1610_s22 = smov 1  }
 0x22d   : >>> { %v684_v57 = vld [vmem:[%s677_s15] sm:$0xff] }
 0x22e   : >>> { %v688_v58 = vsel %vm687_vm0, 0.0, %v684_v57  ;;  %v699_v60 = vld [vmem:[%s690_s24] sm:$0xff] }
 0x22f   : >>> { %v658_v59 = vld [vmem:[%s649_s26] sm:$0xff]  ;;  %689 = vst [vmem:[%s677_s15] sm:$0xff] %v688_v58  ;;  %v703_v63 = vsel %vm702_vm3, %v698_v56, %v699_v60  ;;  %s1868_s15 = smov [#allocation13] }
 0x230   : >>> { %v662_v61 = vsel %vm661_vm1, %v657_v55, %v658_v59  ;;  %v671_v62 = vld [vmem:[%s664_s28] sm:$0xff]  ;;  %704 = vst [vmem:[%s690_s24] sm:$0xff] %v703_v63  ;;  %s793_s24 = smov [#allocation11] }
 0x231   : >>> { %663 = vst [vmem:[%s649_s26] sm:$0xff] %v662_v61  ;;  %v675_v0 = vsel %vm674_vm4, 0.0, %v671_v62  ;;  %s769_s26 = smov [#allocation10] }
 0x232   : >>> { %676 = vst [vmem:[%s664_s28] sm:$0xff] %v675_v0  ;;  %s770_s28 = smov [#allocation12] }
 0x236   : >>> { %v743_v1 = vld [vmem:[%s1865_s21] sm:$0xff] }
 0x237   : >>> { %744 = vrot.lane.b32.xlu0 %v743_v1, %s1610_s22  ;;  %v739_v4 = vld [vmem:[%s1868_s15] sm:$0xff] }
 0x238   : >>> { %v711_v2 = vld [vmem:[%s705_s27] sm:$0xff] }
 0x239   : >>> { %712 = vrot.lane.b32.xlu1 %v711_v2, %s1610_s22  ;;  %v707_v3 = vld [vmem:[%s706_s29] sm:$0xff] }
 0x23d   : >>> { %708 = vrot.lane.b32.xlu1 %v707_v3, %s1610_s22 }
 0x241   : >>> { %729 = vrot.lane.b32.xlu1 %v707_v3, %s1611_s11 }
 0x245   : >>> { %740 = vrot.lane.b32.xlu1 %v739_v4, %s1610_s22  ;;  %s358_s22 = smov (%p450_p9), [#allocation10] }
 0x249   : >>> { %761 = vrot.lane.b32.xlu1 %v739_v4, %s1611_s11  ;;  %s394_s11 = smov (%p450_p9), [#allocation12] }
 0x2a9   : >>> { %v745_v13 = vpop.permute.xlu0 %744 }
 0x2aa   : >>> { %v749_v15 = vsel %vm716_vm5, %v743_v1, %v745_v13 }
 0x2ab   : >>> { %v713_v7 = vpop.permute.xlu1 %712 }
 0x2ac   : >>> { %v717_v8 = vsel %vm716_vm5, %v711_v2, %v713_v7 }
 0x2af   : >>> { %v709_v9 = vpop.permute.xlu1 %708 }
 0x2b0   : >>> { %v721_v10 = vsel %vm720_vm6, %v709_v9, %v717_v8 }
 0x2b1   : >>> { %v727_v11 = vsel %vm1349_vm2, %v721_v10, 0.0 }
 0x2b2   : >>> { %735 = vst [vmem:[%s705_s27] sm:$0xff] %v727_v11  ;;  %s794_s27 = smov [#allocation13] }
 0x2b3   : >>> { %v730_v12 = vpop.permute.xlu1 %729 }
 0x2b4   : >>> { %v734_v14 = vsel %vm733_vm7, %v711_v2, %v730_v12 }
 0x2b5   : >>> { %736 = vst [vmem:[%s706_s29] sm:$0xff] %v734_v14  ;;  %s377_s29 = smov (%p450_p9), [#allocation11] }
 0x2b7   : >>> { %v741_v16 = vpop.permute.xlu1 %740 }
 0x2b8   : >>> { %v753_v17 = vsel %vm720_vm6, %v741_v16, %v749_v15 }
 0x2b9   : >>> { %v771_v18 = vld [vmem:[%s769_s26] ss:$0 sm:$0xff]  ;;  %v1481_v20 = vld [vmem:[%s769_s26 + $0x7] ss:$0 sm:$0xff]  ;;  %v759_v22 = vsel %vm1349_vm2, %v753_v17, 0.0 }
 0x2ba   : >>> { %v1480_v19 = vld [vmem:[%s769_s26 - $0x1] sm:$0xfe]  ;;  %767 = vst [vmem:[%s1865_s21] sm:$0xff] %v759_v22  ;;  %s893_s21 = sadd.s32 (%p450_p9), 1, %s1603_s16  }
 0x2bb   : >>> { %v778_v21 = vsel %vm777_vm14, %v771_v18, %v1480_v19  ;;  %v762_v23 = vpop.permute.xlu1 %761  ;;  %p446_p10 = scmp.ge.s32.totalorder (%p450_p9), %s893_s21, 15  ;;  %s1983_s16 = smov (%p450_p9), %s893_s21 }
 0x2bc   : >>> { %781 = vst [vmem:[%s769_s26] sm:$0xff] %v778_v21  ;;  %v795_v24 = vld [vmem:[%s793_s24] ss:$0 sm:$0xff]  ;;  %v1485_v26 = vld [vmem:[%s793_s24 + $0x7] ss:$0 sm:$0xff]  ;;  %v766_v27 = vsel %vm733_vm7, %v743_v1, %v762_v23 }
 0x2bd   : >>> { %v1484_v25 = vld [vmem:[%s793_s24 - $0x1] sm:$0xfe]  ;;  %768 = vst [vmem:[%s1868_s15] sm:$0xff] %v766_v27  ;;  %s411_s15 = smov (%p450_p9), [#allocation13] }
 0x2be   : >>> { %v802_v28 = vsel %vm777_vm14, %v795_v24, %v1484_v25 }
 0x2bf   : >>> { %805 = vst [vmem:[%s793_s24] sm:$0xff] %v802_v28 }
 0x2c1   : >>> { %v782_v29 = vld [vmem:[%s770_s28] ss:$0 sm:$0xff]  ;;  %v1483_v30 = vld [vmem:[%s770_s28 + $0x1] sm:$0x7f] }
 0x2c2   : >>> { %1482 = vst [vmem:[%s769_s26 + $0x1] sm:$0x1] %v782_v29  ;;  %v790_v31 = vsel %vm789_vm15, %v1481_v20, %v1483_v30  ;;  %452 = sbr.rel (!%p450_p9) target bundleno = 274 (0x112), region = 502 }
 0x2c3   : >>> { %792 = vst [vmem:[%s770_s28] sm:$0xff] %v790_v31 }
 0x2c4   : >>> { %v806_v32 = vld [vmem:[%s794_s27] ss:$0 sm:$0xff]  ;;  %v1487_v33 = vld [vmem:[%s794_s27 + $0x1] sm:$0x7f] }
 0x2c5   : >>> { %1486 = vst [vmem:[%s793_s24 + $0x1] sm:$0x1] %v806_v32  ;;  %v814_v34 = vsel %vm789_vm15, %v1485_v26, %v1487_v33 }
 0x2c6   : >>> { %816 = vst [vmem:[%s794_s27] sm:$0xff] %v814_v34 }
 0x2c9   : >> { %v364_v35 = vld [vmem:[%s358_s22] sm:$0xff] }
 0x2ca   : >> { %v365_v37 = vsel %vm1349_vm2, %v364_v35, 0.0  ;;  %v400_v39 = vld [vmem:[%s394_s11] sm:$0xff] }
 0x2cb   : >> { %v366_v41 = vmul.f32 %v365_v37, %v365_v37  ;;  %v401_v43 = vsel %vm1349_vm2, %v400_v39, 0.0 }
 0x2cc   : >> { %v383_v36 = vld [vmem:[%s377_s29] sm:$0xff]  ;;  %v402_v45 = vmul.f32 %v401_v43, %v401_v43 }
 0x2cd   : >> { %v384_v38 = vsel %vm1349_vm2, %v383_v36, 0.0  ;;  %v417_v40 = vld [vmem:[%s411_s15] sm:$0xff]  ;;  %v370_v48 = vsel %vm369_vm8, 0.0, %v366_v41 }
 0x2ce   : >> { %v385_v42 = vmul.f32 %v384_v38, %v384_v38  ;;  %v418_v44 = vsel %vm1349_vm2, %v417_v40, 0.0 }
 0x2cf   : >> { %v419_v47 = vmul.f32 %v418_v44, %v418_v44 }
 0x2d0   : >> { %v387_v46 = vadd.f32 %v385_v42, %v366_v41  ;;  %v386_v49 = vadd.f32 %v385_v42, %v370_v48 }
 0x2d1   : >> { %v423_v52 = vsel %vm422_vm9, 0.0, %v419_v47 }
 0x2d2   : >> { %v404_v50 = vadd.f32 %v402_v45, %v387_v46  ;;  %v403_v51 = vadd.f32 %v402_v45, %v386_v49 }
 0x2d4   : >> { %v425_v53 = vadd.f32 %v419_v47, %v404_v50  ;;  %v424_v54 = vadd.f32 %v423_v52, %v403_v51 }
 0x2d6   : >> { %426 = vadd.xlane.f32.xlu0 %v425_v53 }
 0x2da   : >> { %434 = vadd.xlane.f32.xlu0 %v424_v54 }
 0x363   : >> { %v427_v55 = vpop.xlane.xlu0 %426 }
 0x364   : >> { %v428_v56 = vrot.slane %v427_v55, 4 }
 0x366   : >> { %v429_v57 = vadd.f32 %v428_v56, %v427_v55 }
 0x367   : >> { %v435_v58 = vpop.xlane.xlu0 %434 }
 0x368   : >> { %v430_v59 = vrot.slane %v429_v57, 2  ;;  %v436_v60 = vrot.slane %v435_v58, 4 }
 0x36a   : >> { %v437_v61 = vadd.f32 %v436_v60, %v435_v58  ;;  %v431_v62 = vadd.f32 %v430_v59, %v429_v57 }
 0x36c   : >> { %v438_v63 = vrot.slane %v437_v61, 2  ;;  %v432_v1 = vrot.slane %v431_v62, 1 }
 0x36e   : >> { %v439_v0 = vadd.f32 %v438_v63, %v437_v61  ;;  %v433_v4 = vadd.f32 %v432_v1, %v431_v62 }
 0x370   : >> { %v440_v2 = vrot.slane %v439_v0, 1 }
 0x372   : >> { %v441_v3 = vadd.f32 %v440_v2, %v439_v0 }
 0x374   : >> { %1514 = vpush %v441_v3 }
 0x375   : >> { %1516 = vpush %v433_v4 }
 0x3a5   : >> { %s1515_s23 = spop %1514 }
 0x3a6   : >> { %s1517_s26 = spop %1516 }
 0x3a7   : >> { %s444_s24 = smul.f32 1e-10, %s1517_s26 }
 0x3a9   : >> { %p445_p11 = scmp.le.f32.partialorder %s1515_s23, %s444_s24 }
 0x3ab   : >> { %p447_p12 = por %p446_p10, %p445_p11 }
 0x3ad   : > { %895 = sbr.rel (!%p447_p12) target bundleno = 273 (0x111), region = 513 }
 0x3b4 PF: > { %s900_s28 = smov [#allocation10]  ;;  %v904_v5 = vmov %v1717_v5  ;;  %v907_v6 = vmov %v1719_v6  ;;  %s920_s16 = smov [#allocation13] }
 0x3b5   : > { %v924_v5 = vmov %v1717_v5  ;;  %v927_v6 = vmov %v1719_v6  ;;  %v908_v7 = vld [vmem:[%s900_s28] sm:$0xff]  ;;  %vm911_vm10 = vcmp.eq.s32.totalorder %v907_v6, %v904_v5  ;;  %s896_s27 = sand.u32 7, %s1678_s12   ;;  %s1984_s22 = scalar_lea.vmem [#allocation5], %s1715_s18 }
 0x3b6   : > { %vm931_vm11 = vcmp.eq.s32.totalorder %v927_v6, %v924_v5  ;;  %v912_v8 = vsel %vm911_vm10, %v908_v7, 0.0  ;;  %v928_v10 = vld [vmem:[%s920_s16] sm:$0xff]  ;;  %s897_s21 = scalar_lea.vmem %s283_s25, %s896_s27 [#allocation4]  ;;  %s899_s29 = scalar_lea.vmem %s1984_s22, %s896_s27 [#allocation5] }
 0x3b7   : > { %v913_v9 = vrot.slane %v912_v8, 4  ;;  %v932_v11 = vsel %vm931_vm11, %v928_v10, 0.0  ;;  %s901_s21 = smov %s897_s21  ;;  %s921_s29 = smov %s899_s29 }
 0x3b8   : > { %v933_v13 = vrot.slane %v932_v11, 4  ;;  %s967_s11 = sshrl.u32 (%p1692_p3), %s1678_s12, 3 }
 0x3b9   : > { %v914_v12 = vadd.f32 %v913_v9, %v912_v8  ;;  %s1502_s15 = sshll.u32 (%p1692_p3), %s967_s11, 3 }
 0x3ba   : > { %v934_v15 = vadd.f32 %v933_v13, %v932_v11  ;;  %s969_s24 = scalar_lea.vmem (%p1692_p3), %s1975_s4, %s1502_s15 }
 0x3bb   : > { %v915_v14 = vrot.slane %v914_v12, 2 }
 0x3bc   : > { %v935_v17 = vrot.slane %v934_v15, 2 }
 0x3bd   : > { %v916_v16 = vadd.f32 %v915_v14, %v914_v12 }
 0x3be   : > { %v936_v19 = vadd.f32 %v935_v17, %v934_v15  ;;  %966 = sbr.rel (!%p1692_p3) target bundleno = 972 (0x3cc), region = 174 }
 0x3bf   : > { %v917_v18 = vrot.slane %v916_v16, 1 }
 0x3c0   : > { %v937_v6 = vrot.slane %v936_v19, 1 }
 0x3c1   : > { %v918_v5 = vadd.f32 %v917_v18, %v916_v16 }
 0x3c2   : > { %v938_v20 = vadd.f32 %v937_v6, %v936_v19 }
 0x3c3   : > { %919 = vst [vmem:[%s901_s21] sm:$0x1] %v918_v5 }
 0x3c4   : > { %939 = vst [vmem:[%s921_s29] sm:$0x1] %v938_v20 }
 0x3ca   : > { %v997_v21 = vld [vmem:[%s283_s25] sm:$0xff] }
 0x3cb   : > { %998 = vst [vmem:[%s969_s24] sm:$0xff] %v997_v21 }
 0x3cc PF: > { %1004 = sbr.rel (!%p1692_p3) target bundleno = 980 (0x3d4), region = 212  ;;  %s1005_s28 = sshrl.u32 (%p1692_p3), %s1678_s12, 3 }
 0x3cd   : > { %s1985_s16 = scalar_lea.vmem (%p1692_p3), [#allocation5], %s1715_s18  ;;  %s1503_s27 = sshll.u32 (%p1692_p3), %s1005_s28, 3 }
 0x3ce   : > { %s1007_s25 = scalar_lea.vmem (%p1692_p3), %s1976_s5, %s1503_s27 }
 0x3d2   : > { %v1035_v22 = vld [vmem:[%s1985_s16] sm:$0xff] (%p1692_p3) }
 0x3d3   : > { %1036 = vst [vmem:[%s1007_s25] sm:$0xff] %v1035_v22 }
 0x3d4 PF: > { %s1504_s29 = sshll.u32 %s1678_s12, 3  ;;  %v1069_v23 = vld [vmem:[%s1721_s14] sm:$0xff]  ;;  %v1103_v24 = vld [vmem:[%s1724_s30] sm:$0xff] }
 0x3d5   : > { %v1137_v25 = vld [vmem:[%s1727_s17] sm:$0xff]  ;;  %s1041_s18 = scalar_lea.vmem %s1977_s6, %s1504_s29  ;;  %s1075_s26 = scalar_lea.vmem %s1978_s7, %s1504_s29  ;;  %v1171_v26 = vld [vmem:[%s1730_s20] sm:$0xff] }
 0x3d6   : > { %1070 = vst [vmem:[%s1041_s18] sm:$0xff] %v1069_v23  ;;  %1104 = vst [vmem:[%s1075_s26] sm:$0xff] %v1103_v24  ;;  %s1109_s16 = scalar_lea.vmem %s1979_s8, %s1504_s29  ;;  %s1143_s14 = scalar_lea.vmem %s1980_s9, %s1504_s29 }
 0x3d7   : > { %1138 = vst [vmem:[%s1109_s16] sm:$0xff] %v1137_v25  ;;  %1172 = vst [vmem:[%s1143_s14] sm:$0xff] %v1171_v26 }
 0x3d8 PF: > { %s1986_s17 = sld [smem:[#allocation23_spill]]  ;;  %p13_p13 = scmp.ge.s32.totalorder %s1681_s13, 10  }
 0x3d9   : > { %s1987_s30 = smov %s1595_s10  ;;  %s1989_s11 = smov %s1681_s13 }
 0x3da   :  { %15 = sbr.rel (!%p13_p13) target bundleno = 2 (0x2), region = 524 }
 0x3de   : > { %s1988_s10 = smov %s1986_s17 }

// kernel: closed_call.38
= control target key start
LH: loop header
LB: loop body
LE: loop exit
PB: predicated region body
PF: predicated region fallthrough
CT: control target
= control target key end

     0   :  { %vm63_vm0 = vcmask 130048   ;;  %v541_v9 = vmov 1966171168   ;;  %v30_v11 = vlaneseq  ;;  %s639_s0 = inlined_call_operand.vmem [shape: f32[2,16,16], index: 0, kind: input, shape index: {}]   ;;  %s640_s1 = inlined_call_operand.vmem [shape: f32[2,16], index: 1, kind: input, shape index: {}]   ;;  %s641_s2 = inlined_call_operand.vmem [shape: f32[2,16,16], index: 2, kind: output, shape index: {0}]   ;;  %s642_s3 = inlined_call_operand.vmem [shape: f32[2,16,16], index: 3, kind: output, shape index: {1}]  }
   0x1   :  { %v13_v0 = vld [vmem:[%s639_s0] sm:$0xff]  ;;  %v14_v1 = vld [vmem:[%s639_s0 + $0x8] sm:$0xff]  ;;  %vm570_vm1 = vmpackc.low %vm63_vm0, %vm63_vm0  ;;  %v28_v10 = vunpack.c.l.s4 %v541_v9 }
   0x2   :  { %v514_v3 = vpack.c.bf16 %v14_v1, %v13_v0  ;;  %v15_v4 = vld [vmem:[%s639_s0 + $0x10] sm:$0xff]  ;;  %v16_v5 = vld [vmem:[%s639_s0 + $0x18] sm:$0xff]  ;;  %v17_v6 = vld [vmem:[%s640_s1] sm:$0x3]  ;;  %v31_v13 = vshrl.u32 %v30_v11, 7 }
   0x3   :  { %v520_v7 = vpack.c.bf16 %v16_v5, %v15_v4  ;;  %v18_v8 = vmax.f32 %v17_v6, 1e-12  ;;  %v29_v12 = vunpack.c.0.s8 %v28_v10 }
   0x4   :  { %516 = vmatprep.subr.msk.bf16.mxu0 %vm570_vm1, %v514_v3  ;;  %v51_v24 = vsub.s32 0, %v31_v13 }
   0x5   :  { %519 = vmatpush3.bf16.xpose.msk.msra.mxu0 %vm570_vm1, %v514_v3  ;;  %522 = vmatprep.subr.msk.bf16.mxu1 %vm570_vm1, %v520_v7  ;;  %539 = vrsqrt.f32 %v18_v8  ;;  %v32_v14 = vsub.s32 %v29_v12, %v31_v13  ;;  %vm21_vm2 = vcmp.eq.f32.partialorder %v18_v8, inf  ;;  %v24_v16 = vand.u32 2147483648, %v18_v8 }
   0x6   :  { %525 = vmatpush3.bf16.xpose.msk.msra.mxu1 %vm570_vm1, %v520_v7  ;;  %528 = vmatprep.subr.msk.bf16.mxu0 %vm570_vm1, %v514_v3  ;;  %vm23_vm3 = vcmp.eq.f32.partialorder %v18_v8, 0.0 }
   0x7   :  { %534 = vmatprep.subr.msk.bf16.mxu1 %vm570_vm1, %v520_v7 }
   0xf   :  { %v540_v15 = vpop.eup %539 }
  0x10   :  { %v20_v17 = vmul.f32 %v540_v15, %v18_v8  ;;  %v250_v18 = vrot.slane %v540_v15, %v32_v14 }
  0x12   :  { %v22_v19 = vsel %vm21_vm2, %v18_v8, %v20_v17  ;;  %v251_v20 = vcombine.high %v250_v18, %v250_v18  ;;  %v258_v22 = vrot.slane %v250_v18, %v32_v14 }
  0x13   :  { %v25_v21 = vsel %vm23_vm3, %v24_v16, %v22_v19 }
  0x14   :  { %v33_v23 = vrot.slane %v25_v21, %v32_v14  ;;  %v265_v25 = vrot.slane %v251_v20, %v32_v14  ;;  %v269_v28 = vrot.slane %v258_v22, %v51_v24 }
  0x16   :  { %v41_v26 = vrot.slane %v33_v23, %v32_v14  ;;  %v34_v27 = vcombine.high %v33_v23, %v33_v23  ;;  %v273_v31 = vrot.slane %v265_v25, %v51_v24  ;;  %v276_v35 = vmul.f32 %v269_v28, %v13_v0 }
  0x17   :  { %v277_v39 = vmul.f32 %v269_v28, %v14_v1 }
  0x18   :  { %v52_v29 = vrot.slane %v41_v26, %v51_v24  ;;  %v48_v30 = vrot.slane %v34_v27, %v32_v14  ;;  %v278_v38 = vmul.f32 %v273_v31, %v15_v4  ;;  %v279_v40 = vmul.f32 %v273_v31, %v16_v5 }
  0x1a   :  { %v59_v32 = vmul.f32 %v52_v29, %v13_v0  ;;  %v60_v33 = vmul.f32 %v52_v29, %v14_v1  ;;  %v56_v34 = vrot.slane %v48_v30, %v51_v24 }
  0x1c   :  { %490 = vmatprep.mubr.msk.f32.mxu0 %vm63_vm0, %v59_v32  ;;  %v61_v36 = vmul.f32 %v56_v34, %v15_v4  ;;  %v62_v37 = vmul.f32 %v56_v34, %v16_v5 }
  0x1d   :  { %491 = vmatmul.mubr.msk.f32.vlgmr.msra.gmra.mrb[0].mxu0 %vm63_vm0, %v60_v33 }
  0x1e   :  { %497 = vmatprep.mubr.msk.f32.mxu1 %vm63_vm0, %v61_v36  ;;  %531 = vmatpush3.bf16.xpose.msk.msra.mxu0 %vm570_vm1, %v514_v3 }
  0x1f   :  { %498 = vmatmul.mubr.msk.f32.vlgmr.msra.gmra.mrb[0].mxu1 %vm63_vm0, %v62_v37  ;;  %504 = vmatprep.mubr.msk.f32.mxu0 %vm63_vm0, %v276_v35 }
  0x20   :  { %537 = vmatpush3.bf16.xpose.msk.msra.mxu1 %vm570_vm1, %v520_v7  ;;  %511 = vmatprep.mubr.msk.f32.mxu1 %vm63_vm0, %v278_v38 }
  0x25   :  { %505 = vmatmul.mubr.msk.f32.vlgmr.msra.gmra.mrb[2].mxu0 %vm63_vm0, %v277_v39 }
  0x27   :  { %512 = vmatmul.mubr.msk.f32.vlgmr.msra.gmra.mrb[2].mxu1 %vm63_vm0, %v279_v40 }
  0xf0   :  { %v492_v41 = vpop.f32.mrb[0].mxu0 }
  0xf1   :  { %239 = vst.msk [vmem:[%s641_s2 + $0x8] sm:$0xff] %vm63_vm0, %v492_v41  ;;  %v142_v42 = vpop.f32.mrb[1].mxu0 }
  0xf2   :  { %238 = vst.msk [vmem:[%s641_s2] sm:$0xff] %vm63_vm0, %v142_v42  ;;  %v499_v43 = vpop.f32.mrb[0].mxu1 }
  0xf3   :  { %241 = vst.msk [vmem:[%s641_s2 + $0x18] sm:$0xff] %vm63_vm0, %v499_v43  ;;  %v229_v44 = vpop.f32.mrb[1].mxu1 }
  0xf4   :  { %240 = vst.msk [vmem:[%s641_s2 + $0x10] sm:$0xff] %vm63_vm0, %v229_v44 }
  0xf8   :  { %v506_v45 = vpop.f32.mrb[2].mxu0 }
  0xf9   :  { %443 = vst.msk [vmem:[%s642_s3 + $0x8] sm:$0xff] %vm63_vm0, %v506_v45  ;;  %v352_v46 = vpop.f32.mrb[3].mxu0 }
  0xfa   :  { %442 = vst.msk [vmem:[%s642_s3] sm:$0xff] %vm63_vm0, %v352_v46  ;;  %v513_v47 = vpop.f32.mrb[2].mxu1 }
  0xfb   :  { %445 = vst.msk [vmem:[%s642_s3 + $0x18] sm:$0xff] %vm63_vm0, %v513_v47  ;;  %v433_v48 = vpop.f32.mrb[3].mxu1 }
  0xfc   :  { %444 = vst.msk [vmem:[%s642_s3 + $0x10] sm:$0xff] %vm63_vm0, %v433_v48 }

// kernel: closed_call.39
= control target key start
LH: loop header
LB: loop body
LE: loop exit
PB: predicated region body
PF: predicated region fallthrough
CT: control target
= control target key end

     0   :  { %vm43_vm0 = vcmask 130048   ;;  %s1925_s1 = inlined_call_operand.vmem [shape: f32[8,16,16], index: 1, kind: input, shape index: {}]   ;;  %s1926_s0 = inlined_call_operand.vmem [shape: f32[8,16,16], index: 0, kind: input, shape index: {}]   ;;  %s1927_s2 = inlined_call_operand.vmem [shape: f32[8,16,16], index: 2, kind: output, shape index: {}]  }
   0x1   :  { %v27_v0 = vld [vmem:[%s1925_s1] sm:$0xff]  ;;  %v28_v1 = vld [vmem:[%s1925_s1 + $0x8] sm:$0xff]  ;;  %v29_v2 = vld [vmem:[%s1925_s1 + $0x10] sm:$0xff] }
   0x2   :  { %v1584_v3 = vpack.c.bf16 %v28_v1, %v27_v0  ;;  %v30_v4 = vld [vmem:[%s1925_s1 + $0x18] sm:$0xff]  ;;  %v11_v5 = vld [vmem:[%s1926_s0] sm:$0xff]  ;;  %v13_v7 = vld [vmem:[%s1926_s0 + $0x10] sm:$0xff] }
   0x3   :  { %v1588_v6 = vpack.c.bf16 %v30_v4, %v29_v2  ;;  %1476 = vmatprep.mubr.msk.f32.mxu0 %vm43_vm0, %v11_v5  ;;  %v31_v8 = vld [vmem:[%s1925_s1 + $0x20] sm:$0xff]  ;;  %1483 = vmatprep.mubr.msk.f32.mxu1 %vm43_vm0, %v13_v7  ;;  %v32_v9 = vld [vmem:[%s1925_s1 + $0x28] sm:$0xff]  ;;  %v33_v10 = vld [vmem:[%s1925_s1 + $0x30] sm:$0xff] }
   0x4   :  { %1585 = vmatprep.subr.bf16.mxu0 %v1584_v3  ;;  %v34_v11 = vld [vmem:[%s1925_s1 + $0x38] sm:$0xff]  ;;  %v12_v12 = vld [vmem:[%s1926_s0 + $0x8] sm:$0xff]  ;;  %v1592_v14 = vpack.c.bf16 %v32_v9, %v31_v8  ;;  %v15_v16 = vld [vmem:[%s1926_s0 + $0x20] sm:$0xff] }
   0x5   :  { %1589 = vmatprep.subr.bf16.mxu1 %v1588_v6  ;;  %1587 = vmatpush3.bf16.msra.mxu0 %v1584_v3  ;;  %v14_v13 = vld [vmem:[%s1926_s0 + $0x18] sm:$0xff]  ;;  %v1596_v15 = vpack.c.bf16 %v34_v11, %v33_v10  ;;  %v17_v17 = vld [vmem:[%s1926_s0 + $0x30] sm:$0xff]  ;;  %v35_v18 = vld [vmem:[%s1925_s1 + $0x40] sm:$0xff]  ;;  %v1616_v44 = vpack.c.bf16 %v12_v12, %v11_v5 }
   0x6   :  { %1591 = vmatpush3.bf16.msra.mxu1 %v1588_v6  ;;  %v36_v19 = vld [vmem:[%s1925_s1 + $0x48] sm:$0xff]  ;;  %1593 = vmatprep.subr.bf16.mxu0 %v1592_v14  ;;  %v37_v22 = vld [vmem:[%s1925_s1 + $0x50] sm:$0xff]  ;;  %v38_v23 = vld [vmem:[%s1925_s1 + $0x58] sm:$0xff]  ;;  %v1622_v45 = vpack.c.bf16 %v14_v13, %v13_v7 }
   0x7   :  { %1597 = vmatprep.subr.bf16.mxu1 %v1596_v15  ;;  %v16_v20 = vld [vmem:[%s1926_s0 + $0x28] sm:$0xff]  ;;  %v1600_v21 = vpack.c.bf16 %v36_v19, %v35_v18  ;;  %v19_v24 = vld [vmem:[%s1926_s0 + $0x40] sm:$0xff]  ;;  %v18_v25 = vld [vmem:[%s1926_s0 + $0x38] sm:$0xff]  ;;  %v1604_v26 = vpack.c.bf16 %v38_v23, %v37_v22 }
   0x8   :  { %1477 = vmatmul.mubr.msk.f32.vlgmr.msra.gmra.mrb[0].mxu0 %vm43_vm0, %v12_v12  ;;  %v20_v27 = vld [vmem:[%s1926_s0 + $0x48] sm:$0xff]  ;;  %v21_v28 = vld [vmem:[%s1926_s0 + $0x50] sm:$0xff]  ;;  %v22_v29 = vld [vmem:[%s1926_s0 + $0x58] sm:$0xff]  ;;  %v1628_v47 = vpack.c.bf16 %v16_v20, %v15_v16  ;;  %v1634_v48 = vpack.c.bf16 %v18_v25, %v17_v17 }
   0x9   :  { %1484 = vmatmul.mubr.msk.f32.vlgmr.msra.gmra.mrb[0].mxu1 %vm43_vm0, %v14_v13  ;;  %1595 = vmatpush3.bf16.msra.mxu0 %v1592_v14  ;;  %v1755_v30 = vpack.c.bf16 %v20_v27, %v19_v24  ;;  %v1757_v31 = vpack.c.bf16 %v22_v29, %v21_v28  ;;  %v39_v32 = vld [vmem:[%s1925_s1 + $0x60] sm:$0xff]  ;;  %v40_v33 = vld [vmem:[%s1925_s1 + $0x68] sm:$0xff]  ;;  %v41_v34 = vld [vmem:[%s1925_s1 + $0x70] sm:$0xff] }
   0xa   :  { %1599 = vmatpush3.bf16.msra.mxu1 %v1596_v15  ;;  %1490 = vmatprep.mubr.msk.f32.mxu0 %vm43_vm0, %v15_v16  ;;  %v42_v35 = vld [vmem:[%s1925_s1 + $0x78] sm:$0xff]  ;;  %v23_v36 = vld [vmem:[%s1926_s0 + $0x60] sm:$0xff]  ;;  %v24_v37 = vld [vmem:[%s1926_s0 + $0x68] sm:$0xff]  ;;  %v1608_v38 = vpack.c.bf16 %v40_v33, %v39_v32 }
   0xb   :  { %1497 = vmatprep.mubr.msk.f32.mxu1 %vm43_vm0, %v17_v17  ;;  %1601 = vmatprep.subr.bf16.mxu0 %v1600_v21  ;;  %v1779_v39 = vpack.c.bf16 %v24_v37, %v23_v36  ;;  %v25_v40 = vld [vmem:[%s1926_s0 + $0x70] sm:$0xff]  ;;  %v26_v41 = vld [vmem:[%s1926_s0 + $0x78] sm:$0xff]  ;;  %v1612_v42 = vpack.c.bf16 %v42_v35, %v41_v34  ;;  %vm1796_vm1 = vmpackc.low %vm43_vm0, %vm43_vm0 }
   0xc   :  { %1491 = vmatmul.mubr.msk.f32.vlgmr.msra.gmra.mrb[2].mxu0 %vm43_vm0, %v16_v20  ;;  %1605 = vmatprep.subr.bf16.mxu1 %v1604_v26  ;;  %v1788_v43 = vpack.c.bf16 %v26_v41, %v25_v40 }
   0xd   :  { %1498 = vmatmul.mubr.msk.f32.vlgmr.msra.gmra.mrb[2].mxu1 %vm43_vm0, %v18_v25  ;;  %1603 = vmatpush3.bf16.msra.mxu0 %v1600_v21 }
   0xe   :  { %1607 = vmatpush3.bf16.msra.mxu1 %v1604_v26  ;;  %1504 = vmatprep.mubr.msk.f32.mxu0 %vm43_vm0, %v19_v24 }
   0xf   :  { %1511 = vmatprep.mubr.msk.f32.mxu1 %vm43_vm0, %v21_v28  ;;  %1609 = vmatprep.subr.bf16.mxu0 %v1608_v38 }
  0x10   :  { %1505 = vmatmul.mubr.msk.f32.vlgmr.msra.gmra.mrb[4].mxu0 %vm43_vm0, %v20_v27  ;;  %1613 = vmatprep.subr.bf16.mxu1 %v1612_v42 }
  0x11   :  { %1512 = vmatmul.mubr.msk.f32.vlgmr.msra.gmra.mrb[4].mxu1 %vm43_vm0, %v22_v29  ;;  %1611 = vmatpush3.bf16.msra.mxu0 %v1608_v38 }
  0x12   :  { %1615 = vmatpush3.bf16.msra.mxu1 %v1612_v42  ;;  %1518 = vmatprep.mubr.msk.f32.mxu0 %vm43_vm0, %v23_v36 }
  0x13   :  { %1525 = vmatprep.mubr.msk.f32.mxu1 %vm43_vm0, %v25_v40  ;;  %1618 = vmatprep.subr.msk.bf16.mxu0 %vm1796_vm1, %v1616_v44 }
  0x14   :  { %1519 = vmatmul.mubr.msk.f32.vlgmr.msra.gmra.mrb[6].mxu0 %vm43_vm0, %v24_v37  ;;  %1624 = vmatprep.subr.msk.bf16.mxu1 %vm1796_vm1, %v1622_v45 }
  0x15   :  { %1526 = vmatmul.mubr.msk.f32.vlgmr.msra.gmra.mrb[6].mxu1 %vm43_vm0, %v26_v41 }
  0x1a   :  { %1621 = vmatpush3.bf16.xpose.msk.msra.mxu0 %vm1796_vm1, %v1616_v44 }
  0x1b   :  { %1627 = vmatpush3.bf16.xpose.msk.msra.mxu1 %vm1796_vm1, %v1622_v45  ;;  %1630 = vmatprep.subr.msk.bf16.mxu0 %vm1796_vm1, %v1628_v47 }
  0x1c   :  { %1636 = vmatprep.subr.msk.bf16.mxu1 %vm1796_vm1, %v1634_v48 }
  0xdb   :  { %v1478_v49 = vpop.f32.mrb[0].mxu0 }
  0xdc   :  { %v1485_v50 = vpop.f32.mrb[0].mxu1  ;;  %v116_v51 = vpop.f32.mrb[1].mxu0 }
  0xdd   :  { %v197_v52 = vpop.f32.mrb[1].mxu1  ;;  %1532 = vmatprep.mubr.msk.f32.mxu0 %vm43_vm0, %v116_v51 }
  0xde   :  { %1539 = vmatprep.mubr.msk.f32.mxu1 %vm43_vm0, %v197_v52  ;;  %1533 = vmatmul.mubr.msk.f32.vlgmr.msra.gmra.mrb[8].mxu0 %vm43_vm0, %v1478_v49 }
  0xdf   :  { %1540 = vmatmul.mubr.msk.f32.vlgmr.msra.gmra.mrb[8].mxu1 %vm43_vm0, %v1485_v50  ;;  %1633 = vmatpush3.bf16.xpose.msk.msra.mxu0 %vm1796_vm1, %v1628_v47  ;;  %v1492_v53 = vpop.f32.mrb[2].mxu0 }
  0xe0   :  { %1639 = vmatpush3.bf16.xpose.msk.msra.mxu1 %vm1796_vm1, %v1634_v48  ;;  %v1499_v54 = vpop.f32.mrb[2].mxu1  ;;  %v278_v55 = vpop.f32.mrb[3].mxu0  ;;  %1642 = vmatprep.subr.msk.bf16.mxu0 %vm1796_vm1, %v1755_v30 }
  0xe1   :  { %v359_v56 = vpop.f32.mrb[3].mxu1  ;;  %1546 = vmatprep.mubr.msk.f32.mxu0 %vm43_vm0, %v278_v55  ;;  %1648 = vmatprep.subr.msk.bf16.mxu1 %vm1796_vm1, %v1757_v31 }
  0xe2   :  { %1553 = vmatprep.mubr.msk.f32.mxu1 %vm43_vm0, %v359_v56 }
  0xe3   :  { %v1506_v57 = vpop.f32.mrb[4].mxu0 }
  0xe4   :  { %v1513_v58 = vpop.f32.mrb[4].mxu1  ;;  %v440_v59 = vpop.f32.mrb[5].mxu0 }
  0xe5   :  { %v521_v60 = vpop.f32.mrb[5].mxu1 }
  0xe6   :  { %1547 = vmatmul.mubr.msk.f32.vlgmr.msra.gmra.mrb[10].mxu0 %vm43_vm0, %v1492_v53 }
  0xe7   :  { %1554 = vmatmul.mubr.msk.f32.vlgmr.msra.gmra.mrb[10].mxu1 %vm43_vm0, %v1499_v54  ;;  %1645 = vmatpush3.bf16.xpose.msk.msra.mxu0 %vm1796_vm1, %v1755_v30  ;;  %v1520_v61 = vpop.f32.mrb[6].mxu0 }
  0xe8   :  { %1651 = vmatpush3.bf16.xpose.msk.msra.mxu1 %vm1796_vm1, %v1757_v31  ;;  %1560 = vmatprep.mubr.msk.f32.mxu0 %vm43_vm0, %v440_v59  ;;  %v1527_v62 = vpop.f32.mrb[6].mxu1  ;;  %v602_v63 = vpop.f32.mrb[7].mxu0 }
  0xe9   :  { %1567 = vmatprep.mubr.msk.f32.mxu1 %vm43_vm0, %v521_v60  ;;  %1654 = vmatprep.subr.msk.bf16.mxu0 %vm1796_vm1, %v1779_v39  ;;  %v683_v0 = vpop.f32.mrb[7].mxu1 }
  0xea   :  { %1660 = vmatprep.subr.msk.bf16.mxu1 %vm1796_vm1, %v1788_v43 }
  0xee   :  { %1561 = vmatmul.mubr.msk.f32.vlgmr.msra.gmra.mrb[12].mxu0 %vm43_vm0, %v1506_v57 }
  0xef   :  { %1568 = vmatmul.mubr.msk.f32.vlgmr.msra.gmra.mrb[12].mxu1 %vm43_vm0, %v1513_v58  ;;  %1657 = vmatpush3.bf16.xpose.msk.msra.mxu0 %vm1796_vm1, %v1779_v39 }
  0xf0   :  { %1663 = vmatpush3.bf16.xpose.msk.msra.mxu1 %vm1796_vm1, %v1788_v43  ;;  %1574 = vmatprep.mubr.msk.f32.mxu0 %vm43_vm0, %v602_v63 }
  0xf1   :  { %1581 = vmatprep.mubr.msk.f32.mxu1 %vm43_vm0, %v683_v0 }
  0xf6   :  { %1575 = vmatmul.mubr.msk.f32.vlgmr.msra.gmra.mrb[14].mxu0 %vm43_vm0, %v1520_v61 }
  0xf7   :  { %1582 = vmatmul.mubr.msk.f32.vlgmr.msra.gmra.mrb[14].mxu1 %vm43_vm0, %v1527_v62 }
 0x1b1   :  { %v1534_v1 = vpop.f32.mrb[8].mxu0 }
 0x1b2   :  { %1341 = vst.msk [vmem:[%s1927_s2 + $0x8] sm:$0xff] %vm43_vm0, %v1534_v1  ;;  %v1541_v2 = vpop.f32.mrb[8].mxu1  ;;  %v764_v3 = vpop.f32.mrb[9].mxu0 }
 0x1b3   :  { %1343 = vst.msk [vmem:[%s1927_s2 + $0x18] sm:$0xff] %vm43_vm0, %v1541_v2  ;;  %1340 = vst.msk [vmem:[%s1927_s2] sm:$0xff] %vm43_vm0, %v764_v3  ;;  %v845_v4 = vpop.f32.mrb[9].mxu1 }
 0x1b4   :  { %1342 = vst.msk [vmem:[%s1927_s2 + $0x10] sm:$0xff] %vm43_vm0, %v845_v4 }
 0x1b9   :  { %v1548_v5 = vpop.f32.mrb[10].mxu0 }
 0x1ba   :  { %1345 = vst.msk [vmem:[%s1927_s2 + $0x28] sm:$0xff] %vm43_vm0, %v1548_v5  ;;  %v1555_v6 = vpop.f32.mrb[10].mxu1  ;;  %v926_v7 = vpop.f32.mrb[11].mxu0 }
 0x1bb   :  { %1347 = vst.msk [vmem:[%s1927_s2 + $0x38] sm:$0xff] %vm43_vm0, %v1555_v6  ;;  %1344 = vst.msk [vmem:[%s1927_s2 + $0x20] sm:$0xff] %vm43_vm0, %v926_v7  ;;  %v1007_v8 = vpop.f32.mrb[11].mxu1 }
 0x1bc   :  { %1346 = vst.msk [vmem:[%s1927_s2 + $0x30] sm:$0xff] %vm43_vm0, %v1007_v8 }
 0x1c1   :  { %v1562_v9 = vpop.f32.mrb[12].mxu0 }
 0x1c2   :  { %1349 = vst.msk [vmem:[%s1927_s2 + $0x48] sm:$0xff] %vm43_vm0, %v1562_v9  ;;  %v1569_v10 = vpop.f32.mrb[12].mxu1  ;;  %v1088_v11 = vpop.f32.mrb[13].mxu0 }
 0x1c3   :  { %1351 = vst.msk [vmem:[%s1927_s2 + $0x58] sm:$0xff] %vm43_vm0, %v1569_v10  ;;  %1348 = vst.msk [vmem:[%s1927_s2 + $0x40] sm:$0xff] %vm43_vm0, %v1088_v11  ;;  %v1169_v12 = vpop.f32.mrb[13].mxu1 }
 0x1c4   :  { %1350 = vst.msk [vmem:[%s1927_s2 + $0x50] sm:$0xff] %vm43_vm0, %v1169_v12 }
 0x1c9   :  { %v1576_v13 = vpop.f32.mrb[14].mxu0 }
 0x1ca   :  { %1353 = vst.msk [vmem:[%s1927_s2 + $0x68] sm:$0xff] %vm43_vm0, %v1576_v13  ;;  %v1583_v14 = vpop.f32.mrb[14].mxu1  ;;  %v1250_v15 = vpop.f32.mrb[15].mxu0 }
 0x1cb   :  { %1355 = vst.msk [vmem:[%s1927_s2 + $0x78] sm:$0xff] %vm43_vm0, %v1583_v14  ;;  %1352 = vst.msk [vmem:[%s1927_s2 + $0x60] sm:$0xff] %vm43_vm0, %v1250_v15  ;;  %v1331_v16 = vpop.f32.mrb[15].mxu1 }
 0x1cc   :  { %1354 = vst.msk [vmem:[%s1927_s2 + $0x70] sm:$0xff] %vm43_vm0, %v1331_v16 }

// kernel: closed_call.41
= control target key start
LH: loop header
LB: loop body
LE: loop exit
PB: predicated region body
PF: predicated region fallthrough
CT: control target
= control target key end

     0   :  { %vm58_vm0 = vcmask 130048   ;;  %v690_v8 = vmov 1966171168   ;;  %v25_v10 = vlaneseq  ;;  %s788_s0 = inlined_call_operand.vmem [shape: f32[2,16,16], index: 0, kind: input, shape index: {}]   ;;  %s789_s1 = inlined_call_operand.vmem [shape: f32[2,16], index: 1, kind: input, shape index: {}]   ;;  %s790_s2 = inlined_call_operand.vmem [shape: f32[2,16,16], index: 2, kind: input, shape index: {}]   ;;  %s791_s3 = inlined_call_operand.vmem [shape: f32[2,16,16], index: 3, kind: output, shape index: {}]  }
   0x1   :  { %v14_v0 = vld [vmem:[%s788_s0] sm:$0xff]  ;;  %v15_v1 = vld [vmem:[%s788_s0 + $0x8] sm:$0xff]  ;;  %vm722_vm1 = vmpackc.low %vm58_vm0, %vm58_vm0  ;;  %v23_v9 = vunpack.c.l.s4 %v690_v8 }
   0x2   :  { %v18_v2 = vld [vmem:[%s789_s1] sm:$0x3]  ;;  %v655_v4 = vpack.c.bf16 %v15_v1, %v14_v0  ;;  %v16_v6 = vld [vmem:[%s788_s0 + $0x10] sm:$0xff]  ;;  %v17_v7 = vld [vmem:[%s788_s0 + $0x18] sm:$0xff]  ;;  %v26_v13 = vshrl.u32 %v25_v10, 7 }
   0x3   :  { %v19_v3 = vmul.f32 1.442695, %v18_v2  ;;  %v661_v11 = vpack.c.bf16 %v17_v7, %v16_v6  ;;  %v24_v12 = vunpack.c.0.s8 %v23_v9  ;;  %v233_v27 = vld [vmem:[%s790_s2] sm:$0xff]  ;;  %v234_v28 = vld [vmem:[%s790_s2 + $0x8] sm:$0xff]  ;;  %v235_v30 = vld [vmem:[%s790_s2 + $0x10] sm:$0xff] }
   0x4   :  { %657 = vmatprep.subr.msk.bf16.mxu0 %vm722_vm1, %v655_v4  ;;  %v46_v17 = vsub.s32 0, %v26_v13  ;;  %v675_v29 = vpack.c.bf16 %v234_v28, %v233_v27  ;;  %v236_v31 = vld [vmem:[%s790_s2 + $0x18] sm:$0xff] }
   0x5   :  { %688 = vpow2.f32 %v19_v3  ;;  %660 = vmatpush3.bf16.xpose.msk.msra.mxu0 %vm722_vm1, %v655_v4  ;;  %663 = vmatprep.subr.msk.bf16.mxu1 %vm722_vm1, %v661_v11  ;;  %v27_v14 = vsub.s32 %v24_v12, %v26_v13  ;;  %v681_v32 = vpack.c.bf16 %v236_v31, %v235_v30 }
   0x6   :  { %666 = vmatpush3.bf16.xpose.msk.msra.mxu1 %vm722_vm1, %v661_v11 }
   0xf   :  { %v689_v15 = vpop.eup %688 }
  0x10   :  { %v28_v16 = vrot.slane %v689_v15, %v27_v14 }
  0x12   :  { %v36_v18 = vrot.slane %v28_v16, %v27_v14  ;;  %v29_v19 = vcombine.high %v28_v16, %v28_v16 }
  0x14   :  { %v47_v20 = vrot.slane %v36_v18, %v46_v17  ;;  %v43_v21 = vrot.slane %v29_v19, %v27_v14 }
  0x16   :  { %v55_v22 = vmul.f32 %v47_v20, %v15_v1  ;;  %v51_v23 = vrot.slane %v43_v21, %v46_v17  ;;  %v54_v24 = vmul.f32 %v47_v20, %v14_v0 }
  0x18   :  { %v57_v25 = vmul.f32 %v51_v23, %v17_v7  ;;  %617 = vmatprep.mubr.msk.f32.mxu0 %vm58_vm0, %v54_v24  ;;  %v56_v26 = vmul.f32 %v51_v23, %v16_v6 }
  0x19   :  { %618 = vmatmul.mubr.msk.f32.vlgmr.msra.gmra.mrb[0].mxu0 %vm58_vm0, %v55_v22 }
  0x1a   :  { %624 = vmatprep.mubr.msk.f32.mxu1 %vm58_vm0, %v56_v26  ;;  %631 = vmatprep.mubr.msk.f32.mxu0 %vm58_vm0, %v233_v27 }
  0x1b   :  { %625 = vmatmul.mubr.msk.f32.vlgmr.msra.gmra.mrb[0].mxu1 %vm58_vm0, %v57_v25 }
  0x1c   :  { %638 = vmatprep.mubr.msk.f32.mxu1 %vm58_vm0, %v235_v30 }
  0xec   :  { %v619_v33 = vpop.f32.mrb[0].mxu0 }
  0xed   :  { %v137_v34 = vpop.f32.mrb[1].mxu0 }
  0xee   :  { %v667_v35 = vpack.c.bf16 %v619_v33, %v137_v34  ;;  %v626_v36 = vpop.f32.mrb[0].mxu1 }
  0xef   :  { %v224_v37 = vpop.f32.mrb[1].mxu1 }
  0xf0   :  { %v671_v38 = vpack.c.bf16 %v626_v36, %v224_v37  ;;  %668 = vmatprep.subr.bf16.mxu0 %v667_v35 }
  0xf1   :  { %670 = vmatpush3.bf16.msra.mxu0 %v667_v35 }
  0xf2   :  { %672 = vmatprep.subr.bf16.mxu1 %v671_v38  ;;  %677 = vmatprep.subr.msk.bf16.mxu0 %vm722_vm1, %v675_v29 }
  0xf3   :  { %674 = vmatpush3.bf16.msra.mxu1 %v671_v38 }
  0xf4   :  { %632 = vmatmul.mubr.msk.f32.vlgmr.msra.gmra.mrb[2].mxu0 %vm58_vm0, %v234_v28  ;;  %683 = vmatprep.subr.msk.bf16.mxu1 %vm722_vm1, %v681_v32 }
  0xf6   :  { %639 = vmatmul.mubr.msk.f32.vlgmr.msra.gmra.mrb[2].mxu1 %vm58_vm0, %v236_v31 }
  0xfa   :  { %680 = vmatpush3.bf16.xpose.msk.msra.mxu0 %vm722_vm1, %v675_v29 }
  0xfc   :  { %686 = vmatpush3.bf16.xpose.msk.msra.mxu1 %vm722_vm1, %v681_v32 }
 0x1c7   :  { %v633_v39 = vpop.f32.mrb[2].mxu0 }
 0x1c8   :  { %v309_v40 = vpop.f32.mrb[3].mxu0 }
 0x1c9   :  { %v640_v41 = vpop.f32.mrb[2].mxu1  ;;  %645 = vmatprep.mubr.msk.f32.mxu0 %vm58_vm0, %v309_v40 }
 0x1ca   :  { %v390_v42 = vpop.f32.mrb[3].mxu1  ;;  %646 = vmatmul.mubr.msk.f32.vlgmr.msra.gmra.mrb[4].mxu0 %vm58_vm0, %v633_v39 }
 0x1cb   :  { %652 = vmatprep.mubr.msk.f32.mxu1 %vm58_vm0, %v390_v42 }
 0x1cc   :  { %653 = vmatmul.mubr.msk.f32.vlgmr.msra.gmra.mrb[4].mxu1 %vm58_vm0, %v640_v41 }
 0x29d   :  { %v647_v43 = vpop.f32.mrb[4].mxu0 }
 0x29e   :  { %562 = vst.msk [vmem:[%s791_s3 + $0x8] sm:$0xff] %vm58_vm0, %v647_v43  ;;  %v471_v44 = vpop.f32.mrb[5].mxu0 }
 0x29f   :  { %561 = vst.msk [vmem:[%s791_s3] sm:$0xff] %vm58_vm0, %v471_v44  ;;  %v654_v45 = vpop.f32.mrb[4].mxu1 }
 0x2a0   :  { %564 = vst.msk [vmem:[%s791_s3 + $0x18] sm:$0xff] %vm58_vm0, %v654_v45  ;;  %v552_v46 = vpop.f32.mrb[5].mxu1 }
 0x2a1   :  { %563 = vst.msk [vmem:[%s791_s3 + $0x10] sm:$0xff] %vm58_vm0, %v552_v46 }

// kernel: closed_call.40
= control target key start
LH: loop header
LB: loop body
LE: loop exit
PB: predicated region body
PF: predicated region fallthrough
CT: control target
= control target key end

     0   :  { %v39_v0 = vlaneseq  ;;  %vm140_vm0 = vcmask 130048   ;;  %v1264_v4 = vmov 1966171168   ;;  %v1265_v6 = vmov 1   ;;  %s1524_s0 = inlined_call_operand.vmem [shape: f32[8,16,16], index: 0, kind: input, shape index: {}]   ;;  %s1525_s1 = inlined_call_operand.vmem [shape: f32[8,16], index: 1, kind: input, shape index: {}]   ;;  %s1526_s2 = inlined_call_operand.vmem [shape: f32[8,2], index: 2, kind: input, shape index: {}]   ;;  %s1527_s3 = inlined_call_operand.vmem [shape: f32[2,16,16], index: 3, kind: output, shape index: {}]  }
   0x1   :  { %v1290_v1 = vld [vmem:[%s1524_s0] sm:$0xff]  ;;  %v1295_v2 = vld [vmem:[%s1524_s0 + $0x8] sm:$0xff]  ;;  %v37_v5 = vunpack.c.l.s4 %v1264_v4  ;;  %1259 = vset.pattern.permute.xlu1 %v1265_v6  ;;  %vm1305_vm1 = vmpackc.low %vm140_vm0, %vm140_vm0  ;;  %v1266_v13 = vmov 0  }
   0x2   :  { %v30_v3 = vld [vmem:[%s1525_s1] sm:$0xff]  ;;  %v40_v8 = vshrl.u32 %v39_v0, 7  ;;  %v1207_v9 = vpack.c.bf16 %v1295_v2, %v1290_v1  ;;  %v1312_v11 = vld [vmem:[%s1524_s0 + $0x10] sm:$0xff]  ;;  %v17_v12 = vld [vmem:[%s1524_s0 + $0x18] sm:$0xff]  ;;  %1258 = vset.pattern.permute.xlu0 %v1266_v13 }
   0x3   :  { %v31_v7 = vmax.f32 %v30_v3, 1e-12  ;;  %v38_v14 = vunpack.c.0.s8 %v37_v5  ;;  %v1213_v15 = vpack.c.bf16 %v17_v12, %v1312_v11  ;;  %v18_v16 = vld [vmem:[%s1524_s0 + $0x20] sm:$0xff]  ;;  %v1324_v17 = vld [vmem:[%s1524_s0 + $0x28] sm:$0xff]  ;;  %v1329_v18 = vld [vmem:[%s1524_s0 + $0x30] sm:$0xff] }
   0x4   :  { %1209 = vmatprep.subr.msk.bf16.mxu0 %vm1305_vm1, %v1207_v9  ;;  %v1219_v19 = vpack.c.bf16 %v1324_v17, %v18_v16  ;;  %v1337_v20 = vld [vmem:[%s1524_s0 + $0x38] sm:$0xff]  ;;  %v837_v23 = vld [vmem:[%s1526_s2] sm:$0xff]  ;;  %v1357_v26 = vsub.s32 0, %v40_v8  ;;  %v23_v46 = vld [vmem:[%s1524_s0 + $0x48] sm:$0xff] }
   0x5   :  { %1262 = vlog2.f32 %v31_v7  ;;  %1212 = vmatpush3.bf16.xpose.msk.msra.mxu0 %vm1305_vm1, %v1207_v9  ;;  %1215 = vmatprep.subr.msk.bf16.mxu1 %vm1305_vm1, %v1213_v15  ;;  %v1225_v21 = vpack.c.bf16 %v1337_v20, %v1329_v18  ;;  %v1345_v22 = vsub.s32 %v38_v14, %v40_v8  ;;  %v839_v25 = vcombine.high %v837_v23, %v837_v23  ;;  %v22_v45 = vld [vmem:[%s1524_s0 + $0x40] sm:$0xff]  ;;  %v24_v54 = vld [vmem:[%s1524_s0 + $0x50] sm:$0xff]  ;;  %v25_v55 = vld [vmem:[%s1524_s0 + $0x58] sm:$0xff] }
   0x6   :  { %1218 = vmatpush3.bf16.xpose.msk.msra.mxu1 %vm1305_vm1, %v1213_v15  ;;  %1221 = vmatprep.subr.msk.bf16.mxu0 %vm1305_vm1, %v1219_v19  ;;  %v1231_v57 = vpack.c.bf16 %v23_v46, %v22_v45  ;;  %v1237_v63 = vpack.c.bf16 %v25_v55, %v24_v54  ;;  %v26_v4 = vld [vmem:[%s1524_s0 + $0x60] sm:$0xff]  ;;  %v27_v5 = vld [vmem:[%s1524_s0 + $0x68] sm:$0xff]  ;;  %v28_v13 = vld [vmem:[%s1524_s0 + $0x70] sm:$0xff] }
   0x7   :  { %1227 = vmatprep.subr.msk.bf16.mxu1 %vm1305_vm1, %v1225_v21  ;;  %v846_v24 = vrot.slane %v837_v23, %v1345_v22  ;;  %v1361_v29 = vrot.slane %v839_v25, %v1345_v22  ;;  %v29_v14 = vld [vmem:[%s1524_s0 + $0x78] sm:$0xff] }
   0x9   :  { %v862_v27 = vrot.slane %v846_v24, %v1345_v22  ;;  %v854_v28 = vcombine.high %v846_v24, %v846_v24  ;;  %v1366_v31 = vrot.slane %v1361_v29, %v1345_v22  ;;  %v855_v9 = vcombine.high %v1361_v29, %v1361_v29 }
   0xb   :  { %v891_v30 = vrot.slane %v862_v27, %v1357_v26  ;;  %v907_v33 = vrot.slane %v1366_v31, %v1357_v26  ;;  %v1371_v34 = vrot.slane %v854_v28, %v1345_v22  ;;  %v884_v49 = vcombine.high %v862_v27, %v862_v27 }
   0xc   :  { %v883_v23 = vrot.slane %v855_v9, %v1345_v22  ;;  %v885_v27 = vcombine.high %v1366_v31, %v1366_v31 }
   0xd   :  { %1001 = vperm.xlu1 %1259, %v891_v30   ;;  %921 = vperm.xlu0 %1258, %v891_v30   ;;  %v895_v38 = vrot.slane %v1371_v34, %v1357_v26  ;;  %v886_v8 = vcombine.high %v1371_v34, %v1371_v34 }
   0xe   :  { %v911_v25 = vrot.slane %v883_v23, %v1357_v26 }
   0xf   :  { %v1263_v32 = vpop.eup %1262 }
  0x10   :  { %v33_v35 = vmul.f32 0.6931472, %v1263_v32  ;;  %v915_v32 = vrot.slane %v885_v27, %v1357_v26 }
  0x11   :  { %1017 = vperm.xlu1 %1259, %v907_v33   ;;  %937 = vperm.xlu0 %1258, %v907_v33   ;;  %v887_v33 = vcombine.high %v883_v23, %v883_v23 }
  0x12   :  { %v35_v36 = vcombine.high %v33_v35, %v33_v35  ;;  %v42_v37 = vrot.slane %v33_v35, %v1345_v22 }
  0x13   :  { %v919_v34 = vrot.slane %v887_v33, %v1357_v26 }
  0x14   :  { %v58_v39 = vrot.slane %v42_v37, %v1345_v22  ;;  %v50_v40 = vcombine.high %v42_v37, %v42_v37  ;;  %v49_v41 = vrot.slane %v35_v36, %v1345_v22 }
  0x15   :  { %1005 = vperm.xlu1 %1259, %v895_v38   ;;  %925 = vperm.xlu0 %1258, %v895_v38  }
  0x16   :  { %v80_v42 = vcombine.high %v58_v39, %v58_v39  ;;  %v87_v43 = vrot.slane %v58_v39, %v1357_v26  ;;  %v72_v44 = vrot.slane %v50_v40, %v1345_v22  ;;  %v65_v47 = vrot.slane %v49_v41, %v1345_v22 }
  0x17   :  { %v51_v48 = vcombine.high %v49_v41, %v49_v41 }
  0x18   :  { %v125_v50 = vmul.f32 %v87_v43, %v1295_v2  ;;  %v82_v51 = vcombine.high %v72_v44, %v72_v44  ;;  %v91_v52 = vrot.slane %v72_v44, %v1357_v26  ;;  %v124_v53 = vmul.f32 %v87_v43, %v1290_v1 }
  0x19   :  { %v95_v56 = vrot.slane %v80_v42, %v1357_v26  ;;  %v79_v61 = vrot.slane %v51_v48, %v1345_v22  ;;  %v103_v0 = vrot.slane %v65_v47, %v1357_v26  ;;  %v899_v2 = vrot.slane %v884_v49, %v1357_v26 }
  0x1a   :  { %v127_v58 = vmul.f32 %v91_v52, %v17_v12  ;;  %1155 = vmatprep.mubr.msk.f32.mxu0 %vm140_vm0, %v124_v53  ;;  %v126_v59 = vmul.f32 %v91_v52, %v1312_v11  ;;  %v99_v60 = vrot.slane %v82_v51, %v1357_v26  ;;  %v81_v12 = vcombine.high %v65_v47, %v65_v47 }
  0x1b   :  { %1156 = vmatmul.mubr.msk.f32.vlgmr.msra.gmra.mrb[0].mxu0 %vm140_vm0, %v125_v50  ;;  %v128_v62 = vmul.f32 %v95_v56, %v18_v16  ;;  %v107_v3 = vrot.slane %v79_v61, %v1357_v26  ;;  %v129_v7 = vmul.f32 %v95_v56, %v1324_v17  ;;  %v132_v11 = vmul.f32 %v103_v0, %v22_v45 }
  0x1c   :  { %1224 = vmatpush3.bf16.xpose.msk.msra.mxu0 %vm1305_vm1, %v1219_v19  ;;  %1162 = vmatprep.mubr.msk.f32.mxu1 %vm140_vm0, %v126_v59  ;;  %v130_v1 = vmul.f32 %v99_v60, %v1329_v18  ;;  %v131_v15 = vmul.f32 %v99_v60, %v1337_v20  ;;  %v1243_v16 = vpack.c.bf16 %v27_v5, %v26_v4 }
  0x1d   :  { %1163 = vmatmul.mubr.msk.f32.vlgmr.msra.gmra.mrb[0].mxu1 %vm140_vm0, %v127_v58  ;;  %1169 = vmatprep.mubr.msk.f32.mxu0 %vm140_vm0, %v128_v62  ;;  %v134_v17 = vmul.f32 %v107_v3, %v24_v54  ;;  %v83_v18 = vcombine.high %v79_v61, %v79_v61  ;;  %v1249_v19 = vpack.c.bf16 %v29_v14, %v28_v13 }
  0x1e   :  { %1230 = vmatpush3.bf16.xpose.msk.msra.mxu1 %vm1305_vm1, %v1225_v21  ;;  %1233 = vmatprep.subr.msk.bf16.mxu0 %vm1305_vm1, %v1231_v57  ;;  %v903_v21 = vrot.slane %v886_v8, %v1357_v26  ;;  %v111_v24 = vrot.slane %v81_v12, %v1357_v26  ;;  %v133_v22 = vmul.f32 %v103_v0, %v23_v46 }
  0x1f   :  { %1176 = vmatprep.mubr.msk.f32.mxu1 %vm140_vm0, %v130_v1  ;;  %1239 = vmatprep.subr.msk.bf16.mxu1 %vm1305_vm1, %v1237_v63  ;;  %v115_v20 = vrot.slane %v83_v18, %v1357_v26  ;;  %v135_v29 = vmul.f32 %v107_v3, %v25_v55 }
  0x20   :  { %1009 = vperm.xlu1 %1259, %v899_v2   ;;  %929 = vperm.xlu0 %1258, %v899_v2   ;;  %v136_v28 = vmul.f32 %v111_v24, %v26_v4  ;;  %v137_v31 = vmul.f32 %v111_v24, %v27_v5 }
  0x21   :  { %v138_v30 = vmul.f32 %v115_v20, %v28_v13  ;;  %v139_v35 = vmul.f32 %v115_v20, %v29_v14 }
  0x23   :  { %1170 = vmatmul.mubr.msk.f32.vlgmr.msra.gmra.mrb[2].mxu0 %vm140_vm0, %v129_v7 }
  0x24   :  { %1236 = vmatpush3.bf16.xpose.msk.msra.mxu0 %vm1305_vm1, %v1231_v57  ;;  %1183 = vmatprep.mubr.msk.f32.mxu0 %vm140_vm0, %v132_v11 }
  0x25   :  { %1177 = vmatmul.mubr.msk.f32.vlgmr.msra.gmra.mrb[2].mxu1 %vm140_vm0, %v131_v15  ;;  %1245 = vmatprep.subr.msk.bf16.mxu0 %vm1305_vm1, %v1243_v16 }
  0x26   :  { %1242 = vmatpush3.bf16.xpose.msk.msra.mxu1 %vm1305_vm1, %v1237_v63  ;;  %1190 = vmatprep.mubr.msk.f32.mxu1 %vm140_vm0, %v134_v17 }
  0x27   :  { %1251 = vmatprep.subr.msk.bf16.mxu1 %vm1305_vm1, %v1249_v19  ;;  %1013 = vperm.xlu1 %1259, %v903_v21  }
  0x28   :  { %933 = vperm.xlu0 %1258, %v903_v21  }
  0x2b   :  { %1184 = vmatmul.mubr.msk.f32.vlgmr.msra.gmra.mrb[4].mxu0 %vm140_vm0, %v133_v22  ;;  %1021 = vperm.xlu1 %1259, %v911_v25  }
  0x2c   :  { %1248 = vmatpush3.bf16.xpose.msk.msra.mxu0 %vm1305_vm1, %v1243_v16  ;;  %1197 = vmatprep.mubr.msk.f32.mxu0 %vm140_vm0, %v136_v28 }
  0x2d   :  { %1191 = vmatmul.mubr.msk.f32.vlgmr.msra.gmra.mrb[4].mxu1 %vm140_vm0, %v135_v29  ;;  %941 = vperm.xlu0 %1258, %v911_v25  }
  0x2e   :  { %1254 = vmatpush3.bf16.xpose.msk.msra.mxu1 %vm1305_vm1, %v1249_v19  ;;  %1204 = vmatprep.mubr.msk.f32.mxu1 %vm140_vm0, %v138_v30 }
  0x2f   :  { %1025 = vperm.xlu1 %1259, %v915_v32  }
  0x31   :  { %945 = vperm.xlu0 %1258, %v915_v32  }
  0x33   :  { %1198 = vmatmul.mubr.msk.f32.vlgmr.msra.gmra.mrb[6].mxu0 %vm140_vm0, %v137_v31  ;;  %1029 = vperm.xlu1 %1259, %v919_v34  }
  0x35   :  { %1205 = vmatmul.mubr.msk.f32.vlgmr.msra.gmra.mrb[6].mxu1 %vm140_vm0, %v139_v35  ;;  %949 = vperm.xlu0 %1258, %v919_v34  }
  0x39   :  { %1260 = vset.pattern.permute.xlu0 %v1265_v6 }
  0x8c   :  { %v1002_v36 = vpop.permute.xlu1 %1001  ;;  %v922_v37 = vpop.permute.xlu0 %921 }
  0x90   :  { %v1468_v10 = vpop.permute.xlu1 %1017  ;;  %v1470_v38 = vpop.permute.xlu0 %937 }
  0x94   :  { %v1006_v39 = vpop.permute.xlu1 %1005  ;;  %v926_v40 = vpop.permute.xlu0 %925 }
  0x9f   :  { %v1010_v26 = vpop.permute.xlu1 %1009  ;;  %v930_v45 = vpop.permute.xlu0 %929 }
  0xa6   :  { %v1014_v63 = vpop.permute.xlu1 %1013 }
  0xa7   :  { %v934_v2 = vpop.permute.xlu0 %933 }
  0xaa   :  { %v1022_v23 = vpop.permute.xlu1 %1021 }
  0xac   :  { %v942_v27 = vpop.permute.xlu0 %941 }
  0xee   :  { %v1157_v41 = vpop.f32.mrb[0].mxu0 }
  0xef   :  { %v953_v42 = vmul.f32 %v1157_v41, %v922_v37  ;;  %v1033_v43 = vmul.f32 %v1157_v41, %v1002_v36  ;;  %v219_v44 = vpop.f32.mrb[1].mxu0 }
  0xf0   :  { %v952_v46 = vmul.f32 %v922_v37, %v219_v44  ;;  %v1032_v47 = vmul.f32 %v1002_v36, %v219_v44  ;;  %v1164_v48 = vpop.f32.mrb[0].mxu1 }
  0xf1   :  { %v955_v49 = vmul.f32 %v1164_v48, %v926_v40  ;;  %v1035_v50 = vmul.f32 %v1164_v48, %v1006_v39  ;;  %v306_v6 = vpop.f32.mrb[1].mxu1  ;;  %v983_v51 = vsel %vm140_vm0, %v953_v42, 0.0  ;;  %v1063_v52 = vsel %vm140_vm0, %v1033_v43, 0.0  ;;  %v1026_v43 = vpop.permute.xlu1 %1025 }
  0xf2   :  { %v954_v53 = vmul.f32 %v926_v40, %v306_v6  ;;  %v1034_v54 = vmul.f32 %v1006_v39, %v306_v6  ;;  %v968_v55 = vsel %vm140_vm0, %v952_v46, 0.0  ;;  %v1048_v56 = vsel %vm140_vm0, %v1032_v47, 0.0 }
  0xf3   :  { %v984_v57 = vsel %vm140_vm0, %v955_v49, 0.0  ;;  %v1064_v58 = vsel %vm140_vm0, %v1035_v50, 0.0  ;;  %v946_v49 = vpop.permute.xlu0 %945 }
  0xf4   :  { %v985_v59 = vadd.f32 %v984_v57, %v983_v51  ;;  %v1065_v60 = vadd.f32 %v1064_v58, %v1063_v52  ;;  %v969_v61 = vsel %vm140_vm0, %v954_v53, 0.0  ;;  %v1049_v62 = vsel %vm140_vm0, %v1034_v54, 0.0 }
  0xf5   :  { %v970_v0 = vadd.f32 %v969_v61, %v968_v55  ;;  %v1050_v1 = vadd.f32 %v1049_v62, %v1048_v56  ;;  %v1030_v62 = vpop.permute.xlu1 %1029 }
  0xf6   :  { %v1171_v3 = vpop.f32.mrb[2].mxu0 }
  0xf7   :  { %v957_v4 = vmul.f32 %v1171_v3, %v930_v45  ;;  %v1037_v5 = vmul.f32 %v1171_v3, %v1010_v26  ;;  %v393_v7 = vpop.f32.mrb[3].mxu0 }
  0xf8   :  { %v956_v8 = vmul.f32 %v930_v45, %v393_v7  ;;  %v1036_v9 = vmul.f32 %v1010_v26, %v393_v7  ;;  %v1178_v11 = vpop.f32.mrb[2].mxu1 }
  0xf9   :  { %v986_v12 = vsel %vm140_vm0, %v957_v4, 0.0  ;;  %v1066_v13 = vsel %vm140_vm0, %v1037_v5, 0.0  ;;  %v959_v14 = vmul.f32 %v1178_v11, %v934_v2  ;;  %v1039_v15 = vmul.f32 %v1178_v11, %v1014_v63  ;;  %v480_v16 = vpop.f32.mrb[3].mxu1  ;;  %v950_v4 = vpop.permute.xlu0 %949 }
  0xfa   :  { %v987_v17 = vadd.f32 %v986_v12, %v985_v59  ;;  %v1067_v18 = vadd.f32 %v1066_v13, %v1065_v60  ;;  %v971_v19 = vsel %vm140_vm0, %v956_v8, 0.0  ;;  %v1051_v21 = vsel %vm140_vm0, %v1036_v9, 0.0 }
  0xfb   :  { %v972_v24 = vadd.f32 %v971_v19, %v970_v0  ;;  %v1052_v20 = vadd.f32 %v1051_v21, %v1050_v1  ;;  %v988_v22 = vsel %vm140_vm0, %v959_v14, 0.0  ;;  %v1068_v25 = vsel %vm140_vm0, %v1039_v15, 0.0 }
  0xfc   :  { %v989_v28 = vadd.f32 %v988_v22, %v987_v17  ;;  %v1069_v29 = vadd.f32 %v1068_v25, %v1067_v18  ;;  %v958_v30 = vmul.f32 %v934_v2, %v480_v16  ;;  %v1038_v32 = vmul.f32 %v1014_v63, %v480_v16 }
  0xfe   :  { %v973_v33 = vsel %vm140_vm0, %v958_v30, 0.0  ;;  %v1053_v31 = vsel %vm140_vm0, %v1038_v32, 0.0  ;;  %v1185_v34 = vpop.f32.mrb[4].mxu0 }
  0xff   :  { %v974_v35 = vadd.f32 %v973_v33, %v972_v24  ;;  %v1054_v36 = vadd.f32 %v1053_v31, %v1052_v20  ;;  %v961_v37 = vmul.f32 %v1185_v34, %v1470_v38  ;;  %v1041_v39 = vmul.f32 %v1185_v34, %v1468_v10  ;;  %v567_v40 = vpop.f32.mrb[5].mxu0 }
 0x100   :  { %v960_v41 = vmul.f32 %v1470_v38, %v567_v40  ;;  %v1040_v26 = vmul.f32 %v1468_v10, %v567_v40  ;;  %v1192_v42 = vpop.f32.mrb[4].mxu1 }
 0x101   :  { %v990_v44 = vsel %vm140_vm0, %v961_v37, 0.0  ;;  %v1070_v45 = vsel %vm140_vm0, %v1041_v39, 0.0  ;;  %v963_v46 = vmul.f32 %v1192_v42, %v942_v27  ;;  %v1043_v47 = vmul.f32 %v1192_v42, %v1022_v23  ;;  %v654_v48 = vpop.f32.mrb[5].mxu1 }
 0x102   :  { %v991_v50 = vadd.f32 %v990_v44, %v989_v28  ;;  %v1071_v6 = vadd.f32 %v1070_v45, %v1069_v29  ;;  %v975_v51 = vsel %vm140_vm0, %v960_v41, 0.0  ;;  %v1055_v52 = vsel %vm140_vm0, %v1040_v26, 0.0 }
 0x103   :  { %v976_v53 = vadd.f32 %v975_v51, %v974_v35  ;;  %v1056_v38 = vadd.f32 %v1055_v52, %v1054_v36  ;;  %v992_v10 = vsel %vm140_vm0, %v963_v46, 0.0  ;;  %v1072_v54 = vsel %vm140_vm0, %v1043_v47, 0.0 }
 0x104   :  { %v993_v55 = vadd.f32 %v992_v10, %v991_v50  ;;  %v1073_v56 = vadd.f32 %v1072_v54, %v1071_v6  ;;  %v962_v57 = vmul.f32 %v942_v27, %v654_v48  ;;  %v1042_v58 = vmul.f32 %v1022_v23, %v654_v48 }
 0x106   :  { %v977_v59 = vsel %vm140_vm0, %v962_v57, 0.0  ;;  %v1057_v60 = vsel %vm140_vm0, %v1042_v58, 0.0  ;;  %v1199_v61 = vpop.f32.mrb[6].mxu0 }
 0x107   :  { %v978_v63 = vadd.f32 %v977_v59, %v976_v53  ;;  %v1058_v0 = vadd.f32 %v1057_v60, %v1056_v38  ;;  %v965_v1 = vmul.f32 %v1199_v61, %v946_v49  ;;  %v1045_v2 = vmul.f32 %v1199_v61, %v1026_v43  ;;  %v741_v3 = vpop.f32.mrb[7].mxu0 }
 0x108   :  { %v964_v5 = vmul.f32 %v946_v49, %v741_v3  ;;  %v1044_v7 = vmul.f32 %v1026_v43, %v741_v3  ;;  %v1206_v8 = vpop.f32.mrb[6].mxu1 }
 0x109   :  { %v994_v9 = vsel %vm140_vm0, %v965_v1, 0.0  ;;  %v1074_v11 = vsel %vm140_vm0, %v1045_v2, 0.0  ;;  %v967_v12 = vmul.f32 %v1206_v8, %v950_v4  ;;  %v1047_v13 = vmul.f32 %v1206_v8, %v1030_v62  ;;  %v828_v14 = vpop.f32.mrb[7].mxu1 }
 0x10a   :  { %v995_v15 = vadd.f32 %v994_v9, %v993_v55  ;;  %v1075_v16 = vadd.f32 %v1074_v11, %v1073_v56  ;;  %v979_v17 = vsel %vm140_vm0, %v964_v5, 0.0  ;;  %v1059_v18 = vsel %vm140_vm0, %v1044_v7, 0.0 }
 0x10b   :  { %v980_v19 = vadd.f32 %v979_v17, %v978_v63  ;;  %v1060_v21 = vadd.f32 %v1059_v18, %v1058_v0  ;;  %v996_v23 = vsel %vm140_vm0, %v967_v12, 0.0  ;;  %v1076_v24 = vsel %vm140_vm0, %v1047_v13, 0.0 }
 0x10c   :  { %v997_v20 = vadd.f32 %v996_v23, %v995_v15  ;;  %v1077_v22 = vadd.f32 %v1076_v24, %v1075_v16  ;;  %v966_v25 = vmul.f32 %v950_v4, %v828_v14  ;;  %v1046_v27 = vmul.f32 %v1030_v62, %v828_v14 }
 0x10e   :  { %999 = vst.msk [vmem:[%s1527_s3 + $0x8] sm:$0xff] %vm140_vm0, %v997_v20  ;;  %1118 = vst.msk [vmem:[%s1527_s3 + $0x18] sm:$0xff] %vm140_vm0, %v1077_v22  ;;  %v981_v28 = vsel %vm140_vm0, %v966_v25, 0.0  ;;  %v1061_v29 = vsel %vm140_vm0, %v1046_v27, 0.0 }
 0x10f   :  { %v982_v30 = vadd.f32 %v981_v28, %v980_v19  ;;  %v1062_v32 = vadd.f32 %v1061_v29, %v1060_v21 }
 0x111   :  { %998 = vst.msk [vmem:[%s1527_s3] sm:$0xff] %vm140_vm0, %v982_v30  ;;  %1117 = vst.msk [vmem:[%s1527_s3 + $0x10] sm:$0xff] %vm140_vm0, %v1062_v32 }

// kernel: dsbn_spdbn_forward.7
= control target key start
LH: loop header
LB: loop body
LE: loop exit
PB: predicated region body
PF: predicated region fallthrough
CT: control target
= control target key end

     0   :  { %vm64_vm0 = vcmask 130048   ;;  %s682_s0 = inlined_call_operand.vmem [shape: f32[2,16,16], index: 0, kind: input, shape index: {}]   ;;  %s683_s1 = inlined_call_operand.vmem [shape: f32[2,16], index: 1, kind: input, shape index: {}]   ;;  %s684_s2 = inlined_call_operand.hbm [shape: f32[2,16,16], index: 2, kind: output, shape index: {0}]   ;;  %s685_s3 = inlined_call_operand.vmem [shape: f32[2,16,16], index: 3, kind: output, shape index: {1}]  }
   0x1   :  { %v14_v0 = vld [vmem:[%s682_s0] sm:$0xff]  ;;  %v15_v1 = vld [vmem:[%s682_s0 + $0x8] sm:$0xff]  ;;  %v16_v2 = vld [vmem:[%s682_s0 + $0x10] sm:$0xff] }
   0x2   :  { %v527_v3 = vpack.c.bf16 %v15_v1, %v14_v0  ;;  %vm616_vm1 = vmpackc.low %vm64_vm0, %vm64_vm0  ;;  %v17_v5 = vld [vmem:[%s682_s0 + $0x18] sm:$0xff]  ;;  %v18_v6 = vld [vmem:[%s683_s1] sm:$0x3] }
   0x3   :  { %v533_v7 = vpack.c.bf16 %v17_v5, %v16_v2  ;;  %v19_v8 = vmax.f32 %v18_v6, 1e-12 }
   0x4   :  { %9 = vsyncpa [#allocation3], 0  ;;  %529 = vmatprep.subr.msk.bf16.mxu0 %vm616_vm1, %v527_v3  ;;  %v581_v9 = vmov 1966171168   ;;  %v31_v11 = vlaneseq  ;;  %s582_s0 = smov [#allocation2]  }
   0x5   :  { %532 = vmatpush3.bf16.xpose.msk.msra.mxu0 %vm616_vm1, %v527_v3  ;;  %535 = vmatprep.subr.msk.bf16.mxu1 %vm616_vm1, %v533_v7  ;;  %555 = vrsqrt.f32 %v19_v8  ;;  %v29_v10 = vunpack.c.l.s4 %v581_v9  ;;  %vm22_vm2 = vcmp.eq.f32.partialorder %v19_v8, inf  ;;  %v25_v16 = vand.u32 2147483648, %v19_v8  ;;  %s452_s1 = sshll.u32 %s582_s0, 4  ;;  %s453_s1 = int_to_ptr.vmem [resolvable:$true] %s452_s1 }
   0x6   :  { %538 = vmatpush3.bf16.xpose.msk.msra.mxu1 %vm616_vm1, %v533_v7  ;;  %541 = vmatprep.subr.msk.bf16.mxu0 %vm616_vm1, %v527_v3  ;;  %v32_v13 = vshrl.u32 %v31_v11, 7  ;;  %vm24_vm3 = vcmp.eq.f32.partialorder %v19_v8, 0.0  ;;  %s557_s22 = scalar_lea.vmem %s453_s1, 512  ;;  %p562_p1 = scmp.lt.s32.totalorder %s453_s1, %s453_s1 }
   0x7   :  { %547 = vmatprep.subr.msk.bf16.mxu1 %vm616_vm1, %v533_v7  ;;  %v30_v12 = vunpack.c.0.s8 %v29_v10  ;;  %p558_p0 = scmp.ne.s32.totalorder %s453_s1, %s557_s22  ;;  %p563_p2 = scmp.lt.s32.totalorder %s557_s22, %s557_s22 }
   0x8   :  { %v52_v24 = vsub.s32 0, %v32_v13 }
   0x9   :  { %v33_v14 = vsub.s32 %v30_v12, %v32_v13  ;;  %p564_p3 = por %p563_p2, %p562_p1 }
   0xb   :  { %p565_p4 = pnand %p564_p3, %p558_p0 }
   0xf   :  { %v556_v15 = vpop.eup %555 }
  0x10   :  { %v21_v17 = vmul.f32 %v556_v15, %v19_v8  ;;  %v251_v18 = vrot.slane %v556_v15, %v33_v14 }
  0x12   :  { %v23_v19 = vsel %vm22_vm2, %v19_v8, %v21_v17  ;;  %v252_v20 = vcombine.high %v251_v18, %v251_v18  ;;  %v259_v22 = vrot.slane %v251_v18, %v33_v14 }
  0x13   :  { %v26_v21 = vsel %vm24_vm3, %v25_v16, %v23_v19 }
  0x14   :  { %v34_v23 = vrot.slane %v26_v21, %v33_v14  ;;  %v266_v25 = vrot.slane %v252_v20, %v33_v14  ;;  %v270_v28 = vrot.slane %v259_v22, %v52_v24 }
  0x16   :  { %v42_v26 = vrot.slane %v34_v23, %v33_v14  ;;  %v35_v27 = vcombine.high %v34_v23, %v34_v23  ;;  %v274_v31 = vrot.slane %v266_v25, %v52_v24  ;;  %v277_v35 = vmul.f32 %v270_v28, %v14_v0 }
  0x17   :  { %v278_v39 = vmul.f32 %v270_v28, %v15_v1 }
  0x18   :  { %v53_v29 = vrot.slane %v42_v26, %v52_v24  ;;  %v49_v30 = vrot.slane %v35_v27, %v33_v14  ;;  %v279_v38 = vmul.f32 %v274_v31, %v16_v2  ;;  %v280_v40 = vmul.f32 %v274_v31, %v17_v5 }
  0x1a   :  { %v60_v32 = vmul.f32 %v53_v29, %v14_v0  ;;  %v61_v33 = vmul.f32 %v53_v29, %v15_v1  ;;  %v57_v34 = vrot.slane %v49_v30, %v52_v24 }
  0x1c   :  { %503 = vmatprep.mubr.msk.f32.mxu0 %vm64_vm0, %v60_v32  ;;  %v62_v36 = vmul.f32 %v57_v34, %v16_v2  ;;  %v63_v37 = vmul.f32 %v57_v34, %v17_v5 }
  0x1d   :  { %504 = vmatmul.mubr.msk.f32.vlgmr.msra.gmra.mrb[0].mxu0 %vm64_vm0, %v61_v33 }
  0x1e   :  { %510 = vmatprep.mubr.msk.f32.mxu1 %vm64_vm0, %v62_v36  ;;  %544 = vmatpush3.bf16.xpose.msk.msra.mxu0 %vm616_vm1, %v527_v3 }
  0x1f   :  { %511 = vmatmul.mubr.msk.f32.vlgmr.msra.gmra.mrb[0].mxu1 %vm64_vm0, %v63_v37  ;;  %517 = vmatprep.mubr.msk.f32.mxu0 %vm64_vm0, %v277_v35 }
  0x20   :  { %550 = vmatpush3.bf16.xpose.msk.msra.mxu1 %vm616_vm1, %v533_v7  ;;  %524 = vmatprep.mubr.msk.f32.mxu1 %vm64_vm0, %v279_v38 }
  0x25   :  { %518 = vmatmul.mubr.msk.f32.vlgmr.msra.gmra.mrb[2].mxu0 %vm64_vm0, %v278_v39 }
  0x27   :  { %525 = vmatmul.mubr.msk.f32.vlgmr.msra.gmra.mrb[2].mxu1 %vm64_vm0, %v280_v40 }
  0xf0   :  { %v505_v41 = vpop.f32.mrb[0].mxu0 }
  0xf1   :  { %240 = vst.msk [vmem:[#allocation2 + $0x8] sm:$0xff] %vm64_vm0, %v505_v41  ;;  %v143_v42 = vpop.f32.mrb[1].mxu0 }
  0xf2   :  { %239 = vst.msk [vmem:[#allocation2] sm:$0xff] %vm64_vm0, %v143_v42  ;;  %v512_v43 = vpop.f32.mrb[0].mxu1 }
  0xf3   :  { %242 = vst.msk [vmem:[#allocation2 + $0x18] sm:$0xff] %vm64_vm0, %v512_v43  ;;  %v230_v44 = vpop.f32.mrb[1].mxu1 }
  0xf4   :  { %241 = vst.msk [vmem:[#allocation2 + $0x10] sm:$0xff] %vm64_vm0, %v230_v44 }
  0xf5   :  { %568 = shalt.err (!%p565_p4)
}
  0xf6   :  { %s569_s25 = scalar_lea.hbm %s684_s2, 512 }
  0xf7   :  { %p570_p5 = scmp.ne.s32.totalorder %s684_s2, %s569_s25  ;;  %p573_p6 = scmp.lt.u32.totalorder %s569_s25, %s684_s2 }
  0xf9   :  { %p575_p7 = pnand %p573_p6, %p570_p5 }
  0xfb   :  { %578 = shalt.err (!%p575_p7)
}
  0xfc   :  { %s583_s30 = smov 128   ;;  %s584_s4 = smov 8   ;;  %v519_v45 = vpop.f32.mrb[2].mxu0  ;;  %v526_v47 = vpop.f32.mrb[2].mxu1 }
  0xfd   :  { %458 = dma.vmem_to_hbm [thread:$0]  %s453_s1, 512, %s684_s2, [#allocation3], %s583_s30, %s583_s30, %s584_s4   ;;  %v353_v46 = vpop.f32.mrb[3].mxu0  ;;  %v434_v48 = vpop.f32.mrb[3].mxu1 }
  0xfe   :  { %444 = vst.msk [vmem:[%s685_s3 + $0x8] sm:$0xff] %vm64_vm0, %v519_v45  ;;  %443 = vst.msk [vmem:[%s685_s3] sm:$0xff] %vm64_vm0, %v353_v46 }
  0xff   :  { %446 = vst.msk [vmem:[%s685_s3 + $0x18] sm:$0xff] %vm64_vm0, %v526_v47  ;;  %445 = vst.msk [vmem:[%s685_s3 + $0x10] sm:$0xff] %vm64_vm0, %v434_v48 }
 0x100   :  { %579 = dma.done.wait [#allocation3], 512  }
 0x101   :  { %580 = vsyncadd [#allocation3], 4294966784 }
 0x102   :  { %466 = vsyncpa [#allocation3], 1 }

// kernel: custom-call.35
= control target key start
LH: loop header
LB: loop body
LE: loop exit
PB: predicated region body
PF: predicated region fallthrough
CT: control target
= control target key end

     0   :  { %v168_v3 = vlaneseq  ;;  %v1217_v5 = vmov 0.0   ;;  %s157_s17 = smov [#allocation22]  ;;  %s160_s18 = smov [#allocation23]  ;;  %s1500_s0 = inlined_call_operand.vmem [shape: f32[1,4,4], index: 0, kind: input, shape index: {}]   ;;  %s1501_s1 = inlined_call_operand.vmem [shape: f32[1,4,4], index: 1, kind: input, shape index: {}]   ;;  %s1502_s2 = inlined_call_operand.vmem [shape: f32[1,4,4], index: 2, kind: input, shape index: {}]   ;;  %s1503_s3 = inlined_call_operand.vmem [shape: f32[1,4,4], index: 3, kind: input, shape index: {}]   ;;  %s1504_s4 = inlined_call_operand.vmem [shape: f32[1,4], index: 4, kind: output, shape index: {0}]   ;;  %s1505_s5 = inlined_call_operand.vmem [shape: f32[1,4], index: 5, kind: output, shape index: {1}]   ;;  %s1506_s6 = inlined_call_operand.vmem [shape: f32[1,4,4], index: 6, kind: output, shape index: {2}]   ;;  %s1507_s7 = inlined_call_operand.vmem [shape: f32[1,4,4], index: 7, kind: output, shape index: {3}]   ;;  %s1508_s8 = inlined_call_operand.vmem [shape: f32[1,4,4], index: 8, kind: output, shape index: {4}]   ;;  %s1509_s9 = inlined_call_operand.vmem [shape: f32[1,4,4], index: 9, kind: output, shape index: {5}]  }
   0x1   :  { %v26_v0 = vld [vmem:[%s1500_s0] sm:$0xf]  ;;  %163 = vst [vmem:[#allocation12] sm:$0xff] %v1217_v5  ;;  %164 = vst [vmem:[#allocation14] sm:$0xff] %v1217_v5  ;;  %s167_s0 = smov [#allocation12]  ;;  %s1061_s19 = smov [#allocation20] }
   0x2   :  { %v57_v1 = vld [vmem:[%s1501_s1] sm:$0xf]  ;;  %27 = vst [vmem:[#allocation1] sm:$0xf] %v26_v0  ;;  %165 = vst [vmem:[#allocation16] sm:$0xff] %v1217_v5  ;;  %v1282_v6 = vand.u32 127, %v168_v3 }
   0x3   :  { %v88_v2 = vld [vmem:[%s1502_s2] sm:$0xf]  ;;  %58 = vst [vmem:[#allocation3] sm:$0xf] %v57_v1  ;;  %166 = vst [vmem:[#allocation18] sm:$0xff] %v1217_v5  ;;  %v1284_v7 = vshrl.u32 %v168_v3, 7 }
   0x4   :  { %89 = vst [vmem:[#allocation5] sm:$0xf] %v88_v2  ;;  %v119_v4 = vld [vmem:[%s1503_s3] sm:$0xf]  ;;  %v170_v6 = vmov %v1282_v6  ;;  %s180_s1 = smov [#allocation18]  ;;  %s151_s2 = smov [#allocation20] }
   0x5   :  { %120 = vst [vmem:[#allocation7] sm:$0xf] %v119_v4  ;;  %v173_v7 = vmov %v1284_v7  ;;  %v183_v6 = vmov %v1282_v6  ;;  %s154_s3 = smov [#allocation21]  ;;  %vm1065_vm2 = vcmp.lt.s32.totalorder %v1282_v6, 4  ;;  %s1078_s20 = smov [#allocation21] }
   0x6   :  { %v186_v7 = vmov %v1284_v7  ;;  %vm177_vm0 = vcmp.eq.s32.totalorder %v173_v7, %v170_v6  ;;  %s1095_s21 = smov [#allocation22]  ;;  %s1112_s22 = smov [#allocation23] }
   0x7   :  { %vm190_vm1 = vcmp.eq.s32.totalorder %v186_v7, %v183_v6  ;;  %v1057_v6 = vmov %v1282_v6  ;;  %v1060_v7 = vmov %v1284_v7 }
   0x8   :  { %v174_v12 = vld [vmem:[%s167_s0] sm:$0xf]  ;;  %vm1070_vm3 = vcmp.eq.s32.totalorder %v1060_v7, %v1057_v6  ;;  %v1108_v6 = vmov %v1282_v6  ;;  %v1077_v7 = vmov %v1284_v7 }
   0x9   :  { %v137_v8 = vld [vmem:[#allocation1] sm:$0xf]  ;;  %v178_v14 = vsel %vm177_vm0, 1.0, %v174_v12  ;;  %v1074_v6 = vmov %v1282_v6  ;;  %v1111_v7 = vmov %v1284_v7 }
   0xa   :  { %v141_v9 = vld [vmem:[#allocation3] sm:$0xf]  ;;  %138 = vst [vmem:[#allocation0] sm:$0xf] %v137_v8  ;;  %v187_v13 = vld [vmem:[%s180_s1] sm:$0xf]  ;;  %v1091_v6 = vmov %v1282_v6  ;;  %v1094_v7 = vmov %v1284_v7  ;;  %vm1121_vm4 = vcmp.eq.s32.totalorder %v1111_v7, %v1108_v6 }
   0xb   :  { %v145_v10 = vld [vmem:[#allocation5] sm:$0xf]  ;;  %142 = vst [vmem:[#allocation2] sm:$0xf] %v141_v9  ;;  %v191_v15 = vsel %vm190_vm1, 1.0, %v187_v13  ;;  %179 = vst [vmem:[%s167_s0] sm:$0xf] %v178_v14 }
   0xc   :  { %146 = vst [vmem:[#allocation4] sm:$0xf] %v145_v10  ;;  %v149_v11 = vld [vmem:[#allocation7] sm:$0xf]  ;;  %192 = vst [vmem:[%s180_s1] sm:$0xf] %v191_v15 }
   0xd   :  { %150 = vst [vmem:[#allocation6] sm:$0xf] %v149_v11 }
  0x11   :  { %v152_v16 = vld [vmem:[#allocation0] sm:$0xff] }
  0x12   :  { %v155_v17 = vld [vmem:[#allocation2] sm:$0xff]  ;;  %153 = vst [vmem:[%s151_s2] sm:$0xff] %v152_v16 }
  0x13   :  { %v158_v18 = vld [vmem:[#allocation4] sm:$0xff]  ;;  %156 = vst [vmem:[%s154_s3] sm:$0xff] %v155_v17 }
  0x14   :  { %159 = vst [vmem:[%s157_s17] sm:$0xff] %v158_v18  ;;  %v161_v19 = vld [vmem:[#allocation6] sm:$0xff] }
  0x15   :  { %162 = vst [vmem:[%s160_s18] sm:$0xff] %v161_v19 }
  0x19   :  { %v1067_v20 = vld [vmem:[%s1061_s19] sm:$0xf] }
  0x1a   :  { %v1084_v21 = vld [vmem:[%s1078_s20] sm:$0xf]  ;;  %v1068_v22 = vsel %vm1065_vm2, %v1067_v20, 0.0 }
  0x1b   :  { %v1085_v23 = vsel %vm1065_vm2, %v1084_v21, 0.0  ;;  %v1101_v24 = vld [vmem:[%s1095_s21] sm:$0xf]  ;;  %v1069_v26 = vmul.f32 %v1068_v22, %v1068_v22 }
  0x1c   :  { %v1118_v25 = vld [vmem:[%s1112_s22] sm:$0xf]  ;;  %v1086_v27 = vmul.f32 %v1085_v23, %v1085_v23  ;;  %v1102_v28 = vsel %vm1065_vm2, %v1101_v24, 0.0 }
  0x1d   :  { %v1119_v29 = vsel %vm1065_vm2, %v1118_v25, 0.0  ;;  %v1103_v30 = vmul.f32 %v1102_v28, %v1102_v28  ;;  %v1071_v33 = vsel %vm1070_vm3, 0.0, %v1069_v26 }
  0x1e   :  { %v1088_v31 = vadd.f32 %v1086_v27, %v1069_v26  ;;  %v1120_v32 = vmul.f32 %v1119_v29, %v1119_v29  ;;  %v1087_v34 = vadd.f32 %v1086_v27, %v1071_v33 }
  0x20   :  { %v1105_v35 = vadd.f32 %v1103_v30, %v1088_v31  ;;  %v1104_v36 = vadd.f32 %v1103_v30, %v1087_v34  ;;  %v1122_v37 = vsel %vm1121_vm4, 0.0, %v1120_v32 }
  0x22   :  { %v1124_v38 = vadd.f32 %v1120_v32, %v1105_v35  ;;  %v1123_v39 = vadd.f32 %v1122_v37, %v1104_v36 }
  0x24   :  { %1125 = vadd.xlane.f32.xlu0 %v1124_v38 }
  0x28   :  { %1133 = vadd.xlane.f32.xlu0 %v1123_v39 }
  0xb1   :  { %v1126_v40 = vpop.xlane.xlu0 %1125 }
  0xb2   :  { %v1127_v41 = vrot.slane %v1126_v40, 4 }
  0xb4   :  { %v1128_v42 = vadd.f32 %v1127_v41, %v1126_v40 }
  0xb5   :  { %v1134_v43 = vpop.xlane.xlu0 %1133 }
  0xb6   :  { %v1129_v44 = vrot.slane %v1128_v42, 2  ;;  %v1135_v45 = vrot.slane %v1134_v43, 4 }
  0xb8   :  { %v1136_v46 = vadd.f32 %v1135_v45, %v1134_v43  ;;  %v1130_v47 = vadd.f32 %v1129_v44, %v1128_v42 }
  0xba   :  { %v1137_v48 = vrot.slane %v1136_v46, 2  ;;  %v1131_v50 = vrot.slane %v1130_v47, 1 }
  0xbc   :  { %v1138_v49 = vadd.f32 %v1137_v48, %v1136_v46  ;;  %v1132_v53 = vadd.f32 %v1131_v50, %v1130_v47 }
  0xbe   :  { %v1139_v51 = vrot.slane %v1138_v49, 1 }
  0xc0   :  { %v1140_v52 = vadd.f32 %v1139_v51, %v1138_v49 }
  0xc2   :  { %1166 = vpush %v1140_v52 }
  0xc3   :  { %1168 = vpush %v1132_v53 }
  0xf3   :  { %s1167_s23 = spop %1166 }
  0xf4   :  { %s1169_s24 = spop %1168 }
  0xf5   :  { %s1143_s25 = smul.f32 1e-10, %s1169_s24 }
  0xf7   :  { %p1144_p0 = scmp.le.f32.partialorder %s1167_s23, %s1143_s25 }
  0xf8   :  { %s1308_s26 = smov (!%p1144_p0), 0  }
  0xf9   :  { %1147 = sbr.rel (%p1144_p0) target bundleno = 931 (0x3a3), region = 402 }
 0x100 LB: > { %s1313_s27 = smov 0   ;;  %s1211_s26 = sphi %s1308_s26, %s1510_s26  }
 0x101 LB: >> { %s297_s28 = smov [#allocation20]  ;;  %v301_v6 = vmov %v1282_v6  ;;  %v304_v7 = vmov %v1284_v7  ;;  %s317_s29 = smov [#allocation21]  ;;  %vm620_vm14 = vcmp.eq.s32.totalorder %v1284_v7, 0  ;;  %vm632_vm15 = vcmp.eq.s32.totalorder %v1284_v7, 3  ;;  %s1215_s27 = sphi %s1313_s27, %s296_s27  }
 0x102   : >> { %v321_v6 = vmov %v1282_v6  ;;  %v324_v7 = vmov %v1284_v7  ;;  %v305_v54 = vld [vmem:[%s297_s28] sm:$0xf]  ;;  %vm308_vm5 = vcmp.eq.s32.totalorder %v304_v7, %v301_v6  ;;  %s337_s30 = smov [#allocation23]  ;;  %s298_s10 = smov [#allocation24] }
 0x103   : >> { %vm328_vm6 = vcmp.eq.s32.totalorder %v324_v7, %v321_v6  ;;  %v341_v6 = vmov %v1282_v6  ;;  %v344_v7 = vmov %v1284_v7  ;;  %v309_v55 = vsel %vm308_vm5, %v305_v54, 0.0  ;;  %v325_v56 = vld [vmem:[%s317_s29] sm:$0xf]  ;;  %s318_s11 = smov [#allocation25]  ;;  %s338_s12 = smov [#allocation26] }
 0x104   : >> { %vm348_vm7 = vcmp.eq.s32.totalorder %v344_v7, %v341_v6  ;;  %v310_v57 = vrot.slane %v309_v55, 4  ;;  %v329_v58 = vsel %vm328_vm6, %v325_v56, 0.0  ;;  %v345_v59 = vld [vmem:[%s337_s30] sm:$0xf]  ;;  %s361_s13 = smov [#allocation25]  ;;  %s359_s14 = smov [#allocation24]  ;;  %v410_v6 = vmov %v1282_v6 }
 0x105   : >> { %v330_v60 = vrot.slane %v329_v58, 4  ;;  %v349_v61 = vsel %vm348_vm7, %v345_v59, 0.0  ;;  %s363_s15 = smov [#allocation26]  ;;  %s398_s16 = smov [#allocation27]  ;;  %v413_v7 = vmov %v1284_v7  ;;  %v425_v6 = vmov %v1282_v6 }
 0x106   : >> { %v311_v62 = vadd.f32 %v310_v57, %v309_v55  ;;  %v350_v63 = vrot.slane %v349_v61, 4  ;;  %s400_s0 = smov [#allocation28]  ;;  %s357_s1 = smov [#allocation29]  ;;  %v428_v7 = vmov %v1284_v7  ;;  %vm415_vm12 = vcmp.eq.s32.totalorder %v413_v7, %v410_v6 }
 0x107   : >> { %v331_v0 = vadd.f32 %v330_v60, %v329_v58  ;;  %s358_s2 = smov [#allocation30]  ;;  %s402_s1 = smov %s357_s1  ;;  %vm430_vm13 = vcmp.eq.s32.totalorder %v428_v7, %v425_v6  ;;  %v523_v6 = vmov %v1282_v6  ;;  %v526_v7 = vmov %v1284_v7 }
 0x108   : >> { %v312_v1 = vrot.slane %v311_v62, 2  ;;  %v351_v2 = vadd.f32 %v350_v63, %v349_v61  ;;  %s404_s2 = smov %s358_s2  ;;  %s406_s3 = smov [#allocation29]  ;;  %v537_v6 = vmov %v1282_v6  ;;  %v540_v7 = vmov %v1284_v7 }
 0x109   : >> { %v332_v3 = vrot.slane %v331_v0, 2  ;;  %s421_s17 = smov [#allocation30]  ;;  %s419_s18 = smov [#allocation31]  ;;  %vm530_vm0 = vcmp.eq.s32.totalorder %v526_v7, %v523_v6  ;;  %v496_v6 = vmov %v1282_v6  ;;  %v499_v7 = vmov %v1284_v7 }
 0x10a   : >> { %v313_v4 = vadd.f32 %v312_v1, %v311_v62  ;;  %v352_v5 = vrot.slane %v351_v2, 2  ;;  %s436_s19 = smov [#allocation31]  ;;  %s1328_s20 = smov [#allocation20]  ;;  %v510_v6 = vmov %v1282_v6  ;;  %v513_v7 = vmov %v1284_v7 }
 0x10b   : >> { %v333_v8 = vadd.f32 %v332_v3, %v331_v0  ;;  %s434_s21 = smov [#allocation32]  ;;  %s1330_s22 = smov [#allocation21]  ;;  %v444_v53 = vld [vmem:[%s1328_s20] sm:$0xf]  ;;  %vm545_vm1 = vcmp.eq.s32.totalorder %v540_v7, %v537_v6  ;;  %vm504_vm3 = vcmp.eq.s32.totalorder %v499_v7, %v496_v6  ;;  %vm517_vm4 = vcmp.eq.s32.totalorder %v513_v7, %v510_v6 }
 0x10c   : >> { %v314_v9 = vrot.slane %v313_v4, 1  ;;  %v353_v10 = vadd.f32 %v352_v5, %v351_v2  ;;  %s1332_s23 = smov [#allocation22]  ;;  %s1334_s24 = smov [#allocation23]  ;;  %v445_v54 = vld [vmem:[%s1330_s22] sm:$0xf]  ;;  %vm559_vm5 = vcmp.eq.s32.totalorder %v1282_v6, 0 }
 0x10d   : >> { %v334_v11 = vrot.slane %v333_v8, 1  ;;  %s1336_s25 = smov [#allocation12]  ;;  %s1338_s28 = smov [#allocation14]  ;;  %v446_v55 = vld [vmem:[%s1332_s23] sm:$0xf]  ;;  %vm563_vm6 = vcmp.eq.s32.totalorder %v1282_v6, 1 }
 0x10e   : >> { %v315_v12 = vadd.f32 %v314_v9, %v313_v4  ;;  %v354_v13 = vrot.slane %v353_v10, 1  ;;  %s1340_s29 = smov [#allocation16]  ;;  %s660_s30 = smov [#allocation31]  ;;  %v447_v56 = vld [vmem:[%s1334_s24] sm:$0xf]  ;;  %vm576_vm7 = vcmp.eq.s32.totalorder %v1282_v6, 3 }
 0x10f   : >> { %v335_v14 = vadd.f32 %v334_v11, %v333_v8  ;;  %v668_v57 = vld [vmem:[%s1336_s25] sm:$0xf]  ;;  %s296_s27 = sadd.s32 1, %s1215_s27  }
 0x110   : >> { %316 = vst [vmem:[%s298_s10] sm:$0x1] %v315_v12  ;;  %v355_v15 = vadd.f32 %v354_v13, %v353_v10  ;;  %s1344_s10 = smov [#allocation18]  ;;  %v669_v58 = vld [vmem:[%s1338_s28] sm:$0xf]  ;;  %p293_p1 = scmp.ge.s32.totalorder %s296_s27, 7  }
 0x111   : >> { %336 = vst [vmem:[%s318_s11] sm:$0x1] %v335_v14  ;;  %v670_v59 = vld [vmem:[%s1340_s29] sm:$0xf]  ;;  %s438_s11 = smov [#allocation32]  ;;  %v197_v6 = vmov (%p293_p1), %v1282_v6  ;;  %v200_v7 = vmov (%p293_p1), %v1284_v7 }
 0x112   : >> { %356 = vst [vmem:[%s338_s12] sm:$0x1] %v355_v15  ;;  %v671_v61 = vld [vmem:[%s1344_s10] sm:$0xf]  ;;  %s662_s12 = smov [#allocation32]  ;;  %v250_v6 = vmov (%p293_p1), %v1282_v6 }
 0x117   : >> { %v360_v18 = vld [vmem:[%s359_s14] sm:$0xff]  ;;  %s466_s14 = smov [#allocation30] }
 0x118   : >> { %v362_v16 = vld [vmem:[%s361_s13] sm:$0xff]  ;;  %v383_v31 = vand.u32 2147483647, %v360_v18  ;;  %s464_s13 = smov [#allocation29] }
 0x119   : >> { %v366_v17 = vmul.f32 2.0, %v362_v16  ;;  %v364_v19 = vld [vmem:[%s363_s15] sm:$0xff]  ;;  %v384_v36 = vand.u32 2147483647, %v362_v16  ;;  %s1360_s15 = smov [#allocation12] }
 0x11a   : >> { %v365_v20 = vsub.f32 %v364_v19, %v360_v18  ;;  %v385_v32 = vand.u32 2147483647, %v364_v19 }
 0x11b   : >> { %1193 = vrcp.f32 %v366_v17 }
 0x11c   : >> { %v386_v35 = vmin.f32 %v383_v31, %v385_v32 }
 0x11e   : >> { %v387_v37 = vmul.f32 1.1920929e-08, %v386_v35 }
 0x120   : >> { %vm388_vm11 = vcmp.le.f32.partialorder %v384_v36, %v387_v37 }
 0x125   : >> { %v1194_v21 = vpop.eup %1193 }
 0x126   : >> { %v368_v22 = vmul.f32 %v1194_v21, %v365_v20 }
 0x128   : >> { %v370_v23 = vmul.f32 %v368_v22, %v368_v22  ;;  %vm369_vm10 = vcmp.ge.f32.partialorder %v368_v22, 0.0 }
 0x12a   : >> { %v371_v24 = vadd.f32 1.0, %v370_v23 }
 0x12c   : >> { %1195 = vrsqrt.f32 %v371_v24  ;;  %vm374_vm8 = vcmp.eq.f32.partialorder %v371_v24, inf  ;;  %v377_v26 = vand.u32 2147483648, %v371_v24  ;;  %vm376_vm9 = vcmp.eq.f32.partialorder %v371_v24, 0.0 }
 0x136   : >> { %v1196_v25 = vpop.eup %1195 }
 0x137   : >> { %v373_v27 = vmul.f32 %v1196_v25, %v371_v24 }
 0x139   : >> { %v375_v28 = vsel %vm374_vm8, %v371_v24, %v373_v27  ;;  %vm212_vm8 = vcmp.eq.s32.totalorder (%p293_p1), %v200_v7, %v197_v6  ;;  %v253_v7 = vmov (%p293_p1), %v1284_v7  ;;  %v216_v6 = vmov (%p293_p1), %v1282_v6 }
 0x13a   : >> { %v378_v29 = vsel %vm376_vm9, %v377_v26, %v375_v28  ;;  %v219_v7 = vmov (%p293_p1), %v1284_v7  ;;  %v233_v6 = vmov (%p293_p1), %v1282_v6  ;;  %vm265_vm9 = vcmp.eq.s32.totalorder (%p293_p1), %v253_v7, %v250_v6 }
 0x13b   : >> { %v379_v30 = vxor.u32 2147483648, %v378_v29  ;;  %v236_v7 = vmov (%p293_p1), %v1284_v7 }
 0x13d   : >> { %v380_v33 = vsel %vm369_vm10, %v378_v29, %v379_v30 }
 0x13e   : >> { %v381_v34 = vadd.f32 %v380_v33, %v368_v22 }
 0x140   : >> { %1197 = vrcp.f32 %v381_v34 }
 0x14a   : >> { %v1198_v38 = vpop.eup %1197 }
 0x14b   : >> { %v389_v39 = vsel %vm388_vm11, 0.0, %v1198_v38 }
 0x14c   : >> { %v390_v40 = vmul.f32 %v389_v39, %v389_v39  ;;  %v394_v41 = vmul.f32 %v389_v39, %v362_v16 }
 0x14e   : >> { %v391_v42 = vadd.f32 1.0, %v390_v40  ;;  %v395_v43 = vsub.f32 %v360_v18, %v394_v41  ;;  %v397_v44 = vadd.f32 %v394_v41, %v364_v19 }
 0x150   : >> { %1199 = vrsqrt.f32 %v391_v42  ;;  %399 = vst [vmem:[%s398_s16] sm:$0xff] %v395_v43  ;;  %401 = vst [vmem:[%s400_s0] sm:$0xff] %v397_v44  ;;  %s1362_s16 = smov [#allocation22]  ;;  %s1364_s0 = smov [#allocation23] }
 0x15a   : >> { %v1200_v45 = vpop.eup %1199 }
 0x15b   : >> { %403 = vst [vmem:[%s402_s1] sm:$0xff] %v1200_v45  ;;  %v393_v46 = vmul.f32 %v1200_v45, %v389_v39  ;;  %s1366_s1 = smov [#allocation20] }
 0x15d   : >> { %405 = vst [vmem:[%s404_s2] sm:$0xff] %v393_v46  ;;  %s1368_s2 = smov [#allocation16] }
 0x162   : >> { %v407_v47 = vld [vmem:[%s406_s3] ss:$0 sm:$0xff]  ;;  %s1370_s3 = smov [#allocation14] }
 0x163   : >> { %v416_v48 = vsel %vm415_vm12, %v407_v47, 0.0  ;;  %v465_v27 = vld [vmem:[%s464_s13] ss:$0 sm:$0xff]  ;;  %s636_s13 = smov [#allocation21] }
 0x164   : >> { %417 = vadd.xlane.f32.xlu0 %v416_v48  ;;  %v422_v49 = vld [vmem:[%s421_s17] ss:$0 sm:$0xff]  ;;  %s1374_s17 = smov [#allocation18] }
 0x165   : >> { %v431_v50 = vsel %vm430_vm13, %v422_v49, 0.0  ;;  %v467_v28 = vld [vmem:[%s466_s14] ss:$0 sm:$0xff]  ;;  %s613_s14 = smov [#allocation22] }
 0x168   : >> { %432 = vadd.xlane.f32.xlu0 %v431_v50 }
 0x1f1   : >> { %v418_v51 = vpop.xlane.xlu0 %417 }
 0x1f2   : >> { %420 = vst [vmem:[%s419_s18] sm:$0xff] %v418_v51  ;;  %s1376_s18 = smov [#allocation21] }
 0x1f5   : >> { %v433_v52 = vpop.xlane.xlu0 %432 }
 0x1f6   : >> { %435 = vst [vmem:[%s434_s21] sm:$0xff] %v433_v52  ;;  %s533_s21 = smov [#allocation23] }
 0x1f9   : >> { %v437_v60 = vld [vmem:[%s436_s19] sm:$0xff]  ;;  %s534_s19 = smov [#allocation28] }
 0x1fa   : >> { %v661_v62 = vld [vmem:[%s660_s30] sm:$0xff]  ;;  %v448_v63 = vmul.f32 %v444_v53, %v437_v60  ;;  %v451_v0 = vmul.f32 %v445_v54, %v437_v60  ;;  %v455_v1 = vmul.f32 %v446_v55, %v437_v60  ;;  %v458_v2 = vmul.f32 %v447_v56, %v437_v60  ;;  %s549_s30 = smov [#allocation21] }
 0x1fb   : >> { %v672_v3 = vmul.f32 %v668_v57, %v661_v62  ;;  %v675_v4 = vmul.f32 %v669_v58, %v661_v62  ;;  %v679_v5 = vmul.f32 %v670_v59, %v661_v62  ;;  %v682_v8 = vmul.f32 %v671_v61, %v661_v62 }
 0x1fd   : >> { %v439_v9 = vld [vmem:[%s438_s11] sm:$0xff]  ;;  %s1421_s11 = smov [#allocation23] }
 0x1fe   : >> { %v663_v10 = vld [vmem:[%s662_s12] sm:$0xff]  ;;  %v449_v11 = vmul.f32 %v446_v55, %v439_v9  ;;  %v452_v12 = vmul.f32 %v447_v56, %v439_v9  ;;  %v454_v13 = vmul.f32 %v444_v53, %v439_v9  ;;  %v457_v14 = vmul.f32 %v445_v54, %v439_v9  ;;  %s612_s12 = smov [#allocation20] }
 0x1ff   : >> { %v673_v15 = vmul.f32 %v670_v59, %v663_v10  ;;  %v676_v16 = vmul.f32 %v671_v61, %v663_v10  ;;  %v678_v17 = vmul.f32 %v668_v57, %v663_v10  ;;  %v681_v18 = vmul.f32 %v669_v58, %v663_v10  ;;  %v541_v59 = vld [vmem:[%s534_s19] ss:$0 sm:$0xff] }
 0x200   : >> { %v450_v19 = vsub.f32 %v448_v63, %v449_v11  ;;  %v453_v20 = vsub.f32 %v451_v0, %v452_v12  ;;  %v456_v21 = vadd.f32 %v455_v1, %v454_v13  ;;  %v459_v22 = vadd.f32 %v458_v2, %v457_v14 }
 0x201   : >> { %v674_v23 = vsub.f32 %v672_v3, %v673_v15  ;;  %v677_v24 = vsub.f32 %v675_v4, %v676_v16  ;;  %v680_v25 = vadd.f32 %v679_v5, %v678_v17  ;;  %v683_v26 = vadd.f32 %v682_v8, %v681_v18 }
 0x202   : >> { %461 = vst [vmem:[%s1330_s22] sm:$0xf] %v453_v20  ;;  %463 = vst [vmem:[%s1334_s24] sm:$0xf] %v459_v22  ;;  %s493_s22 = smov [#allocation27]  ;;  %s507_s24 = smov [#allocation21] }
 0x203   : >> { %460 = vst [vmem:[%s1328_s20] sm:$0xf] %v450_v19  ;;  %462 = vst [vmem:[%s1332_s23] sm:$0xf] %v456_v21  ;;  %s520_s20 = smov [#allocation22]  ;;  %s492_s23 = smov [#allocation20]  ;;  %v500_v63 = vld [vmem:[%s493_s22] ss:$0 sm:$0xff] }
 0x204   : >> { %684 = vst [vmem:[%s1336_s25] sm:$0xf] %v674_v23  ;;  %685 = vst [vmem:[%s1338_s28] sm:$0xf] %v677_v24  ;;  %s1418_s25 = smov [#allocation22]  ;;  %s1218_s28 = smov 1  }
 0x205   : >> { %686 = vst [vmem:[%s1340_s29] sm:$0xf] %v680_v25  ;;  %687 = vst [vmem:[%s1344_s10] sm:$0xf] %v683_v26  ;;  %s548_s29 = smov [#allocation20]  ;;  %s1219_s10 = smov 127  }
 0x209   : >> { %v475_v30 = vld [vmem:[%s1364_s0] sm:$0xf] }
 0x20a   : >> { %v474_v29 = vld [vmem:[%s1362_s16] sm:$0xf]  ;;  %v483_v36 = vmul.f32 %v475_v30, %v467_v28  ;;  %v486_v42 = vmul.f32 %v475_v30, %v465_v27 }
 0x20b   : >> { %v472_v31 = vld [vmem:[%s1366_s1] sm:$0xf]  ;;  %v482_v35 = vmul.f32 %v474_v29, %v465_v27  ;;  %v485_v37 = vmul.f32 %v474_v29, %v467_v28 }
 0x20c   : >> { %v690_v32 = vld [vmem:[%s1360_s15] ss:$0 sm:$0xff]  ;;  %v1159_v34 = vld [vmem:[%s1360_s15 + $0x3] ss:$0 sm:$0xff]  ;;  %v476_v48 = vmul.f32 %v472_v31, %v465_v27  ;;  %v479_v49 = vmul.f32 %v472_v31, %v467_v28 }
 0x20d   : >> { %v1158_v33 = vld [vmem:[%s1360_s15 - $0x1] sm:$0xe]  ;;  %v1163_v45 = vld [vmem:[%s1370_s3 + $0x3] ss:$0 sm:$0xff]  ;;  %v484_v47 = vsub.f32 %v482_v35, %v483_v36  ;;  %v487_v53 = vadd.f32 %v486_v42, %v485_v37 }
 0x20e   : >> { %v697_v38 = vsel %vm620_vm14, %v690_v32, %v1158_v33  ;;  %v701_v39 = vld [vmem:[%s1368_s2] ss:$0 sm:$0xff]  ;;  %v1161_v40 = vld [vmem:[%s1368_s2 + $0x1] sm:$0x7] }
 0x20f   : >> { %v714_v41 = vld [vmem:[%s1370_s3] ss:$0 sm:$0xff]  ;;  %700 = vst [vmem:[%s1360_s15] sm:$0xf] %v697_v38  ;;  %v709_v43 = vsel %vm632_vm15, %v1159_v34, %v1161_v40  ;;  %v1165_v51 = vld [vmem:[%s1374_s17 + $0x1] sm:$0x7]  ;;  %490 = vst [vmem:[%s1362_s16] sm:$0xf] %v484_v47 }
 0x210   : >> { %v1162_v44 = vld [vmem:[%s1370_s3 - $0x1] sm:$0xe]  ;;  %1160 = vst [vmem:[%s1360_s15 + $0x1] sm:$0x1] %v701_v39  ;;  %711 = vst [vmem:[%s1368_s2] sm:$0xf] %v709_v43  ;;  %v733_v54 = vsel %vm632_vm15, %v1163_v45, %v1165_v51  ;;  %s637_s15 = smov [#allocation23] }
 0x211   : >> { %v725_v46 = vld [vmem:[%s1374_s17] ss:$0 sm:$0xff]  ;;  %v721_v50 = vsel %vm620_vm14, %v714_v41, %v1162_v44  ;;  %491 = vst [vmem:[%s1364_s0] sm:$0xf] %v487_v53  ;;  %s736_s16 = sadd.s32 (%p293_p1), 1, %s1211_s26   ;;  %s201_s0 = smov (%p293_p1), [#allocation20] }
 0x212   : >> { %v473_v52 = vld [vmem:[%s1376_s18] sm:$0xf]  ;;  %724 = vst [vmem:[%s1370_s3] sm:$0xf] %v721_v50  ;;  %735 = vst [vmem:[%s1374_s17] sm:$0xf] %v733_v54  ;;  %s237_s2 = smov (%p293_p1), [#allocation22]  ;;  %p289_p2 = scmp.ge.s32.totalorder (%p293_p1), %s736_s16, 15 }
 0x213   : >> { %v477_v55 = vmul.f32 %v473_v52, %v467_v28  ;;  %v480_v56 = vmul.f32 %v473_v52, %v465_v27  ;;  %1164 = vst [vmem:[%s1370_s3 + $0x1] sm:$0x1] %v725_v46  ;;  %s254_s3 = smov (%p293_p1), [#allocation23]  ;;  %s1510_s26 = smov (%p293_p1), %s736_s16 }
 0x215   : >> { %v478_v57 = vsub.f32 %v476_v48, %v477_v55  ;;  %v481_v58 = vadd.f32 %v480_v56, %v479_v49 }
 0x216   : >> { %v527_v60 = vld [vmem:[%s520_s20] sm:$0xf] }
 0x217   : >> { %488 = vst [vmem:[%s1366_s1] sm:$0xf] %v478_v57  ;;  %489 = vst [vmem:[%s1376_s18] sm:$0xf] %v481_v58  ;;  %v531_v61 = vsel %vm530_vm0, 0.0, %v527_v60  ;;  %s220_s1 = smov (%p293_p1), [#allocation21] }
 0x218   : >> { %v542_v62 = vld [vmem:[%s533_s21] sm:$0xf]  ;;  %532 = vst [vmem:[%s520_s20] sm:$0xf] %v531_v61 }
 0x219   : >> { %v546_v0 = vsel %vm545_vm1, %v541_v59, %v542_v62 }
 0x21a   : >> { %547 = vst [vmem:[%s533_s21] sm:$0xf] %v546_v0 }
 0x21e   : >> { %v501_v1 = vld [vmem:[%s492_s23] sm:$0xf] }
 0x21f   : >> { %v514_v2 = vld [vmem:[%s507_s24] sm:$0xf]  ;;  %v505_v3 = vsel %vm504_vm3, %v500_v63, %v501_v1 }
 0x220   : >> { %v518_v4 = vsel %vm517_vm4, 0.0, %v514_v2  ;;  %506 = vst [vmem:[%s492_s23] sm:$0xf] %v505_v3  ;;  %v586_v5 = vld [vmem:[%s1418_s25] sm:$0xf] }
 0x221   : >> { %519 = vst [vmem:[%s507_s24] sm:$0xf] %v518_v4  ;;  %587 = vrot.lane.b32.xlu0 %v586_v5, %s1218_s28  ;;  %v582_v11 = vld [vmem:[%s1421_s11] sm:$0xf] }
 0x222   : >> { %v603_v12 = vld [vmem:[%s1421_s11] sm:$0xf] }
 0x223   : >> { %v585_v30 = vld [vmem:[%s1418_s25] sm:$0xf] }
 0x227   : >> { %v554_v8 = vld [vmem:[%s548_s29] sm:$0xf] }
 0x228   : >> { %555 = vrot.lane.b32.xlu1 %v554_v8, %s1218_s28  ;;  %v550_v9 = vld [vmem:[%s549_s30] sm:$0xf] }
 0x229   : >> { %v571_v10 = vld [vmem:[%s549_s30] sm:$0xf] }
 0x22a   : >> { %v553_v18 = vld [vmem:[%s548_s29] sm:$0xf] }
 0x22c   : >> { %551 = vrot.lane.b32.xlu1 %v550_v9, %s1218_s28 }
 0x230   : >> { %572 = vrot.lane.b32.xlu1 %v571_v10, %s1219_s10 }
 0x234   : >> { %583 = vrot.lane.b32.xlu1 %v582_v11, %s1218_s28 }
 0x238   : >> { %604 = vrot.lane.b32.xlu1 %v603_v12, %s1219_s10 }
 0x293   : >> { %v588_v20 = vpop.permute.xlu0 %587 }
 0x294   : >> { %v592_v22 = vsel %vm559_vm5, %v586_v5, %v588_v20 }
 0x29a   : >> { %v556_v13 = vpop.permute.xlu1 %555 }
 0x29b   : >> { %v560_v14 = vsel %vm559_vm5, %v554_v8, %v556_v13 }
 0x29e   : >> { %v552_v15 = vpop.permute.xlu1 %551 }
 0x29f   : >> { %v564_v16 = vsel %vm563_vm6, %v552_v15, %v560_v14 }
 0x2a0   : >> { %v570_v17 = vsel %vm1065_vm2, %v564_v16, 0.0 }
 0x2a1   : >> { %578 = vst [vmem:[%s548_s29] sm:$0xf] %v570_v17 }
 0x2a2   : >> { %v573_v19 = vpop.permute.xlu1 %572 }
 0x2a3   : >> { %v577_v21 = vsel %vm576_vm7, %v553_v18, %v573_v19 }
 0x2a4   : >> { %579 = vst [vmem:[%s549_s30] sm:$0xf] %v577_v21 }
 0x2a6   : >> { %v584_v23 = vpop.permute.xlu1 %583 }
 0x2a7   : >> { %v596_v24 = vsel %vm563_vm6, %v584_v23, %v592_v22 }
 0x2a8   : >> { %v614_v25 = vld [vmem:[%s612_s12] ss:$0 sm:$0xff]  ;;  %v1151_v27 = vld [vmem:[%s612_s12 + $0x3] ss:$0 sm:$0xff]  ;;  %v602_v29 = vsel %vm1065_vm2, %v596_v24, 0.0 }
 0x2a9   : >> { %v1150_v26 = vld [vmem:[%s612_s12 - $0x1] sm:$0xe]  ;;  %610 = vst [vmem:[%s1418_s25] sm:$0xf] %v602_v29 }
 0x2aa   : >> { %v621_v28 = vsel %vm620_vm14, %v614_v25, %v1150_v26  ;;  %v605_v31 = vpop.permute.xlu1 %604 }
 0x2ab   : >> { %624 = vst [vmem:[%s612_s12] sm:$0xf] %v621_v28  ;;  %v638_v32 = vld [vmem:[%s636_s13] ss:$0 sm:$0xff]  ;;  %v1155_v34 = vld [vmem:[%s636_s13 + $0x3] ss:$0 sm:$0xff]  ;;  %v609_v35 = vsel %vm576_vm7, %v585_v30, %v605_v31 }
 0x2ac   : >> { %v1154_v33 = vld [vmem:[%s636_s13 - $0x1] sm:$0xe]  ;;  %611 = vst [vmem:[%s1421_s11] sm:$0xf] %v609_v35 }
 0x2ad   : >> { %v645_v36 = vsel %vm620_vm14, %v638_v32, %v1154_v33 }
 0x2ae   : >> { %648 = vst [vmem:[%s636_s13] sm:$0xf] %v645_v36 }
 0x2b0   : >> { %v625_v37 = vld [vmem:[%s613_s14] ss:$0 sm:$0xff]  ;;  %v1153_v38 = vld [vmem:[%s613_s14 + $0x1] sm:$0x7] }
 0x2b1   : >> { %1152 = vst [vmem:[%s612_s12 + $0x1] sm:$0x1] %v625_v37  ;;  %v633_v39 = vsel %vm632_vm15, %v1151_v27, %v1153_v38  ;;  %295 = sbr.rel (!%p293_p1) target bundleno = 257 (0x101), region = 397 }
 0x2b2   : >> { %635 = vst [vmem:[%s613_s14] sm:$0xf] %v633_v39 }
 0x2b3   : >> { %v649_v40 = vld [vmem:[%s637_s15] ss:$0 sm:$0xff]  ;;  %v1157_v41 = vld [vmem:[%s637_s15 + $0x1] sm:$0x7] }
 0x2b4   : >> { %1156 = vst [vmem:[%s636_s13 + $0x1] sm:$0x1] %v649_v40  ;;  %v657_v42 = vsel %vm632_vm15, %v1155_v34, %v1157_v41 }
 0x2b5   : >> { %659 = vst [vmem:[%s637_s15] sm:$0xf] %v657_v42 }
 0x2b8   : > { %v207_v43 = vld [vmem:[%s201_s0] sm:$0xf] }
 0x2b9   : > { %v208_v45 = vsel %vm1065_vm2, %v207_v43, 0.0  ;;  %v243_v47 = vld [vmem:[%s237_s2] sm:$0xf] }
 0x2ba   : > { %v209_v49 = vmul.f32 %v208_v45, %v208_v45  ;;  %v244_v51 = vsel %vm1065_vm2, %v243_v47, 0.0 }
 0x2bb   : > { %v226_v44 = vld [vmem:[%s220_s1] sm:$0xf]  ;;  %v245_v53 = vmul.f32 %v244_v51, %v244_v51 }
 0x2bc   : > { %v227_v46 = vsel %vm1065_vm2, %v226_v44, 0.0  ;;  %v260_v48 = vld [vmem:[%s254_s3] sm:$0xf]  ;;  %v213_v56 = vsel %vm212_vm8, 0.0, %v209_v49 }
 0x2bd   : > { %v228_v50 = vmul.f32 %v227_v46, %v227_v46  ;;  %v261_v52 = vsel %vm1065_vm2, %v260_v48, 0.0 }
 0x2be   : > { %v262_v55 = vmul.f32 %v261_v52, %v261_v52 }
 0x2bf   : > { %v230_v54 = vadd.f32 %v228_v50, %v209_v49  ;;  %v229_v57 = vadd.f32 %v228_v50, %v213_v56 }
 0x2c0   : > { %v266_v60 = vsel %vm265_vm9, 0.0, %v262_v55 }
 0x2c1   : > { %v247_v58 = vadd.f32 %v245_v53, %v230_v54  ;;  %v246_v59 = vadd.f32 %v245_v53, %v229_v57 }
 0x2c3   : > { %v268_v61 = vadd.f32 %v262_v55, %v247_v58  ;;  %v267_v62 = vadd.f32 %v266_v60, %v246_v59 }
 0x2c5   : > { %269 = vadd.xlane.f32.xlu0 %v268_v61 }
 0x2c9   : > { %277 = vadd.xlane.f32.xlu0 %v267_v62 }
 0x352   : > { %v270_v63 = vpop.xlane.xlu0 %269 }
 0x353   : > { %v271_v0 = vrot.slane %v270_v63, 4 }
 0x355   : > { %v272_v1 = vadd.f32 %v271_v0, %v270_v63 }
 0x356   : > { %v278_v2 = vpop.xlane.xlu0 %277 }
 0x357   : > { %v273_v3 = vrot.slane %v272_v1, 2  ;;  %v279_v4 = vrot.slane %v278_v2, 4 }
 0x359   : > { %v280_v5 = vadd.f32 %v279_v4, %v278_v2  ;;  %v274_v8 = vadd.f32 %v273_v3, %v272_v1 }
 0x35b   : > { %v281_v9 = vrot.slane %v280_v5, 2  ;;  %v275_v11 = vrot.slane %v274_v8, 1 }
 0x35d   : > { %v282_v10 = vadd.f32 %v281_v9, %v280_v5  ;;  %v276_v14 = vadd.f32 %v275_v11, %v274_v8 }
 0x35f   : > { %v283_v12 = vrot.slane %v282_v10, 1 }
 0x361   : > { %v284_v13 = vadd.f32 %v283_v12, %v282_v10 }
 0x363   : > { %1170 = vpush %v284_v13 }
 0x364   : > { %1172 = vpush %v276_v14 }
 0x394   : > { %s1171_s27 = spop %1170 }
 0x395   : > { %s1173_s17 = spop %1172 }
 0x396   : > { %s287_s18 = smul.f32 1e-10, %s1173_s17 }
 0x398   : > { %p288_p3 = scmp.le.f32.partialorder %s1171_s27, %s287_s18 }
 0x39a   : > { %p290_p4 = por %p289_p2, %p288_p3 }
 0x39c   :  { %738 = sbr.rel (!%p290_p4) target bundleno = 256 (0x100), region = 408 }
 0x3a3 PF:  { %s739_s19 = smov [#allocation20]  ;;  %v743_v6 = vmov %v1282_v6  ;;  %v746_v7 = vmov %v1284_v7  ;;  %v794_v15 = vld [vmem:[#allocation12] sm:$0xf]  ;;  %v800_v16 = vld [vmem:[#allocation14] sm:$0xf]  ;;  %s759_s20 = smov [#allocation23] }
 0x3a4   :  { %v763_v6 = vmov %v1282_v6  ;;  %v766_v7 = vmov %v1284_v7  ;;  %v747_v17 = vld [vmem:[%s739_s19] sm:$0xf]  ;;  %vm750_vm10 = vcmp.eq.s32.totalorder %v746_v7, %v743_v6  ;;  %796 = vst [vmem:[#allocation13] sm:$0xf] %v794_v15  ;;  %802 = vst [vmem:[#allocation15] sm:$0xf] %v800_v16 }
 0x3a5   :  { %vm770_vm11 = vcmp.eq.s32.totalorder %v766_v7, %v763_v6  ;;  %v806_v18 = vld [vmem:[#allocation16] sm:$0xf]  ;;  %v751_v19 = vsel %vm750_vm10, %v747_v17, 0.0  ;;  %v767_v20 = vld [vmem:[%s759_s20] sm:$0xf]  ;;  %s740_s30 = smov [#allocation8] }
 0x3a6   :  { %808 = vst [vmem:[#allocation17] sm:$0xf] %v806_v18  ;;  %v812_v21 = vld [vmem:[#allocation18] sm:$0xf]  ;;  %v752_v22 = vrot.slane %v751_v19, 4  ;;  %v771_v23 = vsel %vm770_vm11, %v767_v20, 0.0 }
 0x3a7   :  { %814 = vst [vmem:[#allocation19] sm:$0xf] %v812_v21  ;;  %v772_v24 = vrot.slane %v771_v23, 4 }
 0x3a8   :  { %v753_v25 = vadd.f32 %v752_v22, %v751_v19 }
 0x3a9   :  { %v773_v26 = vadd.f32 %v772_v24, %v771_v23 }
 0x3aa   :  { %v754_v27 = vrot.slane %v753_v25, 2 }
 0x3ab   :  { %v774_v28 = vrot.slane %v773_v26, 2  ;;  %v896_v29 = vld [vmem:[#allocation13] sm:$0xf]  ;;  %v927_v30 = vld [vmem:[#allocation15] sm:$0xf] }
 0x3ac   :  { %v755_v31 = vadd.f32 %v754_v27, %v753_v25  ;;  %897 = vst [vmem:[%s1506_s6] sm:$0xf] %v896_v29  ;;  %928 = vst [vmem:[%s1507_s7] sm:$0xf] %v927_v30  ;;  %s760_s6 = smov [#allocation10] }
 0x3ad   :  { %v958_v6 = vld [vmem:[#allocation17] sm:$0xf]  ;;  %v775_v7 = vadd.f32 %v774_v28, %v773_v26 }
 0x3ae   :  { %959 = vst [vmem:[%s1508_s8] sm:$0xf] %v958_v6  ;;  %v989_v32 = vld [vmem:[#allocation19] sm:$0xf]  ;;  %v756_v33 = vrot.slane %v755_v31, 1 }
 0x3af   :  { %990 = vst [vmem:[%s1509_s9] sm:$0xf] %v989_v32  ;;  %v776_v34 = vrot.slane %v775_v7, 1 }
 0x3b0   :  { %v757_v35 = vadd.f32 %v756_v33, %v755_v31 }
 0x3b1   :  { %v777_v36 = vadd.f32 %v776_v34, %v775_v7 }
 0x3b2   :  { %758 = vst [vmem:[%s740_s30] sm:$0x1] %v757_v35 }
 0x3b3   :  { %778 = vst [vmem:[%s760_s6] sm:$0x1] %v777_v36 }
 0x3b9   :  { %v782_v37 = vld [vmem:[#allocation8] sm:$0x1] }
 0x3ba   :  { %784 = vst [vmem:[#allocation9] sm:$0x1] %v782_v37  ;;  %v788_v38 = vld [vmem:[#allocation10] sm:$0x1] }
 0x3bb   :  { %790 = vst [vmem:[#allocation11] sm:$0x1] %v788_v38 }
 0x3c1   :  { %v832_v39 = vld [vmem:[#allocation9] sm:$0x1] }
 0x3c2   :  { %833 = vst [vmem:[%s1504_s4] sm:$0x1] %v832_v39  ;;  %v865_v40 = vld [vmem:[#allocation11] sm:$0x1] }
 0x3c3   :  { %866 = vst [vmem:[%s1505_s5] sm:$0x1] %v865_v40 }

// kernel: dsbn_spdbn_forward.10
= control target key start
LH: loop header
LB: loop body
LE: loop exit
PB: predicated region body
PF: predicated region fallthrough
CT: control target
= control target key end

     0   :  { %vm28_vm0 = vcmask 130048   ;;  %v973_v17 = vmov 0.0|0.0   ;;  %vm974_vm1 = vmmov 0   ;;  %v975_v18 = vmov 0.0   ;;  %s1120_s0 = inlined_call_operand.vmem [shape: f32[8,16], index: 0, kind: input, shape index: {}]   ;;  %s1121_s1 = inlined_call_operand.vmem [shape: f32[8,16,16], index: 1, kind: input, shape index: {}]   ;;  %s1122_s2 = inlined_call_operand.vmem [shape: f32[8,8,8], index: 2, kind: output, shape index: {}]  }
   0x1   :  { %v994_v0 = vld [vmem:[%s1120_s0] sm:$0xff]  ;;  %v13_v2 = vld [vmem:[%s1121_s1 + $0x8] sm:$0xff]  ;;  %v14_v3 = vld [vmem:[%s1121_s1 + $0x10] sm:$0xff]  ;;  %946 = vmatprep.subr.bf16.mxu1 %v973_v17  ;;  %894 = vmatprep.mubr.msk.f32.mxu1 %vm974_vm1, %v975_v18  ;;  %vm785_vm2 = vcmask 64512  }
   0x2   :  { %v12_v1 = vld [vmem:[%s1121_s1] sm:$0xff]  ;;  %864 = vmatprep.subr.msk.mxu0 %vm28_vm0, %v994_v0  ;;  %v15_v4 = vld [vmem:[%s1121_s1 + $0x18] sm:$0xff]  ;;  %v17_v6 = vld [vmem:[%s1121_s1 + $0x28] sm:$0xff] }
   0x3   :  { %866 = vmatprep.mubr.msk.f32.mxu0 %vm28_vm0, %v12_v1  ;;  %865 = vmatpush3.xpose.msk.msra.mxu0 %vm28_vm0, %v994_v0  ;;  %v16_v5 = vld [vmem:[%s1121_s1 + $0x20] sm:$0xff]  ;;  %v18_v7 = vld [vmem:[%s1121_s1 + $0x30] sm:$0xff]  ;;  %v19_v8 = vld [vmem:[%s1121_s1 + $0x38] sm:$0xff] }
   0x4   :  { %v20_v9 = vld [vmem:[%s1121_s1 + $0x40] sm:$0xff]  ;;  %v21_v10 = vld [vmem:[%s1121_s1 + $0x48] sm:$0xff]  ;;  %v22_v11 = vld [vmem:[%s1121_s1 + $0x50] sm:$0xff] }
   0x5   :  { %v23_v12 = vld [vmem:[%s1121_s1 + $0x58] sm:$0xff]  ;;  %v24_v13 = vld [vmem:[%s1121_s1 + $0x60] sm:$0xff]  ;;  %v25_v14 = vld [vmem:[%s1121_s1 + $0x68] sm:$0xff] }
   0x6   :  { %867 = vmatmul.mubr.msk.f32.vlgmr.msra.gmra.mrb[0].mxu0 %vm28_vm0, %v13_v2  ;;  %v26_v15 = vld [vmem:[%s1121_s1 + $0x70] sm:$0xff]  ;;  %v27_v16 = vld [vmem:[%s1121_s1 + $0x78] sm:$0xff] }
   0x7   :  { %869 = vmatprep.mubr.msk.f32.mxu0 %vm28_vm0, %v14_v3 }
   0xa   :  { %870 = vmatmul.mubr.msk.f32.gmra.mrb[2].mxu0 %vm28_vm0, %v15_v4 }
   0xb   :  { %872 = vmatprep.mubr.msk.f32.mxu0 %vm28_vm0, %v16_v5 }
   0xe   :  { %873 = vmatmul.mubr.msk.f32.gmra.mrb[4].mxu0 %vm28_vm0, %v17_v6 }
   0xf   :  { %875 = vmatprep.mubr.msk.f32.mxu0 %vm28_vm0, %v18_v7 }
  0x12   :  { %876 = vmatmul.mubr.msk.f32.gmra.mrb[6].mxu0 %vm28_vm0, %v19_v8 }
  0x13   :  { %878 = vmatprep.mubr.msk.f32.mxu0 %vm28_vm0, %v20_v9 }
  0x16   :  { %879 = vmatmul.mubr.msk.f32.gmra.mrb[8].mxu0 %vm28_vm0, %v21_v10 }
  0x17   :  { %881 = vmatprep.mubr.msk.f32.mxu0 %vm28_vm0, %v22_v11 }
  0x1a   :  { %882 = vmatmul.mubr.msk.f32.gmra.mrb[10].mxu0 %vm28_vm0, %v23_v12 }
  0x1b   :  { %884 = vmatprep.mubr.msk.f32.mxu0 %vm28_vm0, %v24_v13 }
  0x1e   :  { %885 = vmatmul.mubr.msk.f32.gmra.mrb[12].mxu0 %vm28_vm0, %v25_v14 }
  0x1f   :  { %887 = vmatprep.mubr.msk.f32.mxu0 %vm28_vm0, %v26_v15 }
  0x22   :  { %888 = vmatmul.mubr.msk.f32.gmra.mrb[14].mxu0 %vm28_vm0, %v27_v16 }
  0xd9   :  { %v868_v19 = vpop.f32.mrb[0].mxu0 }
  0xda   :  { %v146_v20 = vpop.f32.mrb[1].mxu0 }
  0xdb   :  { %v947_v21 = vpack.c.bf16 %v868_v19, %v146_v20 }
  0xdd   :  { %v871_v22 = vpop.f32.mrb[2].mxu0  ;;  %948 = vmatpush3.bf16.msra.mxu1 %v947_v21 }
  0xde   :  { %v156_v23 = vpop.f32.mrb[3].mxu0  ;;  %949 = vmatprep.subr.bf16.mxu1 %v973_v17 }
  0xdf   :  { %v950_v24 = vpack.c.bf16 %v871_v22, %v156_v23 }
  0xe0   :  { %895 = vmatmul.mubr.msk.f32.vlgmr.msra.gmra.mrb[0].mxu1 %vm28_vm0, %v994_v0 }
  0xe1   :  { %v874_v25 = vpop.f32.mrb[4].mxu0  ;;  %951 = vmatpush3.bf16.msra.mxu1 %v950_v24  ;;  %901 = vmatprep.mubr.msk.f32.mxu1 %vm974_vm1, %v975_v18 }
  0xe2   :  { %v166_v26 = vpop.f32.mrb[5].mxu0  ;;  %952 = vmatprep.subr.bf16.mxu1 %v973_v17 }
  0xe3   :  { %v953_v27 = vpack.c.bf16 %v874_v25, %v166_v26 }
  0xe4   :  { %902 = vmatmul.mubr.msk.f32.vlgmr.msra.gmra.mrb[2].mxu1 %vm28_vm0, %v994_v0 }
  0xe5   :  { %v877_v28 = vpop.f32.mrb[6].mxu0  ;;  %954 = vmatpush3.bf16.msra.mxu1 %v953_v27  ;;  %908 = vmatprep.mubr.msk.f32.mxu1 %vm974_vm1, %v975_v18 }
  0xe6   :  { %v176_v29 = vpop.f32.mrb[7].mxu0  ;;  %955 = vmatprep.subr.bf16.mxu1 %v973_v17 }
  0xe7   :  { %v956_v30 = vpack.c.bf16 %v877_v28, %v176_v29 }
  0xe8   :  { %909 = vmatmul.mubr.msk.f32.vlgmr.msra.gmra.mrb[4].mxu1 %vm28_vm0, %v994_v0 }
  0xe9   :  { %v880_v31 = vpop.f32.mrb[8].mxu0  ;;  %957 = vmatpush3.bf16.msra.mxu1 %v956_v30  ;;  %915 = vmatprep.mubr.msk.f32.mxu1 %vm974_vm1, %v975_v18 }
  0xea   :  { %v186_v32 = vpop.f32.mrb[9].mxu0  ;;  %958 = vmatprep.subr.bf16.mxu1 %v973_v17 }
  0xeb   :  { %v959_v33 = vpack.c.bf16 %v880_v31, %v186_v32 }
  0xec   :  { %916 = vmatmul.mubr.msk.f32.vlgmr.msra.gmra.mrb[6].mxu1 %vm28_vm0, %v994_v0 }
  0xed   :  { %v883_v34 = vpop.f32.mrb[10].mxu0  ;;  %960 = vmatpush3.bf16.msra.mxu1 %v959_v33  ;;  %922 = vmatprep.mubr.msk.f32.mxu1 %vm974_vm1, %v975_v18 }
  0xee   :  { %v196_v35 = vpop.f32.mrb[11].mxu0  ;;  %961 = vmatprep.subr.bf16.mxu1 %v973_v17 }
  0xef   :  { %v962_v36 = vpack.c.bf16 %v883_v34, %v196_v35 }
  0xf0   :  { %923 = vmatmul.mubr.msk.f32.vlgmr.msra.gmra.mrb[8].mxu1 %vm28_vm0, %v994_v0 }
  0xf1   :  { %v886_v37 = vpop.f32.mrb[12].mxu0  ;;  %963 = vmatpush3.bf16.msra.mxu1 %v962_v36  ;;  %929 = vmatprep.mubr.msk.f32.mxu1 %vm974_vm1, %v975_v18 }
  0xf2   :  { %v206_v38 = vpop.f32.mrb[13].mxu0  ;;  %964 = vmatprep.subr.bf16.mxu1 %v973_v17 }
  0xf3   :  { %v965_v39 = vpack.c.bf16 %v886_v37, %v206_v38 }
  0xf4   :  { %930 = vmatmul.mubr.msk.f32.vlgmr.msra.gmra.mrb[10].mxu1 %vm28_vm0, %v994_v0 }
  0xf5   :  { %v889_v40 = vpop.f32.mrb[14].mxu0  ;;  %966 = vmatpush3.bf16.msra.mxu1 %v965_v39  ;;  %936 = vmatprep.mubr.msk.f32.mxu1 %vm974_vm1, %v975_v18 }
  0xf6   :  { %v216_v41 = vpop.f32.mrb[15].mxu0  ;;  %967 = vmatprep.subr.bf16.mxu1 %v973_v17 }
  0xf7   :  { %v968_v42 = vpack.c.bf16 %v889_v40, %v216_v41 }
  0xf8   :  { %937 = vmatmul.mubr.msk.f32.vlgmr.msra.gmra.mrb[12].mxu1 %vm28_vm0, %v994_v0 }
  0xf9   :  { %969 = vmatpush3.bf16.msra.mxu1 %v968_v42  ;;  %943 = vmatprep.mubr.msk.f32.mxu1 %vm974_vm1, %v975_v18 }
  0xfc   :  { %944 = vmatmul.mubr.msk.f32.vlgmr.msra.gmra.mrb[14].mxu1 %vm28_vm0, %v994_v0 }
 0x1b3   :  { %v291_v43 = vpop.f32.mrb[0].mxu1 }
 0x1b4   :  { %786 = vst.msk [vmem:[%s1122_s2] sm:$0xff] %vm785_vm2, %v291_v43  ;;  %v896_v44 = vpop.f32.mrb[1].mxu1 }
 0x1b7   :  { %v361_v45 = vpop.f32.mrb[2].mxu1 }
 0x1b8   :  { %787 = vst.msk [vmem:[%s1122_s2 + $0x8] sm:$0xff] %vm785_vm2, %v361_v45  ;;  %v903_v46 = vpop.f32.mrb[3].mxu1 }
 0x1bb   :  { %v431_v47 = vpop.f32.mrb[4].mxu1 }
 0x1bc   :  { %788 = vst.msk [vmem:[%s1122_s2 + $0x10] sm:$0xff] %vm785_vm2, %v431_v47  ;;  %v910_v48 = vpop.f32.mrb[5].mxu1 }
 0x1bf   :  { %v501_v49 = vpop.f32.mrb[6].mxu1 }
 0x1c0   :  { %789 = vst.msk [vmem:[%s1122_s2 + $0x18] sm:$0xff] %vm785_vm2, %v501_v49  ;;  %v917_v50 = vpop.f32.mrb[7].mxu1 }
 0x1c3   :  { %v571_v51 = vpop.f32.mrb[8].mxu1 }
 0x1c4   :  { %790 = vst.msk [vmem:[%s1122_s2 + $0x20] sm:$0xff] %vm785_vm2, %v571_v51  ;;  %v924_v52 = vpop.f32.mrb[9].mxu1 }
 0x1c7   :  { %v641_v53 = vpop.f32.mrb[10].mxu1 }
 0x1c8   :  { %791 = vst.msk [vmem:[%s1122_s2 + $0x28] sm:$0xff] %vm785_vm2, %v641_v53  ;;  %v931_v54 = vpop.f32.mrb[11].mxu1 }
 0x1cb   :  { %v711_v55 = vpop.f32.mrb[12].mxu1 }
 0x1cc   :  { %792 = vst.msk [vmem:[%s1122_s2 + $0x30] sm:$0xff] %vm785_vm2, %v711_v55  ;;  %v938_v56 = vpop.f32.mrb[13].mxu1 }
 0x1cf   :  { %v781_v57 = vpop.f32.mrb[14].mxu1 }
 0x1d0   :  { %793 = vst.msk [vmem:[%s1122_s2 + $0x38] sm:$0xff] %vm785_vm2, %v781_v57  ;;  %v945_v58 = vpop.f32.mrb[15].mxu1 }

// kernel: closed_call.34
= control target key start
LH: loop header
LB: loop body
LE: loop exit
PB: predicated region body
PF: predicated region fallthrough
CT: control target
= control target key end

     0   :  { %vm30_vm0 = vcmask 64512   ;;  %v220_v0 = vmov 0.0   ;;  %vm221_vm1 = vmmov 0   ;;  %v24_v4 = vlaneseq  ;;  %s260_s0 = inlined_call_operand.vmem [shape: f32[1,8,8], index: 0, kind: input, shape index: {}]   ;;  %s261_s1 = inlined_call_operand.vmem [shape: f32[1,8], index: 1, kind: input, shape index: {}]   ;;  %s262_s3 = inlined_call_operand.vmem [shape: f32[1,8,8], index: 3, kind: output, shape index: {1}]   ;;  %s263_s2 = inlined_call_operand.vmem [shape: f32[1,8,8], index: 2, kind: output, shape index: {0}]  }
   0x1   :  { %211 = vmatprep.subr.mxu1 %v220_v0  ;;  %206 = vmatprep.subr.mxu0 %v220_v0  ;;  %v13_v1 = vld [vmem:[%s260_s0] sm:$0xff] }
   0x2   :  { %v14_v2 = vld [vmem:[%s261_s1] sm:$0x1]  ;;  %212 = vmatpush3.xpose.msk.msra.mxu1 %vm30_vm0, %v13_v1  ;;  %207 = vmatpush3.xpose.msk.msra.mxu0 %vm30_vm0, %v13_v1  ;;  %v25_v5 = vshrl.u32 %v24_v4, 7 }
   0x3   :  { %v15_v3 = vmax.f32 %v14_v2, 1e-12  ;;  %213 = vmatprep.mubr.msk.f32.mxu1 %vm221_vm1, %v220_v0  ;;  %208 = vmatprep.mubr.msk.f32.mxu0 %vm221_vm1, %v220_v0 }
   0x4   :  { %v26_v6 = vsub.s32 0, %v25_v5 }
   0x5   :  { %218 = vrsqrt.f32 %v15_v3  ;;  %vm18_vm2 = vcmp.eq.f32.partialorder %v15_v3, inf  ;;  %v21_v8 = vand.u32 2147483648, %v15_v3  ;;  %vm20_vm3 = vcmp.eq.f32.partialorder %v15_v3, 0.0 }
   0xf   :  { %v219_v7 = vpop.eup %218 }
  0x10   :  { %v113_v9 = vrot.slane %v219_v7, %v26_v6  ;;  %v17_v10 = vmul.f32 %v219_v7, %v15_v3 }
  0x12   :  { %v115_v11 = vmul.f32 %v113_v9, %v13_v1  ;;  %v19_v12 = vsel %vm18_vm2, %v15_v3, %v17_v10 }
  0x13   :  { %v22_v13 = vsel %vm20_vm3, %v21_v8, %v19_v12 }
  0x14   :  { %214 = vmatmul.mubr.msk.f32.vlgmr.msra.gmra.mrb[0].mxu1 %vm30_vm0, %v115_v11  ;;  %v27_v14 = vrot.slane %v22_v13, %v26_v6 }
  0x16   :  { %v29_v15 = vmul.f32 %v27_v14, %v13_v1 }
  0x18   :  { %209 = vmatmul.mubr.msk.f32.vlgmr.msra.gmra.mrb[0].mxu0 %vm30_vm0, %v29_v15 }
  0xe7   :  { %v185_v16 = vpop.f32.mrb[0].mxu1 }
  0xe8   :  { %189 = vst.msk [vmem:[%s262_s3] sm:$0xff] %vm30_vm0, %v185_v16  ;;  %v215_v17 = vpop.f32.mrb[1].mxu1 }
  0xeb   :  { %v103_v18 = vpop.f32.mrb[0].mxu0 }
  0xec   :  { %107 = vst.msk [vmem:[%s263_s2] sm:$0xff] %vm30_vm0, %v103_v18  ;;  %v210_v19 = vpop.f32.mrb[1].mxu0 }

// kernel: dsbn_spdbn_forward.9
= control target key start
LH: loop header
LB: loop body
LE: loop exit
PB: predicated region body
PF: predicated region fallthrough
CT: control target
= control target key end

     0   :  { %v1228_v1 = vmov 0.0   ;;  %vm41_vm0 = vcmask 130048   ;;  %vm1229_vm1 = vmmov 0   ;;  %vm47_vm2 = vcmask 64512   ;;  %s1441_s1 = inlined_call_operand.vmem [shape: f32[8,16], index: 1, kind: input, shape index: {}]   ;;  %s1442_s2 = inlined_call_operand.vmem [shape: f32[2,8], index: 2, kind: input, shape index: {}]   ;;  %s1443_s4 = inlined_call_operand.vmem [shape: f32[2,1], index: 4, kind: input, shape index: {}]   ;;  %s1444_s3 = inlined_call_operand.vmem [shape: f32[8,2], index: 3, kind: input, shape index: {}]   ;;  %s1445_s0 = inlined_call_operand.vmem [shape: f32[8,16,16], index: 0, kind: input, shape index: {}]   ;;  %s1446_s5 = inlined_call_operand.vmem [shape: f32[8,16,16], index: 5, kind: output, shape index: {}]  }
   0x1   :  { %v36_v0 = vld [vmem:[%s1441_s1] sm:$0xff]  ;;  %1103 = vmatprep.subr.mxu0 %v1228_v1  ;;  %1108 = vmatprep.subr.mxu1 %v1228_v1  ;;  %v1230_v9 = vmov 0   ;;  %vm128_vm3 = vcmask 1041408   ;;  %vm124_vm4 = vcmask 15360   ;;  %v21_v20 = vld [vmem:[%s1445_s0 + $0x8] sm:$0xff]  ;;  %vm1283_vm5 = vmpackc.low %vm41_vm0, %vm41_vm0  ;;  %v215_v37 = vlaneseq }
   0x2   :  { %v37_v2 = vmax.f32 %v36_v0, 1e-12  ;;  %1105 = vmatprep.mubr.msk.f32.mxu0 %vm1229_vm1, %v1228_v1  ;;  %1110 = vmatprep.mubr.msk.f32.mxu1 %vm1229_vm1, %v1228_v1  ;;  %v45_v7 = vld [vmem:[%s1442_s2] sm:$0x3]  ;;  %v22_v23 = vld [vmem:[%s1445_s0 + $0x10] sm:$0xff]  ;;  %v23_v24 = vld [vmem:[%s1445_s0 + $0x18] sm:$0xff] }
   0x3   :  { %1221 = vset.pattern.permute.xlu0 %v1230_v9  ;;  %v46_v13 = vld [vmem:[%s1443_s4] sm:$0x3]  ;;  %v1175_v25 = vpack.c.bf16 %v23_v24, %v22_v23  ;;  %v25_v27 = vld [vmem:[%s1445_s0 + $0x28] sm:$0xff]  ;;  %v26_v29 = vld [vmem:[%s1445_s0 + $0x30] sm:$0xff]  ;;  %v1231_v35 = vmov 1966171168  }
   0x4   :  { %1222 = vlog2.f32 %v37_v2  ;;  %v123_v16 = vld [vmem:[%s1444_s3] sm:$0xff]  ;;  %v27_v30 = vld [vmem:[%s1445_s0 + $0x38] sm:$0xff]  ;;  %v213_v36 = vunpack.c.l.s4 %v1231_v35  ;;  %v216_v39 = vshrl.u32 %v215_v37, 7  ;;  %v29_v57 = vld [vmem:[%s1445_s0 + $0x48] sm:$0xff] }
   0x5   :  { %v20_v19 = vld [vmem:[%s1445_s0] sm:$0xff]  ;;  %v1187_v31 = vpack.c.bf16 %v27_v30, %v26_v29  ;;  %v30_v0 = vld [vmem:[%s1445_s0 + $0x50] sm:$0xff]  ;;  %v31_v1 = vld [vmem:[%s1445_s0 + $0x58] sm:$0xff] }
   0x6   :  { %v1169_v21 = vpack.c.bf16 %v21_v20, %v20_v19  ;;  %v24_v26 = vld [vmem:[%s1445_s0 + $0x20] sm:$0xff]  ;;  %v214_v38 = vunpack.c.0.s8 %v213_v36  ;;  %v262_v42 = vsub.s32 0, %v216_v39  ;;  %v33_v9 = vld [vmem:[%s1445_s0 + $0x68] sm:$0xff] }
   0x7   :  { %v1181_v28 = vpack.c.bf16 %v25_v27, %v24_v26  ;;  %v28_v56 = vld [vmem:[%s1445_s0 + $0x40] sm:$0xff] }
   0x8   :  { %v217_v40 = vsub.s32 %v214_v38, %v216_v39  ;;  %v1193_v59 = vpack.c.bf16 %v29_v57, %v28_v56 }
   0xe   :  { %v1223_v3 = vpop.eup %1222 }
   0xf   :  { %v39_v4 = vmul.f32 0.6931472, %v1223_v3  ;;  %v1199_v3 = vpack.c.bf16 %v31_v1, %v30_v0 }
  0x11   :  { %v40_v5 = vmul.f32 %v39_v4, %v39_v4 }
  0x13   :  { %v42_v6 = vsel %vm41_vm0, %v40_v5, 0.0 }
  0x14   :  { %43 = vadd.xlane.f32.xlu0 %v42_v6 }
  0xa1   :  { %v44_v8 = vpop.xlane.xlu0 %43 }
  0xa2   :  { %1104 = vmatpush3.msra.mxu0 %v44_v8  ;;  %v32_v8 = vld [vmem:[%s1445_s0 + $0x60] sm:$0xff] }
  0xa3   :  { %1106 = vmatmul.mubr.msk.f32.vlgmr.msra.gmra.mrb[0].mxu0 %vm47_vm2, %v45_v7  ;;  %1171 = vmatprep.subr.msk.bf16.mxu0 %vm1283_vm5, %v1169_v21 }
  0xa9   :  { %1174 = vmatpush3.bf16.xpose.msk.msra.mxu0 %vm1283_vm5, %v1169_v21 }
  0xaa   :  { %1183 = vmatprep.subr.msk.bf16.mxu0 %vm1283_vm5, %v1181_v28 }
 0x176   :  { %v117_v10 = vpop.f32.mrb[0].mxu0 }
 0x177   :  { %v118_v11 = vadd.f32 1e-05, %v117_v10  ;;  %v1107_v12 = vpop.f32.mrb[1].mxu0 }
 0x179   :  { %1224 = vrsqrt.f32 %v118_v11  ;;  %v1205_v11 = vpack.c.bf16 %v33_v9, %v32_v8 }
 0x183   :  { %v1225_v14 = vpop.eup %1224 }
 0x184   :  { %v122_v15 = vmul.f32 %v1225_v14, %v46_v13  ;;  %v34_v14 = vld [vmem:[%s1445_s0 + $0x70] sm:$0xff] }
 0x186   :  { %1109 = vmatpush3.msk.msra.mxu1 %vm128_vm3, %v122_v15  ;;  %v35_v15 = vld [vmem:[%s1445_s0 + $0x78] sm:$0xff] }
 0x187   :  { %1111 = vmatmul.mubr.msk.f32.vlgmr.msra.gmra.mrb[0].mxu1 %vm124_vm4, %v123_v16  ;;  %1177 = vmatprep.subr.msk.bf16.mxu1 %vm1283_vm5, %v1175_v25 }
 0x18d   :  { %1180 = vmatpush3.bf16.xpose.msk.msra.mxu1 %vm1283_vm5, %v1175_v25 }
 0x18e   :  { %1189 = vmatprep.subr.msk.bf16.mxu1 %vm1283_vm5, %v1187_v31 }
 0x25a   :  { %v198_v17 = vpop.f32.mrb[0].mxu1 }
 0x25b   :  { %204 = vperm.xlu0 %1221, %v198_v17   ;;  %v1112_v18 = vpop.f32.mrb[1].mxu1  ;;  %v1211_v17 = vpack.c.bf16 %v35_v15, %v34_v14 }
 0x2da   :  { %v205_v32 = vpop.permute.xlu0 %204 }
 0x2db   :  { %v207_v33 = vmul.f32 %v205_v32, %v39_v4 }
 0x2dd   :  { %v208_v34 = vmul.f32 1.442695, %v207_v33 }
 0x2df   :  { %1226 = vpow2.f32 %v208_v34 }
 0x2e9   :  { %v1227_v41 = vpop.eup %1226 }
 0x2ea   :  { %v211_v43 = vcombine.high %v1227_v41, %v1227_v41  ;;  %v218_v44 = vrot.slane %v1227_v41, %v217_v40 }
 0x2ec   :  { %v225_v45 = vrot.slane %v211_v43, %v217_v40  ;;  %v226_v46 = vcombine.high %v218_v44, %v218_v44  ;;  %v234_v47 = vrot.slane %v218_v44, %v217_v40 }
 0x2ee   :  { %v263_v48 = vrot.slane %v234_v47, %v262_v42  ;;  %v248_v49 = vrot.slane %v226_v46, %v217_v40  ;;  %v256_v50 = vcombine.high %v234_v47, %v234_v47  ;;  %v227_v51 = vcombine.high %v225_v45, %v225_v45 }
 0x2ef   :  { %v241_v63 = vrot.slane %v225_v45, %v217_v40 }
 0x2f0   :  { %v301_v52 = vmul.f32 %v263_v48, %v21_v20  ;;  %v267_v53 = vrot.slane %v248_v49, %v262_v42  ;;  %v300_v54 = vmul.f32 %v263_v48, %v20_v19  ;;  %v271_v55 = vrot.slane %v256_v50, %v262_v42 }
 0x2f1   :  { %v258_v58 = vcombine.high %v248_v49, %v248_v49  ;;  %v255_v4 = vrot.slane %v227_v51, %v217_v40  ;;  %v279_v6 = vrot.slane %v241_v63, %v262_v42  ;;  %v257_v13 = vcombine.high %v241_v63, %v241_v63 }
 0x2f2   :  { %v303_v60 = vmul.f32 %v267_v53, %v23_v24  ;;  %1117 = vmatprep.mubr.msk.f32.mxu0 %vm41_vm0, %v300_v54  ;;  %v302_v61 = vmul.f32 %v267_v53, %v22_v23  ;;  %v304_v62 = vmul.f32 %v271_v55, %v24_v26  ;;  %v305_v10 = vmul.f32 %v271_v55, %v25_v27 }
 0x2f3   :  { %1118 = vmatmul.mubr.msk.f32.vlgmr.msra.gmra.mrb[2].mxu0 %vm41_vm0, %v301_v52  ;;  %v275_v2 = vrot.slane %v258_v58, %v262_v42  ;;  %v283_v7 = vrot.slane %v255_v4, %v262_v42  ;;  %v308_v12 = vmul.f32 %v279_v6, %v28_v56  ;;  %v259_v19 = vcombine.high %v255_v4, %v255_v4 }
 0x2f4   :  { %1186 = vmatpush3.bf16.xpose.msk.msra.mxu0 %vm1283_vm5, %v1181_v28  ;;  %1124 = vmatprep.mubr.msk.f32.mxu1 %vm41_vm0, %v302_v61  ;;  %v287_v20 = vrot.slane %v257_v13, %v262_v42  ;;  %v309_v23 = vmul.f32 %v279_v6, %v29_v57 }
 0x2f5   :  { %1131 = vmatprep.mubr.msk.f32.mxu0 %vm41_vm0, %v304_v62  ;;  %1125 = vmatmul.mubr.msk.f32.vlgmr.msra.gmra.mrb[2].mxu1 %vm41_vm0, %v303_v60  ;;  %v306_v5 = vmul.f32 %v275_v2, %v26_v29  ;;  %v307_v16 = vmul.f32 %v275_v2, %v27_v30  ;;  %v310_v18 = vmul.f32 %v283_v7, %v30_v0 }
 0x2f6   :  { %1192 = vmatpush3.bf16.xpose.msk.msra.mxu1 %vm1283_vm5, %v1187_v31  ;;  %1195 = vmatprep.subr.msk.bf16.mxu0 %vm1283_vm5, %v1193_v59  ;;  %v291_v21 = vrot.slane %v259_v19, %v262_v42  ;;  %v312_v24 = vmul.f32 %v287_v20, %v32_v8  ;;  %v311_v25 = vmul.f32 %v283_v7, %v31_v1 }
 0x2f7   :  { %1138 = vmatprep.mubr.msk.f32.mxu1 %vm41_vm0, %v306_v5  ;;  %1201 = vmatprep.subr.msk.bf16.mxu1 %vm1283_vm5, %v1199_v3  ;;  %v313_v27 = vmul.f32 %v287_v20, %v33_v9 }
 0x2f8   :  { %v314_v26 = vmul.f32 %v291_v21, %v34_v14  ;;  %v315_v28 = vmul.f32 %v291_v21, %v35_v15 }
 0x2fb   :  { %1132 = vmatmul.mubr.msk.f32.vlgmr.msra.gmra.mrb[4].mxu0 %vm41_vm0, %v305_v10 }
 0x2fc   :  { %1198 = vmatpush3.bf16.xpose.msk.msra.mxu0 %vm1283_vm5, %v1193_v59  ;;  %1145 = vmatprep.mubr.msk.f32.mxu0 %vm41_vm0, %v308_v12 }
 0x2fd   :  { %1139 = vmatmul.mubr.msk.f32.vlgmr.msra.gmra.mrb[4].mxu1 %vm41_vm0, %v307_v16  ;;  %1207 = vmatprep.subr.msk.bf16.mxu0 %vm1283_vm5, %v1205_v11 }
 0x2fe   :  { %1204 = vmatpush3.bf16.xpose.msk.msra.mxu1 %vm1283_vm5, %v1199_v3  ;;  %1152 = vmatprep.mubr.msk.f32.mxu1 %vm41_vm0, %v310_v18 }
 0x2ff   :  { %1213 = vmatprep.subr.msk.bf16.mxu1 %vm1283_vm5, %v1211_v17 }
 0x303   :  { %1146 = vmatmul.mubr.msk.f32.vlgmr.msra.gmra.mrb[6].mxu0 %vm41_vm0, %v309_v23 }
 0x304   :  { %1210 = vmatpush3.bf16.xpose.msk.msra.mxu0 %vm1283_vm5, %v1205_v11  ;;  %1159 = vmatprep.mubr.msk.f32.mxu0 %vm41_vm0, %v312_v24 }
 0x305   :  { %1153 = vmatmul.mubr.msk.f32.vlgmr.msra.gmra.mrb[6].mxu1 %vm41_vm0, %v311_v25 }
 0x306   :  { %1216 = vmatpush3.bf16.xpose.msk.msra.mxu1 %vm1283_vm5, %v1211_v17  ;;  %1166 = vmatprep.mubr.msk.f32.mxu1 %vm41_vm0, %v314_v26 }
 0x30b   :  { %1160 = vmatmul.mubr.msk.f32.vlgmr.msra.gmra.mrb[8].mxu0 %vm41_vm0, %v313_v27 }
 0x30d   :  { %1167 = vmatmul.mubr.msk.f32.vlgmr.msra.gmra.mrb[8].mxu1 %vm41_vm0, %v315_v28 }
 0x3c6   :  { %v1119_v29 = vpop.f32.mrb[2].mxu0 }
 0x3c7   :  { %1013 = vst.msk [vmem:[%s1446_s5 + $0x8] sm:$0xff] %vm41_vm0, %v1119_v29  ;;  %v394_v30 = vpop.f32.mrb[3].mxu0 }
 0x3c8   :  { %1012 = vst.msk [vmem:[%s1446_s5] sm:$0xff] %vm41_vm0, %v394_v30  ;;  %v1126_v22 = vpop.f32.mrb[2].mxu1 }
 0x3c9   :  { %1015 = vst.msk [vmem:[%s1446_s5 + $0x18] sm:$0xff] %vm41_vm0, %v1126_v22  ;;  %v481_v31 = vpop.f32.mrb[3].mxu1 }
 0x3ca   :  { %1014 = vst.msk [vmem:[%s1446_s5 + $0x10] sm:$0xff] %vm41_vm0, %v481_v31 }
 0x3ce   :  { %v1133_v32 = vpop.f32.mrb[4].mxu0 }
 0x3cf   :  { %1017 = vst.msk [vmem:[%s1446_s5 + $0x28] sm:$0xff] %vm41_vm0, %v1133_v32  ;;  %v568_v33 = vpop.f32.mrb[5].mxu0 }
 0x3d0   :  { %1016 = vst.msk [vmem:[%s1446_s5 + $0x20] sm:$0xff] %vm41_vm0, %v568_v33  ;;  %v1140_v34 = vpop.f32.mrb[4].mxu1 }
 0x3d1   :  { %1019 = vst.msk [vmem:[%s1446_s5 + $0x38] sm:$0xff] %vm41_vm0, %v1140_v34  ;;  %v655_v35 = vpop.f32.mrb[5].mxu1 }
 0x3d2   :  { %1018 = vst.msk [vmem:[%s1446_s5 + $0x30] sm:$0xff] %vm41_vm0, %v655_v35 }
 0x3d6   :  { %v1147_v36 = vpop.f32.mrb[6].mxu0 }
 0x3d7   :  { %1021 = vst.msk [vmem:[%s1446_s5 + $0x48] sm:$0xff] %vm41_vm0, %v1147_v36  ;;  %v742_v37 = vpop.f32.mrb[7].mxu0 }
 0x3d8   :  { %1020 = vst.msk [vmem:[%s1446_s5 + $0x40] sm:$0xff] %vm41_vm0, %v742_v37  ;;  %v1154_v38 = vpop.f32.mrb[6].mxu1 }
 0x3d9   :  { %1023 = vst.msk [vmem:[%s1446_s5 + $0x58] sm:$0xff] %vm41_vm0, %v1154_v38  ;;  %v829_v39 = vpop.f32.mrb[7].mxu1 }
 0x3da   :  { %1022 = vst.msk [vmem:[%s1446_s5 + $0x50] sm:$0xff] %vm41_vm0, %v829_v39 }
 0x3de   :  { %v1161_v40 = vpop.f32.mrb[8].mxu0 }
 0x3df   :  { %1025 = vst.msk [vmem:[%s1446_s5 + $0x68] sm:$0xff] %vm41_vm0, %v1161_v40  ;;  %v916_v41 = vpop.f32.mrb[9].mxu0 }
 0x3e0   :  { %1024 = vst.msk [vmem:[%s1446_s5 + $0x60] sm:$0xff] %vm41_vm0, %v916_v41  ;;  %v1168_v42 = vpop.f32.mrb[8].mxu1 }
 0x3e1   :  { %1027 = vst.msk [vmem:[%s1446_s5 + $0x78] sm:$0xff] %vm41_vm0, %v1168_v42  ;;  %v1003_v43 = vpop.f32.mrb[9].mxu1 }
 0x3e2   :  { %1026 = vst.msk [vmem:[%s1446_s5 + $0x70] sm:$0xff] %vm41_vm0, %v1003_v43 }

// kernel: custom-call.36
= control target key start
LH: loop header
LB: loop body
LE: loop exit
PB: predicated region body
PF: predicated region fallthrough
CT: control target
= control target key end

     0   :  { %s1694_s30 = smov 0   ;;  %s1696_s10 = smov 0   ;;  %s2021_s0 = inlined_call_operand.vmem [shape: f32[8,4,4], index: 0, kind: input, shape index: {}]   ;;  %s2022_s1 = inlined_call_operand.vmem [shape: f32[8,4,4], index: 1, kind: input, shape index: {}]   ;;  %s2023_s2 = inlined_call_operand.vmem [shape: f32[8,4,4], index: 2, kind: input, shape index: {}]   ;;  %s2024_s3 = inlined_call_operand.vmem [shape: f32[8,4,4], index: 3, kind: input, shape index: {}]   ;;  %s2025_s4 = inlined_call_operand.vmem [shape: f32[8,4], index: 4, kind: output, shape index: {0}]   ;;  %s2026_s5 = inlined_call_operand.vmem [shape: f32[8,4], index: 5, kind: output, shape index: {1}]   ;;  %s2027_s6 = inlined_call_operand.vmem [shape: f32[8,4,4], index: 6, kind: output, shape index: {2}]   ;;  %s2028_s7 = inlined_call_operand.vmem [shape: f32[8,4,4], index: 7, kind: output, shape index: {3}]   ;;  %s2029_s8 = inlined_call_operand.vmem [shape: f32[8,4,4], index: 8, kind: output, shape index: {4}]   ;;  %s2030_s9 = inlined_call_operand.vmem [shape: f32[8,4,4], index: 9, kind: output, shape index: {5}]  }
   0x1   :  { %s1698_s11 = smov 0  }
   0x2 LB: > { %s1710_s12 = sadd.s32 4294967295, %s1631_s11   ;;  %s1713_s13 = sadd.s32 1, %s1631_s11   ;;  %s1631_s11 = sphi %s1698_s11, %s2049_s11   ;;  %s1627_s10 = sphi %s1696_s10, %s2048_s10   ;;  %s1623_s30 = sphi %s1694_s30, %s2047_s30  }
   0x3   : > { %s20_s14 = sshrl.u32 %s1631_s11, 3  ;;  %s21_s15 = sshrl.u32 %s1713_s13, 3 }
   0x4   : > { %s22_s16 = ssub.s32 %s20_s14, %s21_s15  ;;  %s25_s17 = sadd.s32 1, %s1627_s10 }
   0x5   : > { %p23_p0 = scmp.eq.s32.totalorder %s22_s16, 0  ;;  %p35_p1 = scmp.ne.s32.totalorder %s1627_s10, %s1623_s30 }
   0x6   : > { %p36_p2 = scmp.eq.s32.totalorder %s1710_s12, 7  ;;  %p1492_p4 = scmp.ge.s32.totalorder %s1631_s11, 8 }
   0x7   : > { %s1722_s18 = scalar_select %p23_p0, %s1627_s10, %s25_s17  }
   0x8   : > { %p1724_p3 = por %p36_p2, %p35_p1  ;;  %86 = sbr.rel (%p1492_p4) target bundleno = 17 (0x11), region = 16 }
   0x9   : > { %2031 = sst [smem:[#allocation31_spill]] %s1722_s18  ;;  %s88_s20 = sand.u32 (!%p1492_p4), 1, %s1631_s11  }
   0xa   : > { %s1494_s21 = sshll.u32 (!%p1492_p4), %s1631_s11, 2  ;;  %s1493_s22 = sshll.u32 (!%p1492_p4), %s88_s20, 2 }
   0xb   : > { %s92_s25 = scalar_lea.vmem (!%p1492_p4), %s2021_s0, %s1494_s21  ;;  %s90_s26 = scalar_lea.vmem (!%p1492_p4), [#allocation1], %s1493_s22 }
   0xc   : > { %v108_v0 = vld [vmem:[%s92_s25] sm:$0xf] (!%p1492_p4)  ;;  %s129_s29 = scalar_lea.vmem (!%p1492_p4), %s2022_s1, %s1494_s21  ;;  %s166_s16 = scalar_lea.vmem (!%p1492_p4), %s2023_s2, %s1494_s21 }
   0xd   : > { %109 = vst [vmem:[%s90_s26] sm:$0xf] (!%p1492_p4), %v108_v0  ;;  %v145_v1 = vld [vmem:[%s129_s29] sm:$0xf] (!%p1492_p4)  ;;  %s127_s17 = scalar_lea.vmem (!%p1492_p4), [#allocation3], %s1493_s22  ;;  %s203_s23 = scalar_lea.vmem (!%p1492_p4), %s2024_s3, %s1494_s21 }
   0xe   : > { %146 = vst [vmem:[%s127_s17] sm:$0xf] (!%p1492_p4), %v145_v1  ;;  %v182_v2 = vld [vmem:[%s166_s16] sm:$0xf] (!%p1492_p4)  ;;  %s164_s24 = scalar_lea.vmem (!%p1492_p4), [#allocation5], %s1493_s22  ;;  %s201_s25 = scalar_lea.vmem (!%p1492_p4), [#allocation7], %s1493_s22 }
   0xf   : > { %183 = vst [vmem:[%s164_s24] sm:$0xf] %v182_v2  ;;  %v219_v3 = vld [vmem:[%s203_s23] sm:$0xf] }
  0x10   : > { %220 = vst [vmem:[%s201_s25] sm:$0xf] %v219_v3 }
  0x11 PF: > { %p1501_p5 = scmp.ge.s32.totalorder %s1631_s11, 1  ;;  %p236_p6 = scmp.lt.s32.totalorder %s1631_s11, 9 }
  0x13   : > { %p237_p7 = pnand %p1501_p5, %p236_p6 }
  0x15   : > { %240 = sbr.rel (%p237_p7) target bundleno = 991 (0x3df), region = 140 }
  0x1c   : > { %s259_s26 = sand.u32 1, %s1710_s12   ;;  %s277_s27 = sand.u32 1, %s1623_s30   ;;  %v337_v4 = vlaneseq  ;;  %v1641_v5 = vmov 0.0  }
  0x1d   : > { %s1747_s28 = sshll.u32 %s259_s26, 2  ;;  %s1749_s18 = sshll.u32 %s277_s27, 3  ;;  %332 = vst [vmem:[#allocation10] sm:$0xff] %v1641_v5  ;;  %333 = vst [vmem:[#allocation12] sm:$0xff] %v1641_v5 }
  0x1e   : > { %334 = vst [vmem:[#allocation14] sm:$0xff] %v1641_v5  ;;  %335 = vst [vmem:[#allocation16] sm:$0xff] %v1641_v5  ;;  %v1751_v6 = vand.u32 127, %v337_v4  ;;  %v1753_v7 = vshrl.u32 %v337_v4, 7  ;;  %s261_s11 = scalar_lea.vmem [#allocation1], %s1747_s28  ;;  %s265_s30 = scalar_lea.vmem [#allocation3], %s1747_s28 }
  0x1f   : > { %v304_v8 = vld [vmem:[%s261_s11] sm:$0xf]  ;;  %v308_v9 = vld [vmem:[%s265_s30] sm:$0xf]  ;;  %s269_s21 = scalar_lea.vmem [#allocation5], %s1747_s28  ;;  %s273_s22 = scalar_lea.vmem [#allocation7], %s1747_s28 }
  0x20   : > { %305 = vst [vmem:[#allocation0] sm:$0xf] %v304_v8  ;;  %309 = vst [vmem:[#allocation2] sm:$0xf] %v308_v9  ;;  %v312_v10 = vld [vmem:[%s269_s21] sm:$0xf]  ;;  %v339_v6 = vmov %v1751_v6  ;;  %v342_v7 = vmov %v1753_v7 }
  0x21   : > { %v316_v11 = vld [vmem:[%s273_s22] sm:$0xf]  ;;  %313 = vst [vmem:[#allocation4] sm:$0xf] %v312_v10  ;;  %v352_v6 = vmov %v1751_v6  ;;  %v355_v7 = vmov %v1753_v7  ;;  %s320_s29 = smov [#allocation18]  ;;  %s323_s14 = smov [#allocation19]  ;;  %vm346_vm0 = vcmp.eq.s32.totalorder %v342_v7, %v339_v6 }
  0x22   : > { %317 = vst [vmem:[#allocation6] sm:$0xf] %v316_v11  ;;  %vm359_vm1 = vcmp.eq.s32.totalorder %v355_v7, %v352_v6  ;;  %s336_s15 = smov [#allocation10]  ;;  %s349_s16 = smov [#allocation16]  ;;  %vm1381_vm2 = vcmp.lt.s32.totalorder %v1751_v6, 4  ;;  %v1373_v6 = vmov %v1751_v6  ;;  %v1376_v7 = vmov %v1753_v7 }
  0x23   : > { %s326_s17 = smov [#allocation20]  ;;  %s329_s20 = smov [#allocation21]  ;;  %vm1386_vm3 = vcmp.eq.s32.totalorder %v1376_v7, %v1373_v6  ;;  %v1424_v6 = vmov %v1751_v6  ;;  %v1393_v7 = vmov %v1753_v7 }
  0x24   : > { %v343_v12 = vld [vmem:[%s336_s15] sm:$0xf]  ;;  %s1377_s30 = smov [#allocation18]  ;;  %s1394_s21 = smov [#allocation19]  ;;  %v1390_v6 = vmov %v1751_v6  ;;  %v1427_v7 = vmov %v1753_v7 }
  0x25   : > { %v356_v13 = vld [vmem:[%s349_s16] sm:$0xf]  ;;  %v347_v16 = vsel %vm346_vm0, 1.0, %v343_v12  ;;  %s1411_s22 = smov [#allocation20]  ;;  %v1407_v6 = vmov %v1751_v6  ;;  %v1410_v7 = vmov %v1753_v7  ;;  %vm1437_vm4 = vcmp.eq.s32.totalorder %v1427_v7, %v1424_v6 }
  0x26   : > { %v360_v17 = vsel %vm359_vm1, 1.0, %v356_v13  ;;  %348 = vst [vmem:[%s336_s15] sm:$0xf] %v347_v16 }
  0x27   : > { %v321_v14 = vld [vmem:[#allocation0] sm:$0xff]  ;;  %v324_v15 = vld [vmem:[#allocation2] sm:$0xff]  ;;  %361 = vst [vmem:[%s349_s16] sm:$0xf] %v360_v17 }
  0x28   : > { %322 = vst [vmem:[%s320_s29] sm:$0xff] %v321_v14  ;;  %325 = vst [vmem:[%s323_s14] sm:$0xff] %v324_v15  ;;  %v327_v18 = vld [vmem:[#allocation4] sm:$0xff]  ;;  %s1428_s29 = smov [#allocation21] }
  0x29   : > { %v330_v19 = vld [vmem:[#allocation6] sm:$0xff]  ;;  %328 = vst [vmem:[%s326_s17] sm:$0xff] %v327_v18 }
  0x2a   : > { %331 = vst [vmem:[%s329_s20] sm:$0xff] %v330_v19 }
  0x2f   : > { %v1383_v20 = vld [vmem:[%s1377_s30] sm:$0xf] }
  0x30   : > { %v1400_v21 = vld [vmem:[%s1394_s21] sm:$0xf]  ;;  %v1384_v22 = vsel %vm1381_vm2, %v1383_v20, 0.0 }
  0x31   : > { %v1401_v23 = vsel %vm1381_vm2, %v1400_v21, 0.0  ;;  %v1417_v24 = vld [vmem:[%s1411_s22] sm:$0xf]  ;;  %v1385_v26 = vmul.f32 %v1384_v22, %v1384_v22 }
  0x32   : > { %v1434_v25 = vld [vmem:[%s1428_s29] sm:$0xf]  ;;  %v1402_v27 = vmul.f32 %v1401_v23, %v1401_v23  ;;  %v1418_v28 = vsel %vm1381_vm2, %v1417_v24, 0.0 }
  0x33   : > { %v1435_v29 = vsel %vm1381_vm2, %v1434_v25, 0.0  ;;  %v1419_v30 = vmul.f32 %v1418_v28, %v1418_v28  ;;  %v1387_v33 = vsel %vm1386_vm3, 0.0, %v1385_v26 }
  0x34   : > { %v1404_v31 = vadd.f32 %v1402_v27, %v1385_v26  ;;  %v1436_v32 = vmul.f32 %v1435_v29, %v1435_v29  ;;  %v1403_v34 = vadd.f32 %v1402_v27, %v1387_v33 }
  0x36   : > { %v1421_v35 = vadd.f32 %v1419_v30, %v1404_v31  ;;  %v1420_v36 = vadd.f32 %v1419_v30, %v1403_v34  ;;  %v1438_v37 = vsel %vm1437_vm4, 0.0, %v1436_v32 }
  0x38   : > { %v1440_v38 = vadd.f32 %v1436_v32, %v1421_v35  ;;  %v1439_v39 = vadd.f32 %v1438_v37, %v1420_v36 }
  0x3a   : > { %1441 = vadd.xlane.f32.xlu0 %v1440_v38 }
  0x3e   : > { %1449 = vadd.xlane.f32.xlu0 %v1439_v39 }
  0xc7   : > { %v1442_v40 = vpop.xlane.xlu0 %1441 }
  0xc8   : > { %v1443_v41 = vrot.slane %v1442_v40, 4 }
  0xca   : > { %v1444_v42 = vadd.f32 %v1443_v41, %v1442_v40 }
  0xcb   : > { %v1450_v43 = vpop.xlane.xlu0 %1449 }
  0xcc   : > { %v1445_v44 = vrot.slane %v1444_v42, 2  ;;  %v1451_v45 = vrot.slane %v1450_v43, 4 }
  0xce   : > { %v1452_v46 = vadd.f32 %v1451_v45, %v1450_v43  ;;  %v1446_v47 = vadd.f32 %v1445_v44, %v1444_v42 }
  0xd0   : > { %v1453_v48 = vrot.slane %v1452_v46, 2  ;;  %v1447_v50 = vrot.slane %v1446_v47, 1 }
  0xd2   : > { %v1454_v49 = vadd.f32 %v1453_v48, %v1452_v46  ;;  %v1448_v53 = vadd.f32 %v1447_v50, %v1446_v47 }
  0xd4   : > { %v1455_v51 = vrot.slane %v1454_v49, 1 }
  0xd6   : > { %v1456_v52 = vadd.f32 %v1455_v51, %v1454_v49 }
  0xd8   : > { %1542 = vpush %v1456_v52 }
  0xd9   : > { %1544 = vpush %v1448_v53 }
 0x109   : > { %s1543_s14 = spop %1542 }
 0x10a   : > { %s1545_s15 = spop %1544 }
 0x10b   : > { %s1459_s16 = smul.f32 1e-10, %s1545_s15 }
 0x10d   : > { %p1460_p8 = scmp.le.f32.partialorder %s1543_s14, %s1459_s16 }
 0x10e   : > { %s1787_s17 = smov (!%p1460_p8), 0  }
 0x10f   : > { %1463 = sbr.rel (%p1460_p8) target bundleno = 953 (0x3b9), region = 475 }
 0x116 LB: >> { %s1792_s20 = smov 0   ;;  %s1635_s17 = sphi %s1787_s17, %s2033_s17  }
 0x117 LB: >>> { %s466_s30 = smov [#allocation18]  ;;  %v470_v6 = vmov %v1751_v6  ;;  %v473_v7 = vmov %v1753_v7  ;;  %s486_s21 = smov [#allocation19]  ;;  %vm789_vm14 = vcmp.eq.s32.totalorder %v1753_v7, 0  ;;  %vm801_vm15 = vcmp.eq.s32.totalorder %v1753_v7, 3  ;;  %s1639_s20 = sphi %s1792_s20, %s465_s20  }
 0x118   : >>> { %v490_v6 = vmov %v1751_v6  ;;  %v493_v7 = vmov %v1753_v7  ;;  %v474_v54 = vld [vmem:[%s466_s30] sm:$0xf]  ;;  %vm477_vm5 = vcmp.eq.s32.totalorder %v473_v7, %v470_v6  ;;  %s506_s22 = smov [#allocation21]  ;;  %s467_s29 = smov [#allocation22] }
 0x119   : >>> { %vm497_vm6 = vcmp.eq.s32.totalorder %v493_v7, %v490_v6  ;;  %v510_v6 = vmov %v1751_v6  ;;  %v513_v7 = vmov %v1753_v7  ;;  %v478_v55 = vsel %vm477_vm5, %v474_v54, 0.0  ;;  %v494_v56 = vld [vmem:[%s486_s21] sm:$0xf]  ;;  %s487_s14 = smov [#allocation23]  ;;  %s507_s15 = smov [#allocation24] }
 0x11a   : >>> { %vm517_vm7 = vcmp.eq.s32.totalorder %v513_v7, %v510_v6  ;;  %v479_v57 = vrot.slane %v478_v55, 4  ;;  %v498_v58 = vsel %vm497_vm6, %v494_v56, 0.0  ;;  %v514_v59 = vld [vmem:[%s506_s22] sm:$0xf]  ;;  %s530_s16 = smov [#allocation23]  ;;  %s528_s30 = smov [#allocation22]  ;;  %v579_v6 = vmov %v1751_v6 }
 0x11b   : >>> { %v499_v60 = vrot.slane %v498_v58, 4  ;;  %v518_v61 = vsel %vm517_vm7, %v514_v59, 0.0  ;;  %s532_s21 = smov [#allocation24]  ;;  %s567_s22 = smov [#allocation25]  ;;  %v582_v7 = vmov %v1753_v7  ;;  %v594_v6 = vmov %v1751_v6 }
 0x11c   : >>> { %v480_v62 = vadd.f32 %v479_v57, %v478_v55  ;;  %v519_v63 = vrot.slane %v518_v61, 4  ;;  %v597_v7 = vmov %v1753_v7  ;;  %vm584_vm12 = vcmp.eq.s32.totalorder %v582_v7, %v579_v6  ;;  %s1811_s24 = smov [#allocation20]  ;;  %s1817_s23 = smov [#allocation12] }
 0x11d   : >>> { %v500_v0 = vadd.f32 %v499_v60, %v498_v58  ;;  %vm599_vm13 = vcmp.eq.s32.totalorder %v597_v7, %v594_v6  ;;  %s829_s11 = smov [#allocation29]  ;;  %s1823_s27 = smov [#allocation16]  ;;  %v615_v55 = vld [vmem:[%s1811_s24] sm:$0xf]  ;;  %v692_v6 = vmov %v1751_v6  ;;  %v695_v7 = vmov %v1753_v7 }
 0x11e   : >>> { %v481_v1 = vrot.slane %v480_v62, 2  ;;  %v520_v2 = vadd.f32 %v519_v63, %v518_v61  ;;  %v838_v58 = vld [vmem:[%s1817_s23] sm:$0xf]  ;;  %s607_s26 = smov [#allocation30]  ;;  %s831_s25 = smov [#allocation30]  ;;  %v706_v6 = vmov %v1751_v6  ;;  %v709_v7 = vmov %v1753_v7 }
 0x11f   : >>> { %v501_v3 = vrot.slane %v500_v0, 2  ;;  %v840_v61 = vld [vmem:[%s1823_s27] sm:$0xf]  ;;  %vm699_vm0 = vcmp.eq.s32.totalorder %v695_v7, %v692_v6  ;;  %v665_v6 = vmov %v1751_v6  ;;  %v668_v7 = vmov %v1753_v7  ;;  %s465_s20 = sadd.s32 1, %s1639_s20  }
 0x120   : >>> { %v482_v4 = vadd.f32 %v481_v1, %v480_v62  ;;  %v521_v5 = vrot.slane %v520_v2, 2  ;;  %v679_v6 = vmov %v1751_v6  ;;  %v682_v7 = vmov %v1753_v7  ;;  %p462_p9 = scmp.ge.s32.totalorder %s465_s20, 7  }
 0x121   : >>> { %v502_v8 = vadd.f32 %v501_v3, %v500_v0  ;;  %vm714_vm1 = vcmp.eq.s32.totalorder %v709_v7, %v706_v6  ;;  %vm673_vm3 = vcmp.eq.s32.totalorder %v668_v7, %v665_v6  ;;  %vm686_vm4 = vcmp.eq.s32.totalorder %v682_v7, %v679_v6 }
 0x122   : >>> { %v483_v9 = vrot.slane %v482_v4, 1  ;;  %v522_v10 = vadd.f32 %v521_v5, %v520_v2  ;;  %vm728_vm5 = vcmp.eq.s32.totalorder %v1751_v6, 0  ;;  %vm732_vm6 = vcmp.eq.s32.totalorder %v1751_v6, 1 }
 0x123   : >>> { %v503_v11 = vrot.slane %v502_v8, 1  ;;  %vm745_vm7 = vcmp.eq.s32.totalorder %v1751_v6, 3  ;;  %v366_v6 = vmov (%p462_p9), %v1751_v6  ;;  %v369_v7 = vmov (%p462_p9), %v1753_v7 }
 0x124   : >>> { %v484_v12 = vadd.f32 %v483_v9, %v482_v4  ;;  %v523_v13 = vrot.slane %v522_v10, 1  ;;  %v419_v6 = vmov (%p462_p9), %v1751_v6 }
 0x125   : >>> { %v504_v14 = vadd.f32 %v503_v11, %v502_v8 }
 0x126   : >>> { %485 = vst [vmem:[%s467_s29] sm:$0x1] %v484_v12  ;;  %v524_v15 = vadd.f32 %v523_v13, %v522_v10  ;;  %s569_s29 = smov [#allocation26] }
 0x127   : >>> { %505 = vst [vmem:[%s487_s14] sm:$0x1] %v504_v14  ;;  %s526_s14 = smov [#allocation27] }
 0x128   : >>> { %525 = vst [vmem:[%s507_s15] sm:$0x1] %v524_v15  ;;  %s527_s15 = smov [#allocation28]  ;;  %s571_s14 = smov %s526_s14 }
 0x129   : >>> { %s573_s15 = smov %s527_s15 }
 0x12d   : >>> { %v529_v18 = vld [vmem:[%s528_s30] sm:$0xff]  ;;  %s590_s30 = smov [#allocation28] }
 0x12e   : >>> { %v531_v16 = vld [vmem:[%s530_s16] sm:$0xff]  ;;  %v552_v31 = vand.u32 2147483647, %v529_v18  ;;  %s575_s16 = smov [#allocation27] }
 0x12f   : >>> { %v535_v17 = vmul.f32 2.0, %v531_v16  ;;  %v533_v19 = vld [vmem:[%s532_s21] sm:$0xff]  ;;  %v553_v36 = vand.u32 2147483647, %v531_v16  ;;  %s588_s21 = smov [#allocation29] }
 0x130   : >>> { %v534_v20 = vsub.f32 %v533_v19, %v529_v18  ;;  %v554_v32 = vand.u32 2147483647, %v533_v19 }
 0x131   : >>> { %1593 = vrcp.f32 %v535_v17 }
 0x132   : >>> { %v555_v35 = vmin.f32 %v552_v31, %v554_v32 }
 0x134   : >>> { %v556_v37 = vmul.f32 1.1920929e-08, %v555_v35 }
 0x136   : >>> { %vm557_vm11 = vcmp.le.f32.partialorder %v553_v36, %v556_v37 }
 0x13b   : >>> { %v1594_v21 = vpop.eup %1593 }
 0x13c   : >>> { %v537_v22 = vmul.f32 %v1594_v21, %v534_v20 }
 0x13e   : >>> { %v539_v23 = vmul.f32 %v537_v22, %v537_v22  ;;  %vm538_vm10 = vcmp.ge.f32.partialorder %v537_v22, 0.0 }
 0x140   : >>> { %v540_v24 = vadd.f32 1.0, %v539_v23 }
 0x142   : >>> { %1595 = vrsqrt.f32 %v540_v24  ;;  %vm543_vm8 = vcmp.eq.f32.partialorder %v540_v24, inf  ;;  %v546_v26 = vand.u32 2147483648, %v540_v24  ;;  %vm545_vm9 = vcmp.eq.f32.partialorder %v540_v24, 0.0 }
 0x14c   : >>> { %v1596_v25 = vpop.eup %1595 }
 0x14d   : >>> { %v542_v27 = vmul.f32 %v1596_v25, %v540_v24 }
 0x14f   : >>> { %v544_v28 = vsel %vm543_vm8, %v540_v24, %v542_v27  ;;  %vm381_vm8 = vcmp.eq.s32.totalorder (%p462_p9), %v369_v7, %v366_v6  ;;  %v422_v7 = vmov (%p462_p9), %v1753_v7  ;;  %v385_v6 = vmov (%p462_p9), %v1751_v6 }
 0x150   : >>> { %v547_v29 = vsel %vm545_vm9, %v546_v26, %v544_v28  ;;  %v388_v7 = vmov (%p462_p9), %v1753_v7  ;;  %v402_v6 = vmov (%p462_p9), %v1751_v6  ;;  %vm434_vm9 = vcmp.eq.s32.totalorder (%p462_p9), %v422_v7, %v419_v6 }
 0x151   : >>> { %v548_v30 = vxor.u32 2147483648, %v547_v29  ;;  %v405_v7 = vmov (%p462_p9), %v1753_v7 }
 0x153   : >>> { %v549_v33 = vsel %vm538_vm10, %v547_v29, %v548_v30 }
 0x154   : >>> { %v550_v34 = vadd.f32 %v549_v33, %v537_v22 }
 0x156   : >>> { %1597 = vrcp.f32 %v550_v34 }
 0x160   : >>> { %v1598_v38 = vpop.eup %1597 }
 0x161   : >>> { %v558_v39 = vsel %vm557_vm11, 0.0, %v1598_v38 }
 0x162   : >>> { %v559_v40 = vmul.f32 %v558_v39, %v558_v39  ;;  %v563_v41 = vmul.f32 %v558_v39, %v531_v16 }
 0x164   : >>> { %v560_v42 = vadd.f32 1.0, %v559_v40  ;;  %v564_v43 = vsub.f32 %v529_v18, %v563_v41  ;;  %v566_v44 = vadd.f32 %v563_v41, %v533_v19 }
 0x166   : >>> { %1599 = vrsqrt.f32 %v560_v42  ;;  %568 = vst [vmem:[%s567_s22] sm:$0xff] %v564_v43  ;;  %570 = vst [vmem:[%s569_s29] sm:$0xff] %v566_v44  ;;  %s605_s22 = smov [#allocation29]  ;;  %s1807_s29 = smov [#allocation18] }
 0x167   : >>> { %v613_v53 = vld [vmem:[%s1807_s29] sm:$0xf] }
 0x170   : >>> { %v1600_v45 = vpop.eup %1599 }
 0x171   : >>> { %572 = vst [vmem:[%s571_s14] sm:$0xff] %v1600_v45  ;;  %v562_v46 = vmul.f32 %v1600_v45, %v558_v39  ;;  %s603_s14 = smov [#allocation30] }
 0x173   : >>> { %574 = vst [vmem:[%s573_s15] sm:$0xff] %v562_v46  ;;  %s1809_s15 = smov [#allocation19] }
 0x174   : >>> { %v614_v54 = vld [vmem:[%s1809_s15] sm:$0xf] }
 0x178   : >>> { %v576_v47 = vld [vmem:[%s575_s16] ss:$0 sm:$0xff]  ;;  %s1813_s16 = smov [#allocation21] }
 0x179   : >>> { %v585_v48 = vsel %vm584_vm12, %v576_v47, 0.0  ;;  %v616_v56 = vld [vmem:[%s1813_s16] sm:$0xf] }
 0x17a   : >>> { %586 = vadd.xlane.f32.xlu0 %v585_v48  ;;  %v591_v49 = vld [vmem:[%s590_s30] ss:$0 sm:$0xff]  ;;  %s1815_s30 = smov [#allocation10] }
 0x17b   : >>> { %v600_v50 = vsel %vm599_vm13, %v591_v49, 0.0  ;;  %v837_v57 = vld [vmem:[%s1815_s30] sm:$0xf] }
 0x17e   : >>> { %601 = vadd.xlane.f32.xlu0 %v600_v50 }
 0x207   : >>> { %v587_v51 = vpop.xlane.xlu0 %586 }
 0x208   : >>> { %589 = vst [vmem:[%s588_s21] sm:$0xff] %v587_v51  ;;  %s1819_s21 = smov [#allocation14] }
 0x209   : >>> { %v839_v59 = vld [vmem:[%s1819_s21] sm:$0xf] }
 0x20b   : >>> { %v602_v52 = vpop.xlane.xlu0 %601 }
 0x20c   : >>> { %604 = vst [vmem:[%s603_s14] sm:$0xff] %v602_v52  ;;  %s1843_s14 = smov [#allocation21] }
 0x20f   : >>> { %v606_v60 = vld [vmem:[%s605_s22] sm:$0xff]  ;;  %s1841_s22 = smov [#allocation20] }
 0x210   : >>> { %v830_v62 = vld [vmem:[%s829_s11] sm:$0xff]  ;;  %v617_v63 = vmul.f32 %v613_v53, %v606_v60  ;;  %v620_v0 = vmul.f32 %v614_v54, %v606_v60  ;;  %v624_v1 = vmul.f32 %v615_v55, %v606_v60  ;;  %v627_v2 = vmul.f32 %v616_v56, %v606_v60  ;;  %s1839_s11 = smov [#allocation10] }
 0x211   : >>> { %v841_v3 = vmul.f32 %v837_v57, %v830_v62  ;;  %v844_v4 = vmul.f32 %v838_v58, %v830_v62  ;;  %v848_v5 = vmul.f32 %v839_v59, %v830_v62  ;;  %v851_v8 = vmul.f32 %v840_v61, %v830_v62 }
 0x213   : >>> { %v608_v9 = vld [vmem:[%s607_s26] sm:$0xff]  ;;  %s635_s26 = smov [#allocation28] }
 0x214   : >>> { %v832_v10 = vld [vmem:[%s831_s25] sm:$0xff]  ;;  %v618_v11 = vmul.f32 %v615_v55, %v608_v9  ;;  %v621_v12 = vmul.f32 %v616_v56, %v608_v9  ;;  %v623_v13 = vmul.f32 %v613_v53, %v608_v9  ;;  %v626_v14 = vmul.f32 %v614_v54, %v608_v9  ;;  %s633_s25 = smov [#allocation27] }
 0x215   : >>> { %v842_v15 = vmul.f32 %v839_v59, %v832_v10  ;;  %v845_v16 = vmul.f32 %v840_v61, %v832_v10  ;;  %v847_v17 = vmul.f32 %v837_v57, %v832_v10  ;;  %v850_v18 = vmul.f32 %v838_v58, %v832_v10  ;;  %v634_v27 = vld [vmem:[%s633_s25] ss:$0 sm:$0xff]  ;;  %s662_s25 = smov [#allocation25] }
 0x216   : >>> { %v619_v19 = vsub.f32 %v617_v63, %v618_v11  ;;  %v622_v20 = vsub.f32 %v620_v0, %v621_v12  ;;  %v625_v21 = vadd.f32 %v624_v1, %v623_v13  ;;  %v628_v22 = vadd.f32 %v627_v2, %v626_v14  ;;  %v636_v28 = vld [vmem:[%s635_s26] ss:$0 sm:$0xff]  ;;  %s661_s26 = smov [#allocation18] }
 0x217   : >>> { %v843_v23 = vsub.f32 %v841_v3, %v842_v15  ;;  %v846_v24 = vsub.f32 %v844_v4, %v845_v16  ;;  %v849_v25 = vadd.f32 %v848_v5, %v847_v17  ;;  %v852_v26 = vadd.f32 %v851_v8, %v850_v18  ;;  %v669_v63 = vld [vmem:[%s662_s25] ss:$0 sm:$0xff]  ;;  %s905_s25 = sadd.s32 (%p462_p9), 1, %s1635_s17  }
 0x218   : >>> { %630 = vst [vmem:[%s1809_s15] sm:$0xf] %v622_v20  ;;  %632 = vst [vmem:[%s1813_s16] sm:$0xf] %v628_v22  ;;  %s1845_s15 = smov [#allocation18]  ;;  %s703_s16 = smov [#allocation26] }
 0x219   : >>> { %629 = vst [vmem:[%s1807_s29] sm:$0xf] %v619_v19  ;;  %631 = vst [vmem:[%s1811_s24] sm:$0xf] %v625_v21  ;;  %s1847_s24 = smov [#allocation14]  ;;  %s1855_s29 = smov [#allocation19]  ;;  %v710_v59 = vld [vmem:[%s703_s16] ss:$0 sm:$0xff] }
 0x21a   : >>> { %853 = vst [vmem:[%s1815_s30] sm:$0xf] %v843_v23  ;;  %854 = vst [vmem:[%s1817_s23] sm:$0xf] %v846_v24  ;;  %s1849_s23 = smov [#allocation12]  ;;  %s689_s30 = smov [#allocation20] }
 0x21b   : >>> { %855 = vst [vmem:[%s1819_s21] sm:$0xf] %v849_v25  ;;  %856 = vst [vmem:[%s1823_s27] sm:$0xf] %v852_v26  ;;  %s1853_s27 = smov [#allocation16]  ;;  %s702_s21 = smov [#allocation21] }
 0x21c   : >>> { %s805_s16 = smov [#allocation19]  ;;  %p458_p10 = scmp.ge.s32.totalorder (%p462_p9), %s905_s25, 15 }
 0x21d   : >> { %s2033_s17 = smov (%p462_p9), %s905_s25 }
 0x21f   : >>> { %v644_v30 = vld [vmem:[%s1843_s14] sm:$0xf] }
 0x220   : >>> { %v643_v29 = vld [vmem:[%s1841_s22] sm:$0xf]  ;;  %v652_v36 = vmul.f32 %v644_v30, %v636_v28  ;;  %v655_v42 = vmul.f32 %v644_v30, %v634_v27 }
 0x221   : >>> { %v641_v31 = vld [vmem:[%s1845_s15] sm:$0xf]  ;;  %v651_v35 = vmul.f32 %v643_v29, %v634_v27  ;;  %v654_v37 = vmul.f32 %v643_v29, %v636_v28 }
 0x222   : >>> { %v859_v32 = vld [vmem:[%s1839_s11] ss:$0 sm:$0xff]  ;;  %v1521_v34 = vld [vmem:[%s1839_s11 + $0x3] ss:$0 sm:$0xff]  ;;  %v645_v48 = vmul.f32 %v641_v31, %v634_v27  ;;  %v648_v49 = vmul.f32 %v641_v31, %v636_v28 }
 0x223   : >>> { %v1520_v33 = vld [vmem:[%s1839_s11 - $0x1] sm:$0xe]  ;;  %v1525_v45 = vld [vmem:[%s1849_s23 + $0x3] ss:$0 sm:$0xff]  ;;  %v653_v47 = vsub.f32 %v651_v35, %v652_v36  ;;  %v656_v53 = vadd.f32 %v655_v42, %v654_v37 }
 0x224   : >>> { %v866_v38 = vsel %vm789_vm14, %v859_v32, %v1520_v33  ;;  %v870_v39 = vld [vmem:[%s1847_s24] ss:$0 sm:$0xff]  ;;  %v1523_v40 = vld [vmem:[%s1847_s24 + $0x1] sm:$0x7] }
 0x225   : >>> { %v883_v41 = vld [vmem:[%s1849_s23] ss:$0 sm:$0xff]  ;;  %869 = vst [vmem:[%s1839_s11] sm:$0xf] %v866_v38  ;;  %v878_v43 = vsel %vm801_vm15, %v1521_v34, %v1523_v40  ;;  %v1527_v51 = vld [vmem:[%s1853_s27 + $0x1] sm:$0x7]  ;;  %659 = vst [vmem:[%s1841_s22] sm:$0xf] %v653_v47 }
 0x226   : >>> { %v1524_v44 = vld [vmem:[%s1849_s23 - $0x1] sm:$0xe]  ;;  %1522 = vst [vmem:[%s1839_s11 + $0x1] sm:$0x1] %v870_v39  ;;  %880 = vst [vmem:[%s1847_s24] sm:$0xf] %v878_v43  ;;  %v902_v54 = vsel %vm801_vm15, %v1525_v45, %v1527_v51  ;;  %s676_s11 = smov [#allocation19] }
 0x227   : >>> { %v894_v46 = vld [vmem:[%s1853_s27] ss:$0 sm:$0xff]  ;;  %v890_v50 = vsel %vm789_vm14, %v883_v41, %v1524_v44  ;;  %660 = vst [vmem:[%s1843_s14] sm:$0xf] %v656_v53  ;;  %s1897_s22 = smov [#allocation20]  ;;  %s1642_s14 = smov 1  }
 0x228   : >>> { %v642_v52 = vld [vmem:[%s1855_s29] sm:$0xf]  ;;  %893 = vst [vmem:[%s1849_s23] sm:$0xf] %v890_v50  ;;  %904 = vst [vmem:[%s1853_s27] sm:$0xf] %v902_v54  ;;  %s718_s24 = smov [#allocation19]  ;;  %s1900_s27 = smov [#allocation21] }
 0x229   : >>> { %v646_v55 = vmul.f32 %v642_v52, %v636_v28  ;;  %v649_v56 = vmul.f32 %v642_v52, %v634_v27  ;;  %1526 = vst [vmem:[%s1849_s23 + $0x1] sm:$0x1] %v894_v46  ;;  %s1643_s23 = smov 127  }
 0x22b   : >>> { %v647_v57 = vsub.f32 %v645_v48, %v646_v55  ;;  %v650_v58 = vadd.f32 %v649_v56, %v648_v49 }
 0x22c   : >>> { %v696_v60 = vld [vmem:[%s689_s30] sm:$0xf] }
 0x22d   : >>> { %657 = vst [vmem:[%s1845_s15] sm:$0xf] %v647_v57  ;;  %658 = vst [vmem:[%s1855_s29] sm:$0xf] %v650_v58  ;;  %v700_v61 = vsel %vm699_vm0, 0.0, %v696_v60  ;;  %s717_s15 = smov [#allocation18]  ;;  %s781_s29 = smov [#allocation18] }
 0x22e   : >>> { %v711_v62 = vld [vmem:[%s702_s21] sm:$0xf]  ;;  %701 = vst [vmem:[%s689_s30] sm:$0xf] %v700_v61  ;;  %s782_s30 = smov [#allocation20] }
 0x22f   : >>> { %v715_v0 = vsel %vm714_vm1, %v710_v59, %v711_v62 }
 0x230   : >>> { %716 = vst [vmem:[%s702_s21] sm:$0xf] %v715_v0  ;;  %s806_s21 = smov [#allocation21] }
 0x234   : >>> { %v670_v1 = vld [vmem:[%s661_s26] sm:$0xf] }
 0x235   : >>> { %v683_v2 = vld [vmem:[%s676_s11] sm:$0xf]  ;;  %v674_v3 = vsel %vm673_vm3, %v669_v63, %v670_v1 }
 0x236   : >>> { %v687_v4 = vsel %vm686_vm4, 0.0, %v683_v2  ;;  %675 = vst [vmem:[%s661_s26] sm:$0xf] %v674_v3  ;;  %v755_v5 = vld [vmem:[%s1897_s22] sm:$0xf]  ;;  %s370_s26 = smov (%p462_p9), [#allocation18] }
 0x237   : >>> { %688 = vst [vmem:[%s676_s11] sm:$0xf] %v687_v4  ;;  %756 = vrot.lane.b32.xlu0 %v755_v5, %s1642_s14  ;;  %v751_v11 = vld [vmem:[%s1900_s27] sm:$0xf]  ;;  %s389_s11 = smov (%p462_p9), [#allocation19] }
 0x238   : >>> { %v772_v12 = vld [vmem:[%s1900_s27] sm:$0xf] }
 0x239   : >>> { %v754_v30 = vld [vmem:[%s1897_s22] sm:$0xf] }
 0x23d   : >>> { %v723_v8 = vld [vmem:[%s717_s15] sm:$0xf] }
 0x23e   : >>> { %724 = vrot.lane.b32.xlu1 %v723_v8, %s1642_s14  ;;  %v719_v9 = vld [vmem:[%s718_s24] sm:$0xf] }
 0x23f   : >>> { %v740_v10 = vld [vmem:[%s718_s24] sm:$0xf] }
 0x240   : >>> { %v722_v18 = vld [vmem:[%s717_s15] sm:$0xf] }
 0x242   : >>> { %720 = vrot.lane.b32.xlu1 %v719_v9, %s1642_s14 }
 0x246   : >>> { %741 = vrot.lane.b32.xlu1 %v740_v10, %s1643_s23 }
 0x24a   : >>> { %752 = vrot.lane.b32.xlu1 %v751_v11, %s1642_s14  ;;  %s423_s14 = smov (%p462_p9), [#allocation21] }
 0x24e   : >>> { %773 = vrot.lane.b32.xlu1 %v772_v12, %s1643_s23 }
 0x2a9   : >>> { %v757_v20 = vpop.permute.xlu0 %756 }
 0x2aa   : >>> { %v761_v22 = vsel %vm728_vm5, %v755_v5, %v757_v20 }
 0x2b0   : >>> { %v725_v13 = vpop.permute.xlu1 %724 }
 0x2b1   : >>> { %v729_v14 = vsel %vm728_vm5, %v723_v8, %v725_v13 }
 0x2b4   : >>> { %v721_v15 = vpop.permute.xlu1 %720 }
 0x2b5   : >>> { %v733_v16 = vsel %vm732_vm6, %v721_v15, %v729_v14 }
 0x2b6   : >>> { %v739_v17 = vsel %vm1381_vm2, %v733_v16, 0.0 }
 0x2b7   : >>> { %747 = vst [vmem:[%s717_s15] sm:$0xf] %v739_v17 }
 0x2b8   : >>> { %v742_v19 = vpop.permute.xlu1 %741 }
 0x2b9   : >>> { %v746_v21 = vsel %vm745_vm7, %v722_v18, %v742_v19 }
 0x2ba   : >>> { %748 = vst [vmem:[%s718_s24] sm:$0xf] %v746_v21 }
 0x2bc   : >>> { %v753_v23 = vpop.permute.xlu1 %752 }
 0x2bd   : >>> { %v765_v24 = vsel %vm732_vm6, %v753_v23, %v761_v22 }
 0x2be   : >>> { %v783_v25 = vld [vmem:[%s781_s29] ss:$0 sm:$0xff]  ;;  %v1513_v27 = vld [vmem:[%s781_s29 + $0x3] ss:$0 sm:$0xff]  ;;  %v771_v29 = vsel %vm1381_vm2, %v765_v24, 0.0 }
 0x2bf   : >>> { %v1512_v26 = vld [vmem:[%s781_s29 - $0x1] sm:$0xe]  ;;  %779 = vst [vmem:[%s1897_s22] sm:$0xf] %v771_v29  ;;  %s406_s22 = smov (%p462_p9), [#allocation20] }
 0x2c0   : >>> { %v790_v28 = vsel %vm789_vm14, %v783_v25, %v1512_v26  ;;  %v774_v31 = vpop.permute.xlu1 %773 }
 0x2c1   : >>> { %793 = vst [vmem:[%s781_s29] sm:$0xf] %v790_v28  ;;  %v807_v32 = vld [vmem:[%s805_s16] ss:$0 sm:$0xff]  ;;  %v1517_v34 = vld [vmem:[%s805_s16 + $0x3] ss:$0 sm:$0xff]  ;;  %v778_v35 = vsel %vm745_vm7, %v754_v30, %v774_v31 }
 0x2c2   : >>> { %v1516_v33 = vld [vmem:[%s805_s16 - $0x1] sm:$0xe]  ;;  %780 = vst [vmem:[%s1900_s27] sm:$0xf] %v778_v35 }
 0x2c3   : >>> { %v814_v36 = vsel %vm789_vm14, %v807_v32, %v1516_v33 }
 0x2c4   : >>> { %817 = vst [vmem:[%s805_s16] sm:$0xf] %v814_v36 }
 0x2c6   : >>> { %v794_v37 = vld [vmem:[%s782_s30] ss:$0 sm:$0xff]  ;;  %v1515_v38 = vld [vmem:[%s782_s30 + $0x1] sm:$0x7] }
 0x2c7   : >>> { %1514 = vst [vmem:[%s781_s29 + $0x1] sm:$0x1] %v794_v37  ;;  %v802_v39 = vsel %vm801_vm15, %v1513_v27, %v1515_v38  ;;  %464 = sbr.rel (!%p462_p9) target bundleno = 279 (0x117), region = 470 }
 0x2c8   : >>> { %804 = vst [vmem:[%s782_s30] sm:$0xf] %v802_v39 }
 0x2c9   : >>> { %v818_v40 = vld [vmem:[%s806_s21] ss:$0 sm:$0xff]  ;;  %v1519_v41 = vld [vmem:[%s806_s21 + $0x1] sm:$0x7] }
 0x2ca   : >>> { %1518 = vst [vmem:[%s805_s16 + $0x1] sm:$0x1] %v818_v40  ;;  %v826_v42 = vsel %vm801_vm15, %v1517_v34, %v1519_v41 }
 0x2cb   : >>> { %828 = vst [vmem:[%s806_s21] sm:$0xf] %v826_v42 }
 0x2ce   : >> { %v376_v43 = vld [vmem:[%s370_s26] sm:$0xf] }
 0x2cf   : >> { %v377_v45 = vsel %vm1381_vm2, %v376_v43, 0.0  ;;  %v412_v47 = vld [vmem:[%s406_s22] sm:$0xf] }
 0x2d0   : >> { %v378_v49 = vmul.f32 %v377_v45, %v377_v45  ;;  %v413_v51 = vsel %vm1381_vm2, %v412_v47, 0.0 }
 0x2d1   : >> { %v395_v44 = vld [vmem:[%s389_s11] sm:$0xf]  ;;  %v414_v53 = vmul.f32 %v413_v51, %v413_v51 }
 0x2d2   : >> { %v396_v46 = vsel %vm1381_vm2, %v395_v44, 0.0  ;;  %v429_v48 = vld [vmem:[%s423_s14] sm:$0xf]  ;;  %v382_v56 = vsel %vm381_vm8, 0.0, %v378_v49 }
 0x2d3   : >> { %v397_v50 = vmul.f32 %v396_v46, %v396_v46  ;;  %v430_v52 = vsel %vm1381_vm2, %v429_v48, 0.0 }
 0x2d4   : >> { %v431_v55 = vmul.f32 %v430_v52, %v430_v52 }
 0x2d5   : >> { %v399_v54 = vadd.f32 %v397_v50, %v378_v49  ;;  %v398_v57 = vadd.f32 %v397_v50, %v382_v56 }
 0x2d6   : >> { %v435_v60 = vsel %vm434_vm9, 0.0, %v431_v55 }
 0x2d7   : >> { %v416_v58 = vadd.f32 %v414_v53, %v399_v54  ;;  %v415_v59 = vadd.f32 %v414_v53, %v398_v57 }
 0x2d9   : >> { %v437_v61 = vadd.f32 %v431_v55, %v416_v58  ;;  %v436_v62 = vadd.f32 %v435_v60, %v415_v59 }
 0x2db   : >> { %438 = vadd.xlane.f32.xlu0 %v437_v61 }
 0x2df   : >> { %446 = vadd.xlane.f32.xlu0 %v436_v62 }
 0x368   : >> { %v439_v63 = vpop.xlane.xlu0 %438 }
 0x369   : >> { %v440_v0 = vrot.slane %v439_v63, 4 }
 0x36b   : >> { %v441_v1 = vadd.f32 %v440_v0, %v439_v63 }
 0x36c   : >> { %v447_v2 = vpop.xlane.xlu0 %446 }
 0x36d   : >> { %v442_v3 = vrot.slane %v441_v1, 2  ;;  %v448_v4 = vrot.slane %v447_v2, 4 }
 0x36f   : >> { %v449_v5 = vadd.f32 %v448_v4, %v447_v2  ;;  %v443_v8 = vadd.f32 %v442_v3, %v441_v1 }
 0x371   : >> { %v450_v9 = vrot.slane %v449_v5, 2  ;;  %v444_v11 = vrot.slane %v443_v8, 1 }
 0x373   : >> { %v451_v10 = vadd.f32 %v450_v9, %v449_v5  ;;  %v445_v14 = vadd.f32 %v444_v11, %v443_v8 }
 0x375   : >> { %v452_v12 = vrot.slane %v451_v10, 1 }
 0x377   : >> { %v453_v13 = vadd.f32 %v452_v12, %v451_v10 }
 0x379   : >> { %1546 = vpush %v453_v13 }
 0x37a   : >> { %1548 = vpush %v445_v14 }
 0x3aa   : >> { %s1547_s20 = spop %1546 }
 0x3ab   : >> { %s1549_s15 = spop %1548 }
 0x3ac   : >> { %s456_s24 = smul.f32 1e-10, %s1549_s15 }
 0x3ae   : >> { %p457_p11 = scmp.le.f32.partialorder %s1547_s20, %s456_s24 }
 0x3b0   : >> { %p459_p12 = por %p458_p10, %p457_p11 }
 0x3b2   : > { %907 = sbr.rel (!%p459_p12) target bundleno = 278 (0x116), region = 481 }
 0x3b9 PF: > { %s912_s23 = smov [#allocation18]  ;;  %v916_v6 = vmov %v1751_v6  ;;  %v919_v7 = vmov %v1753_v7  ;;  %v955_v15 = vld [vmem:[#allocation10] sm:$0xf]  ;;  %v961_v16 = vld [vmem:[#allocation12] sm:$0xf]  ;;  %s2034_s17 = scalar_lea.vmem [#allocation11], %s1747_s28 }
 0x3ba   : > { %v936_v6 = vmov %v1751_v6  ;;  %v939_v7 = vmov %v1753_v7  ;;  %v920_v17 = vld [vmem:[%s912_s23] sm:$0xf]  ;;  %vm923_vm10 = vcmp.eq.s32.totalorder %v919_v7, %v916_v6  ;;  %957 = vst [vmem:[%s2034_s17] sm:$0xf] %v955_v15  ;;  %s2035_s27 = scalar_lea.vmem [#allocation13], %s1747_s28  ;;  %v973_v19 = vld [vmem:[#allocation16] sm:$0xf] }
 0x3bb   : > { %vm943_vm11 = vcmp.eq.s32.totalorder %v939_v7, %v936_v6  ;;  %963 = vst [vmem:[%s2035_s27] sm:$0xf] %v961_v16  ;;  %v967_v18 = vld [vmem:[#allocation14] sm:$0xf]  ;;  %v924_v20 = vsel %vm923_vm10, %v920_v17, 0.0  ;;  %s932_s29 = smov [#allocation21]  ;;  %s2036_s16 = scalar_lea.vmem [#allocation15], %s1747_s28 }
 0x3bc   : > { %969 = vst [vmem:[%s2036_s16] sm:$0xf] %v967_v18  ;;  %s2037_s30 = scalar_lea.vmem [#allocation17], %s1747_s28  ;;  %v925_v21 = vrot.slane %v924_v20, 4  ;;  %v940_v22 = vld [vmem:[%s932_s29] sm:$0xf]  ;;  %s908_s21 = sand.u32 7, %s1710_s12  }
 0x3bd   : > { %975 = vst [vmem:[%s2037_s30] sm:$0xf] %v973_v19  ;;  %v944_v23 = vsel %vm943_vm11, %v940_v22, 0.0  ;;  %s2038_s25 = scalar_lea.vmem [#allocation8], %s1749_s18  ;;  %s2039_s11 = scalar_lea.vmem [#allocation9], %s1749_s18 }
 0x3be   : > { %v926_v24 = vadd.f32 %v925_v21, %v924_v20  ;;  %v945_v25 = vrot.slane %v944_v23, 4  ;;  %s909_s26 = scalar_lea.vmem %s2038_s25, %s908_s21 [#allocation8]  ;;  %s911_s22 = scalar_lea.vmem %s2039_s11, %s908_s21 [#allocation9] }
 0x3bf   : > { %s913_s26 = smov %s909_s26  ;;  %s933_s22 = smov %s911_s22 }
 0x3c0   : > { %v927_v6 = vrot.slane %v926_v24, 2  ;;  %v946_v7 = vadd.f32 %v945_v25, %v944_v23  ;;  %s1003_s14 = sshrl.u32 (%p1724_p3), %s1710_s12, 3  ;;  %s2040_s20 = scalar_lea.vmem (%p1724_p3), [#allocation8], %s1749_s18 }
 0x3c1   : > { %s1534_s15 = sshll.u32 (%p1724_p3), %s1003_s14, 3 }
 0x3c2   : > { %v928_v26 = vadd.f32 %v927_v6, %v926_v24  ;;  %v947_v27 = vrot.slane %v946_v7, 2  ;;  %s1005_s17 = scalar_lea.vmem (%p1724_p3), %s2025_s4, %s1534_s15 }
 0x3c4   : > { %v929_v28 = vrot.slane %v928_v26, 1  ;;  %v948_v29 = vadd.f32 %v947_v27, %v946_v7  ;;  %1002 = sbr.rel (!%p1724_p3) target bundleno = 977 (0x3d1), region = 158 }
 0x3c6   : > { %v930_v30 = vadd.f32 %v929_v28, %v928_v26  ;;  %v949_v31 = vrot.slane %v948_v29, 1 }
 0x3c8   : > { %931 = vst [vmem:[%s913_s26] sm:$0x1] %v930_v30  ;;  %v950_v32 = vadd.f32 %v949_v31, %v948_v29 }
 0x3ca   : > { %951 = vst [vmem:[%s933_s22] sm:$0x1] %v950_v32 }
 0x3cf   : > { %v1033_v33 = vld [vmem:[%s2040_s20] sm:$0xff] }
 0x3d0   : > { %1034 = vst [vmem:[%s1005_s17] sm:$0xff] %v1033_v33 }
 0x3d1 PF: > { %1040 = sbr.rel (!%p1724_p3) target bundleno = 985 (0x3d9), region = 196  ;;  %s1041_s27 = sshrl.u32 (%p1724_p3), %s1710_s12, 3 }
 0x3d2   : > { %s2041_s29 = scalar_lea.vmem (%p1724_p3), [#allocation9], %s1749_s18  ;;  %s1535_s16 = sshll.u32 (%p1724_p3), %s1041_s27, 3 }
 0x3d3   : > { %s1043_s25 = scalar_lea.vmem (%p1724_p3), %s2026_s5, %s1535_s16 }
 0x3d7   : > { %v1071_v34 = vld [vmem:[%s2041_s29] sm:$0xff] (%p1724_p3) }
 0x3d8   : > { %1072 = vst [vmem:[%s1043_s25] sm:$0xff] %v1071_v34 }
 0x3d9 PF: > { %s1536_s26 = sshll.u32 %s1710_s12, 2  ;;  %s2042_s19 = scalar_lea.vmem [#allocation11], %s1747_s28 }
 0x3da   : > { %v1093_v35 = vld [vmem:[%s2042_s19] sm:$0xf]  ;;  %s2043_s11 = scalar_lea.vmem [#allocation13], %s1747_s28  ;;  %s1077_s14 = scalar_lea.vmem %s2027_s6, %s1536_s26 }
 0x3db   : > { %v1126_v36 = vld [vmem:[%s2043_s11] sm:$0xf]  ;;  %s1110_s24 = scalar_lea.vmem %s2028_s7, %s1536_s26  ;;  %s2044_s23 = scalar_lea.vmem [#allocation15], %s1747_s28  ;;  %1094 = vst [vmem:[%s1077_s14] sm:$0xf] %v1093_v35 }
 0x3dc   : > { %v1159_v37 = vld [vmem:[%s2044_s23] sm:$0xf]  ;;  %s2045_s17 = scalar_lea.vmem [#allocation17], %s1747_s28  ;;  %1127 = vst [vmem:[%s1110_s24] sm:$0xf] %v1126_v36  ;;  %s1143_s29 = scalar_lea.vmem %s2029_s8, %s1536_s26 }
 0x3dd   : > { %v1192_v38 = vld [vmem:[%s2045_s17] sm:$0xf]  ;;  %s1176_s21 = scalar_lea.vmem %s2030_s9, %s1536_s26  ;;  %1160 = vst [vmem:[%s1143_s29] sm:$0xf] %v1159_v37 }
 0x3de   : > { %1193 = vst [vmem:[%s1176_s21] sm:$0xf] %v1192_v38 }
 0x3df PF: > { %s2046_s25 = sld [smem:[#allocation31_spill]]  ;;  %p13_p13 = scmp.ge.s32.totalorder %s1713_s13, 10  }
 0x3e0   : > { %s2047_s30 = smov %s1627_s10  ;;  %s2049_s11 = smov %s1713_s13 }
 0x3e1   :  { %15 = sbr.rel (!%p13_p13) target bundleno = 2 (0x2), region = 492 }
 0x3e5   : > { %s2048_s10 = smov %s2046_s25 }

// kernel: closed_call.35
= control target key start
LH: loop header
LB: loop body
LE: loop exit
PB: predicated region body
PF: predicated region fallthrough
CT: control target
= control target key end

     0   :  { %vm20_vm0 = vcmask 64512   ;;  %v823_v9 = vmov 0.0   ;;  %vm824_vm1 = vmmov 0   ;;  %s925_s0 = inlined_call_operand.vmem [shape: f32[8,8], index: 0, kind: input, shape index: {}]   ;;  %s926_s1 = inlined_call_operand.vmem [shape: f32[8,8,8], index: 1, kind: input, shape index: {}]   ;;  %s927_s2 = inlined_call_operand.vmem [shape: f32[8,8,8], index: 2, kind: output, shape index: {}]  }
   0x1   :  { %v11_v0 = vld [vmem:[%s925_s0] sm:$0xff]  ;;  %v13_v2 = vld [vmem:[%s926_s1 + $0x8] sm:$0xff]  ;;  %v14_v3 = vld [vmem:[%s926_s1 + $0x10] sm:$0xff]  ;;  %781 = vmatprep.subr.mxu1 %v823_v9  ;;  %783 = vmatprep.mubr.msk.f32.mxu1 %vm824_vm1, %v823_v9 }
   0x2   :  { %v12_v1 = vld [vmem:[%s926_s1] sm:$0xff]  ;;  %767 = vmatprep.subr.msk.mxu0 %vm20_vm0, %v11_v0  ;;  %v15_v4 = vld [vmem:[%s926_s1 + $0x18] sm:$0xff]  ;;  %v17_v6 = vld [vmem:[%s926_s1 + $0x28] sm:$0xff] }
   0x3   :  { %769 = vmatprep.mubr.msk.f32.mxu0 %vm20_vm0, %v12_v1  ;;  %768 = vmatpush3.xpose.msk.msra.mxu0 %vm20_vm0, %v11_v0  ;;  %v16_v5 = vld [vmem:[%s926_s1 + $0x20] sm:$0xff]  ;;  %v18_v7 = vld [vmem:[%s926_s1 + $0x30] sm:$0xff]  ;;  %v19_v8 = vld [vmem:[%s926_s1 + $0x38] sm:$0xff] }
   0x4   :  { %806 = vmatprep.subr.mxu0 %v823_v9 }
   0x6   :  { %770 = vmatmul.mubr.msk.f32.vlgmr.msra.gmra.mrb[0].mxu0 %vm20_vm0, %v13_v2 }
   0x7   :  { %772 = vmatprep.mubr.msk.f32.mxu0 %vm20_vm0, %v14_v3 }
   0xa   :  { %773 = vmatmul.mubr.msk.f32.gmra.mrb[2].mxu0 %vm20_vm0, %v15_v4 }
   0xb   :  { %775 = vmatprep.mubr.msk.f32.mxu0 %vm20_vm0, %v16_v5 }
   0xe   :  { %776 = vmatmul.mubr.msk.f32.gmra.mrb[4].mxu0 %vm20_vm0, %v17_v6 }
   0xf   :  { %778 = vmatprep.mubr.msk.f32.mxu0 %vm20_vm0, %v18_v7 }
  0x12   :  { %779 = vmatmul.mubr.msk.f32.gmra.mrb[6].mxu0 %vm20_vm0, %v19_v8 }
  0x13   :  { %808 = vmatprep.mubr.msk.f32.mxu0 %vm824_vm1, %v823_v9 }
  0xd9   :  { %v771_v10 = vpop.f32.mrb[0].mxu0 }
  0xda   :  { %v114_v11 = vpop.f32.mrb[1].mxu0 }
  0xdb   :  { %782 = vmatpush3.msra.mxu1 %v114_v11 }
  0xdc   :  { %784 = vmatmul.mubr.msk.f32.vlgmr.msra.gmra.mrb[0].mxu1 %vm20_vm0, %v11_v0  ;;  %786 = vmatprep.subr.mxu1 %v823_v9 }
  0xdd   :  { %v774_v12 = vpop.f32.mrb[2].mxu0  ;;  %787 = vmatpush3.msra.mxu1 %v771_v10  ;;  %788 = vmatprep.mubr.msk.f32.mxu1 %vm824_vm1, %v823_v9 }
  0xde   :  { %v124_v13 = vpop.f32.mrb[3].mxu0  ;;  %791 = vmatprep.subr.mxu1 %v823_v9 }
  0xe0   :  { %789 = vmatmul.mubr.msk.f32.vlgmr.msra.gmra.mrb[2].mxu1 %vm20_vm0, %v11_v0 }
  0xe1   :  { %792 = vmatpush3.msra.mxu1 %v124_v13  ;;  %v777_v14 = vpop.f32.mrb[4].mxu0  ;;  %793 = vmatprep.mubr.msk.f32.mxu1 %vm824_vm1, %v823_v9 }
  0xe2   :  { %v134_v15 = vpop.f32.mrb[5].mxu0  ;;  %807 = vmatpush3.msra.mxu0 %v777_v14  ;;  %796 = vmatprep.subr.mxu1 %v823_v9 }
  0xe3   :  { %816 = vmatprep.subr.mxu0 %v823_v9  ;;  %809 = vmatmul.mubr.msk.f32.vlgmr.msra.gmra.mrb[8].mxu0 %vm20_vm0, %v11_v0 }
  0xe4   :  { %794 = vmatmul.mubr.msk.f32.vlgmr.msra.gmra.mrb[4].mxu1 %vm20_vm0, %v11_v0  ;;  %818 = vmatprep.mubr.msk.f32.mxu0 %vm824_vm1, %v823_v9 }
  0xe5   :  { %797 = vmatpush3.msra.mxu1 %v774_v12  ;;  %798 = vmatprep.mubr.msk.f32.mxu1 %vm824_vm1, %v823_v9  ;;  %v780_v16 = vpop.f32.mrb[6].mxu0 }
  0xe6   :  { %801 = vmatprep.subr.mxu1 %v823_v9  ;;  %v144_v17 = vpop.f32.mrb[7].mxu0  ;;  %817 = vmatpush3.msra.mxu0 %v780_v16 }
  0xe7   :  { %819 = vmatmul.mubr.msk.f32.vlgmr.msra.gmra.mrb[10].mxu0 %vm20_vm0, %v11_v0 }
  0xe8   :  { %799 = vmatmul.mubr.msk.f32.vlgmr.msra.gmra.mrb[6].mxu1 %vm20_vm0, %v11_v0 }
  0xe9   :  { %802 = vmatpush3.msra.mxu1 %v134_v15  ;;  %803 = vmatprep.mubr.msk.f32.mxu1 %vm824_vm1, %v823_v9 }
  0xea   :  { %811 = vmatprep.subr.mxu1 %v823_v9 }
  0xec   :  { %804 = vmatmul.mubr.msk.f32.vlgmr.msra.gmra.mrb[8].mxu1 %vm20_vm0, %v11_v0 }
  0xed   :  { %812 = vmatpush3.msra.mxu1 %v144_v17  ;;  %813 = vmatprep.mubr.msk.f32.mxu1 %vm824_vm1, %v823_v9 }
  0xf0   :  { %814 = vmatmul.mubr.msk.f32.vlgmr.msra.gmra.mrb[10].mxu1 %vm20_vm0, %v11_v0 }
 0x1af   :  { %v219_v18 = vpop.f32.mrb[0].mxu1 }
 0x1b0   :  { %713 = vst.msk [vmem:[%s927_s2] sm:$0xff] %vm20_vm0, %v219_v18  ;;  %v785_v19 = vpop.f32.mrb[1].mxu1 }
 0x1b3   :  { %v289_v20 = vpop.f32.mrb[2].mxu1 }
 0x1b4   :  { %714 = vst.msk [vmem:[%s927_s2 + $0x8] sm:$0xff] %vm20_vm0, %v289_v20  ;;  %v790_v21 = vpop.f32.mrb[3].mxu1 }
 0x1b6   :  { %v569_v22 = vpop.f32.mrb[8].mxu0 }
 0x1b7   :  { %v359_v23 = vpop.f32.mrb[4].mxu1  ;;  %718 = vst.msk [vmem:[%s927_s2 + $0x28] sm:$0xff] %vm20_vm0, %v569_v22  ;;  %v810_v24 = vpop.f32.mrb[9].mxu0 }
 0x1b8   :  { %715 = vst.msk [vmem:[%s927_s2 + $0x10] sm:$0xff] %vm20_vm0, %v359_v23  ;;  %v795_v25 = vpop.f32.mrb[5].mxu1 }
 0x1ba   :  { %v709_v26 = vpop.f32.mrb[10].mxu0 }
 0x1bb   :  { %v429_v27 = vpop.f32.mrb[6].mxu1  ;;  %720 = vst.msk [vmem:[%s927_s2 + $0x38] sm:$0xff] %vm20_vm0, %v709_v26  ;;  %v820_v28 = vpop.f32.mrb[11].mxu0 }
 0x1bc   :  { %716 = vst.msk [vmem:[%s927_s2 + $0x18] sm:$0xff] %vm20_vm0, %v429_v27  ;;  %v800_v29 = vpop.f32.mrb[7].mxu1 }
 0x1bf   :  { %v499_v30 = vpop.f32.mrb[8].mxu1 }
 0x1c0   :  { %717 = vst.msk [vmem:[%s927_s2 + $0x20] sm:$0xff] %vm20_vm0, %v499_v30  ;;  %v805_v31 = vpop.f32.mrb[9].mxu1 }
 0x1c3   :  { %v639_v32 = vpop.f32.mrb[10].mxu1 }
 0x1c4   :  { %719 = vst.msk [vmem:[%s927_s2 + $0x30] sm:$0xff] %vm20_vm0, %v639_v32  ;;  %v815_v33 = vpop.f32.mrb[11].mxu1 }

// kernel: closed_call.37
= control target key start
LH: loop header
LB: loop body
LE: loop exit
PB: predicated region body
PF: predicated region fallthrough
CT: control target
= control target key end

     0   :  { %vm25_vm0 = vcmask 64512   ;;  %v284_v0 = vmov 0.0   ;;  %vm285_vm1 = vmmov 0   ;;  %v19_v4 = vlaneseq  ;;  %s327_s0 = inlined_call_operand.vmem [shape: f32[1,8,8], index: 0, kind: input, shape index: {}]   ;;  %s328_s1 = inlined_call_operand.vmem [shape: f32[1,8], index: 1, kind: input, shape index: {}]   ;;  %s329_s2 = inlined_call_operand.vmem [shape: f32[1,8,8], index: 2, kind: input, shape index: {}]   ;;  %s330_s3 = inlined_call_operand.vmem [shape: f32[1,8,8], index: 3, kind: output, shape index: {}]  }
   0x1   :  { %265 = vmatprep.subr.mxu0 %v284_v0  ;;  %v14_v1 = vld [vmem:[%s327_s0] sm:$0xff]  ;;  %267 = vmatprep.mubr.msk.f32.mxu0 %vm285_vm1, %v284_v0 }
   0x2   :  { %v15_v2 = vld [vmem:[%s328_s1] sm:$0x1]  ;;  %266 = vmatpush3.xpose.msk.msra.mxu0 %vm25_vm0, %v14_v1  ;;  %270 = vmatprep.subr.mxu1 %v284_v0  ;;  %v20_v5 = vshrl.u32 %v19_v4, 7 }
   0x3   :  { %v16_v3 = vmul.f32 1.442695, %v15_v2  ;;  %272 = vmatprep.mubr.msk.f32.mxu1 %vm285_vm1, %v284_v0  ;;  %v102_v10 = vld [vmem:[%s329_s2] sm:$0xff] }
   0x4   :  { %v21_v6 = vsub.s32 0, %v20_v5 }
   0x5   :  { %282 = vpow2.f32 %v16_v3 }
   0xf   :  { %v283_v7 = vpop.eup %282 }
  0x10   :  { %v22_v8 = vrot.slane %v283_v7, %v21_v6 }
  0x12   :  { %v24_v9 = vmul.f32 %v22_v8, %v14_v1 }
  0x14   :  { %268 = vmatmul.mubr.msk.f32.vlgmr.msra.gmra.mrb[0].mxu0 %vm25_vm0, %v24_v9 }
  0xe7   :  { %v98_v11 = vpop.f32.mrb[0].mxu0 }
  0xe8   :  { %v269_v12 = vpop.f32.mrb[1].mxu0  ;;  %271 = vmatpush3.msra.mxu1 %v98_v11 }
  0xe9   :  { %273 = vmatmul.mubr.msk.f32.vlgmr.msra.gmra.mrb[0].mxu1 %vm25_vm0, %v102_v10  ;;  %275 = vmatprep.subr.mxu1 %v284_v0 }
  0xea   :  { %277 = vmatprep.mubr.msk.f32.mxu1 %vm285_vm1, %v284_v0 }
  0xef   :  { %276 = vmatpush3.xpose.msk.msra.mxu1 %vm25_vm0, %v102_v10 }
 0x1bc   :  { %v172_v13 = vpop.f32.mrb[0].mxu1 }
 0x1bd   :  { %v274_v14 = vpop.f32.mrb[1].mxu1  ;;  %278 = vmatmul.mubr.msk.f32.vlgmr.msra.gmra.mrb[2].mxu1 %vm25_vm0, %v172_v13 }
 0x290   :  { %v245_v15 = vpop.f32.mrb[2].mxu1 }
 0x291   :  { %249 = vst.msk [vmem:[%s330_s3] sm:$0xff] %vm25_vm0, %v245_v15  ;;  %v279_v16 = vpop.f32.mrb[3].mxu1 }

// kernel: dsbn_spdbn_forward.11
= control target key start
LH: loop header
LB: loop body
LE: loop exit
PB: predicated region body
PF: predicated region fallthrough
CT: control target
= control target key end

     0   :  { %vm31_vm0 = vcmask 64512   ;;  %v256_v2 = vmov 0.0   ;;  %s306_s0 = inlined_call_operand.vmem [shape: f32[1,8,8], index: 0, kind: input, shape index: {}]   ;;  %s307_s1 = inlined_call_operand.vmem [shape: f32[1,8], index: 1, kind: input, shape index: {}]   ;;  %s308_s2 = inlined_call_operand.hbm [shape: f32[1,8,8], index: 2, kind: output, shape index: {0}]   ;;  %s309_s3 = inlined_call_operand.vmem [shape: f32[1,8,8], index: 3, kind: output, shape index: {1}]  }
   0x1   :  { %v14_v0 = vld [vmem:[%s306_s0] sm:$0xff]  ;;  %217 = vmatprep.subr.mxu0 %v256_v2  ;;  %222 = vmatprep.subr.mxu1 %v256_v2 }
   0x2   :  { %v15_v1 = vld [vmem:[%s307_s1] sm:$0x1] }
   0x3   :  { %v16_v3 = vmax.f32 %v15_v1, 1e-12 }
   0x4   :  { %9 = vsyncpa [#allocation3], 0  ;;  %218 = vmatpush3.xpose.msk.msra.mxu0 %vm31_vm0, %v14_v0  ;;  %223 = vmatpush3.xpose.msk.msra.mxu1 %vm31_vm0, %v14_v0  ;;  %v25_v4 = vlaneseq  ;;  %vm257_vm1 = vmmov 0   ;;  %s258_s0 = smov [#allocation2]  }
   0x5   :  { %219 = vmatprep.mubr.msk.f32.mxu0 %vm257_vm1, %v256_v2  ;;  %224 = vmatprep.mubr.msk.f32.mxu1 %vm257_vm1, %v256_v2  ;;  %230 = vrsqrt.f32 %v16_v3  ;;  %vm19_vm2 = vcmp.eq.f32.partialorder %v16_v3, inf  ;;  %v22_v8 = vand.u32 2147483648, %v16_v3  ;;  %vm21_vm3 = vcmp.eq.f32.partialorder %v16_v3, 0.0  ;;  %s197_s1 = sshll.u32 %s258_s0, 4  ;;  %s198_s1 = int_to_ptr.vmem [resolvable:$true] %s197_s1 }
   0x6   :  { %v26_v5 = vshrl.u32 %v25_v4, 7  ;;  %s232_s18 = scalar_lea.vmem %s198_s1, 128  ;;  %p237_p1 = scmp.lt.s32.totalorder %s198_s1, %s198_s1 }
   0x7   :  { %p233_p0 = scmp.ne.s32.totalorder %s198_s1, %s232_s18  ;;  %p238_p2 = scmp.lt.s32.totalorder %s232_s18, %s232_s18 }
   0x8   :  { %v27_v6 = vsub.s32 0, %v26_v5 }
   0x9   :  { %p239_p3 = por %p238_p2, %p237_p1 }
   0xb   :  { %p240_p4 = pnand %p239_p3, %p233_p0 }
   0xf   :  { %v231_v7 = vpop.eup %230 }
  0x10   :  { %v18_v9 = vmul.f32 %v231_v7, %v16_v3  ;;  %v114_v10 = vrot.slane %v231_v7, %v27_v6 }
  0x12   :  { %v20_v11 = vsel %vm19_vm2, %v16_v3, %v18_v9  ;;  %v116_v12 = vmul.f32 %v114_v10, %v14_v0 }
  0x13   :  { %v23_v13 = vsel %vm21_vm3, %v22_v8, %v20_v11 }
  0x14   :  { %v28_v14 = vrot.slane %v23_v13, %v27_v6  ;;  %225 = vmatmul.mubr.msk.f32.vlgmr.msra.gmra.mrb[0].mxu1 %vm31_vm0, %v116_v12 }
  0x16   :  { %v30_v15 = vmul.f32 %v28_v14, %v14_v0 }
  0x18   :  { %220 = vmatmul.mubr.msk.f32.vlgmr.msra.gmra.mrb[0].mxu0 %vm31_vm0, %v30_v15 }
  0xe7   :  { %v186_v16 = vpop.f32.mrb[0].mxu1 }
  0xe8   :  { %190 = vst.msk [vmem:[%s309_s3] sm:$0xff] %vm31_vm0, %v186_v16  ;;  %v226_v17 = vpop.f32.mrb[1].mxu1 }
  0xeb   :  { %v104_v18 = vpop.f32.mrb[0].mxu0 }
  0xec   :  { %108 = vst.msk [vmem:[#allocation2] sm:$0xff] %vm31_vm0, %v104_v18  ;;  %v221_v19 = vpop.f32.mrb[1].mxu0 }
  0xed   :  { %243 = shalt.err (!%p240_p4)
}
  0xee   :  { %s244_s21 = scalar_lea.hbm %s308_s2, 128 }
  0xef   :  { %p245_p5 = scmp.ne.s32.totalorder %s308_s2, %s244_s21  ;;  %p248_p6 = scmp.lt.u32.totalorder %s244_s21, %s308_s2 }
  0xf1   :  { %p250_p7 = pnand %p248_p6, %p245_p5 }
  0xf3   :  { %253 = shalt.err (!%p250_p7)
}
  0xf4   :  { %200 = dma.vmem_to_hbm [thread:$0]  %s198_s1, 128, %s308_s2, [#allocation3]  }
  0xf5   :  { %254 = dma.done.wait [#allocation3], 128  }
  0xf6   :  { %255 = vsyncadd [#allocation3], 4294967168 }
  0xf7   :  { %208 = vsyncpa [#allocation3], 1 }

// kernel: closed_call.36
= control target key start
LH: loop header
LB: loop body
LE: loop exit
PB: predicated region body
PF: predicated region fallthrough
CT: control target
= control target key end

     0   :  { %v31_v0 = vlaneseq  ;;  %vm124_vm0 = vcmask 64512   ;;  %v957_v1 = vmov 0.0   ;;  %v958_v4 = vmov 1966171168   ;;  %s1085_s0 = inlined_call_operand.vmem [shape: f32[8,8,8], index: 0, kind: input, shape index: {}]   ;;  %s1086_s1 = inlined_call_operand.vmem [shape: f32[8,8], index: 1, kind: input, shape index: {}]   ;;  %s1087_s2 = inlined_call_operand.vmem [shape: f32[8,1], index: 2, kind: input, shape index: {}]   ;;  %s1088_s3 = inlined_call_operand.vmem [shape: f32[1,8,8], index: 3, kind: output, shape index: {}]  }
   0x1   :  { %908 = vmatprep.subr.mxu0 %v957_v1  ;;  %v14_v2 = vld [vmem:[%s1085_s0] sm:$0xff]  ;;  %v29_v5 = vunpack.c.l.s4 %v958_v4  ;;  %913 = vmatprep.subr.mxu1 %v957_v1  ;;  %v992_v6 = vld [vmem:[%s1085_s0 + $0x8] sm:$0xff]  ;;  %vm959_vm1 = vmmov 0   ;;  %v960_v12 = vmov 0   ;;  %v16_v44 = vld [vmem:[%s1085_s0 + $0x10] sm:$0xff] }
   0x2   :  { %v22_v3 = vld [vmem:[%s1086_s1] sm:$0xff]  ;;  %v32_v8 = vshrl.u32 %v31_v0, 7  ;;  %909 = vmatpush3.xpose.msk.msra.mxu0 %vm124_vm0, %v14_v2  ;;  %914 = vmatpush3.xpose.msk.msra.mxu1 %vm124_vm0, %v992_v6  ;;  %v17_v50 = vld [vmem:[%s1085_s0 + $0x18] sm:$0xff]  ;;  %v19_v62 = vld [vmem:[%s1085_s0 + $0x28] sm:$0xff] }
   0x3   :  { %v23_v7 = vmax.f32 %v22_v3, 1e-12  ;;  %v30_v9 = vunpack.c.0.s8 %v29_v5  ;;  %910 = vmatprep.mubr.msk.f32.mxu0 %vm959_vm1, %v957_v1  ;;  %918 = vmatprep.subr.mxu0 %v957_v1  ;;  %v733_v10 = vld [vmem:[%s1087_s2] sm:$0xff] }
   0x4   :  { %915 = vmatprep.mubr.msk.f32.mxu1 %vm959_vm1, %v957_v1  ;;  %923 = vmatprep.subr.mxu1 %v957_v1  ;;  %v735_v13 = vcombine.high %v733_v10, %v733_v10  ;;  %v1006_v15 = vsub.s32 0, %v32_v8  ;;  %v18_v57 = vld [vmem:[%s1085_s0 + $0x20] sm:$0xff] }
   0x5   :  { %955 = vlog2.f32 %v23_v7  ;;  %v33_v11 = vsub.s32 %v30_v9, %v32_v8  ;;  %952 = vset.pattern.permute.xlu0 %v960_v12  ;;  %953 = vset.pattern.permute.xlu1 %v960_v12 }
   0x7   :  { %v742_v14 = vrot.slane %v733_v10, %v33_v11  ;;  %v749_v18 = vrot.slane %v735_v13, %v33_v11 }
   0x9   :  { %v758_v16 = vrot.slane %v742_v14, %v33_v11  ;;  %v750_v17 = vcombine.high %v742_v14, %v742_v14  ;;  %v751_v22 = vcombine.high %v749_v18, %v749_v18  ;;  %v765_v26 = vrot.slane %v749_v18, %v33_v11 }
   0xb   :  { %v787_v19 = vrot.slane %v758_v16, %v1006_v15  ;;  %v780_v20 = vcombine.high %v758_v16, %v758_v16  ;;  %v772_v21 = vrot.slane %v750_v17, %v33_v11  ;;  %v779_v30 = vrot.slane %v751_v22, %v33_v11 }
   0xc   :  { %v781_v31 = vcombine.high %v765_v26, %v765_v26  ;;  %v803_v34 = vrot.slane %v765_v26, %v1006_v15 }
   0xd   :  { %817 = vperm.xlu0 %952, %v787_v19   ;;  %v795_v23 = vrot.slane %v780_v20, %v1006_v15  ;;  %v791_v24 = vrot.slane %v772_v21, %v1006_v15  ;;  %v782_v25 = vcombine.high %v772_v21, %v772_v21  ;;  %v807_v38 = vrot.slane %v779_v30, %v1006_v15 }
   0xe   :  { %v811_v39 = vrot.slane %v781_v31, %v1006_v15  ;;  %v783_v58 = vcombine.high %v779_v30, %v779_v30 }
   0xf   :  { %v956_v27 = vpop.eup %955  ;;  %825 = vperm.xlu1 %953, %v795_v23   ;;  %v799_v29 = vrot.slane %v782_v25, %v1006_v15 }
  0x10   :  { %v25_v28 = vmul.f32 0.6931472, %v956_v27  ;;  %v815_v5 = vrot.slane %v783_v58, %v1006_v15 }
  0x11   :  { %821 = vperm.xlu0 %952, %v791_v24  }
  0x12   :  { %v27_v32 = vcombine.high %v25_v28, %v25_v28  ;;  %v34_v33 = vrot.slane %v25_v28, %v33_v11 }
  0x13   :  { %829 = vperm.xlu1 %953, %v799_v29  }
  0x14   :  { %v50_v35 = vrot.slane %v34_v33, %v33_v11  ;;  %v42_v36 = vcombine.high %v34_v33, %v34_v33  ;;  %v41_v37 = vrot.slane %v27_v32, %v33_v11 }
  0x15   :  { %833 = vperm.xlu0 %952, %v803_v34  }
  0x16   :  { %v72_v40 = vcombine.high %v50_v35, %v50_v35  ;;  %v79_v41 = vrot.slane %v50_v35, %v1006_v15  ;;  %v64_v42 = vrot.slane %v42_v36, %v33_v11  ;;  %v57_v43 = vrot.slane %v41_v37, %v33_v11 }
  0x17   :  { %v43_v45 = vcombine.high %v41_v37, %v41_v37  ;;  %837 = vperm.xlu1 %953, %v807_v38  }
  0x18   :  { %v116_v46 = vmul.f32 %v79_v41, %v14_v2  ;;  %v74_v47 = vcombine.high %v64_v42, %v64_v42  ;;  %v83_v48 = vrot.slane %v64_v42, %v1006_v15  ;;  %v87_v49 = vrot.slane %v72_v40, %v1006_v15  ;;  %v20_v2 = vld [vmem:[%s1085_s0 + $0x30] sm:$0xff] }
  0x19   :  { %v95_v51 = vrot.slane %v57_v43, %v1006_v15  ;;  %v71_v52 = vrot.slane %v43_v45, %v33_v11  ;;  %v73_v53 = vcombine.high %v57_v43, %v57_v43  ;;  %841 = vperm.xlu0 %952, %v811_v39  }
  0x1a   :  { %v117_v54 = vmul.f32 %v83_v48, %v992_v6  ;;  %911 = vmatmul.mubr.msk.f32.vlgmr.msra.gmra.mrb[0].mxu0 %vm124_vm0, %v116_v46  ;;  %v118_v55 = vmul.f32 %v87_v49, %v16_v44  ;;  %v91_v56 = vrot.slane %v74_v47, %v1006_v15  ;;  %v21_v6 = vld [vmem:[%s1085_s0 + $0x38] sm:$0xff] }
  0x1b   :  { %919 = vmatpush3.xpose.msk.msra.mxu0 %vm124_vm0, %v16_v44  ;;  %920 = vmatprep.mubr.msk.f32.mxu0 %vm959_vm1, %v957_v1  ;;  %v99_v60 = vrot.slane %v71_v52, %v1006_v15  ;;  %v75_v61 = vcombine.high %v71_v52, %v71_v52  ;;  %v120_v63 = vmul.f32 %v95_v51, %v18_v57 }
  0x1c   :  { %916 = vmatmul.mubr.msk.f32.vlgmr.msra.gmra.mrb[0].mxu1 %vm124_vm0, %v117_v54  ;;  %v119_v59 = vmul.f32 %v91_v56, %v17_v50  ;;  %928 = vmatprep.subr.mxu0 %v957_v1  ;;  %v103_v0 = vrot.slane %v73_v53, %v1006_v15 }
  0x1d   :  { %924 = vmatpush3.xpose.msk.msra.mxu1 %vm124_vm0, %v17_v50  ;;  %925 = vmatprep.mubr.msk.f32.mxu1 %vm959_vm1, %v957_v1  ;;  %v121_v3 = vmul.f32 %v99_v60, %v19_v62  ;;  %v107_v4 = vrot.slane %v75_v61, %v1006_v15 }
  0x1e   :  { %921 = vmatmul.mubr.msk.f32.vlgmr.msra.gmra.mrb[2].mxu0 %vm124_vm0, %v118_v55  ;;  %933 = vmatprep.subr.mxu1 %v957_v1  ;;  %v122_v7 = vmul.f32 %v103_v0, %v20_v2 }
  0x1f   :  { %929 = vmatpush3.xpose.msk.msra.mxu0 %vm124_vm0, %v18_v57  ;;  %930 = vmatprep.mubr.msk.f32.mxu0 %vm959_vm1, %v957_v1  ;;  %v123_v8 = vmul.f32 %v107_v4, %v21_v6 }
  0x20   :  { %926 = vmatmul.mubr.msk.f32.vlgmr.msra.gmra.mrb[2].mxu1 %vm124_vm0, %v119_v59  ;;  %938 = vmatprep.subr.mxu0 %v957_v1 }
  0x21   :  { %934 = vmatpush3.xpose.msk.msra.mxu1 %vm124_vm0, %v19_v62  ;;  %935 = vmatprep.mubr.msk.f32.mxu1 %vm959_vm1, %v957_v1 }
  0x22   :  { %931 = vmatmul.mubr.msk.f32.vlgmr.msra.gmra.mrb[4].mxu0 %vm124_vm0, %v120_v63  ;;  %943 = vmatprep.subr.mxu1 %v957_v1 }
  0x23   :  { %939 = vmatpush3.xpose.msk.msra.mxu0 %vm124_vm0, %v20_v2  ;;  %940 = vmatprep.mubr.msk.f32.mxu0 %vm959_vm1, %v957_v1 }
  0x24   :  { %936 = vmatmul.mubr.msk.f32.vlgmr.msra.gmra.mrb[4].mxu1 %vm124_vm0, %v121_v3  ;;  %845 = vperm.xlu1 %953, %v815_v5  }
  0x25   :  { %944 = vmatpush3.xpose.msk.msra.mxu1 %vm124_vm0, %v21_v6  ;;  %945 = vmatprep.mubr.msk.f32.mxu1 %vm959_vm1, %v957_v1 }
  0x26   :  { %941 = vmatmul.mubr.msk.f32.vlgmr.msra.gmra.mrb[6].mxu0 %vm124_vm0, %v122_v7 }
  0x28   :  { %946 = vmatmul.mubr.msk.f32.vlgmr.msra.gmra.mrb[6].mxu1 %vm124_vm0, %v123_v8 }
  0x8c   :  { %v818_v9 = vpop.permute.xlu0 %817 }
  0x8e   :  { %v826_v10 = vpop.permute.xlu1 %825 }
  0x90   :  { %v822_v11 = vpop.permute.xlu0 %821 }
  0x92   :  { %v830_v15 = vpop.permute.xlu1 %829 }
  0x94   :  { %v834_v23 = vpop.permute.xlu0 %833 }
  0x96   :  { %v838_v29 = vpop.permute.xlu1 %837 }
  0x98   :  { %v842_v40 = vpop.permute.xlu0 %841 }
  0xa3   :  { %v846_v46 = vpop.permute.xlu1 %845 }
  0xed   :  { %v197_v12 = vpop.f32.mrb[0].mxu0 }
  0xee   :  { %v848_v13 = vmul.f32 %v818_v9, %v197_v12  ;;  %v912_v14 = vpop.f32.mrb[1].mxu0 }
  0xef   :  { %v273_v16 = vpop.f32.mrb[0].mxu1 }
  0xf0   :  { %v849_v17 = vmul.f32 %v822_v11, %v273_v16  ;;  %v917_v18 = vpop.f32.mrb[1].mxu1  ;;  %v856_v20 = vsel %vm124_vm0, %v848_v13, 0.0 }
  0xf1   :  { %v349_v19 = vpop.f32.mrb[2].mxu0 }
  0xf2   :  { %v857_v21 = vsel %vm124_vm0, %v849_v17, 0.0  ;;  %v850_v1 = vmul.f32 %v826_v10, %v349_v19  ;;  %v922_v22 = vpop.f32.mrb[3].mxu0 }
  0xf3   :  { %v858_v24 = vadd.f32 %v857_v21, %v856_v20  ;;  %v425_v25 = vpop.f32.mrb[2].mxu1 }
  0xf4   :  { %v859_v26 = vsel %vm124_vm0, %v850_v1, 0.0  ;;  %v851_v27 = vmul.f32 %v830_v15, %v425_v25  ;;  %v927_v28 = vpop.f32.mrb[3].mxu1 }
  0xf5   :  { %v860_v30 = vadd.f32 %v859_v26, %v858_v24  ;;  %v501_v31 = vpop.f32.mrb[4].mxu0 }
  0xf6   :  { %v861_v32 = vsel %vm124_vm0, %v851_v27, 0.0  ;;  %v852_v33 = vmul.f32 %v834_v23, %v501_v31  ;;  %v932_v34 = vpop.f32.mrb[5].mxu0 }
  0xf7   :  { %v862_v35 = vadd.f32 %v861_v32, %v860_v30  ;;  %v577_v36 = vpop.f32.mrb[4].mxu1 }
  0xf8   :  { %v863_v37 = vsel %vm124_vm0, %v852_v33, 0.0  ;;  %v853_v38 = vmul.f32 %v838_v29, %v577_v36  ;;  %v937_v39 = vpop.f32.mrb[5].mxu1 }
  0xf9   :  { %v864_v41 = vadd.f32 %v863_v37, %v862_v35  ;;  %v653_v42 = vpop.f32.mrb[6].mxu0 }
  0xfa   :  { %v865_v43 = vsel %vm124_vm0, %v853_v38, 0.0  ;;  %v854_v44 = vmul.f32 %v842_v40, %v653_v42  ;;  %v942_v45 = vpop.f32.mrb[7].mxu0 }
  0xfb   :  { %v866_v47 = vadd.f32 %v865_v43, %v864_v41  ;;  %v729_v48 = vpop.f32.mrb[6].mxu1 }
  0xfc   :  { %v867_v49 = vsel %vm124_vm0, %v854_v44, 0.0  ;;  %v855_v50 = vmul.f32 %v846_v46, %v729_v48  ;;  %v947_v51 = vpop.f32.mrb[7].mxu1 }
  0xfd   :  { %v868_v52 = vadd.f32 %v867_v49, %v866_v47 }
  0xfe   :  { %v869_v53 = vsel %vm124_vm0, %v855_v50, 0.0 }
  0xff   :  { %v870_v54 = vadd.f32 %v869_v53, %v868_v52 }
 0x101   :  { %871 = vst.msk [vmem:[%s1088_s3] sm:$0xff] %vm124_vm0, %v870_v54 }

// kernel: dsbn_spdbn_forward.13
= control target key start
LH: loop header
LB: loop body
LE: loop exit
PB: predicated region body
PF: predicated region fallthrough
CT: control target
= control target key end

     0   :  { %vm124_vm0 = vcmask 64512   ;;  %v1611_v0 = vmov 0.0   ;;  %vm1612_vm1 = vmmov 0   ;;  %v1613_v4 = vmov 1966171168   ;;  %s1816_s0 = inlined_call_operand.vmem [shape: f32[8,8,8], index: 0, kind: input, shape index: {}]   ;;  %s1817_s1 = inlined_call_operand.vmem [shape: f32[8,8], index: 1, kind: input, shape index: {}]   ;;  %s1818_s2 = inlined_call_operand.vmem [shape: f32[8,8,4], index: 2, kind: input, shape index: {}]   ;;  %s1819_s3 = inlined_call_operand.vmem [shape: f32[8,4], index: 3, kind: output, shape index: {}]  }
   0x1   :  { %1512 = vmatprep.subr.mxu1 %v1611_v0  ;;  %v14_v1 = vld [vmem:[%s1816_s0] sm:$0xff]  ;;  %1552 = vmatprep.subr.mxu0 %v1611_v0  ;;  %v29_v5 = vunpack.c.l.s4 %v1613_v4  ;;  %v31_v6 = vlaneseq  ;;  %v15_v20 = vld [vmem:[%s1816_s0 + $0x8] sm:$0xff]  ;;  %v16_v27 = vld [vmem:[%s1816_s0 + $0x10] sm:$0xff]  ;;  %vm750_vm2 = vcmask 1041409   ;;  %vm753_vm3 = vcmask 1042434  }
   0x2   :  { %v22_v2 = vld [vmem:[%s1817_s1] sm:$0xff]  ;;  %1513 = vmatpush3.xpose.msk.msra.mxu1 %vm124_vm0, %v14_v1  ;;  %1514 = vmatprep.mubr.msk.f32.mxu1 %vm1612_vm1, %v1611_v0  ;;  %v17_v32 = vld [vmem:[%s1816_s0 + $0x18] sm:$0xff]  ;;  %v19_v40 = vld [vmem:[%s1816_s0 + $0x28] sm:$0xff]  ;;  %vm756_vm4 = vcmask 1043459   ;;  %vm759_vm5 = vcmask 1044484   ;;  %vm762_vm6 = vcmask 1045509  }
   0x3   :  { %v23_v3 = vmax.f32 %v22_v2, 0.0001  ;;  %1517 = vmatprep.subr.mxu1 %v1611_v0  ;;  %1554 = vmatprep.mubr.msk.f32.mxu0 %vm1612_vm1, %v1611_v0  ;;  %v30_v7 = vunpack.c.0.s8 %v29_v5  ;;  %v32_v8 = vshrl.u32 %v31_v6, 7  ;;  %v18_v36 = vld [vmem:[%s1816_s0 + $0x20] sm:$0xff]  ;;  %v20_v44 = vld [vmem:[%s1816_s0 + $0x30] sm:$0xff]  ;;  %v21_v47 = vld [vmem:[%s1816_s0 + $0x38] sm:$0xff] }
   0x4   :  { %v734_v49 = vld [vmem:[%s1818_s2 + $0x8] sm:$0xff]  ;;  %vm765_vm7 = vcmask 1046534   ;;  %vm768_vm8 = vcmask 1047559   ;;  %vm1450_vm9 = vcmask 31744  }
   0x5   :  { %1609 = vlog2.f32 %v23_v3  ;;  %v33_v9 = vsub.s32 %v30_v7, %v32_v8  ;;  %v78_v13 = vsub.s32 0, %v32_v8  ;;  %1553 = vmatpush3.msra.mxu0 %v734_v49 }
   0x6   :  { %1557 = vmatprep.subr.mxu0 %v1611_v0 }
   0xf   :  { %v1610_v10 = vpop.eup %1609 }
  0x10   :  { %v25_v11 = vmul.f32 0.6931472, %v1610_v10 }
  0x12   :  { %v34_v12 = vrot.slane %v25_v11, %v33_v9  ;;  %v27_v16 = vcombine.high %v25_v11, %v25_v11 }
  0x14   :  { %v42_v14 = vcombine.high %v34_v12, %v34_v12  ;;  %v50_v15 = vrot.slane %v34_v12, %v33_v9  ;;  %v41_v26 = vrot.slane %v27_v16, %v33_v9 }
  0x16   :  { %v72_v17 = vcombine.high %v50_v15, %v50_v15  ;;  %v79_v18 = vrot.slane %v50_v15, %v78_v13  ;;  %v64_v19 = vrot.slane %v42_v14, %v33_v9  ;;  %v57_v30 = vrot.slane %v41_v26, %v33_v9 }
  0x17   :  { %v43_v31 = vcombine.high %v41_v26, %v41_v26 }
  0x18   :  { %v116_v21 = vmul.f32 %v79_v18, %v14_v1  ;;  %v83_v22 = vrot.slane %v64_v19, %v78_v13  ;;  %v87_v24 = vrot.slane %v72_v17, %v78_v13  ;;  %v74_v25 = vcombine.high %v64_v19, %v64_v19 }
  0x19   :  { %v95_v34 = vrot.slane %v57_v30, %v78_v13  ;;  %v71_v35 = vrot.slane %v43_v31, %v33_v9  ;;  %v73_v39 = vcombine.high %v57_v30, %v57_v30 }
  0x1a   :  { %1515 = vmatmul.mubr.msk.f32.vlgmr.msra.gmra.mrb[0].mxu1 %vm124_vm0, %v116_v21  ;;  %v117_v23 = vmul.f32 %v83_v22, %v15_v20  ;;  %v118_v28 = vmul.f32 %v87_v24, %v16_v27  ;;  %v91_v29 = vrot.slane %v74_v25, %v78_v13 }
  0x1b   :  { %1518 = vmatpush3.xpose.msk.msra.mxu1 %vm124_vm0, %v15_v20  ;;  %1519 = vmatprep.mubr.msk.f32.mxu1 %vm1612_vm1, %v1611_v0  ;;  %v120_v37 = vmul.f32 %v95_v34, %v18_v36  ;;  %v99_v38 = vrot.slane %v71_v35, %v78_v13  ;;  %v103_v42 = vrot.slane %v73_v39, %v78_v13 }
  0x1c   :  { %1522 = vmatprep.subr.mxu1 %v1611_v0  ;;  %v119_v33 = vmul.f32 %v91_v29, %v17_v32  ;;  %v75_v43 = vcombine.high %v71_v35, %v71_v35 }
  0x1d   :  { %v121_v41 = vmul.f32 %v99_v38, %v19_v40  ;;  %v122_v45 = vmul.f32 %v103_v42, %v20_v44 }
  0x1e   :  { %1520 = vmatmul.mubr.msk.f32.vlgmr.msra.gmra.mrb[2].mxu1 %vm124_vm0, %v117_v23  ;;  %v107_v46 = vrot.slane %v75_v43, %v78_v13 }
  0x1f   :  { %1523 = vmatpush3.xpose.msk.msra.mxu1 %vm124_vm0, %v16_v27  ;;  %1524 = vmatprep.mubr.msk.f32.mxu1 %vm1612_vm1, %v1611_v0 }
  0x20   :  { %1527 = vmatprep.subr.mxu1 %v1611_v0  ;;  %v123_v48 = vmul.f32 %v107_v46, %v21_v47 }
  0x22   :  { %1525 = vmatmul.mubr.msk.f32.vlgmr.msra.gmra.mrb[4].mxu1 %vm124_vm0, %v118_v28 }
  0x23   :  { %1528 = vmatpush3.xpose.msk.msra.mxu1 %vm124_vm0, %v17_v32  ;;  %1529 = vmatprep.mubr.msk.f32.mxu1 %vm1612_vm1, %v1611_v0 }
  0x24   :  { %1532 = vmatprep.subr.mxu1 %v1611_v0 }
  0x26   :  { %1530 = vmatmul.mubr.msk.f32.vlgmr.msra.gmra.mrb[6].mxu1 %vm124_vm0, %v119_v33 }
  0x27   :  { %1533 = vmatpush3.xpose.msk.msra.mxu1 %vm124_vm0, %v18_v36  ;;  %1534 = vmatprep.mubr.msk.f32.mxu1 %vm1612_vm1, %v1611_v0 }
  0x28   :  { %1537 = vmatprep.subr.mxu1 %v1611_v0 }
  0x2a   :  { %1535 = vmatmul.mubr.msk.f32.vlgmr.msra.gmra.mrb[8].mxu1 %vm124_vm0, %v120_v37 }
  0x2b   :  { %1538 = vmatpush3.xpose.msk.msra.mxu1 %vm124_vm0, %v19_v40  ;;  %1539 = vmatprep.mubr.msk.f32.mxu1 %vm1612_vm1, %v1611_v0 }
  0x2c   :  { %1542 = vmatprep.subr.mxu1 %v1611_v0 }
  0x2e   :  { %1540 = vmatmul.mubr.msk.f32.vlgmr.msra.gmra.mrb[10].mxu1 %vm124_vm0, %v121_v41 }
  0x2f   :  { %1543 = vmatpush3.xpose.msk.msra.mxu1 %vm124_vm0, %v20_v44  ;;  %1544 = vmatprep.mubr.msk.f32.mxu1 %vm1612_vm1, %v1611_v0 }
  0x30   :  { %1547 = vmatprep.subr.mxu1 %v1611_v0 }
  0x32   :  { %1545 = vmatmul.mubr.msk.f32.vlgmr.msra.gmra.mrb[12].mxu1 %vm124_vm0, %v122_v45 }
  0x33   :  { %1548 = vmatpush3.xpose.msk.msra.mxu1 %vm124_vm0, %v21_v47  ;;  %1549 = vmatprep.mubr.msk.f32.mxu1 %vm1612_vm1, %v1611_v0 }
  0x36   :  { %1550 = vmatmul.mubr.msk.f32.vlgmr.msra.gmra.mrb[14].mxu1 %vm124_vm0, %v123_v48 }
  0xed   :  { %v197_v50 = vpop.f32.mrb[0].mxu1 }
  0xee   :  { %v1516_v51 = vpop.f32.mrb[1].mxu1  ;;  %v749_v52 = vrot.slane %v197_v50, 1  ;;  %v928_v53 = vrot.slane %v197_v50, 2  ;;  %v1015_v54 = vrot.slane %v197_v50, 3  ;;  %v1102_v55 = vrot.slane %v197_v50, 4 }
  0xef   :  { %v1189_v56 = vrot.slane %v197_v50, 5  ;;  %v1276_v57 = vrot.slane %v197_v50, 6  ;;  %v1363_v58 = vrot.slane %v197_v50, 7 }
  0xf1   :  { %v273_v59 = vpop.f32.mrb[2].mxu1 }
  0xf2   :  { %v842_v60 = vrot.slane %v273_v59, 7  ;;  %v929_v61 = vrot.slane %v273_v59, 1  ;;  %v1016_v62 = vrot.slane %v273_v59, 2  ;;  %v1103_v63 = vrot.slane %v273_v59, 3  ;;  %v1521_v1 = vpop.f32.mrb[3].mxu1 }
  0xf3   :  { %v1190_v2 = vrot.slane %v273_v59, 4  ;;  %v1277_v3 = vrot.slane %v273_v59, 5  ;;  %v1364_v4 = vrot.slane %v273_v59, 6  ;;  %v751_v5 = vsel %vm750_vm2, %v273_v59, %v749_v52 }
  0xf4   :  { %v843_v6 = vsel %vm750_vm2, %v842_v60, %v197_v50  ;;  %v930_v7 = vsel %vm750_vm2, %v929_v61, %v928_v53  ;;  %v1017_v8 = vsel %vm750_vm2, %v1016_v62, %v1015_v54  ;;  %v1104_v9 = vsel %vm750_vm2, %v1103_v63, %v1102_v55 }
  0xf5   :  { %v349_v10 = vpop.f32.mrb[4].mxu1  ;;  %v1191_v11 = vsel %vm750_vm2, %v1190_v2, %v1189_v56  ;;  %v1278_v12 = vsel %vm750_vm2, %v1277_v3, %v1276_v57  ;;  %v1365_v13 = vsel %vm750_vm2, %v1364_v4, %v1363_v58 }
  0xf6   :  { %v844_v14 = vrot.slane %v349_v10, 6  ;;  %v1018_v15 = vrot.slane %v349_v10, 1  ;;  %v1105_v16 = vrot.slane %v349_v10, 2  ;;  %v1192_v17 = vrot.slane %v349_v10, 3  ;;  %v1526_v18 = vpop.f32.mrb[5].mxu1 }
  0xf7   :  { %v1279_v19 = vrot.slane %v349_v10, 4  ;;  %v1366_v20 = vrot.slane %v349_v10, 5  ;;  %v752_v21 = vrot.slane %v349_v10, 7  ;;  %v931_v22 = vsel %vm753_vm3, %v349_v10, %v930_v7 }
  0xf8   :  { %v845_v23 = vsel %vm753_vm3, %v844_v14, %v843_v6  ;;  %v1019_v24 = vsel %vm753_vm3, %v1018_v15, %v1017_v8  ;;  %v1106_v25 = vsel %vm753_vm3, %v1105_v16, %v1104_v9  ;;  %v1193_v26 = vsel %vm753_vm3, %v1192_v17, %v1191_v11 }
  0xf9   :  { %v425_v27 = vpop.f32.mrb[6].mxu1  ;;  %v754_v28 = vsel %vm753_vm3, %v752_v21, %v751_v5  ;;  %v1280_v29 = vsel %vm753_vm3, %v1279_v19, %v1278_v12  ;;  %v1367_v30 = vsel %vm753_vm3, %v1366_v20, %v1365_v13 }
  0xfa   :  { %v1531_v31 = vpop.f32.mrb[7].mxu1  ;;  %v755_v32 = vrot.slane %v425_v27, 6  ;;  %v846_v33 = vrot.slane %v425_v27, 5  ;;  %v932_v34 = vrot.slane %v425_v27, 7  ;;  %v1020_v35 = vsel %vm756_vm4, %v425_v27, %v1019_v24 }
  0xfb   :  { %v1107_v36 = vrot.slane %v425_v27, 1  ;;  %v1194_v37 = vrot.slane %v425_v27, 2  ;;  %v1281_v38 = vrot.slane %v425_v27, 3  ;;  %v1368_v39 = vrot.slane %v425_v27, 4 }
  0xfc   :  { %v757_v40 = vsel %vm756_vm4, %v755_v32, %v754_v28  ;;  %v847_v41 = vsel %vm756_vm4, %v846_v33, %v845_v23  ;;  %v933_v42 = vsel %vm756_vm4, %v932_v34, %v931_v22 }
  0xfd   :  { %v501_v43 = vpop.f32.mrb[8].mxu1  ;;  %v1108_v44 = vsel %vm756_vm4, %v1107_v36, %v1106_v25  ;;  %v1195_v45 = vsel %vm756_vm4, %v1194_v37, %v1193_v26  ;;  %v1282_v46 = vsel %vm756_vm4, %v1281_v38, %v1280_v29  ;;  %v1369_v47 = vsel %vm756_vm4, %v1368_v39, %v1367_v30 }
  0xfe   :  { %v1536_v48 = vpop.f32.mrb[9].mxu1  ;;  %v758_v49 = vrot.slane %v501_v43, 5  ;;  %v848_v50 = vrot.slane %v501_v43, 4  ;;  %v934_v51 = vrot.slane %v501_v43, 6  ;;  %v1021_v52 = vrot.slane %v501_v43, 7 }
  0xff   :  { %v1109_v53 = vsel %vm759_vm5, %v501_v43, %v1108_v44  ;;  %v1196_v54 = vrot.slane %v501_v43, 1  ;;  %v1283_v55 = vrot.slane %v501_v43, 2  ;;  %v1370_v56 = vrot.slane %v501_v43, 3 }
 0x100   :  { %v760_v57 = vsel %vm759_vm5, %v758_v49, %v757_v40  ;;  %v849_v58 = vsel %vm759_vm5, %v848_v50, %v847_v41  ;;  %v935_v59 = vsel %vm759_vm5, %v934_v51, %v933_v42  ;;  %v1022_v60 = vsel %vm759_vm5, %v1021_v52, %v1020_v35  ;;  %v733_v41 = vld [vmem:[%s1818_s2] sm:$0xff] }
 0x101   :  { %v577_v61 = vpop.f32.mrb[10].mxu1  ;;  %v1197_v62 = vsel %vm759_vm5, %v1196_v54, %v1195_v45  ;;  %v1284_v63 = vsel %vm759_vm5, %v1283_v55, %v1282_v46  ;;  %v1371_v1 = vsel %vm759_vm5, %v1370_v56, %v1369_v47  ;;  %v736_v54 = vld [vmem:[%s1818_s2 + $0x18] sm:$0xff]  ;;  %v737_v55 = vld [vmem:[%s1818_s2 + $0x20] sm:$0xff]  ;;  %v738_v56 = vld [vmem:[%s1818_s2 + $0x28] sm:$0xff] }
 0x102   :  { %v1541_v2 = vpop.f32.mrb[11].mxu1  ;;  %v761_v3 = vrot.slane %v577_v61, 4  ;;  %v850_v4 = vrot.slane %v577_v61, 3  ;;  %v936_v5 = vrot.slane %v577_v61, 5  ;;  %v1023_v6 = vrot.slane %v577_v61, 6 }
 0x103   :  { %v1110_v7 = vrot.slane %v577_v61, 7  ;;  %v1198_v8 = vsel %vm762_vm6, %v577_v61, %v1197_v62  ;;  %v1285_v9 = vrot.slane %v577_v61, 1  ;;  %v1372_v10 = vrot.slane %v577_v61, 2 }
 0x104   :  { %v763_v11 = vsel %vm762_vm6, %v761_v3, %v760_v57  ;;  %v851_v12 = vsel %vm762_vm6, %v850_v4, %v849_v58  ;;  %v937_v13 = vsel %vm762_vm6, %v936_v5, %v935_v59  ;;  %v1024_v14 = vsel %vm762_vm6, %v1023_v6, %v1022_v60  ;;  %v739_v57 = vld [vmem:[%s1818_s2 + $0x30] sm:$0xff]  ;;  %v740_v58 = vld [vmem:[%s1818_s2 + $0x38] sm:$0xff] }
 0x105   :  { %v653_v15 = vpop.f32.mrb[12].mxu1  ;;  %v1111_v16 = vsel %vm762_vm6, %v1110_v7, %v1109_v53  ;;  %v1286_v17 = vsel %vm762_vm6, %v1285_v9, %v1284_v63  ;;  %v1373_v18 = vsel %vm762_vm6, %v1372_v10, %v1371_v1  ;;  %v735_v53 = vld [vmem:[%s1818_s2 + $0x10] sm:$0xff] }
 0x106   :  { %v1546_v19 = vpop.f32.mrb[13].mxu1  ;;  %v764_v20 = vrot.slane %v653_v15, 3  ;;  %v852_v21 = vrot.slane %v653_v15, 2  ;;  %v938_v22 = vrot.slane %v653_v15, 4  ;;  %v1025_v23 = vrot.slane %v653_v15, 5 }
 0x107   :  { %v1112_v24 = vrot.slane %v653_v15, 6  ;;  %v1199_v25 = vrot.slane %v653_v15, 7  ;;  %v1287_v26 = vsel %vm765_vm7, %v653_v15, %v1286_v17  ;;  %v1374_v27 = vrot.slane %v653_v15, 1 }
 0x108   :  { %v766_v28 = vsel %vm765_vm7, %v764_v20, %v763_v11  ;;  %v853_v29 = vsel %vm765_vm7, %v852_v21, %v851_v12  ;;  %v939_v30 = vsel %vm765_vm7, %v938_v22, %v937_v13  ;;  %v1026_v31 = vsel %vm765_vm7, %v1025_v23, %v1024_v14 }
 0x109   :  { %v729_v32 = vpop.f32.mrb[14].mxu1  ;;  %v1113_v33 = vsel %vm765_vm7, %v1112_v24, %v1111_v16  ;;  %v1200_v34 = vsel %vm765_vm7, %v1199_v25, %v1198_v8  ;;  %v1375_v35 = vsel %vm765_vm7, %v1374_v27, %v1373_v18 }
 0x10a   :  { %v1551_v36 = vpop.f32.mrb[15].mxu1  ;;  %v767_v37 = vrot.slane %v729_v32, 2  ;;  %v854_v38 = vrot.slane %v729_v32, 1  ;;  %v940_v39 = vrot.slane %v729_v32, 3  ;;  %v1027_v40 = vrot.slane %v729_v32, 4 }
 0x10b   :  { %v1114_v42 = vrot.slane %v729_v32, 5  ;;  %v1201_v43 = vrot.slane %v729_v32, 6  ;;  %v1288_v44 = vrot.slane %v729_v32, 7  ;;  %v1376_v45 = vsel %vm768_vm8, %v729_v32, %v1375_v35 }
 0x10c   :  { %v769_v46 = vsel %vm768_vm8, %v767_v37, %v766_v28  ;;  %v855_v47 = vsel %vm768_vm8, %v854_v38, %v853_v29  ;;  %v941_v48 = vsel %vm768_vm8, %v940_v39, %v939_v30  ;;  %v1028_v49 = vsel %vm768_vm8, %v1027_v40, %v1026_v31 }
 0x10d   :  { %1555 = vmatmul.mubr.msk.f32.vlgmr.msra.gmra.mrb[0].mxu0 %vm124_vm0, %v769_v46  ;;  %v1115_v50 = vsel %vm768_vm8, %v1114_v42, %v1113_v33  ;;  %v1202_v51 = vsel %vm768_vm8, %v1201_v43, %v1200_v34  ;;  %v1289_v52 = vsel %vm768_vm8, %v1288_v44, %v1287_v26 }
 0x10e   :  { %1558 = vmatpush3.msra.mxu0 %v733_v41  ;;  %1559 = vmatprep.mubr.msk.f32.mxu0 %vm1612_vm1, %v1611_v0 }
 0x10f   :  { %1562 = vmatprep.subr.mxu0 %v1611_v0 }
 0x115   :  { %1560 = vmatmul.mubr.msk.f32.vlgmr.msra.gmra.mrb[0].mxu0 %vm124_vm0, %v855_v47 }
 0x116   :  { %1563 = vmatpush3.msra.mxu0 %v735_v53  ;;  %1564 = vmatprep.mubr.msk.f32.mxu0 %vm1612_vm1, %v1611_v0 }
 0x117   :  { %1567 = vmatprep.subr.mxu0 %v1611_v0 }
 0x11d   :  { %1565 = vmatmul.mubr.msk.f32.vlgmr.msra.gmra.mrb[0].mxu0 %vm124_vm0, %v941_v48 }
 0x11e   :  { %1568 = vmatpush3.msra.mxu0 %v736_v54  ;;  %1569 = vmatprep.mubr.msk.f32.mxu0 %vm1612_vm1, %v1611_v0 }
 0x11f   :  { %1572 = vmatprep.subr.mxu0 %v1611_v0 }
 0x125   :  { %1570 = vmatmul.mubr.msk.f32.vlgmr.msra.gmra.mrb[0].mxu0 %vm124_vm0, %v1028_v49 }
 0x126   :  { %1573 = vmatpush3.msra.mxu0 %v737_v55  ;;  %1574 = vmatprep.mubr.msk.f32.mxu0 %vm1612_vm1, %v1611_v0 }
 0x127   :  { %1577 = vmatprep.subr.mxu0 %v1611_v0 }
 0x12d   :  { %1575 = vmatmul.mubr.msk.f32.vlgmr.msra.gmra.mrb[0].mxu0 %vm124_vm0, %v1115_v50 }
 0x12e   :  { %1578 = vmatpush3.msra.mxu0 %v738_v56  ;;  %1579 = vmatprep.mubr.msk.f32.mxu0 %vm1612_vm1, %v1611_v0 }
 0x12f   :  { %1582 = vmatprep.subr.mxu0 %v1611_v0 }
 0x135   :  { %1580 = vmatmul.mubr.msk.f32.vlgmr.msra.gmra.mrb[0].mxu0 %vm124_vm0, %v1202_v51 }
 0x136   :  { %1583 = vmatpush3.msra.mxu0 %v739_v57  ;;  %1584 = vmatprep.mubr.msk.f32.mxu0 %vm1612_vm1, %v1611_v0 }
 0x137   :  { %1587 = vmatprep.subr.mxu0 %v1611_v0 }
 0x13d   :  { %1585 = vmatmul.mubr.msk.f32.vlgmr.msra.gmra.mrb[0].mxu0 %vm124_vm0, %v1289_v52 }
 0x13e   :  { %1588 = vmatpush3.msra.mxu0 %v740_v58  ;;  %1589 = vmatprep.mubr.msk.f32.mxu0 %vm1612_vm1, %v1611_v0 }
 0x145   :  { %1590 = vmatmul.mubr.msk.f32.vlgmr.msra.gmra.mrb[0].mxu0 %vm124_vm0, %v1376_v45 }
 0x218   :  { %v1445_v59 = vpop.f32.mrb[0].mxu0 }
 0x219   :  { %1451 = vst.msk [vmem:[%s1819_s3] sm:$0xff] %vm1450_vm9, %v1445_v59  ;;  %v1591_v60 = vpop.f32.mrb[1].mxu0 }

</bundles_post_ra>
